<compile_context>
chip_gen: v6e
topology: v6e:2x2x1
jax: 0.10.0
libtpu: 0.0.40
codegen_flags: <defaults>
</compile_context>

<pallas_src>
import functools

import jax
import jax.numpy as jnp
from jax.experimental import pallas as pl
from jax.experimental.pallas import tpu as pltpu


# Matmul operand dtype.  float32 preserves reference numerics; set to
# jnp.bfloat16 to run the MXU at native bf16 rate (accumulation stays f32,
# GroupNorm statistics / softmax stay f32 either way).
MXU_DTYPE = jnp.float32

_GN_EPS = 1e-6
_NUM_GROUPS = 32


# ----------------------------------------------------------------------------
# In-kernel helpers (operate on VMEM-resident values)
# ----------------------------------------------------------------------------
def _mxu(x):
    return x.astype(MXU_DTYPE)


def _silu(y):
    return y * jax.nn.sigmoid(y)


def _group_norm(x, gamma, beta, m, mt, eps):
    """GroupNorm on a (T, C) f32 slab.  m: (C, G) one-hot membership, mt = m.T.

    Two-pass: mean first, then variance of the centered values (avoids the
    E[x^2]-E[x]^2 cancellation)."""
    t, c = x.shape
    g = m.shape[1]
    n = jnp.float32(t * (c // g))
    s1 = jnp.sum(x, axis=0, keepdims=True)                               # (1, C)
    mean_g = jnp.dot(s1, m, preferred_element_type=jnp.float32) / n      # (1, G)
    mean_c = jnp.dot(mean_g, mt, preferred_element_type=jnp.float32)     # (1, C)
    d = x - mean_c
    s2 = jnp.sum(d * d, axis=0, keepdims=True)                           # (1, C)
    var_g = jnp.dot(s2, m, preferred_element_type=jnp.float32) / n       # (1, G)
    var_c = jnp.dot(var_g, mt, preferred_element_type=jnp.float32)       # (1, C)
    return d * jax.lax.rsqrt(var_c + eps) * gamma + beta


def _shift_down(a):
    """out[t] = a[t-1], out[0] = 0  (VMEM-only, replaces the HBM halo pad)."""
    z = jnp.zeros((1, a.shape[1]), a.dtype)
    return jnp.concatenate([z, a[:-1, :]], axis=0)


def _shift_up(a):
    """out[t] = a[t+1], out[T-1] = 0."""
    z = jnp.zeros((1, a.shape[1]), a.dtype)
    return jnp.concatenate([a[1:, :], z], axis=0)


def _conv3_taps(x, w_ref):
    """Per-tap matmuls of a (T, Cin) slab against (3, Cin, Cout) weights."""
    xm = _mxu(x)
    a0 = jnp.dot(xm, _mxu(w_ref[0]), preferred_element_type=jnp.float32)
    a1 = jnp.dot(xm, _mxu(w_ref[1]), preferred_element_type=jnp.float32)
    a2 = jnp.dot(xm, _mxu(w_ref[2]), preferred_element_type=jnp.float32)
    return a0, a1, a2


def _conv3(x, w_ref, b):
    """Conv1d(k=3, stride=1, pad=1): y[t] = x[t-1] W0 + x[t] W1 + x[t+1] W2 + b."""
    a0, a1, a2 = _conv3_taps(x, w_ref)
    return _shift_down(a0) + a1 + _shift_up(a2) + b


# ----------------------------------------------------------------------------
# Pallas kernels (one per fused module block)
# ----------------------------------------------------------------------------
def _conv3_kernel(x_ref, w_ref, b_ref, o_ref):
    x = x_ref[0].astype(jnp.float32)
    o_ref[0] = _conv3(x, w_ref, b_ref[...]).astype(o_ref.dtype)


def _resnet_kernel(x_ref, g1_ref, b1_ref, m1_ref, m1t_ref, w1_ref, c1b_ref,
                   g2_ref, b2_ref, m2_ref, m2t_ref, w2_ref, c2b_ref,
                   *rest, eps):
    """Fused ResnetBlock1D (temb is None, dropout p=0 -> both no-ops)."""
    if len(rest) == 3:
        wn_ref, bn_ref, o_ref = rest
    else:
        (o_ref,) = rest
        wn_ref = bn_ref = None

    x = x_ref[0].astype(jnp.float32)
    h = _silu(_group_norm(x, g1_ref[...], b1_ref[...], m1_ref[...], m1t_ref[...], eps))
    h = _conv3(h, w1_ref, c1b_ref[...])
    h = _silu(_group_norm(h, g2_ref[...], b2_ref[...], m2_ref[...], m2t_ref[...], eps))
    h = _conv3(h, w2_ref, c2b_ref[...])
    if wn_ref is not None:                       # 1x1 nin_shortcut (Cin != Cout)
        shortcut = jnp.dot(_mxu(x), _mxu(wn_ref[...]),
                           preferred_element_type=jnp.float32) + bn_ref[...]
    else:
        shortcut = x
    o_ref[0] = (shortcut + h).astype(o_ref.dtype)


def _attn_kernel(x_ref, g_ref, b_ref, m_ref, mt_ref,
                 wq_ref, wk_ref, wv_ref, wp_ref,
                 bq_ref, bk_ref, bv_ref, bp_ref, o_ref, *, eps, scale):
    """Fused AttnBlock1D: GroupNorm + q/k/v + softmax + proj + residual."""
    x = x_ref[0].astype(jnp.float32)
    h = _group_norm(x, g_ref[...], b_ref[...], m_ref[...], mt_ref[...], eps)
    hm = _mxu(h)
    q = jnp.dot(hm, _mxu(wq_ref[...]), preferred_element_type=jnp.float32) + bq_ref[...]
    k = jnp.dot(hm, _mxu(wk_ref[...]), preferred_element_type=jnp.float32) + bk_ref[...]
    v = jnp.dot(hm, _mxu(wv_ref[...]), preferred_element_type=jnp.float32) + bv_ref[...]

    # logits[i, j] = sum_c q[i, c] k[j, c]   (contract over channels)
    logits = jax.lax.dot_general(_mxu(q), _mxu(k), (((1,), (1,)), ((), ())),
                                 preferred_element_type=jnp.float32) * scale
    mx = jnp.max(logits, axis=-1, keepdims=True)
    e = jnp.exp(logits - mx)
    w = e * pl.reciprocal(jnp.sum(e, axis=-1, keepdims=True), approx=True)
    att = jnp.dot(_mxu(w.astype(jnp.float32)), _mxu(v),
                  preferred_element_type=jnp.float32)
    out = jnp.dot(_mxu(att), _mxu(wp_ref[...]),
                  preferred_element_type=jnp.float32) + bp_ref[...]
    o_ref[0] = (x + out).astype(o_ref.dtype)


def _gn_silu_conv3_kernel(x_ref, g_ref, b_ref, m_ref, mt_ref, w_ref, cb_ref,
                          o_ref, *, eps):
    """Fused norm_out + SiLU + conv_out."""
    x = x_ref[0].astype(jnp.float32)
    h = _silu(_group_norm(x, g_ref[...], b_ref[...], m_ref[...], mt_ref[...], eps))
    o_ref[0] = _conv3(h, w_ref, cb_ref[...]).astype(o_ref.dtype)


def _upsample_conv3_kernel(x_ref, w_ref, b_ref, even_ref, odd_ref):
    """2x nearest upsample fused with Conv1d(k=3, pad=1).

    With up[i] = x[i // 2]:
        y[2t]   = x[t-1] W0 + x[t] (W1 + W2)
        y[2t+1] = x[t] (W0 + W1) + x[t+1] W2
    so the length-2T upsampled signal is never built; only 3 matmuls over T rows.
    """
    x = x_ref[0].astype(jnp.float32)
    a0, a1, a2 = _conv3_taps(x, w_ref)
    b = b_ref[...]
    even_ref[0] = (_shift_down(a0) + a1 + a2 + b).astype(even_ref.dtype)
    odd_ref[0] = (a0 + a1 + _shift_up(a2) + b).astype(odd_ref.dtype)


# ----------------------------------------------------------------------------
# pallas_call wrappers
# ----------------------------------------------------------------------------
def _compiler_params():
    # Batch grid axis is embarrassingly parallel -> lets Mosaic shard grid
    # steps across both TensorCores on v7x; harmless on single-TC v5e/v6e.
    return pltpu.CompilerParams(dimension_semantics=("parallel",))


def _group_matrices(c, num_groups=_NUM_GROUPS):
    m = (jnp.arange(c)[:, None] // (c // num_groups)
         == jnp.arange(num_groups)[None, :]).astype(jnp.float32)
    return m, m.T


def _rowspec(c):
    return pl.BlockSpec((1, c), lambda i: (0, 0))


def _matspec(shape):
    nd = len(shape)
    return pl.BlockSpec(shape, lambda i, _nd=nd: (0,) * _nd)


def conv1d_k3(x, w, b):
    """Standalone Conv1d(k=3, pad=1) (used for conv_in)."""
    B, T, Cin = x.shape
    Cout = w.shape[-1]
    return pl.pallas_call(
        _conv3_kernel,
        out_shape=jax.ShapeDtypeStruct((B, T, Cout), x.dtype),
        grid=(B,),
        in_specs=[pl.BlockSpec((1, T, Cin), lambda i: (i, 0, 0)),
                  _matspec((3, Cin, Cout)), _rowspec(Cout)],
        out_specs=pl.BlockSpec((1, T, Cout), lambda i: (i, 0, 0)),
        compiler_params=_compiler_params(),
    )(x, w, b.reshape(1, Cout))


def resnet_block(x, p, *, eps=_GN_EPS):
    B, T, Cin = x.shape
    Cout = p['conv1']['w'].shape[-1]
    m1, m1t = _group_matrices(Cin)
    m2, m2t = _group_matrices(Cout)
    args = [x,
            p['gn1']['g'].reshape(1, Cin), p['gn1']['b'].reshape(1, Cin), m1, m1t,
            p['conv1']['w'], p['conv1']['b'].reshape(1, Cout),
            p['gn2']['g'].reshape(1, Cout), p['gn2']['b'].reshape(1, Cout), m2, m2t,
            p['conv2']['w'], p['conv2']['b'].reshape(1, Cout)]
    in_specs = [pl.BlockSpec((1, T, Cin), lambda i: (i, 0, 0)),
                _rowspec(Cin), _rowspec(Cin),
                _matspec((Cin, _NUM_GROUPS)), _matspec((_NUM_GROUPS, Cin)),
                _matspec((3, Cin, Cout)), _rowspec(Cout),
                _rowspec(Cout), _rowspec(Cout),
                _matspec((Cout, _NUM_GROUPS)), _matspec((_NUM_GROUPS, Cout)),
                _matspec((3, Cout, Cout)), _rowspec(Cout)]
    if 'nin' in p:
        args += [p['nin']['w'], p['nin']['b'].reshape(1, Cout)]
        in_specs += [_matspec((Cin, Cout)), _rowspec(Cout)]
    return pl.pallas_call(
        functools.partial(_resnet_kernel, eps=eps),
        out_shape=jax.ShapeDtypeStruct((B, T, Cout), x.dtype),
        grid=(B,),
        in_specs=in_specs,
        out_specs=pl.BlockSpec((1, T, Cout), lambda i: (i, 0, 0)),
        compiler_params=_compiler_params(),
    )(*args)


def attn_block(x, p, *, eps=_GN_EPS):
    B, T, C = x.shape
    # torch scales by int(t)**-0.5 where t unpacks the *channel* dim of a
    # (B, C, T) tensor -> scale = C ** -0.5.
    scale = float(C) ** -0.5
    m, mt = _group_matrices(C)
    rv = lambda a: a.reshape(1, C)
    xspec = pl.BlockSpec((1, T, C), lambda i: (i, 0, 0))
    in_specs = [xspec, _rowspec(C), _rowspec(C),
                _matspec((C, _NUM_GROUPS)), _matspec((_NUM_GROUPS, C)),
                _matspec((C, C)), _matspec((C, C)), _matspec((C, C)), _matspec((C, C)),
                _rowspec(C), _rowspec(C), _rowspec(C), _rowspec(C)]
    return pl.pallas_call(
        functools.partial(_attn_kernel, eps=eps, scale=scale),
        out_shape=jax.ShapeDtypeStruct((B, T, C), x.dtype),
        grid=(B,),
        in_specs=in_specs,
        out_specs=xspec,
        compiler_params=_compiler_params(),
    )(x, rv(p['gn']['g']), rv(p['gn']['b']), m, mt,
      p['wq'], p['wk'], p['wv'], p['wp'],
      rv(p['bq']), rv(p['bk']), rv(p['bv']), rv(p['bp']))


def upsample2x_conv3(x, w, b):
    B, T, C = x.shape
    even, odd = pl.pallas_call(
        _upsample_conv3_kernel,
        out_shape=(jax.ShapeDtypeStruct((B, T, C), x.dtype),
                   jax.ShapeDtypeStruct((B, T, C), x.dtype)),
        grid=(B,),
        in_specs=[pl.BlockSpec((1, T, C), lambda i: (i, 0, 0)),
                  _matspec((3, C, C)), _rowspec(C)],
        out_specs=(pl.BlockSpec((1, T, C), lambda i: (i, 0, 0)),
                   pl.BlockSpec((1, T, C), lambda i: (i, 0, 0))),
        compiler_params=_compiler_params(),
    )(x, w, b.reshape(1, C))
    # Interleave even/odd conv outputs -> (B, 2T, C).  The (B, 2T, C) upsampled
    # *input* never touches HBM; only this output interleave does.
    return jnp.stack([even, odd], axis=2).reshape(B, 2 * T, C)


def gn_silu_conv3(x, gn_p, conv_p, *, eps=_GN_EPS):
    B, T, C = x.shape
    Cout = conv_p['w'].shape[-1]
    m, mt = _group_matrices(C)
    return pl.pallas_call(
        functools.partial(_gn_silu_conv3_kernel, eps=eps),
        out_shape=jax.ShapeDtypeStruct((B, T, Cout), x.dtype),
        grid=(B,),
        in_specs=[pl.BlockSpec((1, T, C), lambda i: (i, 0, 0)),
                  _rowspec(C), _rowspec(C),
                  _matspec((C, _NUM_GROUPS)), _matspec((_NUM_GROUPS, C)),
                  _matspec((3, C, Cout)), _rowspec(Cout)],
        out_specs=pl.BlockSpec((1, T, Cout), lambda i: (i, 0, 0)),
        compiler_params=_compiler_params(),
    )(x, gn_p['g'].reshape(1, C), gn_p['b'].reshape(1, C), m, mt,
      conv_p['w'], conv_p['b'].reshape(1, Cout))


# ----------------------------------------------------------------------------
# Decoder1D forward
# ----------------------------------------------------------------------------
def decoder_forward(z, params, *, ch_mult, num_res_blocks, attn_layers, down_layers):
    num_layers = len(ch_mult)
    down_layers_shift = [i + 1 for i in down_layers]

    h = conv1d_k3(z, params['conv_in']['w'], params['conv_in']['b'])
    h = resnet_block(h, params['mid_block1'])
    h = attn_block(h, params['mid_attn'])
    h = resnet_block(h, params['mid_block2'])

    for i_level in reversed(range(num_layers)):
        lvl = params['up'][i_level]
        for i_block in range(num_res_blocks + 1):
            h = resnet_block(h, lvl['blocks'][i_block])
            if lvl['attn'] is not None:
                h = attn_block(h, lvl['attn'][i_block])
        if i_level in down_layers_shift:
            h = upsample2x_conv3(h, lvl['upsample']['w'], lvl['upsample']['b'])

    # give_pre_end=False, tanh_out=False
    h = gn_silu_conv3(h, params['norm_out'], params['conv_out'])
    return h


# ----------------------------------------------------------------------------
# Deterministic parameter initialization
# ----------------------------------------------------------------------------
class KeyGen:
    def __init__(self, key):
        self.key = key

    def __call__(self):
        self.key, sub = jax.random.split(self.key)
        return sub


def init_conv_k3(kg, cin, cout):
    return {'w': 0.05 * jax.random.normal(kg(), (3, cin, cout), jnp.float32),
            'b': 0.01 * jax.random.normal(kg(), (cout,), jnp.float32)}


def init_conv1x1(kg, cin, cout):
    return {'w': 0.05 * jax.random.normal(kg(), (cin, cout), jnp.float32),
            'b': 0.01 * jax.random.normal(kg(), (cout,), jnp.float32)}


def init_gn(kg, c):
    return {'g': 1.0 + 0.01 * jax.random.normal(kg(), (c,), jnp.float32),
            'b': 0.01 * jax.random.normal(kg(), (c,), jnp.float32)}


def init_resnet(kg, cin, cout):
    p = {'gn1': init_gn(kg, cin), 'conv1': init_conv_k3(kg, cin, cout),
         'gn2': init_gn(kg, cout), 'conv2': init_conv_k3(kg, cout, cout)}
    if cin != cout:
        p['nin'] = init_conv1x1(kg, cin, cout)
    return p


def init_attn(kg, c):
    p = {'gn': init_gn(kg, c)}
    for name in ('q', 'k', 'v', 'p'):
        p['w' + name] = 0.05 * jax.random.normal(kg(), (c, c), jnp.float32)
        p['b' + name] = 0.01 * jax.random.normal(kg(), (c,), jnp.float32)
    return p


def init_decoder(kg, *, ch, out_ch, ch_mult, num_res_blocks, attn_layers,
                 down_layers, z_channels):
    num_layers = len(ch_mult)
    down_layers_shift = [i + 1 for i in down_layers]
    block_in = ch * ch_mult[num_layers - 1]

    params = {'conv_in': init_conv_k3(kg, z_channels, block_in),
              'mid_block1': init_resnet(kg, block_in, block_in),
              'mid_attn': init_attn(kg, block_in),
              'mid_block2': init_resnet(kg, block_in, block_in)}

    up_params = [None] * num_layers
    for i_level in reversed(range(num_layers)):
        block_out = ch * ch_mult[i_level]
        blocks, attns = [], []
        for _ in range(num_res_blocks + 1):
            blocks.append(init_resnet(kg, block_in, block_out))
            block_in = block_out
            if i_level in attn_layers:
                attns.append(init_attn(kg, block_in))
        lvl = {'blocks': blocks, 'attn': attns if attns else None}
        if i_level in down_layers_shift:
            lvl['upsample'] = init_conv_k3(kg, block_in, block_in)
        up_params[i_level] = lvl
    params['up'] = up_params
    params['norm_out'] = init_gn(kg, block_in)
    params['conv_out'] = init_conv_k3(kg, block_in, out_ch)
    return params


# ----------------------------------------------------------------------------
if __name__ == "__main__":
    # Small Decoder1D config (GroupNorm(32) requires channel multiples of 32).
    cfg = dict(ch=32, out_ch=4, ch_mult=(1, 2), num_res_blocks=1,
               attn_layers=[1], down_layers=[0], z_channels=8)

    key = jax.random.PRNGKey(0)
    k_param, k_data = jax.random.split(key)
    params = init_decoder(KeyGen(k_param), **cfg)

    B, T = 2, 16
    # layout: (B, T, C); torch-equivalent input is (B, z_channels, T) = (2, 8, 16)
    z = jax.random.normal(k_data, (B, T, cfg['z_channels']), jnp.float32)

    fwd = jax.jit(lambda zz, pp: decoder_forward(
        zz, pp,
        ch_mult=cfg['ch_mult'],
        num_res_blocks=cfg['num_res_blocks'],
        attn_layers=cfg['attn_layers'],
        down_layers=cfg['down_layers']))

    out = jax.block_until_ready(fwd(z, params))

    expected_T = T * (2 ** len(cfg['down_layers']))   # one upsample level -> 32
    assert out.shape == (B, expected_T, cfg['out_ch']), out.shape
    assert bool(jnp.all(jnp.isfinite(out)))
    print("KERNEL_OK")
</pallas_src>

<mosaic_0001>
module attributes {stable_mosaic.version = 11 : i64} {
  func.func @_attn_kernel(%arg0: i32, %arg1: memref<1x16x64xf32, #tpu.memory_space<vmem>>, %arg2: memref<1x64xf32, #tpu.memory_space<vmem>>, %arg3: memref<1x64xf32, #tpu.memory_space<vmem>>, %arg4: memref<64x32xf32, #tpu.memory_space<vmem>>, %arg5: memref<32x64xf32, #tpu.memory_space<vmem>>, %arg6: memref<64x64xf32, #tpu.memory_space<vmem>>, %arg7: memref<64x64xf32, #tpu.memory_space<vmem>>, %arg8: memref<64x64xf32, #tpu.memory_space<vmem>>, %arg9: memref<64x64xf32, #tpu.memory_space<vmem>>, %arg10: memref<1x64xf32, #tpu.memory_space<vmem>>, %arg11: memref<1x64xf32, #tpu.memory_space<vmem>>, %arg12: memref<1x64xf32, #tpu.memory_space<vmem>>, %arg13: memref<1x64xf32, #tpu.memory_space<vmem>>, %arg14: memref<1x16x64xf32, #tpu.memory_space<vmem>>) attributes {dimension_semantics = [#tpu.dimension_semantics<parallel>], iteration_bounds = array<i64: 2>, scalar_prefetch = 0 : i64, scratch_operands = 0 : i64, tpu.core_type = #tpu.core_type<tc>, window_params = [{transform_indices = @transform_0, window_bounds = array<i64: 1, 16, 64>}, {pipeline_mode = #tpu.pipeline_mode<synchronous>, transform_indices = @transform_1, window_bounds = array<i64: 1, 64>}, {pipeline_mode = #tpu.pipeline_mode<synchronous>, transform_indices = @transform_2, window_bounds = array<i64: 1, 64>}, {pipeline_mode = #tpu.pipeline_mode<synchronous>, transform_indices = @transform_3, window_bounds = array<i64: 64, 32>}, {pipeline_mode = #tpu.pipeline_mode<synchronous>, transform_indices = @transform_4, window_bounds = array<i64: 32, 64>}, {pipeline_mode = #tpu.pipeline_mode<synchronous>, transform_indices = @transform_5, window_bounds = array<i64: 64, 64>}, {pipeline_mode = #tpu.pipeline_mode<synchronous>, transform_indices = @transform_6, window_bounds = array<i64: 64, 64>}, {pipeline_mode = #tpu.pipeline_mode<synchronous>, transform_indices = @transform_7, window_bounds = array<i64: 64, 64>}, {pipeline_mode = #tpu.pipeline_mode<synchronous>, transform_indices = @transform_8, window_bounds = array<i64: 64, 64>}, {pipeline_mode = #tpu.pipeline_mode<synchronous>, transform_indices = @transform_9, window_bounds = array<i64: 1, 64>}, {pipeline_mode = #tpu.pipeline_mode<synchronous>, transform_indices = @transform_10, window_bounds = array<i64: 1, 64>}, {pipeline_mode = #tpu.pipeline_mode<synchronous>, transform_indices = @transform_11, window_bounds = array<i64: 1, 64>}, {pipeline_mode = #tpu.pipeline_mode<synchronous>, transform_indices = @transform_12, window_bounds = array<i64: 1, 64>}, {transform_indices = @transform_13, window_bounds = array<i64: 1, 16, 64>}]} {
    %c0 = arith.constant 0 : index
    %c0_0 = arith.constant 0 : index
    %c0_1 = arith.constant 0 : index
    %0 = vector.load %arg1[%c0, %c0_0, %c0_1] : memref<1x16x64xf32, #tpu.memory_space<vmem>>, vector<1x16x64xf32>
    %1 = vector.shape_cast %0 : vector<1x16x64xf32> to vector<16x64xf32>
    %c0_2 = arith.constant 0 : index
    %c0_3 = arith.constant 0 : index
    %2 = vector.load %arg2[%c0_2, %c0_3] : memref<1x64xf32, #tpu.memory_space<vmem>>, vector<1x64xf32>
    %c0_4 = arith.constant 0 : index
    %c0_5 = arith.constant 0 : index
    %3 = vector.load %arg3[%c0_4, %c0_5] : memref<1x64xf32, #tpu.memory_space<vmem>>, vector<1x64xf32>
    %c0_6 = arith.constant 0 : index
    %c0_7 = arith.constant 0 : index
    %4 = vector.load %arg4[%c0_6, %c0_7] : memref<64x32xf32, #tpu.memory_space<vmem>>, vector<64x32xf32>
    %c0_8 = arith.constant 0 : index
    %c0_9 = arith.constant 0 : index
    %5 = vector.load %arg5[%c0_8, %c0_9] : memref<32x64xf32, #tpu.memory_space<vmem>>, vector<32x64xf32>
    %cst = arith.constant dense<0.000000e+00> : vector<64xf32>
    %6 = vector.multi_reduction <add>, %1, %cst [0] : vector<16x64xf32> to vector<64xf32>
    %7 = vector.shape_cast %6 : vector<64xf32> to vector<1x64xf32>
    %cst_10 = arith.constant dense<0.000000e+00> : vector<1x32xf32>
    %8 = tpu.matmul %7, %4, %cst_10 {dimension_numbers = #tpu.dot_dimension_numbers<[1], [0], [0], [1], [0, 0, 1, 1], [], []>} : vector<1x64xf32>, vector<64x32xf32>, vector<1x32xf32> -> vector<1x32xf32>
    %cst_11 = arith.constant 3.200000e+01 : f32
    %9 = vector.broadcast %cst_11 : f32 to vector<1x32xf32>
    %10 = arith.divf %8, %9 : vector<1x32xf32>
    %cst_12 = arith.constant dense<0.000000e+00> : vector<1x64xf32>
    %11 = tpu.matmul %10, %5, %cst_12 {dimension_numbers = #tpu.dot_dimension_numbers<[1], [0], [0], [1], [0, 0, 1, 1], [], []>} : vector<1x32xf32>, vector<32x64xf32>, vector<1x64xf32> -> vector<1x64xf32>
    %12 = vector.broadcast %11 : vector<1x64xf32> to vector<16x64xf32>
    %13 = arith.subf %1, %12 : vector<16x64xf32>
    %14 = arith.mulf %13, %13 : vector<16x64xf32>
    %cst_13 = arith.constant dense<0.000000e+00> : vector<64xf32>
    %15 = vector.multi_reduction <add>, %14, %cst_13 [0] : vector<16x64xf32> to vector<64xf32>
    %16 = vector.shape_cast %15 : vector<64xf32> to vector<1x64xf32>
    %cst_14 = arith.constant dense<0.000000e+00> : vector<1x32xf32>
    %17 = tpu.matmul %16, %4, %cst_14 {dimension_numbers = #tpu.dot_dimension_numbers<[1], [0], [0], [1], [0, 0, 1, 1], [], []>} : vector<1x64xf32>, vector<64x32xf32>, vector<1x32xf32> -> vector<1x32xf32>
    %cst_15 = arith.constant 3.200000e+01 : f32
    %18 = vector.broadcast %cst_15 : f32 to vector<1x32xf32>
    %19 = arith.divf %17, %18 : vector<1x32xf32>
    %cst_16 = arith.constant dense<0.000000e+00> : vector<1x64xf32>
    %20 = tpu.matmul %19, %5, %cst_16 {dimension_numbers = #tpu.dot_dimension_numbers<[1], [0], [0], [1], [0, 0, 1, 1], [], []>} : vector<1x32xf32>, vector<32x64xf32>, vector<1x64xf32> -> vector<1x64xf32>
    %cst_17 = arith.constant 9.99999997E-7 : f32
    %21 = vector.broadcast %cst_17 : f32 to vector<1x64xf32>
    %22 = arith.addf %20, %21 : vector<1x64xf32>
    %23 = math.rsqrt %22 : vector<1x64xf32>
    %24 = vector.broadcast %23 : vector<1x64xf32> to vector<16x64xf32>
    %25 = arith.mulf %13, %24 : vector<16x64xf32>
    %26 = vector.broadcast %2 : vector<1x64xf32> to vector<16x64xf32>
    %27 = arith.mulf %25, %26 : vector<16x64xf32>
    %28 = vector.broadcast %3 : vector<1x64xf32> to vector<16x64xf32>
    %29 = arith.addf %27, %28 : vector<16x64xf32>
    %c0_18 = arith.constant 0 : index
    %c0_19 = arith.constant 0 : index
    %30 = vector.load %arg6[%c0_18, %c0_19] : memref<64x64xf32, #tpu.memory_space<vmem>>, vector<64x64xf32>
    %cst_20 = arith.constant dense<0.000000e+00> : vector<16x64xf32>
    %31 = tpu.matmul %29, %30, %cst_20 {dimension_numbers = #tpu.dot_dimension_numbers<[1], [0], [0], [1], [0, 0, 1, 1], [], []>} : vector<16x64xf32>, vector<64x64xf32>, vector<16x64xf32> -> vector<16x64xf32>
    %c0_21 = arith.constant 0 : index
    %c0_22 = arith.constant 0 : index
    %32 = vector.load %arg10[%c0_21, %c0_22] : memref<1x64xf32, #tpu.memory_space<vmem>>, vector<1x64xf32>
    %33 = vector.broadcast %32 : vector<1x64xf32> to vector<16x64xf32>
    %34 = arith.addf %31, %33 : vector<16x64xf32>
    %c0_23 = arith.constant 0 : index
    %c0_24 = arith.constant 0 : index
    %35 = vector.load %arg7[%c0_23, %c0_24] : memref<64x64xf32, #tpu.memory_space<vmem>>, vector<64x64xf32>
    %cst_25 = arith.constant dense<0.000000e+00> : vector<16x64xf32>
    %36 = tpu.matmul %29, %35, %cst_25 {dimension_numbers = #tpu.dot_dimension_numbers<[1], [0], [0], [1], [0, 0, 1, 1], [], []>} : vector<16x64xf32>, vector<64x64xf32>, vector<16x64xf32> -> vector<16x64xf32>
    %c0_26 = arith.constant 0 : index
    %c0_27 = arith.constant 0 : index
    %37 = vector.load %arg11[%c0_26, %c0_27] : memref<1x64xf32, #tpu.memory_space<vmem>>, vector<1x64xf32>
    %38 = vector.broadcast %37 : vector<1x64xf32> to vector<16x64xf32>
    %39 = arith.addf %36, %38 : vector<16x64xf32>
    %c0_28 = arith.constant 0 : index
    %c0_29 = arith.constant 0 : index
    %40 = vector.load %arg8[%c0_28, %c0_29] : memref<64x64xf32, #tpu.memory_space<vmem>>, vector<64x64xf32>
    %cst_30 = arith.constant dense<0.000000e+00> : vector<16x64xf32>
    %41 = tpu.matmul %29, %40, %cst_30 {dimension_numbers = #tpu.dot_dimension_numbers<[1], [0], [0], [1], [0, 0, 1, 1], [], []>} : vector<16x64xf32>, vector<64x64xf32>, vector<16x64xf32> -> vector<16x64xf32>
    %c0_31 = arith.constant 0 : index
    %c0_32 = arith.constant 0 : index
    %42 = vector.load %arg12[%c0_31, %c0_32] : memref<1x64xf32, #tpu.memory_space<vmem>>, vector<1x64xf32>
    %43 = vector.broadcast %42 : vector<1x64xf32> to vector<16x64xf32>
    %44 = arith.addf %41, %43 : vector<16x64xf32>
    %cst_33 = arith.constant dense<0.000000e+00> : vector<16x16xf32>
    %45 = tpu.matmul %34, %39, %cst_33 {dimension_numbers = #tpu.dot_dimension_numbers<[1], [1], [0], [0], [0, 0, 1, 0], [], []>} : vector<16x64xf32>, vector<16x64xf32>, vector<16x16xf32> -> vector<16x16xf32>
    %cst_34 = arith.constant 1.250000e-01 : f32
    %46 = vector.broadcast %cst_34 : f32 to vector<16x16xf32>
    %47 = arith.mulf %45, %46 : vector<16x16xf32>
    %cst_35 = arith.constant dense<0xFF800000> : vector<16xf32>
    %48 = vector.multi_reduction <maximumf>, %47, %cst_35 [1] : vector<16x16xf32> to vector<16xf32>
    %49 = vector.shape_cast %48 : vector<16xf32> to vector<16x1xf32>
    %50 = vector.broadcast %49 : vector<16x1xf32> to vector<16x16xf32>
    %51 = arith.subf %47, %50 : vector<16x16xf32>
    %52 = math.exp %51 : vector<16x16xf32>
    %cst_36 = arith.constant dense<0.000000e+00> : vector<16xf32>
    %53 = vector.multi_reduction <add>, %52, %cst_36 [1] : vector<16x16xf32> to vector<16xf32>
    %54 = vector.shape_cast %53 : vector<16xf32> to vector<16x1xf32>
    %55 = tpu.reciprocal %54 {approx = true} : vector<16x1xf32> -> vector<16x1xf32>
    %56 = vector.broadcast %55 : vector<16x1xf32> to vector<16x16xf32>
    %57 = arith.mulf %52, %56 : vector<16x16xf32>
    %cst_37 = arith.constant dense<0.000000e+00> : vector<16x64xf32>
    %58 = tpu.matmul %57, %44, %cst_37 {dimension_numbers = #tpu.dot_dimension_numbers<[1], [0], [0], [1], [0, 0, 1, 1], [], []>} : vector<16x16xf32>, vector<16x64xf32>, vector<16x64xf32> -> vector<16x64xf32>
    %c0_38 = arith.constant 0 : index
    %c0_39 = arith.constant 0 : index
    %59 = vector.load %arg9[%c0_38, %c0_39] : memref<64x64xf32, #tpu.memory_space<vmem>>, vector<64x64xf32>
    %cst_40 = arith.constant dense<0.000000e+00> : vector<16x64xf32>
    %60 = tpu.matmul %58, %59, %cst_40 {dimension_numbers = #tpu.dot_dimension_numbers<[1], [0], [0], [1], [0, 0, 1, 1], [], []>} : vector<16x64xf32>, vector<64x64xf32>, vector<16x64xf32> -> vector<16x64xf32>
    %c0_41 = arith.constant 0 : index
    %c0_42 = arith.constant 0 : index
    %61 = vector.load %arg13[%c0_41, %c0_42] : memref<1x64xf32, #tpu.memory_space<vmem>>, vector<1x64xf32>
    %62 = vector.broadcast %61 : vector<1x64xf32> to vector<16x64xf32>
    %63 = arith.addf %60, %62 : vector<16x64xf32>
    %64 = arith.addf %1, %63 : vector<16x64xf32>
    %c0_43 = arith.constant 0 : index
    %c0_44 = arith.constant 0 : index
    %c0_45 = arith.constant 0 : index
    %65 = vector.load %arg14[%c0_43, %c0_44, %c0_45] : memref<1x16x64xf32, #tpu.memory_space<vmem>>, vector<1x16x64xf32>
    %66 = vector.shape_cast %65 : vector<1x16x64xf32> to vector<16x64xf32>
    %67 = vector.shape_cast %64 : vector<16x64xf32> to vector<1x16x64xf32>
    tpu.vector_store %arg14[%c0_43, %c0_44, %c0_45], %67 {strides = array<i32>} : memref<1x16x64xf32, #tpu.memory_space<vmem>>, vector<1x16x64xf32>,
    return
  }
  func.func @transform_0(%arg0: i32) -> (i32, i32, i32) {
    %c0_i32 = arith.constant 0 : i32
    %c0_i32_0 = arith.constant 0 : i32
    %c0_i32_1 = arith.constant 0 : i32
    return %arg0, %c0_i32, %c0_i32_0 : i32, i32, i32
  }
  func.func @transform_1(%arg0: i32) -> (i32, i32) {
    %c0_i32 = arith.constant 0 : i32
    %c0_i32_0 = arith.constant 0 : i32
    %c0_i32_1 = arith.constant 0 : i32
    return %c0_i32, %c0_i32_0 : i32, i32
  }
  func.func @transform_2(%arg0: i32) -> (i32, i32) {
    %c0_i32 = arith.constant 0 : i32
    %c0_i32_0 = arith.constant 0 : i32
    %c0_i32_1 = arith.constant 0 : i32
    return %c0_i32, %c0_i32_0 : i32, i32
  }
  func.func @transform_3(%arg0: i32) -> (i32, i32) {
    %c0_i32 = arith.constant 0 : i32
    %c0_i32_0 = arith.constant 0 : i32
    %c0_i32_1 = arith.constant 0 : i32
    return %c0_i32, %c0_i32_0 : i32, i32
  }
  func.func @transform_4(%arg0: i32) -> (i32, i32) {
    %c0_i32 = arith.constant 0 : i32
    %c0_i32_0 = arith.constant 0 : i32
    %c0_i32_1 = arith.constant 0 : i32
    return %c0_i32, %c0_i32_0 : i32, i32
  }
  func.func @transform_5(%arg0: i32) -> (i32, i32) {
    %c0_i32 = arith.constant 0 : i32
    %c0_i32_0 = arith.constant 0 : i32
    %c0_i32_1 = arith.constant 0 : i32
    return %c0_i32, %c0_i32_0 : i32, i32
  }
  func.func @transform_6(%arg0: i32) -> (i32, i32) {
    %c0_i32 = arith.constant 0 : i32
    %c0_i32_0 = arith.constant 0 : i32
    %c0_i32_1 = arith.constant 0 : i32
    return %c0_i32, %c0_i32_0 : i32, i32
  }
  func.func @transform_7(%arg0: i32) -> (i32, i32) {
    %c0_i32 = arith.constant 0 : i32
    %c0_i32_0 = arith.constant 0 : i32
    %c0_i32_1 = arith.constant 0 : i32
    return %c0_i32, %c0_i32_0 : i32, i32
  }
  func.func @transform_8(%arg0: i32) -> (i32, i32) {
    %c0_i32 = arith.constant 0 : i32
    %c0_i32_0 = arith.constant 0 : i32
    %c0_i32_1 = arith.constant 0 : i32
    return %c0_i32, %c0_i32_0 : i32, i32
  }
  func.func @transform_9(%arg0: i32) -> (i32, i32) {
    %c0_i32 = arith.constant 0 : i32
    %c0_i32_0 = arith.constant 0 : i32
    %c0_i32_1 = arith.constant 0 : i32
    return %c0_i32, %c0_i32_0 : i32, i32
  }
  func.func @transform_10(%arg0: i32) -> (i32, i32) {
    %c0_i32 = arith.constant 0 : i32
    %c0_i32_0 = arith.constant 0 : i32
    %c0_i32_1 = arith.constant 0 : i32
    return %c0_i32, %c0_i32_0 : i32, i32
  }
  func.func @transform_11(%arg0: i32) -> (i32, i32) {
    %c0_i32 = arith.constant 0 : i32
    %c0_i32_0 = arith.constant 0 : i32
    %c0_i32_1 = arith.constant 0 : i32
    return %c0_i32, %c0_i32_0 : i32, i32
  }
  func.func @transform_12(%arg0: i32) -> (i32, i32) {
    %c0_i32 = arith.constant 0 : i32
    %c0_i32_0 = arith.constant 0 : i32
    %c0_i32_1 = arith.constant 0 : i32
    return %c0_i32, %c0_i32_0 : i32, i32
  }
  func.func @transform_13(%arg0: i32) -> (i32, i32, i32) {
    %c0_i32 = arith.constant 0 : i32
    %c0_i32_0 = arith.constant 0 : i32
    %c0_i32_1 = arith.constant 0 : i32
    return %arg0, %c0_i32, %c0_i32_0 : i32, i32, i32
  }
}

module attributes {stable_mosaic.version = 11 : i64} {
  func.func @_conv3_kernel(%arg0: i32, %arg1: memref<1x16x8xf32, #tpu.memory_space<vmem>>, %arg2: memref<3x8x64xf32, #tpu.memory_space<vmem>>, %arg3: memref<1x64xf32, #tpu.memory_space<vmem>>, %arg4: memref<1x16x64xf32, #tpu.memory_space<vmem>>) attributes {dimension_semantics = [#tpu.dimension_semantics<parallel>], iteration_bounds = array<i64: 2>, scalar_prefetch = 0 : i64, scratch_operands = 0 : i64, tpu.core_type = #tpu.core_type<tc>, window_params = [{transform_indices = @transform_0, window_bounds = array<i64: 1, 16, 8>}, {pipeline_mode = #tpu.pipeline_mode<synchronous>, transform_indices = @transform_1, window_bounds = array<i64: 3, 8, 64>}, {pipeline_mode = #tpu.pipeline_mode<synchronous>, transform_indices = @transform_2, window_bounds = array<i64: 1, 64>}, {transform_indices = @transform_3, window_bounds = array<i64: 1, 16, 64>}]} {
    %c0 = arith.constant 0 : index
    %c0_0 = arith.constant 0 : index
    %c0_1 = arith.constant 0 : index
    %0 = vector.load %arg1[%c0, %c0_0, %c0_1] : memref<1x16x8xf32, #tpu.memory_space<vmem>>, vector<1x16x8xf32>
    %1 = vector.shape_cast %0 : vector<1x16x8xf32> to vector<16x8xf32>
    %c0_2 = arith.constant 0 : index
    %c0_3 = arith.constant 0 : index
    %2 = vector.load %arg3[%c0_2, %c0_3] : memref<1x64xf32, #tpu.memory_space<vmem>>, vector<1x64xf32>
    %c0_4 = arith.constant 0 : index
    %c0_5 = arith.constant 0 : index
    %c0_6 = arith.constant 0 : index
    %3 = vector.load %arg2[%c0_4, %c0_5, %c0_6] : memref<3x8x64xf32, #tpu.memory_space<vmem>>, vector<1x8x64xf32>
    %4 = vector.shape_cast %3 : vector<1x8x64xf32> to vector<8x64xf32>
    %cst = arith.constant dense<0.000000e+00> : vector<16x64xf32>
    %5 = tpu.matmul %1, %4, %cst {dimension_numbers = #tpu.dot_dimension_numbers<[1], [0], [0], [1], [0, 0, 1, 1], [], []>} : vector<16x8xf32>, vector<8x64xf32>, vector<16x64xf32> -> vector<16x64xf32>
    %c1 = arith.constant 1 : index
    %c0_7 = arith.constant 0 : index
    %c0_8 = arith.constant 0 : index
    %6 = vector.load %arg2[%c1, %c0_7, %c0_8] : memref<3x8x64xf32, #tpu.memory_space<vmem>>, vector<1x8x64xf32>
    %7 = vector.shape_cast %6 : vector<1x8x64xf32> to vector<8x64xf32>
    %cst_9 = arith.constant dense<0.000000e+00> : vector<16x64xf32>
    %8 = tpu.matmul %1, %7, %cst_9 {dimension_numbers = #tpu.dot_dimension_numbers<[1], [0], [0], [1], [0, 0, 1, 1], [], []>} : vector<16x8xf32>, vector<8x64xf32>, vector<16x64xf32> -> vector<16x64xf32>
    %c2 = arith.constant 2 : index
    %c0_10 = arith.constant 0 : index
    %c0_11 = arith.constant 0 : index
    %9 = vector.load %arg2[%c2, %c0_10, %c0_11] : memref<3x8x64xf32, #tpu.memory_space<vmem>>, vector<1x8x64xf32>
    %10 = vector.shape_cast %9 : vector<1x8x64xf32> to vector<8x64xf32>
    %cst_12 = arith.constant dense<0.000000e+00> : vector<16x64xf32>
    %11 = tpu.matmul %1, %10, %cst_12 {dimension_numbers = #tpu.dot_dimension_numbers<[1], [0], [0], [1], [0, 0, 1, 1], [], []>} : vector<16x8xf32>, vector<8x64xf32>, vector<16x64xf32> -> vector<16x64xf32>
    %cst_13 = arith.constant 0.000000e+00 : f32
    %12 = vector.broadcast %cst_13 : f32 to vector<1x64xf32>
    %13 = vector.extract_strided_slice %5 {offsets = [0, 0], sizes = [15, 64], strides = [1, 1]} : vector<16x64xf32> to vector<15x64xf32>
    %14 = tpu.concatenate %12, %13 in 0 : vector<1x64xf32>, vector<15x64xf32> -> vector<16x64xf32>
    %15 = arith.addf %14, %8 : vector<16x64xf32>
    %cst_14 = arith.constant 0.000000e+00 : f32
    %16 = vector.broadcast %cst_14 : f32 to vector<1x64xf32>
    %17 = vector.extract_strided_slice %11 {offsets = [1, 0], sizes = [15, 64], strides = [1, 1]} : vector<16x64xf32> to vector<15x64xf32>
    %18 = tpu.concatenate %17, %16 in 0 : vector<15x64xf32>, vector<1x64xf32> -> vector<16x64xf32>
    %19 = arith.addf %15, %18 : vector<16x64xf32>
    %20 = vector.broadcast %2 : vector<1x64xf32> to vector<16x64xf32>
    %21 = arith.addf %19, %20 : vector<16x64xf32>
    %c0_15 = arith.constant 0 : index
    %c0_16 = arith.constant 0 : index
    %c0_17 = arith.constant 0 : index
    %22 = vector.load %arg4[%c0_15, %c0_16, %c0_17] : memref<1x16x64xf32, #tpu.memory_space<vmem>>, vector<1x16x64xf32>
    %23 = vector.shape_cast %22 : vector<1x16x64xf32> to vector<16x64xf32>
    %24 = vector.shape_cast %21 : vector<16x64xf32> to vector<1x16x64xf32>
    tpu.vector_store %arg4[%c0_15, %c0_16, %c0_17], %24 {strides = array<i32>} : memref<1x16x64xf32, #tpu.memory_space<vmem>>, vector<1x16x64xf32>,
    return
  }
  func.func @transform_0(%arg0: i32) -> (i32, i32, i32) {
    %c0_i32 = arith.constant 0 : i32
    %c0_i32_0 = arith.constant 0 : i32
    %c0_i32_1 = arith.constant 0 : i32
    return %arg0, %c0_i32, %c0_i32_0 : i32, i32, i32
  }
  func.func @transform_1(%arg0: i32) -> (i32, i32, i32) {
    %c0_i32 = arith.constant 0 : i32
    %c0_i32_0 = arith.constant 0 : i32
    %c0_i32_1 = arith.constant 0 : i32
    %c0_i32_2 = arith.constant 0 : i32
    return %c0_i32, %c0_i32_0, %c0_i32_1 : i32, i32, i32
  }
  func.func @transform_2(%arg0: i32) -> (i32, i32) {
    %c0_i32 = arith.constant 0 : i32
    %c0_i32_0 = arith.constant 0 : i32
    %c0_i32_1 = arith.constant 0 : i32
    return %c0_i32, %c0_i32_0 : i32, i32
  }
  func.func @transform_3(%arg0: i32) -> (i32, i32, i32) {
    %c0_i32 = arith.constant 0 : i32
    %c0_i32_0 = arith.constant 0 : i32
    %c0_i32_1 = arith.constant 0 : i32
    return %arg0, %c0_i32, %c0_i32_0 : i32, i32, i32
  }
}

module attributes {stable_mosaic.version = 11 : i64} {
  func.func @_resnet_kernel(%arg0: i32, %arg1: memref<1x16x64xf32, #tpu.memory_space<vmem>>, %arg2: memref<1x64xf32, #tpu.memory_space<vmem>>, %arg3: memref<1x64xf32, #tpu.memory_space<vmem>>, %arg4: memref<64x32xf32, #tpu.memory_space<vmem>>, %arg5: memref<32x64xf32, #tpu.memory_space<vmem>>, %arg6: memref<3x64x64xf32, #tpu.memory_space<vmem>>, %arg7: memref<1x64xf32, #tpu.memory_space<vmem>>, %arg8: memref<1x64xf32, #tpu.memory_space<vmem>>, %arg9: memref<1x64xf32, #tpu.memory_space<vmem>>, %arg10: memref<64x32xf32, #tpu.memory_space<vmem>>, %arg11: memref<32x64xf32, #tpu.memory_space<vmem>>, %arg12: memref<3x64x64xf32, #tpu.memory_space<vmem>>, %arg13: memref<1x64xf32, #tpu.memory_space<vmem>>, %arg14: memref<1x16x64xf32, #tpu.memory_space<vmem>>) attributes {dimension_semantics = [#tpu.dimension_semantics<parallel>], iteration_bounds = array<i64: 2>, scalar_prefetch = 0 : i64, scratch_operands = 0 : i64, tpu.core_type = #tpu.core_type<tc>, window_params = [{transform_indices = @transform_0, window_bounds = array<i64: 1, 16, 64>}, {pipeline_mode = #tpu.pipeline_mode<synchronous>, transform_indices = @transform_1, window_bounds = array<i64: 1, 64>}, {pipeline_mode = #tpu.pipeline_mode<synchronous>, transform_indices = @transform_2, window_bounds = array<i64: 1, 64>}, {pipeline_mode = #tpu.pipeline_mode<synchronous>, transform_indices = @transform_3, window_bounds = array<i64: 64, 32>}, {pipeline_mode = #tpu.pipeline_mode<synchronous>, transform_indices = @transform_4, window_bounds = array<i64: 32, 64>}, {pipeline_mode = #tpu.pipeline_mode<synchronous>, transform_indices = @transform_5, window_bounds = array<i64: 3, 64, 64>}, {pipeline_mode = #tpu.pipeline_mode<synchronous>, transform_indices = @transform_6, window_bounds = array<i64: 1, 64>}, {pipeline_mode = #tpu.pipeline_mode<synchronous>, transform_indices = @transform_7, window_bounds = array<i64: 1, 64>}, {pipeline_mode = #tpu.pipeline_mode<synchronous>, transform_indices = @transform_8, window_bounds = array<i64: 1, 64>}, {pipeline_mode = #tpu.pipeline_mode<synchronous>, transform_indices = @transform_9, window_bounds = array<i64: 64, 32>}, {pipeline_mode = #tpu.pipeline_mode<synchronous>, transform_indices = @transform_10, window_bounds = array<i64: 32, 64>}, {pipeline_mode = #tpu.pipeline_mode<synchronous>, transform_indices = @transform_11, window_bounds = array<i64: 3, 64, 64>}, {pipeline_mode = #tpu.pipeline_mode<synchronous>, transform_indices = @transform_12, window_bounds = array<i64: 1, 64>}, {transform_indices = @transform_13, window_bounds = array<i64: 1, 16, 64>}]} {
    %c0 = arith.constant 0 : index
    %c0_0 = arith.constant 0 : index
    %c0_1 = arith.constant 0 : index
    %0 = vector.load %arg1[%c0, %c0_0, %c0_1] : memref<1x16x64xf32, #tpu.memory_space<vmem>>, vector<1x16x64xf32>
    %1 = vector.shape_cast %0 : vector<1x16x64xf32> to vector<16x64xf32>
    %c0_2 = arith.constant 0 : index
    %c0_3 = arith.constant 0 : index
    %2 = vector.load %arg2[%c0_2, %c0_3] : memref<1x64xf32, #tpu.memory_space<vmem>>, vector<1x64xf32>
    %c0_4 = arith.constant 0 : index
    %c0_5 = arith.constant 0 : index
    %3 = vector.load %arg3[%c0_4, %c0_5] : memref<1x64xf32, #tpu.memory_space<vmem>>, vector<1x64xf32>
    %c0_6 = arith.constant 0 : index
    %c0_7 = arith.constant 0 : index
    %4 = vector.load %arg4[%c0_6, %c0_7] : memref<64x32xf32, #tpu.memory_space<vmem>>, vector<64x32xf32>
    %c0_8 = arith.constant 0 : index
    %c0_9 = arith.constant 0 : index
    %5 = vector.load %arg5[%c0_8, %c0_9] : memref<32x64xf32, #tpu.memory_space<vmem>>, vector<32x64xf32>
    %cst = arith.constant dense<0.000000e+00> : vector<64xf32>
    %6 = vector.multi_reduction <add>, %1, %cst [0] : vector<16x64xf32> to vector<64xf32>
    %7 = vector.shape_cast %6 : vector<64xf32> to vector<1x64xf32>
    %cst_10 = arith.constant dense<0.000000e+00> : vector<1x32xf32>
    %8 = tpu.matmul %7, %4, %cst_10 {dimension_numbers = #tpu.dot_dimension_numbers<[1], [0], [0], [1], [0, 0, 1, 1], [], []>} : vector<1x64xf32>, vector<64x32xf32>, vector<1x32xf32> -> vector<1x32xf32>
    %cst_11 = arith.constant 3.200000e+01 : f32
    %9 = vector.broadcast %cst_11 : f32 to vector<1x32xf32>
    %10 = arith.divf %8, %9 : vector<1x32xf32>
    %cst_12 = arith.constant dense<0.000000e+00> : vector<1x64xf32>
    %11 = tpu.matmul %10, %5, %cst_12 {dimension_numbers = #tpu.dot_dimension_numbers<[1], [0], [0], [1], [0, 0, 1, 1], [], []>} : vector<1x32xf32>, vector<32x64xf32>, vector<1x64xf32> -> vector<1x64xf32>
    %12 = vector.broadcast %11 : vector<1x64xf32> to vector<16x64xf32>
    %13 = arith.subf %1, %12 : vector<16x64xf32>
    %14 = arith.mulf %13, %13 : vector<16x64xf32>
    %cst_13 = arith.constant dense<0.000000e+00> : vector<64xf32>
    %15 = vector.multi_reduction <add>, %14, %cst_13 [0] : vector<16x64xf32> to vector<64xf32>
    %16 = vector.shape_cast %15 : vector<64xf32> to vector<1x64xf32>
    %cst_14 = arith.constant dense<0.000000e+00> : vector<1x32xf32>
    %17 = tpu.matmul %16, %4, %cst_14 {dimension_numbers = #tpu.dot_dimension_numbers<[1], [0], [0], [1], [0, 0, 1, 1], [], []>} : vector<1x64xf32>, vector<64x32xf32>, vector<1x32xf32> -> vector<1x32xf32>
    %cst_15 = arith.constant 3.200000e+01 : f32
    %18 = vector.broadcast %cst_15 : f32 to vector<1x32xf32>
    %19 = arith.divf %17, %18 : vector<1x32xf32>
    %cst_16 = arith.constant dense<0.000000e+00> : vector<1x64xf32>
    %20 = tpu.matmul %19, %5, %cst_16 {dimension_numbers = #tpu.dot_dimension_numbers<[1], [0], [0], [1], [0, 0, 1, 1], [], []>} : vector<1x32xf32>, vector<32x64xf32>, vector<1x64xf32> -> vector<1x64xf32>
    %cst_17 = arith.constant 9.99999997E-7 : f32
    %21 = vector.broadcast %cst_17 : f32 to vector<1x64xf32>
    %22 = arith.addf %20, %21 : vector<1x64xf32>
    %23 = math.rsqrt %22 : vector<1x64xf32>
    %24 = vector.broadcast %23 : vector<1x64xf32> to vector<16x64xf32>
    %25 = arith.mulf %13, %24 : vector<16x64xf32>
    %26 = vector.broadcast %2 : vector<1x64xf32> to vector<16x64xf32>
    %27 = arith.mulf %25, %26 : vector<16x64xf32>
    %28 = vector.broadcast %3 : vector<1x64xf32> to vector<16x64xf32>
    %29 = arith.addf %27, %28 : vector<16x64xf32>
    %30 = arith.negf %29 : vector<16x64xf32>
    %31 = math.exp %30 : vector<16x64xf32>
    %cst_18 = arith.constant 1.000000e+00 : f32
    %32 = vector.broadcast %cst_18 : f32 to vector<16x64xf32>
    %33 = arith.addf %32, %31 : vector<16x64xf32>
    %34 = arith.divf %32, %33 : vector<16x64xf32>
    %35 = arith.mulf %29, %34 : vector<16x64xf32>
    %c0_19 = arith.constant 0 : index
    %c0_20 = arith.constant 0 : index
    %36 = vector.load %arg7[%c0_19, %c0_20] : memref<1x64xf32, #tpu.memory_space<vmem>>, vector<1x64xf32>
    %c0_21 = arith.constant 0 : index
    %c0_22 = arith.constant 0 : index
    %c0_23 = arith.constant 0 : index
    %37 = vector.load %arg6[%c0_21, %c0_22, %c0_23] : memref<3x64x64xf32, #tpu.memory_space<vmem>>, vector<1x64x64xf32>
    %38 = vector.shape_cast %37 : vector<1x64x64xf32> to vector<64x64xf32>
    %cst_24 = arith.constant dense<0.000000e+00> : vector<16x64xf32>
    %39 = tpu.matmul %35, %38, %cst_24 {dimension_numbers = #tpu.dot_dimension_numbers<[1], [0], [0], [1], [0, 0, 1, 1], [], []>} : vector<16x64xf32>, vector<64x64xf32>, vector<16x64xf32> -> vector<16x64xf32>
    %c1 = arith.constant 1 : index
    %c0_25 = arith.constant 0 : index
    %c0_26 = arith.constant 0 : index
    %40 = vector.load %arg6[%c1, %c0_25, %c0_26] : memref<3x64x64xf32, #tpu.memory_space<vmem>>, vector<1x64x64xf32>
    %41 = vector.shape_cast %40 : vector<1x64x64xf32> to vector<64x64xf32>
    %cst_27 = arith.constant dense<0.000000e+00> : vector<16x64xf32>
    %42 = tpu.matmul %35, %41, %cst_27 {dimension_numbers = #tpu.dot_dimension_numbers<[1], [0], [0], [1], [0, 0, 1, 1], [], []>} : vector<16x64xf32>, vector<64x64xf32>, vector<16x64xf32> -> vector<16x64xf32>
    %c2 = arith.constant 2 : index
    %c0_28 = arith.constant 0 : index
    %c0_29 = arith.constant 0 : index
    %43 = vector.load %arg6[%c2, %c0_28, %c0_29] : memref<3x64x64xf32, #tpu.memory_space<vmem>>, vector<1x64x64xf32>
    %44 = vector.shape_cast %43 : vector<1x64x64xf32> to vector<64x64xf32>
    %cst_30 = arith.constant dense<0.000000e+00> : vector<16x64xf32>
    %45 = tpu.matmul %35, %44, %cst_30 {dimension_numbers = #tpu.dot_dimension_numbers<[1], [0], [0], [1], [0, 0, 1, 1], [], []>} : vector<16x64xf32>, vector<64x64xf32>, vector<16x64xf32> -> vector<16x64xf32>
    %cst_31 = arith.constant 0.000000e+00 : f32
    %46 = vector.broadcast %cst_31 : f32 to vector<1x64xf32>
    %47 = vector.extract_strided_slice %39 {offsets = [0, 0], sizes = [15, 64], strides = [1, 1]} : vector<16x64xf32> to vector<15x64xf32>
    %48 = tpu.concatenate %46, %47 in 0 : vector<1x64xf32>, vector<15x64xf32> -> vector<16x64xf32>
    %49 = arith.addf %48, %42 : vector<16x64xf32>
    %cst_32 = arith.constant 0.000000e+00 : f32
    %50 = vector.broadcast %cst_32 : f32 to vector<1x64xf32>
    %51 = vector.extract_strided_slice %45 {offsets = [1, 0], sizes = [15, 64], strides = [1, 1]} : vector<16x64xf32> to vector<15x64xf32>
    %52 = tpu.concatenate %51, %50 in 0 : vector<15x64xf32>, vector<1x64xf32> -> vector<16x64xf32>
    %53 = arith.addf %49, %52 : vector<16x64xf32>
    %54 = vector.broadcast %36 : vector<1x64xf32> to vector<16x64xf32>
    %55 = arith.addf %53, %54 : vector<16x64xf32>
    %c0_33 = arith.constant 0 : index
    %c0_34 = arith.constant 0 : index
    %56 = vector.load %arg8[%c0_33, %c0_34] : memref<1x64xf32, #tpu.memory_space<vmem>>, vector<1x64xf32>
    %c0_35 = arith.constant 0 : index
    %c0_36 = arith.constant 0 : index
    %57 = vector.load %arg9[%c0_35, %c0_36] : memref<1x64xf32, #tpu.memory_space<vmem>>, vector<1x64xf32>
    %c0_37 = arith.constant 0 : index
    %c0_38 = arith.constant 0 : index
    %58 = vector.load %arg10[%c0_37, %c0_38] : memref<64x32xf32, #tpu.memory_space<vmem>>, vector<64x32xf32>
    %c0_39 = arith.constant 0 : index
    %c0_40 = arith.constant 0 : index
    %59 = vector.load %arg11[%c0_39, %c0_40] : memref<32x64xf32, #tpu.memory_space<vmem>>, vector<32x64xf32>
    %cst_41 = arith.constant dense<0.000000e+00> : vector<64xf32>
    %60 = vector.multi_reduction <add>, %55, %cst_41 [0] : vector<16x64xf32> to vector<64xf32>
    %61 = vector.shape_cast %60 : vector<64xf32> to vector<1x64xf32>
    %cst_42 = arith.constant dense<0.000000e+00> : vector<1x32xf32>
    %62 = tpu.matmul %61, %58, %cst_42 {dimension_numbers = #tpu.dot_dimension_numbers<[1], [0], [0], [1], [0, 0, 1, 1], [], []>} : vector<1x64xf32>, vector<64x32xf32>, vector<1x32xf32> -> vector<1x32xf32>
    %cst_43 = arith.constant 3.200000e+01 : f32
    %63 = vector.broadcast %cst_43 : f32 to vector<1x32xf32>
    %64 = arith.divf %62, %63 : vector<1x32xf32>
    %cst_44 = arith.constant dense<0.000000e+00> : vector<1x64xf32>
    %65 = tpu.matmul %64, %59, %cst_44 {dimension_numbers = #tpu.dot_dimension_numbers<[1], [0], [0], [1], [0, 0, 1, 1], [], []>} : vector<1x32xf32>, vector<32x64xf32>, vector<1x64xf32> -> vector<1x64xf32>
    %66 = vector.broadcast %65 : vector<1x64xf32> to vector<16x64xf32>
    %67 = arith.subf %55, %66 : vector<16x64xf32>
    %68 = arith.mulf %67, %67 : vector<16x64xf32>
    %cst_45 = arith.constant dense<0.000000e+00> : vector<64xf32>
    %69 = vector.multi_reduction <add>, %68, %cst_45 [0] : vector<16x64xf32> to vector<64xf32>
    %70 = vector.shape_cast %69 : vector<64xf32> to vector<1x64xf32>
    %cst_46 = arith.constant dense<0.000000e+00> : vector<1x32xf32>
    %71 = tpu.matmul %70, %58, %cst_46 {dimension_numbers = #tpu.dot_dimension_numbers<[1], [0], [0], [1], [0, 0, 1, 1], [], []>} : vector<1x64xf32>, vector<64x32xf32>, vector<1x32xf32> -> vector<1x32xf32>
    %cst_47 = arith.constant 3.200000e+01 : f32
    %72 = vector.broadcast %cst_47 : f32 to vector<1x32xf32>
    %73 = arith.divf %71, %72 : vector<1x32xf32>
    %cst_48 = arith.constant dense<0.000000e+00> : vector<1x64xf32>
    %74 = tpu.matmul %73, %59, %cst_48 {dimension_numbers = #tpu.dot_dimension_numbers<[1], [0], [0], [1], [0, 0, 1, 1], [], []>} : vector<1x32xf32>, vector<32x64xf32>, vector<1x64xf32> -> vector<1x64xf32>
    %cst_49 = arith.constant 9.99999997E-7 : f32
    %75 = vector.broadcast %cst_49 : f32 to vector<1x64xf32>
    %76 = arith.addf %74, %75 : vector<1x64xf32>
    %77 = math.rsqrt %76 : vector<1x64xf32>
    %78 = vector.broadcast %77 : vector<1x64xf32> to vector<16x64xf32>
    %79 = arith.mulf %67, %78 : vector<16x64xf32>
    %80 = vector.broadcast %56 : vector<1x64xf32> to vector<16x64xf32>
    %81 = arith.mulf %79, %80 : vector<16x64xf32>
    %82 = vector.broadcast %57 : vector<1x64xf32> to vector<16x64xf32>
    %83 = arith.addf %81, %82 : vector<16x64xf32>
    %84 = arith.negf %83 : vector<16x64xf32>
    %85 = math.exp %84 : vector<16x64xf32>
    %cst_50 = arith.constant 1.000000e+00 : f32
    %86 = vector.broadcast %cst_50 : f32 to vector<16x64xf32>
    %87 = arith.addf %86, %85 : vector<16x64xf32>
    %88 = arith.divf %86, %87 : vector<16x64xf32>
    %89 = arith.mulf %83, %88 : vector<16x64xf32>
    %c0_51 = arith.constant 0 : index
    %c0_52 = arith.constant 0 : index
    %90 = vector.load %arg13[%c0_51, %c0_52] : memref<1x64xf32, #tpu.memory_space<vmem>>, vector<1x64xf32>
    %c0_53 = arith.constant 0 : index
    %c0_54 = arith.constant 0 : index
    %c0_55 = arith.constant 0 : index
    %91 = vector.load %arg12[%c0_53, %c0_54, %c0_55] : memref<3x64x64xf32, #tpu.memory_space<vmem>>, vector<1x64x64xf32>
    %92 = vector.shape_cast %91 : vector<1x64x64xf32> to vector<64x64xf32>
    %cst_56 = arith.constant dense<0.000000e+00> : vector<16x64xf32>
    %93 = tpu.matmul %89, %92, %cst_56 {dimension_numbers = #tpu.dot_dimension_numbers<[1], [0], [0], [1], [0, 0, 1, 1], [], []>} : vector<16x64xf32>, vector<64x64xf32>, vector<16x64xf32> -> vector<16x64xf32>
    %c1_57 = arith.constant 1 : index
    %c0_58 = arith.constant 0 : index
    %c0_59 = arith.constant 0 : index
    %94 = vector.load %arg12[%c1_57, %c0_58, %c0_59] : memref<3x64x64xf32, #tpu.memory_space<vmem>>, vector<1x64x64xf32>
    %95 = vector.shape_cast %94 : vector<1x64x64xf32> to vector<64x64xf32>
    %cst_60 = arith.constant dense<0.000000e+00> : vector<16x64xf32>
    %96 = tpu.matmul %89, %95, %cst_60 {dimension_numbers = #tpu.dot_dimension_numbers<[1], [0], [0], [1], [0, 0, 1, 1], [], []>} : vector<16x64xf32>, vector<64x64xf32>, vector<16x64xf32> -> vector<16x64xf32>
    %c2_61 = arith.constant 2 : index
    %c0_62 = arith.constant 0 : index
    %c0_63 = arith.constant 0 : index
    %97 = vector.load %arg12[%c2_61, %c0_62, %c0_63] : memref<3x64x64xf32, #tpu.memory_space<vmem>>, vector<1x64x64xf32>
    %98 = vector.shape_cast %97 : vector<1x64x64xf32> to vector<64x64xf32>
    %cst_64 = arith.constant dense<0.000000e+00> : vector<16x64xf32>
    %99 = tpu.matmul %89, %98, %cst_64 {dimension_numbers = #tpu.dot_dimension_numbers<[1], [0], [0], [1], [0, 0, 1, 1], [], []>} : vector<16x64xf32>, vector<64x64xf32>, vector<16x64xf32> -> vector<16x64xf32>
    %cst_65 = arith.constant 0.000000e+00 : f32
    %100 = vector.broadcast %cst_65 : f32 to vector<1x64xf32>
    %101 = vector.extract_strided_slice %93 {offsets = [0, 0], sizes = [15, 64], strides = [1, 1]} : vector<16x64xf32> to vector<15x64xf32>
    %102 = tpu.concatenate %100, %101 in 0 : vector<1x64xf32>, vector<15x64xf32> -> vector<16x64xf32>
    %103 = arith.addf %102, %96 : vector<16x64xf32>
    %cst_66 = arith.constant 0.000000e+00 : f32
    %104 = vector.broadcast %cst_66 : f32 to vector<1x64xf32>
    %105 = vector.extract_strided_slice %99 {offsets = [1, 0], sizes = [15, 64], strides = [1, 1]} : vector<16x64xf32> to vector<15x64xf32>
    %106 = tpu.concatenate %105, %104 in 0 : vector<15x64xf32>, vector<1x64xf32> -> vector<16x64xf32>
    %107 = arith.addf %103, %106 : vector<16x64xf32>
    %108 = vector.broadcast %90 : vector<1x64xf32> to vector<16x64xf32>
    %109 = arith.addf %107, %108 : vector<16x64xf32>
    %110 = arith.addf %1, %109 : vector<16x64xf32>
    %c0_67 = arith.constant 0 : index
    %c0_68 = arith.constant 0 : index
    %c0_69 = arith.constant 0 : index
    %111 = vector.load %arg14[%c0_67, %c0_68, %c0_69] : memref<1x16x64xf32, #tpu.memory_space<vmem>>, vector<1x16x64xf32>
    %112 = vector.shape_cast %111 : vector<1x16x64xf32> to vector<16x64xf32>
    %113 = vector.shape_cast %110 : vector<16x64xf32> to vector<1x16x64xf32>
    tpu.vector_store %arg14[%c0_67, %c0_68, %c0_69], %113 {strides = array<i32>} : memref<1x16x64xf32, #tpu.memory_space<vmem>>, vector<1x16x64xf32>,
    return
  }
  func.func @transform_0(%arg0: i32) -> (i32, i32, i32) {
    %c0_i32 = arith.constant 0 : i32
    %c0_i32_0 = arith.constant 0 : i32
    %c0_i32_1 = arith.constant 0 : i32
    return %arg0, %c0_i32, %c0_i32_0 : i32, i32, i32
  }
  func.func @transform_1(%arg0: i32) -> (i32, i32) {
    %c0_i32 = arith.constant 0 : i32
    %c0_i32_0 = arith.constant 0 : i32
    %c0_i32_1 = arith.constant 0 : i32
    return %c0_i32, %c0_i32_0 : i32, i32
  }
  func.func @transform_2(%arg0: i32) -> (i32, i32) {
    %c0_i32 = arith.constant 0 : i32
    %c0_i32_0 = arith.constant 0 : i32
    %c0_i32_1 = arith.constant 0 : i32
    return %c0_i32, %c0_i32_0 : i32, i32
  }
  func.func @transform_3(%arg0: i32) -> (i32, i32) {
    %c0_i32 = arith.constant 0 : i32
    %c0_i32_0 = arith.constant 0 : i32
    %c0_i32_1 = arith.constant 0 : i32
    return %c0_i32, %c0_i32_0 : i32, i32
  }
  func.func @transform_4(%arg0: i32) -> (i32, i32) {
    %c0_i32 = arith.constant 0 : i32
    %c0_i32_0 = arith.constant 0 : i32
    %c0_i32_1 = arith.constant 0 : i32
    return %c0_i32, %c0_i32_0 : i32, i32
  }
  func.func @transform_5(%arg0: i32) -> (i32, i32, i32) {
    %c0_i32 = arith.constant 0 : i32
    %c0_i32_0 = arith.constant 0 : i32
    %c0_i32_1 = arith.constant 0 : i32
    %c0_i32_2 = arith.constant 0 : i32
    return %c0_i32, %c0_i32_0, %c0_i32_1 : i32, i32, i32
  }
  func.func @transform_6(%arg0: i32) -> (i32, i32) {
    %c0_i32 = arith.constant 0 : i32
    %c0_i32_0 = arith.constant 0 : i32
    %c0_i32_1 = arith.constant 0 : i32
    return %c0_i32, %c0_i32_0 : i32, i32
  }
  func.func @transform_7(%arg0: i32) -> (i32, i32) {
    %c0_i32 = arith.constant 0 : i32
    %c0_i32_0 = arith.constant 0 : i32
    %c0_i32_1 = arith.constant 0 : i32
    return %c0_i32, %c0_i32_0 : i32, i32
  }
  func.func @transform_8(%arg0: i32) -> (i32, i32) {
    %c0_i32 = arith.constant 0 : i32
    %c0_i32_0 = arith.constant 0 : i32
    %c0_i32_1 = arith.constant 0 : i32
    return %c0_i32, %c0_i32_0 : i32, i32
  }
  func.func @transform_9(%arg0: i32) -> (i32, i32) {
    %c0_i32 = arith.constant 0 : i32
    %c0_i32_0 = arith.constant 0 : i32
    %c0_i32_1 = arith.constant 0 : i32
    return %c0_i32, %c0_i32_0 : i32, i32
  }
  func.func @transform_10(%arg0: i32) -> (i32, i32) {
    %c0_i32 = arith.constant 0 : i32
    %c0_i32_0 = arith.constant 0 : i32
    %c0_i32_1 = arith.constant 0 : i32
    return %c0_i32, %c0_i32_0 : i32, i32
  }
  func.func @transform_11(%arg0: i32) -> (i32, i32, i32) {
    %c0_i32 = arith.constant 0 : i32
    %c0_i32_0 = arith.constant 0 : i32
    %c0_i32_1 = arith.constant 0 : i32
    %c0_i32_2 = arith.constant 0 : i32
    return %c0_i32, %c0_i32_0, %c0_i32_1 : i32, i32, i32
  }
  func.func @transform_12(%arg0: i32) -> (i32, i32) {
    %c0_i32 = arith.constant 0 : i32
    %c0_i32_0 = arith.constant 0 : i32
    %c0_i32_1 = arith.constant 0 : i32
    return %c0_i32, %c0_i32_0 : i32, i32
  }
  func.func @transform_13(%arg0: i32) -> (i32, i32, i32) {
    %c0_i32 = arith.constant 0 : i32
    %c0_i32_0 = arith.constant 0 : i32
    %c0_i32_1 = arith.constant 0 : i32
    return %arg0, %c0_i32, %c0_i32_0 : i32, i32, i32
  }
}

module attributes {stable_mosaic.version = 11 : i64} {
  func.func @_resnet_kernel(%arg0: i32, %arg1: memref<1x16x64xf32, #tpu.memory_space<vmem>>, %arg2: memref<1x64xf32, #tpu.memory_space<vmem>>, %arg3: memref<1x64xf32, #tpu.memory_space<vmem>>, %arg4: memref<64x32xf32, #tpu.memory_space<vmem>>, %arg5: memref<32x64xf32, #tpu.memory_space<vmem>>, %arg6: memref<3x64x64xf32, #tpu.memory_space<vmem>>, %arg7: memref<1x64xf32, #tpu.memory_space<vmem>>, %arg8: memref<1x64xf32, #tpu.memory_space<vmem>>, %arg9: memref<1x64xf32, #tpu.memory_space<vmem>>, %arg10: memref<64x32xf32, #tpu.memory_space<vmem>>, %arg11: memref<32x64xf32, #tpu.memory_space<vmem>>, %arg12: memref<3x64x64xf32, #tpu.memory_space<vmem>>, %arg13: memref<1x64xf32, #tpu.memory_space<vmem>>, %arg14: memref<1x16x64xf32, #tpu.memory_space<vmem>>) attributes {dimension_semantics = [#tpu.dimension_semantics<parallel>], iteration_bounds = array<i64: 2>, scalar_prefetch = 0 : i64, scratch_operands = 0 : i64, tpu.core_type = #tpu.core_type<tc>, window_params = [{transform_indices = @transform_0, window_bounds = array<i64: 1, 16, 64>}, {pipeline_mode = #tpu.pipeline_mode<synchronous>, transform_indices = @transform_1, window_bounds = array<i64: 1, 64>}, {pipeline_mode = #tpu.pipeline_mode<synchronous>, transform_indices = @transform_2, window_bounds = array<i64: 1, 64>}, {pipeline_mode = #tpu.pipeline_mode<synchronous>, transform_indices = @transform_3, window_bounds = array<i64: 64, 32>}, {pipeline_mode = #tpu.pipeline_mode<synchronous>, transform_indices = @transform_4, window_bounds = array<i64: 32, 64>}, {pipeline_mode = #tpu.pipeline_mode<synchronous>, transform_indices = @transform_5, window_bounds = array<i64: 3, 64, 64>}, {pipeline_mode = #tpu.pipeline_mode<synchronous>, transform_indices = @transform_6, window_bounds = array<i64: 1, 64>}, {pipeline_mode = #tpu.pipeline_mode<synchronous>, transform_indices = @transform_7, window_bounds = array<i64: 1, 64>}, {pipeline_mode = #tpu.pipeline_mode<synchronous>, transform_indices = @transform_8, window_bounds = array<i64: 1, 64>}, {pipeline_mode = #tpu.pipeline_mode<synchronous>, transform_indices = @transform_9, window_bounds = array<i64: 64, 32>}, {pipeline_mode = #tpu.pipeline_mode<synchronous>, transform_indices = @transform_10, window_bounds = array<i64: 32, 64>}, {pipeline_mode = #tpu.pipeline_mode<synchronous>, transform_indices = @transform_11, window_bounds = array<i64: 3, 64, 64>}, {pipeline_mode = #tpu.pipeline_mode<synchronous>, transform_indices = @transform_12, window_bounds = array<i64: 1, 64>}, {transform_indices = @transform_13, window_bounds = array<i64: 1, 16, 64>}]} {
    %c0 = arith.constant 0 : index
    %c0_0 = arith.constant 0 : index
    %c0_1 = arith.constant 0 : index
    %0 = vector.load %arg1[%c0, %c0_0, %c0_1] : memref<1x16x64xf32, #tpu.memory_space<vmem>>, vector<1x16x64xf32>
    %1 = vector.shape_cast %0 : vector<1x16x64xf32> to vector<16x64xf32>
    %c0_2 = arith.constant 0 : index
    %c0_3 = arith.constant 0 : index
    %2 = vector.load %arg2[%c0_2, %c0_3] : memref<1x64xf32, #tpu.memory_space<vmem>>, vector<1x64xf32>
    %c0_4 = arith.constant 0 : index
    %c0_5 = arith.constant 0 : index
    %3 = vector.load %arg3[%c0_4, %c0_5] : memref<1x64xf32, #tpu.memory_space<vmem>>, vector<1x64xf32>
    %c0_6 = arith.constant 0 : index
    %c0_7 = arith.constant 0 : index
    %4 = vector.load %arg4[%c0_6, %c0_7] : memref<64x32xf32, #tpu.memory_space<vmem>>, vector<64x32xf32>
    %c0_8 = arith.constant 0 : index
    %c0_9 = arith.constant 0 : index
    %5 = vector.load %arg5[%c0_8, %c0_9] : memref<32x64xf32, #tpu.memory_space<vmem>>, vector<32x64xf32>
    %cst = arith.constant dense<0.000000e+00> : vector<64xf32>
    %6 = vector.multi_reduction <add>, %1, %cst [0] : vector<16x64xf32> to vector<64xf32>
    %7 = vector.shape_cast %6 : vector<64xf32> to vector<1x64xf32>
    %cst_10 = arith.constant dense<0.000000e+00> : vector<1x32xf32>
    %8 = tpu.matmul %7, %4, %cst_10 {dimension_numbers = #tpu.dot_dimension_numbers<[1], [0], [0], [1], [0, 0, 1, 1], [], []>} : vector<1x64xf32>, vector<64x32xf32>, vector<1x32xf32> -> vector<1x32xf32>
    %cst_11 = arith.constant 3.200000e+01 : f32
    %9 = vector.broadcast %cst_11 : f32 to vector<1x32xf32>
    %10 = arith.divf %8, %9 : vector<1x32xf32>
    %cst_12 = arith.constant dense<0.000000e+00> : vector<1x64xf32>
    %11 = tpu.matmul %10, %5, %cst_12 {dimension_numbers = #tpu.dot_dimension_numbers<[1], [0], [0], [1], [0, 0, 1, 1], [], []>} : vector<1x32xf32>, vector<32x64xf32>, vector<1x64xf32> -> vector<1x64xf32>
    %12 = vector.broadcast %11 : vector<1x64xf32> to vector<16x64xf32>
    %13 = arith.subf %1, %12 : vector<16x64xf32>
    %14 = arith.mulf %13, %13 : vector<16x64xf32>
    %cst_13 = arith.constant dense<0.000000e+00> : vector<64xf32>
    %15 = vector.multi_reduction <add>, %14, %cst_13 [0] : vector<16x64xf32> to vector<64xf32>
    %16 = vector.shape_cast %15 : vector<64xf32> to vector<1x64xf32>
    %cst_14 = arith.constant dense<0.000000e+00> : vector<1x32xf32>
    %17 = tpu.matmul %16, %4, %cst_14 {dimension_numbers = #tpu.dot_dimension_numbers<[1], [0], [0], [1], [0, 0, 1, 1], [], []>} : vector<1x64xf32>, vector<64x32xf32>, vector<1x32xf32> -> vector<1x32xf32>
    %cst_15 = arith.constant 3.200000e+01 : f32
    %18 = vector.broadcast %cst_15 : f32 to vector<1x32xf32>
    %19 = arith.divf %17, %18 : vector<1x32xf32>
    %cst_16 = arith.constant dense<0.000000e+00> : vector<1x64xf32>
    %20 = tpu.matmul %19, %5, %cst_16 {dimension_numbers = #tpu.dot_dimension_numbers<[1], [0], [0], [1], [0, 0, 1, 1], [], []>} : vector<1x32xf32>, vector<32x64xf32>, vector<1x64xf32> -> vector<1x64xf32>
    %cst_17 = arith.constant 9.99999997E-7 : f32
    %21 = vector.broadcast %cst_17 : f32 to vector<1x64xf32>
    %22 = arith.addf %20, %21 : vector<1x64xf32>
    %23 = math.rsqrt %22 : vector<1x64xf32>
    %24 = vector.broadcast %23 : vector<1x64xf32> to vector<16x64xf32>
    %25 = arith.mulf %13, %24 : vector<16x64xf32>
    %26 = vector.broadcast %2 : vector<1x64xf32> to vector<16x64xf32>
    %27 = arith.mulf %25, %26 : vector<16x64xf32>
    %28 = vector.broadcast %3 : vector<1x64xf32> to vector<16x64xf32>
    %29 = arith.addf %27, %28 : vector<16x64xf32>
    %30 = arith.negf %29 : vector<16x64xf32>
    %31 = math.exp %30 : vector<16x64xf32>
    %cst_18 = arith.constant 1.000000e+00 : f32
    %32 = vector.broadcast %cst_18 : f32 to vector<16x64xf32>
    %33 = arith.addf %32, %31 : vector<16x64xf32>
    %34 = arith.divf %32, %33 : vector<16x64xf32>
    %35 = arith.mulf %29, %34 : vector<16x64xf32>
    %c0_19 = arith.constant 0 : index
    %c0_20 = arith.constant 0 : index
    %36 = vector.load %arg7[%c0_19, %c0_20] : memref<1x64xf32, #tpu.memory_space<vmem>>, vector<1x64xf32>
    %c0_21 = arith.constant 0 : index
    %c0_22 = arith.constant 0 : index
    %c0_23 = arith.constant 0 : index
    %37 = vector.load %arg6[%c0_21, %c0_22, %c0_23] : memref<3x64x64xf32, #tpu.memory_space<vmem>>, vector<1x64x64xf32>
    %38 = vector.shape_cast %37 : vector<1x64x64xf32> to vector<64x64xf32>
    %cst_24 = arith.constant dense<0.000000e+00> : vector<16x64xf32>
    %39 = tpu.matmul %35, %38, %cst_24 {dimension_numbers = #tpu.dot_dimension_numbers<[1], [0], [0], [1], [0, 0, 1, 1], [], []>} : vector<16x64xf32>, vector<64x64xf32>, vector<16x64xf32> -> vector<16x64xf32>
    %c1 = arith.constant 1 : index
    %c0_25 = arith.constant 0 : index
    %c0_26 = arith.constant 0 : index
    %40 = vector.load %arg6[%c1, %c0_25, %c0_26] : memref<3x64x64xf32, #tpu.memory_space<vmem>>, vector<1x64x64xf32>
    %41 = vector.shape_cast %40 : vector<1x64x64xf32> to vector<64x64xf32>
    %cst_27 = arith.constant dense<0.000000e+00> : vector<16x64xf32>
    %42 = tpu.matmul %35, %41, %cst_27 {dimension_numbers = #tpu.dot_dimension_numbers<[1], [0], [0], [1], [0, 0, 1, 1], [], []>} : vector<16x64xf32>, vector<64x64xf32>, vector<16x64xf32> -> vector<16x64xf32>
    %c2 = arith.constant 2 : index
    %c0_28 = arith.constant 0 : index
    %c0_29 = arith.constant 0 : index
    %43 = vector.load %arg6[%c2, %c0_28, %c0_29] : memref<3x64x64xf32, #tpu.memory_space<vmem>>, vector<1x64x64xf32>
    %44 = vector.shape_cast %43 : vector<1x64x64xf32> to vector<64x64xf32>
    %cst_30 = arith.constant dense<0.000000e+00> : vector<16x64xf32>
    %45 = tpu.matmul %35, %44, %cst_30 {dimension_numbers = #tpu.dot_dimension_numbers<[1], [0], [0], [1], [0, 0, 1, 1], [], []>} : vector<16x64xf32>, vector<64x64xf32>, vector<16x64xf32> -> vector<16x64xf32>
    %cst_31 = arith.constant 0.000000e+00 : f32
    %46 = vector.broadcast %cst_31 : f32 to vector<1x64xf32>
    %47 = vector.extract_strided_slice %39 {offsets = [0, 0], sizes = [15, 64], strides = [1, 1]} : vector<16x64xf32> to vector<15x64xf32>
    %48 = tpu.concatenate %46, %47 in 0 : vector<1x64xf32>, vector<15x64xf32> -> vector<16x64xf32>
    %49 = arith.addf %48, %42 : vector<16x64xf32>
    %cst_32 = arith.constant 0.000000e+00 : f32
    %50 = vector.broadcast %cst_32 : f32 to vector<1x64xf32>
    %51 = vector.extract_strided_slice %45 {offsets = [1, 0], sizes = [15, 64], strides = [1, 1]} : vector<16x64xf32> to vector<15x64xf32>
    %52 = tpu.concatenate %51, %50 in 0 : vector<15x64xf32>, vector<1x64xf32> -> vector<16x64xf32>
    %53 = arith.addf %49, %52 : vector<16x64xf32>
    %54 = vector.broadcast %36 : vector<1x64xf32> to vector<16x64xf32>
    %55 = arith.addf %53, %54 : vector<16x64xf32>
    %c0_33 = arith.constant 0 : index
    %c0_34 = arith.constant 0 : index
    %56 = vector.load %arg8[%c0_33, %c0_34] : memref<1x64xf32, #tpu.memory_space<vmem>>, vector<1x64xf32>
    %c0_35 = arith.constant 0 : index
    %c0_36 = arith.constant 0 : index
    %57 = vector.load %arg9[%c0_35, %c0_36] : memref<1x64xf32, #tpu.memory_space<vmem>>, vector<1x64xf32>
    %c0_37 = arith.constant 0 : index
    %c0_38 = arith.constant 0 : index
    %58 = vector.load %arg10[%c0_37, %c0_38] : memref<64x32xf32, #tpu.memory_space<vmem>>, vector<64x32xf32>
    %c0_39 = arith.constant 0 : index
    %c0_40 = arith.constant 0 : index
    %59 = vector.load %arg11[%c0_39, %c0_40] : memref<32x64xf32, #tpu.memory_space<vmem>>, vector<32x64xf32>
    %cst_41 = arith.constant dense<0.000000e+00> : vector<64xf32>
    %60 = vector.multi_reduction <add>, %55, %cst_41 [0] : vector<16x64xf32> to vector<64xf32>
    %61 = vector.shape_cast %60 : vector<64xf32> to vector<1x64xf32>
    %cst_42 = arith.constant dense<0.000000e+00> : vector<1x32xf32>
    %62 = tpu.matmul %61, %58, %cst_42 {dimension_numbers = #tpu.dot_dimension_numbers<[1], [0], [0], [1], [0, 0, 1, 1], [], []>} : vector<1x64xf32>, vector<64x32xf32>, vector<1x32xf32> -> vector<1x32xf32>
    %cst_43 = arith.constant 3.200000e+01 : f32
    %63 = vector.broadcast %cst_43 : f32 to vector<1x32xf32>
    %64 = arith.divf %62, %63 : vector<1x32xf32>
    %cst_44 = arith.constant dense<0.000000e+00> : vector<1x64xf32>
    %65 = tpu.matmul %64, %59, %cst_44 {dimension_numbers = #tpu.dot_dimension_numbers<[1], [0], [0], [1], [0, 0, 1, 1], [], []>} : vector<1x32xf32>, vector<32x64xf32>, vector<1x64xf32> -> vector<1x64xf32>
    %66 = vector.broadcast %65 : vector<1x64xf32> to vector<16x64xf32>
    %67 = arith.subf %55, %66 : vector<16x64xf32>
    %68 = arith.mulf %67, %67 : vector<16x64xf32>
    %cst_45 = arith.constant dense<0.000000e+00> : vector<64xf32>
    %69 = vector.multi_reduction <add>, %68, %cst_45 [0] : vector<16x64xf32> to vector<64xf32>
    %70 = vector.shape_cast %69 : vector<64xf32> to vector<1x64xf32>
    %cst_46 = arith.constant dense<0.000000e+00> : vector<1x32xf32>
    %71 = tpu.matmul %70, %58, %cst_46 {dimension_numbers = #tpu.dot_dimension_numbers<[1], [0], [0], [1], [0, 0, 1, 1], [], []>} : vector<1x64xf32>, vector<64x32xf32>, vector<1x32xf32> -> vector<1x32xf32>
    %cst_47 = arith.constant 3.200000e+01 : f32
    %72 = vector.broadcast %cst_47 : f32 to vector<1x32xf32>
    %73 = arith.divf %71, %72 : vector<1x32xf32>
    %cst_48 = arith.constant dense<0.000000e+00> : vector<1x64xf32>
    %74 = tpu.matmul %73, %59, %cst_48 {dimension_numbers = #tpu.dot_dimension_numbers<[1], [0], [0], [1], [0, 0, 1, 1], [], []>} : vector<1x32xf32>, vector<32x64xf32>, vector<1x64xf32> -> vector<1x64xf32>
    %cst_49 = arith.constant 9.99999997E-7 : f32
    %75 = vector.broadcast %cst_49 : f32 to vector<1x64xf32>
    %76 = arith.addf %74, %75 : vector<1x64xf32>
    %77 = math.rsqrt %76 : vector<1x64xf32>
    %78 = vector.broadcast %77 : vector<1x64xf32> to vector<16x64xf32>
    %79 = arith.mulf %67, %78 : vector<16x64xf32>
    %80 = vector.broadcast %56 : vector<1x64xf32> to vector<16x64xf32>
    %81 = arith.mulf %79, %80 : vector<16x64xf32>
    %82 = vector.broadcast %57 : vector<1x64xf32> to vector<16x64xf32>
    %83 = arith.addf %81, %82 : vector<16x64xf32>
    %84 = arith.negf %83 : vector<16x64xf32>
    %85 = math.exp %84 : vector<16x64xf32>
    %cst_50 = arith.constant 1.000000e+00 : f32
    %86 = vector.broadcast %cst_50 : f32 to vector<16x64xf32>
    %87 = arith.addf %86, %85 : vector<16x64xf32>
    %88 = arith.divf %86, %87 : vector<16x64xf32>
    %89 = arith.mulf %83, %88 : vector<16x64xf32>
    %c0_51 = arith.constant 0 : index
    %c0_52 = arith.constant 0 : index
    %90 = vector.load %arg13[%c0_51, %c0_52] : memref<1x64xf32, #tpu.memory_space<vmem>>, vector<1x64xf32>
    %c0_53 = arith.constant 0 : index
    %c0_54 = arith.constant 0 : index
    %c0_55 = arith.constant 0 : index
    %91 = vector.load %arg12[%c0_53, %c0_54, %c0_55] : memref<3x64x64xf32, #tpu.memory_space<vmem>>, vector<1x64x64xf32>
    %92 = vector.shape_cast %91 : vector<1x64x64xf32> to vector<64x64xf32>
    %cst_56 = arith.constant dense<0.000000e+00> : vector<16x64xf32>
    %93 = tpu.matmul %89, %92, %cst_56 {dimension_numbers = #tpu.dot_dimension_numbers<[1], [0], [0], [1], [0, 0, 1, 1], [], []>} : vector<16x64xf32>, vector<64x64xf32>, vector<16x64xf32> -> vector<16x64xf32>
    %c1_57 = arith.constant 1 : index
    %c0_58 = arith.constant 0 : index
    %c0_59 = arith.constant 0 : index
    %94 = vector.load %arg12[%c1_57, %c0_58, %c0_59] : memref<3x64x64xf32, #tpu.memory_space<vmem>>, vector<1x64x64xf32>
    %95 = vector.shape_cast %94 : vector<1x64x64xf32> to vector<64x64xf32>
    %cst_60 = arith.constant dense<0.000000e+00> : vector<16x64xf32>
    %96 = tpu.matmul %89, %95, %cst_60 {dimension_numbers = #tpu.dot_dimension_numbers<[1], [0], [0], [1], [0, 0, 1, 1], [], []>} : vector<16x64xf32>, vector<64x64xf32>, vector<16x64xf32> -> vector<16x64xf32>
    %c2_61 = arith.constant 2 : index
    %c0_62 = arith.constant 0 : index
    %c0_63 = arith.constant 0 : index
    %97 = vector.load %arg12[%c2_61, %c0_62, %c0_63] : memref<3x64x64xf32, #tpu.memory_space<vmem>>, vector<1x64x64xf32>
    %98 = vector.shape_cast %97 : vector<1x64x64xf32> to vector<64x64xf32>
    %cst_64 = arith.constant dense<0.000000e+00> : vector<16x64xf32>
    %99 = tpu.matmul %89, %98, %cst_64 {dimension_numbers = #tpu.dot_dimension_numbers<[1], [0], [0], [1], [0, 0, 1, 1], [], []>} : vector<16x64xf32>, vector<64x64xf32>, vector<16x64xf32> -> vector<16x64xf32>
    %cst_65 = arith.constant 0.000000e+00 : f32
    %100 = vector.broadcast %cst_65 : f32 to vector<1x64xf32>
    %101 = vector.extract_strided_slice %93 {offsets = [0, 0], sizes = [15, 64], strides = [1, 1]} : vector<16x64xf32> to vector<15x64xf32>
    %102 = tpu.concatenate %100, %101 in 0 : vector<1x64xf32>, vector<15x64xf32> -> vector<16x64xf32>
    %103 = arith.addf %102, %96 : vector<16x64xf32>
    %cst_66 = arith.constant 0.000000e+00 : f32
    %104 = vector.broadcast %cst_66 : f32 to vector<1x64xf32>
    %105 = vector.extract_strided_slice %99 {offsets = [1, 0], sizes = [15, 64], strides = [1, 1]} : vector<16x64xf32> to vector<15x64xf32>
    %106 = tpu.concatenate %105, %104 in 0 : vector<15x64xf32>, vector<1x64xf32> -> vector<16x64xf32>
    %107 = arith.addf %103, %106 : vector<16x64xf32>
    %108 = vector.broadcast %90 : vector<1x64xf32> to vector<16x64xf32>
    %109 = arith.addf %107, %108 : vector<16x64xf32>
    %110 = arith.addf %1, %109 : vector<16x64xf32>
    %c0_67 = arith.constant 0 : index
    %c0_68 = arith.constant 0 : index
    %c0_69 = arith.constant 0 : index
    %111 = vector.load %arg14[%c0_67, %c0_68, %c0_69] : memref<1x16x64xf32, #tpu.memory_space<vmem>>, vector<1x16x64xf32>
    %112 = vector.shape_cast %111 : vector<1x16x64xf32> to vector<16x64xf32>
    %113 = vector.shape_cast %110 : vector<16x64xf32> to vector<1x16x64xf32>
    tpu.vector_store %arg14[%c0_67, %c0_68, %c0_69], %113 {strides = array<i32>} : memref<1x16x64xf32, #tpu.memory_space<vmem>>, vector<1x16x64xf32>,
    return
  }
  func.func @transform_0(%arg0: i32) -> (i32, i32, i32) {
    %c0_i32 = arith.constant 0 : i32
    %c0_i32_0 = arith.constant 0 : i32
    %c0_i32_1 = arith.constant 0 : i32
    return %arg0, %c0_i32, %c0_i32_0 : i32, i32, i32
  }
  func.func @transform_1(%arg0: i32) -> (i32, i32) {
    %c0_i32 = arith.constant 0 : i32
    %c0_i32_0 = arith.constant 0 : i32
    %c0_i32_1 = arith.constant 0 : i32
    return %c0_i32, %c0_i32_0 : i32, i32
  }
  func.func @transform_2(%arg0: i32) -> (i32, i32) {
    %c0_i32 = arith.constant 0 : i32
    %c0_i32_0 = arith.constant 0 : i32
    %c0_i32_1 = arith.constant 0 : i32
    return %c0_i32, %c0_i32_0 : i32, i32
  }
  func.func @transform_3(%arg0: i32) -> (i32, i32) {
    %c0_i32 = arith.constant 0 : i32
    %c0_i32_0 = arith.constant 0 : i32
    %c0_i32_1 = arith.constant 0 : i32
    return %c0_i32, %c0_i32_0 : i32, i32
  }
  func.func @transform_4(%arg0: i32) -> (i32, i32) {
    %c0_i32 = arith.constant 0 : i32
    %c0_i32_0 = arith.constant 0 : i32
    %c0_i32_1 = arith.constant 0 : i32
    return %c0_i32, %c0_i32_0 : i32, i32
  }
  func.func @transform_5(%arg0: i32) -> (i32, i32, i32) {
    %c0_i32 = arith.constant 0 : i32
    %c0_i32_0 = arith.constant 0 : i32
    %c0_i32_1 = arith.constant 0 : i32
    %c0_i32_2 = arith.constant 0 : i32
    return %c0_i32, %c0_i32_0, %c0_i32_1 : i32, i32, i32
  }
  func.func @transform_6(%arg0: i32) -> (i32, i32) {
    %c0_i32 = arith.constant 0 : i32
    %c0_i32_0 = arith.constant 0 : i32
    %c0_i32_1 = arith.constant 0 : i32
    return %c0_i32, %c0_i32_0 : i32, i32
  }
  func.func @transform_7(%arg0: i32) -> (i32, i32) {
    %c0_i32 = arith.constant 0 : i32
    %c0_i32_0 = arith.constant 0 : i32
    %c0_i32_1 = arith.constant 0 : i32
    return %c0_i32, %c0_i32_0 : i32, i32
  }
  func.func @transform_8(%arg0: i32) -> (i32, i32) {
    %c0_i32 = arith.constant 0 : i32
    %c0_i32_0 = arith.constant 0 : i32
    %c0_i32_1 = arith.constant 0 : i32
    return %c0_i32, %c0_i32_0 : i32, i32
  }
  func.func @transform_9(%arg0: i32) -> (i32, i32) {
    %c0_i32 = arith.constant 0 : i32
    %c0_i32_0 = arith.constant 0 : i32
    %c0_i32_1 = arith.constant 0 : i32
    return %c0_i32, %c0_i32_0 : i32, i32
  }
  func.func @transform_10(%arg0: i32) -> (i32, i32) {
    %c0_i32 = arith.constant 0 : i32
    %c0_i32_0 = arith.constant 0 : i32
    %c0_i32_1 = arith.constant 0 : i32
    return %c0_i32, %c0_i32_0 : i32, i32
  }
  func.func @transform_11(%arg0: i32) -> (i32, i32, i32) {
    %c0_i32 = arith.constant 0 : i32
    %c0_i32_0 = arith.constant 0 : i32
    %c0_i32_1 = arith.constant 0 : i32
    %c0_i32_2 = arith.constant 0 : i32
    return %c0_i32, %c0_i32_0, %c0_i32_1 : i32, i32, i32
  }
  func.func @transform_12(%arg0: i32) -> (i32, i32) {
    %c0_i32 = arith.constant 0 : i32
    %c0_i32_0 = arith.constant 0 : i32
    %c0_i32_1 = arith.constant 0 : i32
    return %c0_i32, %c0_i32_0 : i32, i32
  }
  func.func @transform_13(%arg0: i32) -> (i32, i32, i32) {
    %c0_i32 = arith.constant 0 : i32
    %c0_i32_0 = arith.constant 0 : i32
    %c0_i32_1 = arith.constant 0 : i32
    return %arg0, %c0_i32, %c0_i32_0 : i32, i32, i32
  }
}

module attributes {stable_mosaic.version = 11 : i64} {
  func.func @_upsample_conv3_kernel(%arg0: i32, %arg1: memref<1x16x64xf32, #tpu.memory_space<vmem>>, %arg2: memref<3x64x64xf32, #tpu.memory_space<vmem>>, %arg3: memref<1x64xf32, #tpu.memory_space<vmem>>, %arg4: memref<1x16x64xf32, #tpu.memory_space<vmem>>, %arg5: memref<1x16x64xf32, #tpu.memory_space<vmem>>) attributes {dimension_semantics = [#tpu.dimension_semantics<parallel>], iteration_bounds = array<i64: 2>, scalar_prefetch = 0 : i64, scratch_operands = 0 : i64, tpu.core_type = #tpu.core_type<tc>, window_params = [{transform_indices = @transform_0, window_bounds = array<i64: 1, 16, 64>}, {pipeline_mode = #tpu.pipeline_mode<synchronous>, transform_indices = @transform_1, window_bounds = array<i64: 3, 64, 64>}, {pipeline_mode = #tpu.pipeline_mode<synchronous>, transform_indices = @transform_2, window_bounds = array<i64: 1, 64>}, {transform_indices = @transform_3, window_bounds = array<i64: 1, 16, 64>}, {transform_indices = @transform_4, window_bounds = array<i64: 1, 16, 64>}]} {
    %c0 = arith.constant 0 : index
    %c0_0 = arith.constant 0 : index
    %c0_1 = arith.constant 0 : index
    %0 = vector.load %arg1[%c0, %c0_0, %c0_1] : memref<1x16x64xf32, #tpu.memory_space<vmem>>, vector<1x16x64xf32>
    %1 = vector.shape_cast %0 : vector<1x16x64xf32> to vector<16x64xf32>
    %c0_2 = arith.constant 0 : index
    %c0_3 = arith.constant 0 : index
    %c0_4 = arith.constant 0 : index
    %2 = vector.load %arg2[%c0_2, %c0_3, %c0_4] : memref<3x64x64xf32, #tpu.memory_space<vmem>>, vector<1x64x64xf32>
    %3 = vector.shape_cast %2 : vector<1x64x64xf32> to vector<64x64xf32>
    %cst = arith.constant dense<0.000000e+00> : vector<16x64xf32>
    %4 = tpu.matmul %1, %3, %cst {dimension_numbers = #tpu.dot_dimension_numbers<[1], [0], [0], [1], [0, 0, 1, 1], [], []>} : vector<16x64xf32>, vector<64x64xf32>, vector<16x64xf32> -> vector<16x64xf32>
    %c1 = arith.constant 1 : index
    %c0_5 = arith.constant 0 : index
    %c0_6 = arith.constant 0 : index
    %5 = vector.load %arg2[%c1, %c0_5, %c0_6] : memref<3x64x64xf32, #tpu.memory_space<vmem>>, vector<1x64x64xf32>
    %6 = vector.shape_cast %5 : vector<1x64x64xf32> to vector<64x64xf32>
    %cst_7 = arith.constant dense<0.000000e+00> : vector<16x64xf32>
    %7 = tpu.matmul %1, %6, %cst_7 {dimension_numbers = #tpu.dot_dimension_numbers<[1], [0], [0], [1], [0, 0, 1, 1], [], []>} : vector<16x64xf32>, vector<64x64xf32>, vector<16x64xf32> -> vector<16x64xf32>
    %c2 = arith.constant 2 : index
    %c0_8 = arith.constant 0 : index
    %c0_9 = arith.constant 0 : index
    %8 = vector.load %arg2[%c2, %c0_8, %c0_9] : memref<3x64x64xf32, #tpu.memory_space<vmem>>, vector<1x64x64xf32>
    %9 = vector.shape_cast %8 : vector<1x64x64xf32> to vector<64x64xf32>
    %cst_10 = arith.constant dense<0.000000e+00> : vector<16x64xf32>
    %10 = tpu.matmul %1, %9, %cst_10 {dimension_numbers = #tpu.dot_dimension_numbers<[1], [0], [0], [1], [0, 0, 1, 1], [], []>} : vector<16x64xf32>, vector<64x64xf32>, vector<16x64xf32> -> vector<16x64xf32>
    %c0_11 = arith.constant 0 : index
    %c0_12 = arith.constant 0 : index
    %11 = vector.load %arg3[%c0_11, %c0_12] : memref<1x64xf32, #tpu.memory_space<vmem>>, vector<1x64xf32>
    %cst_13 = arith.constant 0.000000e+00 : f32
    %12 = vector.broadcast %cst_13 : f32 to vector<1x64xf32>
    %13 = vector.extract_strided_slice %4 {offsets = [0, 0], sizes = [15, 64], strides = [1, 1]} : vector<16x64xf32> to vector<15x64xf32>
    %14 = tpu.concatenate %12, %13 in 0 : vector<1x64xf32>, vector<15x64xf32> -> vector<16x64xf32>
    %15 = arith.addf %14, %7 : vector<16x64xf32>
    %16 = arith.addf %15, %10 : vector<16x64xf32>
    %17 = vector.broadcast %11 : vector<1x64xf32> to vector<16x64xf32>
    %18 = arith.addf %16, %17 : vector<16x64xf32>
    %c0_14 = arith.constant 0 : index
    %c0_15 = arith.constant 0 : index
    %c0_16 = arith.constant 0 : index
    %19 = vector.load %arg4[%c0_14, %c0_15, %c0_16] : memref<1x16x64xf32, #tpu.memory_space<vmem>>, vector<1x16x64xf32>
    %20 = vector.shape_cast %19 : vector<1x16x64xf32> to vector<16x64xf32>
    %21 = vector.shape_cast %18 : vector<16x64xf32> to vector<1x16x64xf32>
    tpu.vector_store %arg4[%c0_14, %c0_15, %c0_16], %21 {strides = array<i32>} : memref<1x16x64xf32, #tpu.memory_space<vmem>>, vector<1x16x64xf32>,
    %22 = arith.addf %4, %7 : vector<16x64xf32>
    %cst_17 = arith.constant 0.000000e+00 : f32
    %23 = vector.broadcast %cst_17 : f32 to vector<1x64xf32>
    %24 = vector.extract_strided_slice %10 {offsets = [1, 0], sizes = [15, 64], strides = [1, 1]} : vector<16x64xf32> to vector<15x64xf32>
    %25 = tpu.concatenate %24, %23 in 0 : vector<15x64xf32>, vector<1x64xf32> -> vector<16x64xf32>
    %26 = arith.addf %22, %25 : vector<16x64xf32>
    %27 = vector.broadcast %11 : vector<1x64xf32> to vector<16x64xf32>
    %28 = arith.addf %26, %27 : vector<16x64xf32>
    %c0_18 = arith.constant 0 : index
    %c0_19 = arith.constant 0 : index
    %c0_20 = arith.constant 0 : index
    %29 = vector.load %arg5[%c0_18, %c0_19, %c0_20] : memref<1x16x64xf32, #tpu.memory_space<vmem>>, vector<1x16x64xf32>
    %30 = vector.shape_cast %29 : vector<1x16x64xf32> to vector<16x64xf32>
    %31 = vector.shape_cast %28 : vector<16x64xf32> to vector<1x16x64xf32>
    tpu.vector_store %arg5[%c0_18, %c0_19, %c0_20], %31 {strides = array<i32>} : memref<1x16x64xf32, #tpu.memory_space<vmem>>, vector<1x16x64xf32>,
    return
  }
  func.func @transform_0(%arg0: i32) -> (i32, i32, i32) {
    %c0_i32 = arith.constant 0 : i32
    %c0_i32_0 = arith.constant 0 : i32
    %c0_i32_1 = arith.constant 0 : i32
    return %arg0, %c0_i32, %c0_i32_0 : i32, i32, i32
  }
  func.func @transform_1(%arg0: i32) -> (i32, i32, i32) {
    %c0_i32 = arith.constant 0 : i32
    %c0_i32_0 = arith.constant 0 : i32
    %c0_i32_1 = arith.constant 0 : i32
    %c0_i32_2 = arith.constant 0 : i32
    return %c0_i32, %c0_i32_0, %c0_i32_1 : i32, i32, i32
  }
  func.func @transform_2(%arg0: i32) -> (i32, i32) {
    %c0_i32 = arith.constant 0 : i32
    %c0_i32_0 = arith.constant 0 : i32
    %c0_i32_1 = arith.constant 0 : i32
    return %c0_i32, %c0_i32_0 : i32, i32
  }
  func.func @transform_3(%arg0: i32) -> (i32, i32, i32) {
    %c0_i32 = arith.constant 0 : i32
    %c0_i32_0 = arith.constant 0 : i32
    %c0_i32_1 = arith.constant 0 : i32
    return %arg0, %c0_i32, %c0_i32_0 : i32, i32, i32
  }
  func.func @transform_4(%arg0: i32) -> (i32, i32, i32) {
    %c0_i32 = arith.constant 0 : i32
    %c0_i32_0 = arith.constant 0 : i32
    %c0_i32_1 = arith.constant 0 : i32
    return %arg0, %c0_i32, %c0_i32_0 : i32, i32, i32
  }
}

module attributes {stable_mosaic.version = 11 : i64} {
  func.func @_resnet_kernel(%arg0: i32, %arg1: memref<1x32x64xf32, #tpu.memory_space<vmem>>, %arg2: memref<1x64xf32, #tpu.memory_space<vmem>>, %arg3: memref<1x64xf32, #tpu.memory_space<vmem>>, %arg4: memref<64x32xf32, #tpu.memory_space<vmem>>, %arg5: memref<32x64xf32, #tpu.memory_space<vmem>>, %arg6: memref<3x64x32xf32, #tpu.memory_space<vmem>>, %arg7: memref<1x32xf32, #tpu.memory_space<vmem>>, %arg8: memref<1x32xf32, #tpu.memory_space<vmem>>, %arg9: memref<1x32xf32, #tpu.memory_space<vmem>>, %arg10: memref<32x32xf32, #tpu.memory_space<vmem>>, %arg11: memref<32x32xf32, #tpu.memory_space<vmem>>, %arg12: memref<3x32x32xf32, #tpu.memory_space<vmem>>, %arg13: memref<1x32xf32, #tpu.memory_space<vmem>>, %arg14: memref<64x32xf32, #tpu.memory_space<vmem>>, %arg15: memref<1x32xf32, #tpu.memory_space<vmem>>, %arg16: memref<1x32x32xf32, #tpu.memory_space<vmem>>) attributes {dimension_semantics = [#tpu.dimension_semantics<parallel>], iteration_bounds = array<i64: 2>, scalar_prefetch = 0 : i64, scratch_operands = 0 : i64, tpu.core_type = #tpu.core_type<tc>, window_params = [{transform_indices = @transform_0, window_bounds = array<i64: 1, 32, 64>}, {pipeline_mode = #tpu.pipeline_mode<synchronous>, transform_indices = @transform_1, window_bounds = array<i64: 1, 64>}, {pipeline_mode = #tpu.pipeline_mode<synchronous>, transform_indices = @transform_2, window_bounds = array<i64: 1, 64>}, {pipeline_mode = #tpu.pipeline_mode<synchronous>, transform_indices = @transform_3, window_bounds = array<i64: 64, 32>}, {pipeline_mode = #tpu.pipeline_mode<synchronous>, transform_indices = @transform_4, window_bounds = array<i64: 32, 64>}, {pipeline_mode = #tpu.pipeline_mode<synchronous>, transform_indices = @transform_5, window_bounds = array<i64: 3, 64, 32>}, {pipeline_mode = #tpu.pipeline_mode<synchronous>, transform_indices = @transform_6, window_bounds = array<i64: 1, 32>}, {pipeline_mode = #tpu.pipeline_mode<synchronous>, transform_indices = @transform_7, window_bounds = array<i64: 1, 32>}, {pipeline_mode = #tpu.pipeline_mode<synchronous>, transform_indices = @transform_8, window_bounds = array<i64: 1, 32>}, {pipeline_mode = #tpu.pipeline_mode<synchronous>, transform_indices = @transform_9, window_bounds = array<i64: 32, 32>}, {pipeline_mode = #tpu.pipeline_mode<synchronous>, transform_indices = @transform_10, window_bounds = array<i64: 32, 32>}, {pipeline_mode = #tpu.pipeline_mode<synchronous>, transform_indices = @transform_11, window_bounds = array<i64: 3, 32, 32>}, {pipeline_mode = #tpu.pipeline_mode<synchronous>, transform_indices = @transform_12, window_bounds = array<i64: 1, 32>}, {pipeline_mode = #tpu.pipeline_mode<synchronous>, transform_indices = @transform_13, window_bounds = array<i64: 64, 32>}, {pipeline_mode = #tpu.pipeline_mode<synchronous>, transform_indices = @transform_14, window_bounds = array<i64: 1, 32>}, {transform_indices = @transform_15, window_bounds = array<i64: 1, 32, 32>}]} {
    %c0 = arith.constant 0 : index
    %c0_0 = arith.constant 0 : index
    %c0_1 = arith.constant 0 : index
    %0 = vector.load %arg1[%c0, %c0_0, %c0_1] : memref<1x32x64xf32, #tpu.memory_space<vmem>>, vector<1x32x64xf32>
    %1 = vector.shape_cast %0 : vector<1x32x64xf32> to vector<32x64xf32>
    %c0_2 = arith.constant 0 : index
    %c0_3 = arith.constant 0 : index
    %2 = vector.load %arg2[%c0_2, %c0_3] : memref<1x64xf32, #tpu.memory_space<vmem>>, vector<1x64xf32>
    %c0_4 = arith.constant 0 : index
    %c0_5 = arith.constant 0 : index
    %3 = vector.load %arg3[%c0_4, %c0_5] : memref<1x64xf32, #tpu.memory_space<vmem>>, vector<1x64xf32>
    %c0_6 = arith.constant 0 : index
    %c0_7 = arith.constant 0 : index
    %4 = vector.load %arg4[%c0_6, %c0_7] : memref<64x32xf32, #tpu.memory_space<vmem>>, vector<64x32xf32>
    %c0_8 = arith.constant 0 : index
    %c0_9 = arith.constant 0 : index
    %5 = vector.load %arg5[%c0_8, %c0_9] : memref<32x64xf32, #tpu.memory_space<vmem>>, vector<32x64xf32>
    %cst = arith.constant dense<0.000000e+00> : vector<64xf32>
    %6 = vector.multi_reduction <add>, %1, %cst [0] : vector<32x64xf32> to vector<64xf32>
    %7 = vector.shape_cast %6 : vector<64xf32> to vector<1x64xf32>
    %cst_10 = arith.constant dense<0.000000e+00> : vector<1x32xf32>
    %8 = tpu.matmul %7, %4, %cst_10 {dimension_numbers = #tpu.dot_dimension_numbers<[1], [0], [0], [1], [0, 0, 1, 1], [], []>} : vector<1x64xf32>, vector<64x32xf32>, vector<1x32xf32> -> vector<1x32xf32>
    %cst_11 = arith.constant 6.400000e+01 : f32
    %9 = vector.broadcast %cst_11 : f32 to vector<1x32xf32>
    %10 = arith.divf %8, %9 : vector<1x32xf32>
    %cst_12 = arith.constant dense<0.000000e+00> : vector<1x64xf32>
    %11 = tpu.matmul %10, %5, %cst_12 {dimension_numbers = #tpu.dot_dimension_numbers<[1], [0], [0], [1], [0, 0, 1, 1], [], []>} : vector<1x32xf32>, vector<32x64xf32>, vector<1x64xf32> -> vector<1x64xf32>
    %12 = vector.broadcast %11 : vector<1x64xf32> to vector<32x64xf32>
    %13 = arith.subf %1, %12 : vector<32x64xf32>
    %14 = arith.mulf %13, %13 : vector<32x64xf32>
    %cst_13 = arith.constant dense<0.000000e+00> : vector<64xf32>
    %15 = vector.multi_reduction <add>, %14, %cst_13 [0] : vector<32x64xf32> to vector<64xf32>
    %16 = vector.shape_cast %15 : vector<64xf32> to vector<1x64xf32>
    %cst_14 = arith.constant dense<0.000000e+00> : vector<1x32xf32>
    %17 = tpu.matmul %16, %4, %cst_14 {dimension_numbers = #tpu.dot_dimension_numbers<[1], [0], [0], [1], [0, 0, 1, 1], [], []>} : vector<1x64xf32>, vector<64x32xf32>, vector<1x32xf32> -> vector<1x32xf32>
    %cst_15 = arith.constant 6.400000e+01 : f32
    %18 = vector.broadcast %cst_15 : f32 to vector<1x32xf32>
    %19 = arith.divf %17, %18 : vector<1x32xf32>
    %cst_16 = arith.constant dense<0.000000e+00> : vector<1x64xf32>
    %20 = tpu.matmul %19, %5, %cst_16 {dimension_numbers = #tpu.dot_dimension_numbers<[1], [0], [0], [1], [0, 0, 1, 1], [], []>} : vector<1x32xf32>, vector<32x64xf32>, vector<1x64xf32> -> vector<1x64xf32>
    %cst_17 = arith.constant 9.99999997E-7 : f32
    %21 = vector.broadcast %cst_17 : f32 to vector<1x64xf32>
    %22 = arith.addf %20, %21 : vector<1x64xf32>
    %23 = math.rsqrt %22 : vector<1x64xf32>
    %24 = vector.broadcast %23 : vector<1x64xf32> to vector<32x64xf32>
    %25 = arith.mulf %13, %24 : vector<32x64xf32>
    %26 = vector.broadcast %2 : vector<1x64xf32> to vector<32x64xf32>
    %27 = arith.mulf %25, %26 : vector<32x64xf32>
    %28 = vector.broadcast %3 : vector<1x64xf32> to vector<32x64xf32>
    %29 = arith.addf %27, %28 : vector<32x64xf32>
    %30 = arith.negf %29 : vector<32x64xf32>
    %31 = math.exp %30 : vector<32x64xf32>
    %cst_18 = arith.constant 1.000000e+00 : f32
    %32 = vector.broadcast %cst_18 : f32 to vector<32x64xf32>
    %33 = arith.addf %32, %31 : vector<32x64xf32>
    %34 = arith.divf %32, %33 : vector<32x64xf32>
    %35 = arith.mulf %29, %34 : vector<32x64xf32>
    %c0_19 = arith.constant 0 : index
    %c0_20 = arith.constant 0 : index
    %36 = vector.load %arg7[%c0_19, %c0_20] : memref<1x32xf32, #tpu.memory_space<vmem>>, vector<1x32xf32>
    %c0_21 = arith.constant 0 : index
    %c0_22 = arith.constant 0 : index
    %c0_23 = arith.constant 0 : index
    %37 = vector.load %arg6[%c0_21, %c0_22, %c0_23] : memref<3x64x32xf32, #tpu.memory_space<vmem>>, vector<1x64x32xf32>
    %38 = vector.shape_cast %37 : vector<1x64x32xf32> to vector<64x32xf32>
    %cst_24 = arith.constant dense<0.000000e+00> : vector<32x32xf32>
    %39 = tpu.matmul %35, %38, %cst_24 {dimension_numbers = #tpu.dot_dimension_numbers<[1], [0], [0], [1], [0, 0, 1, 1], [], []>} : vector<32x64xf32>, vector<64x32xf32>, vector<32x32xf32> -> vector<32x32xf32>
    %c1 = arith.constant 1 : index
    %c0_25 = arith.constant 0 : index
    %c0_26 = arith.constant 0 : index
    %40 = vector.load %arg6[%c1, %c0_25, %c0_26] : memref<3x64x32xf32, #tpu.memory_space<vmem>>, vector<1x64x32xf32>
    %41 = vector.shape_cast %40 : vector<1x64x32xf32> to vector<64x32xf32>
    %cst_27 = arith.constant dense<0.000000e+00> : vector<32x32xf32>
    %42 = tpu.matmul %35, %41, %cst_27 {dimension_numbers = #tpu.dot_dimension_numbers<[1], [0], [0], [1], [0, 0, 1, 1], [], []>} : vector<32x64xf32>, vector<64x32xf32>, vector<32x32xf32> -> vector<32x32xf32>
    %c2 = arith.constant 2 : index
    %c0_28 = arith.constant 0 : index
    %c0_29 = arith.constant 0 : index
    %43 = vector.load %arg6[%c2, %c0_28, %c0_29] : memref<3x64x32xf32, #tpu.memory_space<vmem>>, vector<1x64x32xf32>
    %44 = vector.shape_cast %43 : vector<1x64x32xf32> to vector<64x32xf32>
    %cst_30 = arith.constant dense<0.000000e+00> : vector<32x32xf32>
    %45 = tpu.matmul %35, %44, %cst_30 {dimension_numbers = #tpu.dot_dimension_numbers<[1], [0], [0], [1], [0, 0, 1, 1], [], []>} : vector<32x64xf32>, vector<64x32xf32>, vector<32x32xf32> -> vector<32x32xf32>
    %cst_31 = arith.constant 0.000000e+00 : f32
    %46 = vector.broadcast %cst_31 : f32 to vector<1x32xf32>
    %47 = vector.extract_strided_slice %39 {offsets = [0, 0], sizes = [31, 32], strides = [1, 1]} : vector<32x32xf32> to vector<31x32xf32>
    %48 = tpu.concatenate %46, %47 in 0 : vector<1x32xf32>, vector<31x32xf32> -> vector<32x32xf32>
    %49 = arith.addf %48, %42 : vector<32x32xf32>
    %cst_32 = arith.constant 0.000000e+00 : f32
    %50 = vector.broadcast %cst_32 : f32 to vector<1x32xf32>
    %51 = vector.extract_strided_slice %45 {offsets = [1, 0], sizes = [31, 32], strides = [1, 1]} : vector<32x32xf32> to vector<31x32xf32>
    %52 = tpu.concatenate %51, %50 in 0 : vector<31x32xf32>, vector<1x32xf32> -> vector<32x32xf32>
    %53 = arith.addf %49, %52 : vector<32x32xf32>
    %54 = vector.broadcast %36 : vector<1x32xf32> to vector<32x32xf32>
    %55 = arith.addf %53, %54 : vector<32x32xf32>
    %c0_33 = arith.constant 0 : index
    %c0_34 = arith.constant 0 : index
    %56 = vector.load %arg8[%c0_33, %c0_34] : memref<1x32xf32, #tpu.memory_space<vmem>>, vector<1x32xf32>
    %c0_35 = arith.constant 0 : index
    %c0_36 = arith.constant 0 : index
    %57 = vector.load %arg9[%c0_35, %c0_36] : memref<1x32xf32, #tpu.memory_space<vmem>>, vector<1x32xf32>
    %c0_37 = arith.constant 0 : index
    %c0_38 = arith.constant 0 : index
    %58 = vector.load %arg10[%c0_37, %c0_38] : memref<32x32xf32, #tpu.memory_space<vmem>>, vector<32x32xf32>
    %c0_39 = arith.constant 0 : index
    %c0_40 = arith.constant 0 : index
    %59 = vector.load %arg11[%c0_39, %c0_40] : memref<32x32xf32, #tpu.memory_space<vmem>>, vector<32x32xf32>
    %cst_41 = arith.constant dense<0.000000e+00> : vector<32xf32>
    %60 = vector.multi_reduction <add>, %55, %cst_41 [0] : vector<32x32xf32> to vector<32xf32>
    %61 = vector.shape_cast %60 : vector<32xf32> to vector<1x32xf32>
    %cst_42 = arith.constant dense<0.000000e+00> : vector<1x32xf32>
    %62 = tpu.matmul %61, %58, %cst_42 {dimension_numbers = #tpu.dot_dimension_numbers<[1], [0], [0], [1], [0, 0, 1, 1], [], []>} : vector<1x32xf32>, vector<32x32xf32>, vector<1x32xf32> -> vector<1x32xf32>
    %cst_43 = arith.constant 3.200000e+01 : f32
    %63 = vector.broadcast %cst_43 : f32 to vector<1x32xf32>
    %64 = arith.divf %62, %63 : vector<1x32xf32>
    %cst_44 = arith.constant dense<0.000000e+00> : vector<1x32xf32>
    %65 = tpu.matmul %64, %59, %cst_44 {dimension_numbers = #tpu.dot_dimension_numbers<[1], [0], [0], [1], [0, 0, 1, 1], [], []>} : vector<1x32xf32>, vector<32x32xf32>, vector<1x32xf32> -> vector<1x32xf32>
    %66 = vector.broadcast %65 : vector<1x32xf32> to vector<32x32xf32>
    %67 = arith.subf %55, %66 : vector<32x32xf32>
    %68 = arith.mulf %67, %67 : vector<32x32xf32>
    %cst_45 = arith.constant dense<0.000000e+00> : vector<32xf32>
    %69 = vector.multi_reduction <add>, %68, %cst_45 [0] : vector<32x32xf32> to vector<32xf32>
    %70 = vector.shape_cast %69 : vector<32xf32> to vector<1x32xf32>
    %cst_46 = arith.constant dense<0.000000e+00> : vector<1x32xf32>
    %71 = tpu.matmul %70, %58, %cst_46 {dimension_numbers = #tpu.dot_dimension_numbers<[1], [0], [0], [1], [0, 0, 1, 1], [], []>} : vector<1x32xf32>, vector<32x32xf32>, vector<1x32xf32> -> vector<1x32xf32>
    %cst_47 = arith.constant 3.200000e+01 : f32
    %72 = vector.broadcast %cst_47 : f32 to vector<1x32xf32>
    %73 = arith.divf %71, %72 : vector<1x32xf32>
    %cst_48 = arith.constant dense<0.000000e+00> : vector<1x32xf32>
    %74 = tpu.matmul %73, %59, %cst_48 {dimension_numbers = #tpu.dot_dimension_numbers<[1], [0], [0], [1], [0, 0, 1, 1], [], []>} : vector<1x32xf32>, vector<32x32xf32>, vector<1x32xf32> -> vector<1x32xf32>
    %cst_49 = arith.constant 9.99999997E-7 : f32
    %75 = vector.broadcast %cst_49 : f32 to vector<1x32xf32>
    %76 = arith.addf %74, %75 : vector<1x32xf32>
    %77 = math.rsqrt %76 : vector<1x32xf32>
    %78 = vector.broadcast %77 : vector<1x32xf32> to vector<32x32xf32>
    %79 = arith.mulf %67, %78 : vector<32x32xf32>
    %80 = vector.broadcast %56 : vector<1x32xf32> to vector<32x32xf32>
    %81 = arith.mulf %79, %80 : vector<32x32xf32>
    %82 = vector.broadcast %57 : vector<1x32xf32> to vector<32x32xf32>
    %83 = arith.addf %81, %82 : vector<32x32xf32>
    %84 = arith.negf %83 : vector<32x32xf32>
    %85 = math.exp %84 : vector<32x32xf32>
    %cst_50 = arith.constant 1.000000e+00 : f32
    %86 = vector.broadcast %cst_50 : f32 to vector<32x32xf32>
    %87 = arith.addf %86, %85 : vector<32x32xf32>
    %88 = arith.divf %86, %87 : vector<32x32xf32>
    %89 = arith.mulf %83, %88 : vector<32x32xf32>
    %c0_51 = arith.constant 0 : index
    %c0_52 = arith.constant 0 : index
    %90 = vector.load %arg13[%c0_51, %c0_52] : memref<1x32xf32, #tpu.memory_space<vmem>>, vector<1x32xf32>
    %c0_53 = arith.constant 0 : index
    %c0_54 = arith.constant 0 : index
    %c0_55 = arith.constant 0 : index
    %91 = vector.load %arg12[%c0_53, %c0_54, %c0_55] : memref<3x32x32xf32, #tpu.memory_space<vmem>>, vector<1x32x32xf32>
    %92 = vector.shape_cast %91 : vector<1x32x32xf32> to vector<32x32xf32>
    %cst_56 = arith.constant dense<0.000000e+00> : vector<32x32xf32>
    %93 = tpu.matmul %89, %92, %cst_56 {dimension_numbers = #tpu.dot_dimension_numbers<[1], [0], [0], [1], [0, 0, 1, 1], [], []>} : vector<32x32xf32>, vector<32x32xf32>, vector<32x32xf32> -> vector<32x32xf32>
    %c1_57 = arith.constant 1 : index
    %c0_58 = arith.constant 0 : index
    %c0_59 = arith.constant 0 : index
    %94 = vector.load %arg12[%c1_57, %c0_58, %c0_59] : memref<3x32x32xf32, #tpu.memory_space<vmem>>, vector<1x32x32xf32>
    %95 = vector.shape_cast %94 : vector<1x32x32xf32> to vector<32x32xf32>
    %cst_60 = arith.constant dense<0.000000e+00> : vector<32x32xf32>
    %96 = tpu.matmul %89, %95, %cst_60 {dimension_numbers = #tpu.dot_dimension_numbers<[1], [0], [0], [1], [0, 0, 1, 1], [], []>} : vector<32x32xf32>, vector<32x32xf32>, vector<32x32xf32> -> vector<32x32xf32>
    %c2_61 = arith.constant 2 : index
    %c0_62 = arith.constant 0 : index
    %c0_63 = arith.constant 0 : index
    %97 = vector.load %arg12[%c2_61, %c0_62, %c0_63] : memref<3x32x32xf32, #tpu.memory_space<vmem>>, vector<1x32x32xf32>
    %98 = vector.shape_cast %97 : vector<1x32x32xf32> to vector<32x32xf32>
    %cst_64 = arith.constant dense<0.000000e+00> : vector<32x32xf32>
    %99 = tpu.matmul %89, %98, %cst_64 {dimension_numbers = #tpu.dot_dimension_numbers<[1], [0], [0], [1], [0, 0, 1, 1], [], []>} : vector<32x32xf32>, vector<32x32xf32>, vector<32x32xf32> -> vector<32x32xf32>
    %cst_65 = arith.constant 0.000000e+00 : f32
    %100 = vector.broadcast %cst_65 : f32 to vector<1x32xf32>
    %101 = vector.extract_strided_slice %93 {offsets = [0, 0], sizes = [31, 32], strides = [1, 1]} : vector<32x32xf32> to vector<31x32xf32>
    %102 = tpu.concatenate %100, %101 in 0 : vector<1x32xf32>, vector<31x32xf32> -> vector<32x32xf32>
    %103 = arith.addf %102, %96 : vector<32x32xf32>
    %cst_66 = arith.constant 0.000000e+00 : f32
    %104 = vector.broadcast %cst_66 : f32 to vector<1x32xf32>
    %105 = vector.extract_strided_slice %99 {offsets = [1, 0], sizes = [31, 32], strides = [1, 1]} : vector<32x32xf32> to vector<31x32xf32>
    %106 = tpu.concatenate %105, %104 in 0 : vector<31x32xf32>, vector<1x32xf32> -> vector<32x32xf32>
    %107 = arith.addf %103, %106 : vector<32x32xf32>
    %108 = vector.broadcast %90 : vector<1x32xf32> to vector<32x32xf32>
    %109 = arith.addf %107, %108 : vector<32x32xf32>
    %c0_67 = arith.constant 0 : index
    %c0_68 = arith.constant 0 : index
    %110 = vector.load %arg14[%c0_67, %c0_68] : memref<64x32xf32, #tpu.memory_space<vmem>>, vector<64x32xf32>
    %cst_69 = arith.constant dense<0.000000e+00> : vector<32x32xf32>
    %111 = tpu.matmul %1, %110, %cst_69 {dimension_numbers = #tpu.dot_dimension_numbers<[1], [0], [0], [1], [0, 0, 1, 1], [], []>} : vector<32x64xf32>, vector<64x32xf32>, vector<32x32xf32> -> vector<32x32xf32>
    %c0_70 = arith.constant 0 : index
    %c0_71 = arith.constant 0 : index
    %112 = vector.load %arg15[%c0_70, %c0_71] : memref<1x32xf32, #tpu.memory_space<vmem>>, vector<1x32xf32>
    %113 = vector.broadcast %112 : vector<1x32xf32> to vector<32x32xf32>
    %114 = arith.addf %111, %113 : vector<32x32xf32>
    %115 = arith.addf %114, %109 : vector<32x32xf32>
    %c0_72 = arith.constant 0 : index
    %c0_73 = arith.constant 0 : index
    %c0_74 = arith.constant 0 : index
    %116 = vector.load %arg16[%c0_72, %c0_73, %c0_74] : memref<1x32x32xf32, #tpu.memory_space<vmem>>, vector<1x32x32xf32>
    %117 = vector.shape_cast %116 : vector<1x32x32xf32> to vector<32x32xf32>
    %118 = vector.shape_cast %115 : vector<32x32xf32> to vector<1x32x32xf32>
    tpu.vector_store %arg16[%c0_72, %c0_73, %c0_74], %118 {strides = array<i32>} : memref<1x32x32xf32, #tpu.memory_space<vmem>>, vector<1x32x32xf32>,
    return
  }
  func.func @transform_0(%arg0: i32) -> (i32, i32, i32) {
    %c0_i32 = arith.constant 0 : i32
    %c0_i32_0 = arith.constant 0 : i32
    %c0_i32_1 = arith.constant 0 : i32
    return %arg0, %c0_i32, %c0_i32_0 : i32, i32, i32
  }
  func.func @transform_1(%arg0: i32) -> (i32, i32) {
    %c0_i32 = arith.constant 0 : i32
    %c0_i32_0 = arith.constant 0 : i32
    %c0_i32_1 = arith.constant 0 : i32
    return %c0_i32, %c0_i32_0 : i32, i32
  }
  func.func @transform_2(%arg0: i32) -> (i32, i32) {
    %c0_i32 = arith.constant 0 : i32
    %c0_i32_0 = arith.constant 0 : i32
    %c0_i32_1 = arith.constant 0 : i32
    return %c0_i32, %c0_i32_0 : i32, i32
  }
  func.func @transform_3(%arg0: i32) -> (i32, i32) {
    %c0_i32 = arith.constant 0 : i32
    %c0_i32_0 = arith.constant 0 : i32
    %c0_i32_1 = arith.constant 0 : i32
    return %c0_i32, %c0_i32_0 : i32, i32
  }
  func.func @transform_4(%arg0: i32) -> (i32, i32) {
    %c0_i32 = arith.constant 0 : i32
    %c0_i32_0 = arith.constant 0 : i32
    %c0_i32_1 = arith.constant 0 : i32
    return %c0_i32, %c0_i32_0 : i32, i32
  }
  func.func @transform_5(%arg0: i32) -> (i32, i32, i32) {
    %c0_i32 = arith.constant 0 : i32
    %c0_i32_0 = arith.constant 0 : i32
    %c0_i32_1 = arith.constant 0 : i32
    %c0_i32_2 = arith.constant 0 : i32
    return %c0_i32, %c0_i32_0, %c0_i32_1 : i32, i32, i32
  }
  func.func @transform_6(%arg0: i32) -> (i32, i32) {
    %c0_i32 = arith.constant 0 : i32
    %c0_i32_0 = arith.constant 0 : i32
    %c0_i32_1 = arith.constant 0 : i32
    return %c0_i32, %c0_i32_0 : i32, i32
  }
  func.func @transform_7(%arg0: i32) -> (i32, i32) {
    %c0_i32 = arith.constant 0 : i32
    %c0_i32_0 = arith.constant 0 : i32
    %c0_i32_1 = arith.constant 0 : i32
    return %c0_i32, %c0_i32_0 : i32, i32
  }
  func.func @transform_8(%arg0: i32) -> (i32, i32) {
    %c0_i32 = arith.constant 0 : i32
    %c0_i32_0 = arith.constant 0 : i32
    %c0_i32_1 = arith.constant 0 : i32
    return %c0_i32, %c0_i32_0 : i32, i32
  }
  func.func @transform_9(%arg0: i32) -> (i32, i32) {
    %c0_i32 = arith.constant 0 : i32
    %c0_i32_0 = arith.constant 0 : i32
    %c0_i32_1 = arith.constant 0 : i32
    return %c0_i32, %c0_i32_0 : i32, i32
  }
  func.func @transform_10(%arg0: i32) -> (i32, i32) {
    %c0_i32 = arith.constant 0 : i32
    %c0_i32_0 = arith.constant 0 : i32
    %c0_i32_1 = arith.constant 0 : i32
    return %c0_i32, %c0_i32_0 : i32, i32
  }
  func.func @transform_11(%arg0: i32) -> (i32, i32, i32) {
    %c0_i32 = arith.constant 0 : i32
    %c0_i32_0 = arith.constant 0 : i32
    %c0_i32_1 = arith.constant 0 : i32
    %c0_i32_2 = arith.constant 0 : i32
    return %c0_i32, %c0_i32_0, %c0_i32_1 : i32, i32, i32
  }
  func.func @transform_12(%arg0: i32) -> (i32, i32) {
    %c0_i32 = arith.constant 0 : i32
    %c0_i32_0 = arith.constant 0 : i32
    %c0_i32_1 = arith.constant 0 : i32
    return %c0_i32, %c0_i32_0 : i32, i32
  }
  func.func @transform_13(%arg0: i32) -> (i32, i32) {
    %c0_i32 = arith.constant 0 : i32
    %c0_i32_0 = arith.constant 0 : i32
    %c0_i32_1 = arith.constant 0 : i32
    return %c0_i32, %c0_i32_0 : i32, i32
  }
  func.func @transform_14(%arg0: i32) -> (i32, i32) {
    %c0_i32 = arith.constant 0 : i32
    %c0_i32_0 = arith.constant 0 : i32
    %c0_i32_1 = arith.constant 0 : i32
    return %c0_i32, %c0_i32_0 : i32, i32
  }
  func.func @transform_15(%arg0: i32) -> (i32, i32, i32) {
    %c0_i32 = arith.constant 0 : i32
    %c0_i32_0 = arith.constant 0 : i32
    %c0_i32_1 = arith.constant 0 : i32
    return %arg0, %c0_i32, %c0_i32_0 : i32, i32, i32
  }
}

module attributes {stable_mosaic.version = 11 : i64} {
  func.func @_resnet_kernel(%arg0: i32, %arg1: memref<1x32x32xf32, #tpu.memory_space<vmem>>, %arg2: memref<1x32xf32, #tpu.memory_space<vmem>>, %arg3: memref<1x32xf32, #tpu.memory_space<vmem>>, %arg4: memref<32x32xf32, #tpu.memory_space<vmem>>, %arg5: memref<32x32xf32, #tpu.memory_space<vmem>>, %arg6: memref<3x32x32xf32, #tpu.memory_space<vmem>>, %arg7: memref<1x32xf32, #tpu.memory_space<vmem>>, %arg8: memref<1x32xf32, #tpu.memory_space<vmem>>, %arg9: memref<1x32xf32, #tpu.memory_space<vmem>>, %arg10: memref<32x32xf32, #tpu.memory_space<vmem>>, %arg11: memref<32x32xf32, #tpu.memory_space<vmem>>, %arg12: memref<3x32x32xf32, #tpu.memory_space<vmem>>, %arg13: memref<1x32xf32, #tpu.memory_space<vmem>>, %arg14: memref<1x32x32xf32, #tpu.memory_space<vmem>>) attributes {dimension_semantics = [#tpu.dimension_semantics<parallel>], iteration_bounds = array<i64: 2>, scalar_prefetch = 0 : i64, scratch_operands = 0 : i64, tpu.core_type = #tpu.core_type<tc>, window_params = [{transform_indices = @transform_0, window_bounds = array<i64: 1, 32, 32>}, {pipeline_mode = #tpu.pipeline_mode<synchronous>, transform_indices = @transform_1, window_bounds = array<i64: 1, 32>}, {pipeline_mode = #tpu.pipeline_mode<synchronous>, transform_indices = @transform_2, window_bounds = array<i64: 1, 32>}, {pipeline_mode = #tpu.pipeline_mode<synchronous>, transform_indices = @transform_3, window_bounds = array<i64: 32, 32>}, {pipeline_mode = #tpu.pipeline_mode<synchronous>, transform_indices = @transform_4, window_bounds = array<i64: 32, 32>}, {pipeline_mode = #tpu.pipeline_mode<synchronous>, transform_indices = @transform_5, window_bounds = array<i64: 3, 32, 32>}, {pipeline_mode = #tpu.pipeline_mode<synchronous>, transform_indices = @transform_6, window_bounds = array<i64: 1, 32>}, {pipeline_mode = #tpu.pipeline_mode<synchronous>, transform_indices = @transform_7, window_bounds = array<i64: 1, 32>}, {pipeline_mode = #tpu.pipeline_mode<synchronous>, transform_indices = @transform_8, window_bounds = array<i64: 1, 32>}, {pipeline_mode = #tpu.pipeline_mode<synchronous>, transform_indices = @transform_9, window_bounds = array<i64: 32, 32>}, {pipeline_mode = #tpu.pipeline_mode<synchronous>, transform_indices = @transform_10, window_bounds = array<i64: 32, 32>}, {pipeline_mode = #tpu.pipeline_mode<synchronous>, transform_indices = @transform_11, window_bounds = array<i64: 3, 32, 32>}, {pipeline_mode = #tpu.pipeline_mode<synchronous>, transform_indices = @transform_12, window_bounds = array<i64: 1, 32>}, {transform_indices = @transform_13, window_bounds = array<i64: 1, 32, 32>}]} {
    %c0 = arith.constant 0 : index
    %c0_0 = arith.constant 0 : index
    %c0_1 = arith.constant 0 : index
    %0 = vector.load %arg1[%c0, %c0_0, %c0_1] : memref<1x32x32xf32, #tpu.memory_space<vmem>>, vector<1x32x32xf32>
    %1 = vector.shape_cast %0 : vector<1x32x32xf32> to vector<32x32xf32>
    %c0_2 = arith.constant 0 : index
    %c0_3 = arith.constant 0 : index
    %2 = vector.load %arg2[%c0_2, %c0_3] : memref<1x32xf32, #tpu.memory_space<vmem>>, vector<1x32xf32>
    %c0_4 = arith.constant 0 : index
    %c0_5 = arith.constant 0 : index
    %3 = vector.load %arg3[%c0_4, %c0_5] : memref<1x32xf32, #tpu.memory_space<vmem>>, vector<1x32xf32>
    %c0_6 = arith.constant 0 : index
    %c0_7 = arith.constant 0 : index
    %4 = vector.load %arg4[%c0_6, %c0_7] : memref<32x32xf32, #tpu.memory_space<vmem>>, vector<32x32xf32>
    %c0_8 = arith.constant 0 : index
    %c0_9 = arith.constant 0 : index
    %5 = vector.load %arg5[%c0_8, %c0_9] : memref<32x32xf32, #tpu.memory_space<vmem>>, vector<32x32xf32>
    %cst = arith.constant dense<0.000000e+00> : vector<32xf32>
    %6 = vector.multi_reduction <add>, %1, %cst [0] : vector<32x32xf32> to vector<32xf32>
    %7 = vector.shape_cast %6 : vector<32xf32> to vector<1x32xf32>
    %cst_10 = arith.constant dense<0.000000e+00> : vector<1x32xf32>
    %8 = tpu.matmul %7, %4, %cst_10 {dimension_numbers = #tpu.dot_dimension_numbers<[1], [0], [0], [1], [0, 0, 1, 1], [], []>} : vector<1x32xf32>, vector<32x32xf32>, vector<1x32xf32> -> vector<1x32xf32>
    %cst_11 = arith.constant 3.200000e+01 : f32
    %9 = vector.broadcast %cst_11 : f32 to vector<1x32xf32>
    %10 = arith.divf %8, %9 : vector<1x32xf32>
    %cst_12 = arith.constant dense<0.000000e+00> : vector<1x32xf32>
    %11 = tpu.matmul %10, %5, %cst_12 {dimension_numbers = #tpu.dot_dimension_numbers<[1], [0], [0], [1], [0, 0, 1, 1], [], []>} : vector<1x32xf32>, vector<32x32xf32>, vector<1x32xf32> -> vector<1x32xf32>
    %12 = vector.broadcast %11 : vector<1x32xf32> to vector<32x32xf32>
    %13 = arith.subf %1, %12 : vector<32x32xf32>
    %14 = arith.mulf %13, %13 : vector<32x32xf32>
    %cst_13 = arith.constant dense<0.000000e+00> : vector<32xf32>
    %15 = vector.multi_reduction <add>, %14, %cst_13 [0] : vector<32x32xf32> to vector<32xf32>
    %16 = vector.shape_cast %15 : vector<32xf32> to vector<1x32xf32>
    %cst_14 = arith.constant dense<0.000000e+00> : vector<1x32xf32>
    %17 = tpu.matmul %16, %4, %cst_14 {dimension_numbers = #tpu.dot_dimension_numbers<[1], [0], [0], [1], [0, 0, 1, 1], [], []>} : vector<1x32xf32>, vector<32x32xf32>, vector<1x32xf32> -> vector<1x32xf32>
    %cst_15 = arith.constant 3.200000e+01 : f32
    %18 = vector.broadcast %cst_15 : f32 to vector<1x32xf32>
    %19 = arith.divf %17, %18 : vector<1x32xf32>
    %cst_16 = arith.constant dense<0.000000e+00> : vector<1x32xf32>
    %20 = tpu.matmul %19, %5, %cst_16 {dimension_numbers = #tpu.dot_dimension_numbers<[1], [0], [0], [1], [0, 0, 1, 1], [], []>} : vector<1x32xf32>, vector<32x32xf32>, vector<1x32xf32> -> vector<1x32xf32>
    %cst_17 = arith.constant 9.99999997E-7 : f32
    %21 = vector.broadcast %cst_17 : f32 to vector<1x32xf32>
    %22 = arith.addf %20, %21 : vector<1x32xf32>
    %23 = math.rsqrt %22 : vector<1x32xf32>
    %24 = vector.broadcast %23 : vector<1x32xf32> to vector<32x32xf32>
    %25 = arith.mulf %13, %24 : vector<32x32xf32>
    %26 = vector.broadcast %2 : vector<1x32xf32> to vector<32x32xf32>
    %27 = arith.mulf %25, %26 : vector<32x32xf32>
    %28 = vector.broadcast %3 : vector<1x32xf32> to vector<32x32xf32>
    %29 = arith.addf %27, %28 : vector<32x32xf32>
    %30 = arith.negf %29 : vector<32x32xf32>
    %31 = math.exp %30 : vector<32x32xf32>
    %cst_18 = arith.constant 1.000000e+00 : f32
    %32 = vector.broadcast %cst_18 : f32 to vector<32x32xf32>
    %33 = arith.addf %32, %31 : vector<32x32xf32>
    %34 = arith.divf %32, %33 : vector<32x32xf32>
    %35 = arith.mulf %29, %34 : vector<32x32xf32>
    %c0_19 = arith.constant 0 : index
    %c0_20 = arith.constant 0 : index
    %36 = vector.load %arg7[%c0_19, %c0_20] : memref<1x32xf32, #tpu.memory_space<vmem>>, vector<1x32xf32>
    %c0_21 = arith.constant 0 : index
    %c0_22 = arith.constant 0 : index
    %c0_23 = arith.constant 0 : index
    %37 = vector.load %arg6[%c0_21, %c0_22, %c0_23] : memref<3x32x32xf32, #tpu.memory_space<vmem>>, vector<1x32x32xf32>
    %38 = vector.shape_cast %37 : vector<1x32x32xf32> to vector<32x32xf32>
    %cst_24 = arith.constant dense<0.000000e+00> : vector<32x32xf32>
    %39 = tpu.matmul %35, %38, %cst_24 {dimension_numbers = #tpu.dot_dimension_numbers<[1], [0], [0], [1], [0, 0, 1, 1], [], []>} : vector<32x32xf32>, vector<32x32xf32>, vector<32x32xf32> -> vector<32x32xf32>
    %c1 = arith.constant 1 : index
    %c0_25 = arith.constant 0 : index
    %c0_26 = arith.constant 0 : index
    %40 = vector.load %arg6[%c1, %c0_25, %c0_26] : memref<3x32x32xf32, #tpu.memory_space<vmem>>, vector<1x32x32xf32>
    %41 = vector.shape_cast %40 : vector<1x32x32xf32> to vector<32x32xf32>
    %cst_27 = arith.constant dense<0.000000e+00> : vector<32x32xf32>
    %42 = tpu.matmul %35, %41, %cst_27 {dimension_numbers = #tpu.dot_dimension_numbers<[1], [0], [0], [1], [0, 0, 1, 1], [], []>} : vector<32x32xf32>, vector<32x32xf32>, vector<32x32xf32> -> vector<32x32xf32>
    %c2 = arith.constant 2 : index
    %c0_28 = arith.constant 0 : index
    %c0_29 = arith.constant 0 : index
    %43 = vector.load %arg6[%c2, %c0_28, %c0_29] : memref<3x32x32xf32, #tpu.memory_space<vmem>>, vector<1x32x32xf32>
    %44 = vector.shape_cast %43 : vector<1x32x32xf32> to vector<32x32xf32>
    %cst_30 = arith.constant dense<0.000000e+00> : vector<32x32xf32>
    %45 = tpu.matmul %35, %44, %cst_30 {dimension_numbers = #tpu.dot_dimension_numbers<[1], [0], [0], [1], [0, 0, 1, 1], [], []>} : vector<32x32xf32>, vector<32x32xf32>, vector<32x32xf32> -> vector<32x32xf32>
    %cst_31 = arith.constant 0.000000e+00 : f32
    %46 = vector.broadcast %cst_31 : f32 to vector<1x32xf32>
    %47 = vector.extract_strided_slice %39 {offsets = [0, 0], sizes = [31, 32], strides = [1, 1]} : vector<32x32xf32> to vector<31x32xf32>
    %48 = tpu.concatenate %46, %47 in 0 : vector<1x32xf32>, vector<31x32xf32> -> vector<32x32xf32>
    %49 = arith.addf %48, %42 : vector<32x32xf32>
    %cst_32 = arith.constant 0.000000e+00 : f32
    %50 = vector.broadcast %cst_32 : f32 to vector<1x32xf32>
    %51 = vector.extract_strided_slice %45 {offsets = [1, 0], sizes = [31, 32], strides = [1, 1]} : vector<32x32xf32> to vector<31x32xf32>
    %52 = tpu.concatenate %51, %50 in 0 : vector<31x32xf32>, vector<1x32xf32> -> vector<32x32xf32>
    %53 = arith.addf %49, %52 : vector<32x32xf32>
    %54 = vector.broadcast %36 : vector<1x32xf32> to vector<32x32xf32>
    %55 = arith.addf %53, %54 : vector<32x32xf32>
    %c0_33 = arith.constant 0 : index
    %c0_34 = arith.constant 0 : index
    %56 = vector.load %arg8[%c0_33, %c0_34] : memref<1x32xf32, #tpu.memory_space<vmem>>, vector<1x32xf32>
    %c0_35 = arith.constant 0 : index
    %c0_36 = arith.constant 0 : index
    %57 = vector.load %arg9[%c0_35, %c0_36] : memref<1x32xf32, #tpu.memory_space<vmem>>, vector<1x32xf32>
    %c0_37 = arith.constant 0 : index
    %c0_38 = arith.constant 0 : index
    %58 = vector.load %arg10[%c0_37, %c0_38] : memref<32x32xf32, #tpu.memory_space<vmem>>, vector<32x32xf32>
    %c0_39 = arith.constant 0 : index
    %c0_40 = arith.constant 0 : index
    %59 = vector.load %arg11[%c0_39, %c0_40] : memref<32x32xf32, #tpu.memory_space<vmem>>, vector<32x32xf32>
    %cst_41 = arith.constant dense<0.000000e+00> : vector<32xf32>
    %60 = vector.multi_reduction <add>, %55, %cst_41 [0] : vector<32x32xf32> to vector<32xf32>
    %61 = vector.shape_cast %60 : vector<32xf32> to vector<1x32xf32>
    %cst_42 = arith.constant dense<0.000000e+00> : vector<1x32xf32>
    %62 = tpu.matmul %61, %58, %cst_42 {dimension_numbers = #tpu.dot_dimension_numbers<[1], [0], [0], [1], [0, 0, 1, 1], [], []>} : vector<1x32xf32>, vector<32x32xf32>, vector<1x32xf32> -> vector<1x32xf32>
    %cst_43 = arith.constant 3.200000e+01 : f32
    %63 = vector.broadcast %cst_43 : f32 to vector<1x32xf32>
    %64 = arith.divf %62, %63 : vector<1x32xf32>
    %cst_44 = arith.constant dense<0.000000e+00> : vector<1x32xf32>
    %65 = tpu.matmul %64, %59, %cst_44 {dimension_numbers = #tpu.dot_dimension_numbers<[1], [0], [0], [1], [0, 0, 1, 1], [], []>} : vector<1x32xf32>, vector<32x32xf32>, vector<1x32xf32> -> vector<1x32xf32>
    %66 = vector.broadcast %65 : vector<1x32xf32> to vector<32x32xf32>
    %67 = arith.subf %55, %66 : vector<32x32xf32>
    %68 = arith.mulf %67, %67 : vector<32x32xf32>
    %cst_45 = arith.constant dense<0.000000e+00> : vector<32xf32>
    %69 = vector.multi_reduction <add>, %68, %cst_45 [0] : vector<32x32xf32> to vector<32xf32>
    %70 = vector.shape_cast %69 : vector<32xf32> to vector<1x32xf32>
    %cst_46 = arith.constant dense<0.000000e+00> : vector<1x32xf32>
    %71 = tpu.matmul %70, %58, %cst_46 {dimension_numbers = #tpu.dot_dimension_numbers<[1], [0], [0], [1], [0, 0, 1, 1], [], []>} : vector<1x32xf32>, vector<32x32xf32>, vector<1x32xf32> -> vector<1x32xf32>
    %cst_47 = arith.constant 3.200000e+01 : f32
    %72 = vector.broadcast %cst_47 : f32 to vector<1x32xf32>
    %73 = arith.divf %71, %72 : vector<1x32xf32>
    %cst_48 = arith.constant dense<0.000000e+00> : vector<1x32xf32>
    %74 = tpu.matmul %73, %59, %cst_48 {dimension_numbers = #tpu.dot_dimension_numbers<[1], [0], [0], [1], [0, 0, 1, 1], [], []>} : vector<1x32xf32>, vector<32x32xf32>, vector<1x32xf32> -> vector<1x32xf32>
    %cst_49 = arith.constant 9.99999997E-7 : f32
    %75 = vector.broadcast %cst_49 : f32 to vector<1x32xf32>
    %76 = arith.addf %74, %75 : vector<1x32xf32>
    %77 = math.rsqrt %76 : vector<1x32xf32>
    %78 = vector.broadcast %77 : vector<1x32xf32> to vector<32x32xf32>
    %79 = arith.mulf %67, %78 : vector<32x32xf32>
    %80 = vector.broadcast %56 : vector<1x32xf32> to vector<32x32xf32>
    %81 = arith.mulf %79, %80 : vector<32x32xf32>
    %82 = vector.broadcast %57 : vector<1x32xf32> to vector<32x32xf32>
    %83 = arith.addf %81, %82 : vector<32x32xf32>
    %84 = arith.negf %83 : vector<32x32xf32>
    %85 = math.exp %84 : vector<32x32xf32>
    %cst_50 = arith.constant 1.000000e+00 : f32
    %86 = vector.broadcast %cst_50 : f32 to vector<32x32xf32>
    %87 = arith.addf %86, %85 : vector<32x32xf32>
    %88 = arith.divf %86, %87 : vector<32x32xf32>
    %89 = arith.mulf %83, %88 : vector<32x32xf32>
    %c0_51 = arith.constant 0 : index
    %c0_52 = arith.constant 0 : index
    %90 = vector.load %arg13[%c0_51, %c0_52] : memref<1x32xf32, #tpu.memory_space<vmem>>, vector<1x32xf32>
    %c0_53 = arith.constant 0 : index
    %c0_54 = arith.constant 0 : index
    %c0_55 = arith.constant 0 : index
    %91 = vector.load %arg12[%c0_53, %c0_54, %c0_55] : memref<3x32x32xf32, #tpu.memory_space<vmem>>, vector<1x32x32xf32>
    %92 = vector.shape_cast %91 : vector<1x32x32xf32> to vector<32x32xf32>
    %cst_56 = arith.constant dense<0.000000e+00> : vector<32x32xf32>
    %93 = tpu.matmul %89, %92, %cst_56 {dimension_numbers = #tpu.dot_dimension_numbers<[1], [0], [0], [1], [0, 0, 1, 1], [], []>} : vector<32x32xf32>, vector<32x32xf32>, vector<32x32xf32> -> vector<32x32xf32>
    %c1_57 = arith.constant 1 : index
    %c0_58 = arith.constant 0 : index
    %c0_59 = arith.constant 0 : index
    %94 = vector.load %arg12[%c1_57, %c0_58, %c0_59] : memref<3x32x32xf32, #tpu.memory_space<vmem>>, vector<1x32x32xf32>
    %95 = vector.shape_cast %94 : vector<1x32x32xf32> to vector<32x32xf32>
    %cst_60 = arith.constant dense<0.000000e+00> : vector<32x32xf32>
    %96 = tpu.matmul %89, %95, %cst_60 {dimension_numbers = #tpu.dot_dimension_numbers<[1], [0], [0], [1], [0, 0, 1, 1], [], []>} : vector<32x32xf32>, vector<32x32xf32>, vector<32x32xf32> -> vector<32x32xf32>
    %c2_61 = arith.constant 2 : index
    %c0_62 = arith.constant 0 : index
    %c0_63 = arith.constant 0 : index
    %97 = vector.load %arg12[%c2_61, %c0_62, %c0_63] : memref<3x32x32xf32, #tpu.memory_space<vmem>>, vector<1x32x32xf32>
    %98 = vector.shape_cast %97 : vector<1x32x32xf32> to vector<32x32xf32>
    %cst_64 = arith.constant dense<0.000000e+00> : vector<32x32xf32>
    %99 = tpu.matmul %89, %98, %cst_64 {dimension_numbers = #tpu.dot_dimension_numbers<[1], [0], [0], [1], [0, 0, 1, 1], [], []>} : vector<32x32xf32>, vector<32x32xf32>, vector<32x32xf32> -> vector<32x32xf32>
    %cst_65 = arith.constant 0.000000e+00 : f32
    %100 = vector.broadcast %cst_65 : f32 to vector<1x32xf32>
    %101 = vector.extract_strided_slice %93 {offsets = [0, 0], sizes = [31, 32], strides = [1, 1]} : vector<32x32xf32> to vector<31x32xf32>
    %102 = tpu.concatenate %100, %101 in 0 : vector<1x32xf32>, vector<31x32xf32> -> vector<32x32xf32>
    %103 = arith.addf %102, %96 : vector<32x32xf32>
    %cst_66 = arith.constant 0.000000e+00 : f32
    %104 = vector.broadcast %cst_66 : f32 to vector<1x32xf32>
    %105 = vector.extract_strided_slice %99 {offsets = [1, 0], sizes = [31, 32], strides = [1, 1]} : vector<32x32xf32> to vector<31x32xf32>
    %106 = tpu.concatenate %105, %104 in 0 : vector<31x32xf32>, vector<1x32xf32> -> vector<32x32xf32>
    %107 = arith.addf %103, %106 : vector<32x32xf32>
    %108 = vector.broadcast %90 : vector<1x32xf32> to vector<32x32xf32>
    %109 = arith.addf %107, %108 : vector<32x32xf32>
    %110 = arith.addf %1, %109 : vector<32x32xf32>
    %c0_67 = arith.constant 0 : index
    %c0_68 = arith.constant 0 : index
    %c0_69 = arith.constant 0 : index
    %111 = vector.load %arg14[%c0_67, %c0_68, %c0_69] : memref<1x32x32xf32, #tpu.memory_space<vmem>>, vector<1x32x32xf32>
    %112 = vector.shape_cast %111 : vector<1x32x32xf32> to vector<32x32xf32>
    %113 = vector.shape_cast %110 : vector<32x32xf32> to vector<1x32x32xf32>
    tpu.vector_store %arg14[%c0_67, %c0_68, %c0_69], %113 {strides = array<i32>} : memref<1x32x32xf32, #tpu.memory_space<vmem>>, vector<1x32x32xf32>,
    return
  }
  func.func @transform_0(%arg0: i32) -> (i32, i32, i32) {
    %c0_i32 = arith.constant 0 : i32
    %c0_i32_0 = arith.constant 0 : i32
    %c0_i32_1 = arith.constant 0 : i32
    return %arg0, %c0_i32, %c0_i32_0 : i32, i32, i32
  }
  func.func @transform_1(%arg0: i32) -> (i32, i32) {
    %c0_i32 = arith.constant 0 : i32
    %c0_i32_0 = arith.constant 0 : i32
    %c0_i32_1 = arith.constant 0 : i32
    return %c0_i32, %c0_i32_0 : i32, i32
  }
  func.func @transform_2(%arg0: i32) -> (i32, i32) {
    %c0_i32 = arith.constant 0 : i32
    %c0_i32_0 = arith.constant 0 : i32
    %c0_i32_1 = arith.constant 0 : i32
    return %c0_i32, %c0_i32_0 : i32, i32
  }
  func.func @transform_3(%arg0: i32) -> (i32, i32) {
    %c0_i32 = arith.constant 0 : i32
    %c0_i32_0 = arith.constant 0 : i32
    %c0_i32_1 = arith.constant 0 : i32
    return %c0_i32, %c0_i32_0 : i32, i32
  }
  func.func @transform_4(%arg0: i32) -> (i32, i32) {
    %c0_i32 = arith.constant 0 : i32
    %c0_i32_0 = arith.constant 0 : i32
    %c0_i32_1 = arith.constant 0 : i32
    return %c0_i32, %c0_i32_0 : i32, i32
  }
  func.func @transform_5(%arg0: i32) -> (i32, i32, i32) {
    %c0_i32 = arith.constant 0 : i32
    %c0_i32_0 = arith.constant 0 : i32
    %c0_i32_1 = arith.constant 0 : i32
    %c0_i32_2 = arith.constant 0 : i32
    return %c0_i32, %c0_i32_0, %c0_i32_1 : i32, i32, i32
  }
  func.func @transform_6(%arg0: i32) -> (i32, i32) {
    %c0_i32 = arith.constant 0 : i32
    %c0_i32_0 = arith.constant 0 : i32
    %c0_i32_1 = arith.constant 0 : i32
    return %c0_i32, %c0_i32_0 : i32, i32
  }
  func.func @transform_7(%arg0: i32) -> (i32, i32) {
    %c0_i32 = arith.constant 0 : i32
    %c0_i32_0 = arith.constant 0 : i32
    %c0_i32_1 = arith.constant 0 : i32
    return %c0_i32, %c0_i32_0 : i32, i32
  }
  func.func @transform_8(%arg0: i32) -> (i32, i32) {
    %c0_i32 = arith.constant 0 : i32
    %c0_i32_0 = arith.constant 0 : i32
    %c0_i32_1 = arith.constant 0 : i32
    return %c0_i32, %c0_i32_0 : i32, i32
  }
  func.func @transform_9(%arg0: i32) -> (i32, i32) {
    %c0_i32 = arith.constant 0 : i32
    %c0_i32_0 = arith.constant 0 : i32
    %c0_i32_1 = arith.constant 0 : i32
    return %c0_i32, %c0_i32_0 : i32, i32
  }
  func.func @transform_10(%arg0: i32) -> (i32, i32) {
    %c0_i32 = arith.constant 0 : i32
    %c0_i32_0 = arith.constant 0 : i32
    %c0_i32_1 = arith.constant 0 : i32
    return %c0_i32, %c0_i32_0 : i32, i32
  }
  func.func @transform_11(%arg0: i32) -> (i32, i32, i32) {
    %c0_i32 = arith.constant 0 : i32
    %c0_i32_0 = arith.constant 0 : i32
    %c0_i32_1 = arith.constant 0 : i32
    %c0_i32_2 = arith.constant 0 : i32
    return %c0_i32, %c0_i32_0, %c0_i32_1 : i32, i32, i32
  }
  func.func @transform_12(%arg0: i32) -> (i32, i32) {
    %c0_i32 = arith.constant 0 : i32
    %c0_i32_0 = arith.constant 0 : i32
    %c0_i32_1 = arith.constant 0 : i32
    return %c0_i32, %c0_i32_0 : i32, i32
  }
  func.func @transform_13(%arg0: i32) -> (i32, i32, i32) {
    %c0_i32 = arith.constant 0 : i32
    %c0_i32_0 = arith.constant 0 : i32
    %c0_i32_1 = arith.constant 0 : i32
    return %arg0, %c0_i32, %c0_i32_0 : i32, i32, i32
  }
}

module attributes {stable_mosaic.version = 11 : i64} {
  func.func @_gn_silu_conv3_kernel(%arg0: i32, %arg1: memref<1x32x32xf32, #tpu.memory_space<vmem>>, %arg2: memref<1x32xf32, #tpu.memory_space<vmem>>, %arg3: memref<1x32xf32, #tpu.memory_space<vmem>>, %arg4: memref<32x32xf32, #tpu.memory_space<vmem>>, %arg5: memref<32x32xf32, #tpu.memory_space<vmem>>, %arg6: memref<3x32x4xf32, #tpu.memory_space<vmem>>, %arg7: memref<1x4xf32, #tpu.memory_space<vmem>>, %arg8: memref<1x32x4xf32, #tpu.memory_space<vmem>>) attributes {dimension_semantics = [#tpu.dimension_semantics<parallel>], iteration_bounds = array<i64: 2>, scalar_prefetch = 0 : i64, scratch_operands = 0 : i64, tpu.core_type = #tpu.core_type<tc>, window_params = [{transform_indices = @transform_0, window_bounds = array<i64: 1, 32, 32>}, {pipeline_mode = #tpu.pipeline_mode<synchronous>, transform_indices = @transform_1, window_bounds = array<i64: 1, 32>}, {pipeline_mode = #tpu.pipeline_mode<synchronous>, transform_indices = @transform_2, window_bounds = array<i64: 1, 32>}, {pipeline_mode = #tpu.pipeline_mode<synchronous>, transform_indices = @transform_3, window_bounds = array<i64: 32, 32>}, {pipeline_mode = #tpu.pipeline_mode<synchronous>, transform_indices = @transform_4, window_bounds = array<i64: 32, 32>}, {pipeline_mode = #tpu.pipeline_mode<synchronous>, transform_indices = @transform_5, window_bounds = array<i64: 3, 32, 4>}, {pipeline_mode = #tpu.pipeline_mode<synchronous>, transform_indices = @transform_6, window_bounds = array<i64: 1, 4>}, {transform_indices = @transform_7, window_bounds = array<i64: 1, 32, 4>}]} {
    %c0 = arith.constant 0 : index
    %c0_0 = arith.constant 0 : index
    %c0_1 = arith.constant 0 : index
    %0 = vector.load %arg1[%c0, %c0_0, %c0_1] : memref<1x32x32xf32, #tpu.memory_space<vmem>>, vector<1x32x32xf32>
    %1 = vector.shape_cast %0 : vector<1x32x32xf32> to vector<32x32xf32>
    %c0_2 = arith.constant 0 : index
    %c0_3 = arith.constant 0 : index
    %2 = vector.load %arg2[%c0_2, %c0_3] : memref<1x32xf32, #tpu.memory_space<vmem>>, vector<1x32xf32>
    %c0_4 = arith.constant 0 : index
    %c0_5 = arith.constant 0 : index
    %3 = vector.load %arg3[%c0_4, %c0_5] : memref<1x32xf32, #tpu.memory_space<vmem>>, vector<1x32xf32>
    %c0_6 = arith.constant 0 : index
    %c0_7 = arith.constant 0 : index
    %4 = vector.load %arg4[%c0_6, %c0_7] : memref<32x32xf32, #tpu.memory_space<vmem>>, vector<32x32xf32>
    %c0_8 = arith.constant 0 : index
    %c0_9 = arith.constant 0 : index
    %5 = vector.load %arg5[%c0_8, %c0_9] : memref<32x32xf32, #tpu.memory_space<vmem>>, vector<32x32xf32>
    %cst = arith.constant dense<0.000000e+00> : vector<32xf32>
    %6 = vector.multi_reduction <add>, %1, %cst [0] : vector<32x32xf32> to vector<32xf32>
    %7 = vector.shape_cast %6 : vector<32xf32> to vector<1x32xf32>
    %cst_10 = arith.constant dense<0.000000e+00> : vector<1x32xf32>
    %8 = tpu.matmul %7, %4, %cst_10 {dimension_numbers = #tpu.dot_dimension_numbers<[1], [0], [0], [1], [0, 0, 1, 1], [], []>} : vector<1x32xf32>, vector<32x32xf32>, vector<1x32xf32> -> vector<1x32xf32>
    %cst_11 = arith.constant 3.200000e+01 : f32
    %9 = vector.broadcast %cst_11 : f32 to vector<1x32xf32>
    %10 = arith.divf %8, %9 : vector<1x32xf32>
    %cst_12 = arith.constant dense<0.000000e+00> : vector<1x32xf32>
    %11 = tpu.matmul %10, %5, %cst_12 {dimension_numbers = #tpu.dot_dimension_numbers<[1], [0], [0], [1], [0, 0, 1, 1], [], []>} : vector<1x32xf32>, vector<32x32xf32>, vector<1x32xf32> -> vector<1x32xf32>
    %12 = vector.broadcast %11 : vector<1x32xf32> to vector<32x32xf32>
    %13 = arith.subf %1, %12 : vector<32x32xf32>
    %14 = arith.mulf %13, %13 : vector<32x32xf32>
    %cst_13 = arith.constant dense<0.000000e+00> : vector<32xf32>
    %15 = vector.multi_reduction <add>, %14, %cst_13 [0] : vector<32x32xf32> to vector<32xf32>
    %16 = vector.shape_cast %15 : vector<32xf32> to vector<1x32xf32>
    %cst_14 = arith.constant dense<0.000000e+00> : vector<1x32xf32>
    %17 = tpu.matmul %16, %4, %cst_14 {dimension_numbers = #tpu.dot_dimension_numbers<[1], [0], [0], [1], [0, 0, 1, 1], [], []>} : vector<1x32xf32>, vector<32x32xf32>, vector<1x32xf32> -> vector<1x32xf32>
    %cst_15 = arith.constant 3.200000e+01 : f32
    %18 = vector.broadcast %cst_15 : f32 to vector<1x32xf32>
    %19 = arith.divf %17, %18 : vector<1x32xf32>
    %cst_16 = arith.constant dense<0.000000e+00> : vector<1x32xf32>
    %20 = tpu.matmul %19, %5, %cst_16 {dimension_numbers = #tpu.dot_dimension_numbers<[1], [0], [0], [1], [0, 0, 1, 1], [], []>} : vector<1x32xf32>, vector<32x32xf32>, vector<1x32xf32> -> vector<1x32xf32>
    %cst_17 = arith.constant 9.99999997E-7 : f32
    %21 = vector.broadcast %cst_17 : f32 to vector<1x32xf32>
    %22 = arith.addf %20, %21 : vector<1x32xf32>
    %23 = math.rsqrt %22 : vector<1x32xf32>
    %24 = vector.broadcast %23 : vector<1x32xf32> to vector<32x32xf32>
    %25 = arith.mulf %13, %24 : vector<32x32xf32>
    %26 = vector.broadcast %2 : vector<1x32xf32> to vector<32x32xf32>
    %27 = arith.mulf %25, %26 : vector<32x32xf32>
    %28 = vector.broadcast %3 : vector<1x32xf32> to vector<32x32xf32>
    %29 = arith.addf %27, %28 : vector<32x32xf32>
    %30 = arith.negf %29 : vector<32x32xf32>
    %31 = math.exp %30 : vector<32x32xf32>
    %cst_18 = arith.constant 1.000000e+00 : f32
    %32 = vector.broadcast %cst_18 : f32 to vector<32x32xf32>
    %33 = arith.addf %32, %31 : vector<32x32xf32>
    %34 = arith.divf %32, %33 : vector<32x32xf32>
    %35 = arith.mulf %29, %34 : vector<32x32xf32>
    %c0_19 = arith.constant 0 : index
    %c0_20 = arith.constant 0 : index
    %36 = vector.load %arg7[%c0_19, %c0_20] : memref<1x4xf32, #tpu.memory_space<vmem>>, vector<1x4xf32>
    %c0_21 = arith.constant 0 : index
    %c0_22 = arith.constant 0 : index
    %c0_23 = arith.constant 0 : index
    %37 = vector.load %arg6[%c0_21, %c0_22, %c0_23] : memref<3x32x4xf32, #tpu.memory_space<vmem>>, vector<1x32x4xf32>
    %38 = vector.shape_cast %37 : vector<1x32x4xf32> to vector<32x4xf32>
    %cst_24 = arith.constant dense<0.000000e+00> : vector<32x4xf32>
    %39 = tpu.matmul %35, %38, %cst_24 {dimension_numbers = #tpu.dot_dimension_numbers<[1], [0], [0], [1], [0, 0, 1, 1], [], []>} : vector<32x32xf32>, vector<32x4xf32>, vector<32x4xf32> -> vector<32x4xf32>
    %c1 = arith.constant 1 : index
    %c0_25 = arith.constant 0 : index
    %c0_26 = arith.constant 0 : index
    %40 = vector.load %arg6[%c1, %c0_25, %c0_26] : memref<3x32x4xf32, #tpu.memory_space<vmem>>, vector<1x32x4xf32>
    %41 = vector.shape_cast %40 : vector<1x32x4xf32> to vector<32x4xf32>
    %cst_27 = arith.constant dense<0.000000e+00> : vector<32x4xf32>
    %42 = tpu.matmul %35, %41, %cst_27 {dimension_numbers = #tpu.dot_dimension_numbers<[1], [0], [0], [1], [0, 0, 1, 1], [], []>} : vector<32x32xf32>, vector<32x4xf32>, vector<32x4xf32> -> vector<32x4xf32>
    %c2 = arith.constant 2 : index
    %c0_28 = arith.constant 0 : index
    %c0_29 = arith.constant 0 : index
    %43 = vector.load %arg6[%c2, %c0_28, %c0_29] : memref<3x32x4xf32, #tpu.memory_space<vmem>>, vector<1x32x4xf32>
    %44 = vector.shape_cast %43 : vector<1x32x4xf32> to vector<32x4xf32>
    %cst_30 = arith.constant dense<0.000000e+00> : vector<32x4xf32>
    %45 = tpu.matmul %35, %44, %cst_30 {dimension_numbers = #tpu.dot_dimension_numbers<[1], [0], [0], [1], [0, 0, 1, 1], [], []>} : vector<32x32xf32>, vector<32x4xf32>, vector<32x4xf32> -> vector<32x4xf32>
    %cst_31 = arith.constant 0.000000e+00 : f32
    %46 = vector.broadcast %cst_31 : f32 to vector<1x4xf32>
    %47 = vector.extract_strided_slice %39 {offsets = [0, 0], sizes = [31, 4], strides = [1, 1]} : vector<32x4xf32> to vector<31x4xf32>
    %48 = tpu.concatenate %46, %47 in 0 : vector<1x4xf32>, vector<31x4xf32> -> vector<32x4xf32>
    %49 = arith.addf %48, %42 : vector<32x4xf32>
    %cst_32 = arith.constant 0.000000e+00 : f32
    %50 = vector.broadcast %cst_32 : f32 to vector<1x4xf32>
    %51 = vector.extract_strided_slice %45 {offsets = [1, 0], sizes = [31, 4], strides = [1, 1]} : vector<32x4xf32> to vector<31x4xf32>
    %52 = tpu.concatenate %51, %50 in 0 : vector<31x4xf32>, vector<1x4xf32> -> vector<32x4xf32>
    %53 = arith.addf %49, %52 : vector<32x4xf32>
    %54 = vector.broadcast %36 : vector<1x4xf32> to vector<32x4xf32>
    %55 = arith.addf %53, %54 : vector<32x4xf32>
    %c0_33 = arith.constant 0 : index
    %c0_34 = arith.constant 0 : index
    %c0_35 = arith.constant 0 : index
    %56 = vector.load %arg8[%c0_33, %c0_34, %c0_35] : memref<1x32x4xf32, #tpu.memory_space<vmem>>, vector<1x32x4xf32>
    %57 = vector.shape_cast %56 : vector<1x32x4xf32> to vector<32x4xf32>
    %58 = vector.shape_cast %55 : vector<32x4xf32> to vector<1x32x4xf32>
    tpu.vector_store %arg8[%c0_33, %c0_34, %c0_35], %58 {strides = array<i32>} : memref<1x32x4xf32, #tpu.memory_space<vmem>>, vector<1x32x4xf32>,
    return
  }
  func.func @transform_0(%arg0: i32) -> (i32, i32, i32) {
    %c0_i32 = arith.constant 0 : i32
    %c0_i32_0 = arith.constant 0 : i32
    %c0_i32_1 = arith.constant 0 : i32
    return %arg0, %c0_i32, %c0_i32_0 : i32, i32, i32
  }
  func.func @transform_1(%arg0: i32) -> (i32, i32) {
    %c0_i32 = arith.constant 0 : i32
    %c0_i32_0 = arith.constant 0 : i32
    %c0_i32_1 = arith.constant 0 : i32
    return %c0_i32, %c0_i32_0 : i32, i32
  }
  func.func @transform_2(%arg0: i32) -> (i32, i32) {
    %c0_i32 = arith.constant 0 : i32
    %c0_i32_0 = arith.constant 0 : i32
    %c0_i32_1 = arith.constant 0 : i32
    return %c0_i32, %c0_i32_0 : i32, i32
  }
  func.func @transform_3(%arg0: i32) -> (i32, i32) {
    %c0_i32 = arith.constant 0 : i32
    %c0_i32_0 = arith.constant 0 : i32
    %c0_i32_1 = arith.constant 0 : i32
    return %c0_i32, %c0_i32_0 : i32, i32
  }
  func.func @transform_4(%arg0: i32) -> (i32, i32) {
    %c0_i32 = arith.constant 0 : i32
    %c0_i32_0 = arith.constant 0 : i32
    %c0_i32_1 = arith.constant 0 : i32
    return %c0_i32, %c0_i32_0 : i32, i32
  }
  func.func @transform_5(%arg0: i32) -> (i32, i32, i32) {
    %c0_i32 = arith.constant 0 : i32
    %c0_i32_0 = arith.constant 0 : i32
    %c0_i32_1 = arith.constant 0 : i32
    %c0_i32_2 = arith.constant 0 : i32
    return %c0_i32, %c0_i32_0, %c0_i32_1 : i32, i32, i32
  }
  func.func @transform_6(%arg0: i32) -> (i32, i32) {
    %c0_i32 = arith.constant 0 : i32
    %c0_i32_0 = arith.constant 0 : i32
    %c0_i32_1 = arith.constant 0 : i32
    return %c0_i32, %c0_i32_0 : i32, i32
  }
  func.func @transform_7(%arg0: i32) -> (i32, i32, i32) {
    %c0_i32 = arith.constant 0 : i32
    %c0_i32_0 = arith.constant 0 : i32
    %c0_i32_1 = arith.constant 0 : i32
    return %arg0, %c0_i32, %c0_i32_0 : i32, i32, i32
  }
}

</mosaic_0001>

<bundles_post_ra>
// kernel: _lambda_.14
= control target key start
LH: loop header
LB: loop body
LE: loop exit
PB: predicated region body
PF: predicated region fallthrough
CT: control target
= control target key end

     0   :  { %s1790_s25 = smov 0   ;;  %s2053_s0 = inlined_call_operand.vmem [shape: f32[2,16,64], index: 0, kind: input, shape index: {}]   ;;  %s2054_s1 = inlined_call_operand.vmem [shape: f32[1,64], index: 1, kind: input, shape index: {}]   ;;  %s2055_s2 = inlined_call_operand.vmem [shape: f32[1,64], index: 2, kind: input, shape index: {}]   ;;  %s2056_s3 = inlined_call_operand.vmem [shape: f32[64,32], index: 3, kind: input, shape index: {}]   ;;  %s2057_s4 = inlined_call_operand.vmem [shape: f32[32,64], index: 4, kind: input, shape index: {}]   ;;  %s2058_s5 = inlined_call_operand.vmem [shape: f32[64,64], index: 5, kind: input, shape index: {}]   ;;  %s2059_s6 = inlined_call_operand.vmem [shape: f32[64,64], index: 6, kind: input, shape index: {}]   ;;  %s2060_s7 = inlined_call_operand.vmem [shape: f32[64,64], index: 7, kind: input, shape index: {}]   ;;  %s2061_s8 = inlined_call_operand.vmem [shape: f32[64,64], index: 8, kind: input, shape index: {}]   ;;  %s2062_s9 = inlined_call_operand.vmem [shape: f32[1,64], index: 9, kind: input, shape index: {}]   ;;  %s2063_s10 = inlined_call_operand.vmem [shape: f32[1,64], index: 10, kind: input, shape index: {}]   ;;  %s2064_s11 = inlined_call_operand.vmem [shape: f32[1,64], index: 11, kind: input, shape index: {}]   ;;  %s2065_s12 = inlined_call_operand.vmem [shape: f32[1,64], index: 12, kind: input, shape index: {}]   ;;  %s2066_s13 = inlined_call_operand.vmem [shape: f32[2,16,64], index: 13, kind: output, shape index: {}]  }
   0x1 LB: > { %s1427_s26 = sadd.s32 4294967295, %s1716_s25   ;;  %p1431_p0 = scmp.ge.s32.totalorder %s1716_s25, 1  ;;  %s1716_s25 = sphi %s1790_s25, %s23_s25  }
   0x2   : > { %p387_p1 = scmp.lt.s32.totalorder %s1716_s25, 3 }
   0x4   : > { %p388_p2 = pnand %p1431_p0, %p387_p1 }
   0x5   : > { %p431_p3 = scmp.lt.s32.totalorder (!%p388_p2), %s1427_s26, 1 }
   0x6   : > { %391 = sbr.rel (%p388_p2) target bundleno = 1964 (0x7ac), region = 72 }
   0xb   : > { %v452_v0 = vld [vmem:[%s2056_s3 + $0x38] sm:$0xff]  ;;  %v1718_v1 = vmov 0.0   ;;  %v451_v2 = vld [vmem:[%s2056_s3 + $0x30] sm:$0xff]  ;;  %vm1719_vm0 = vmmov 0   ;;  %s2068_s26 = smov (!%p431_p3, %s1427_s26), 1  ;;  %v450_v3 = vld [vmem:[%s2056_s3 + $0x28] sm:$0xff]  ;;  %v616_v27 = vlaneseq }
   0xc   : > { %1540 = vmatprep.subr.mxu0 %v1718_v1  ;;  %1556 = vmatprep.mubr.msk.f32.mxu0 %vm1719_vm0, %v1718_v1  ;;  %s1462_s16 = sshll.u32 %s2068_s26, 4  ;;  %vm457_vm1 = vcmask 523264   ;;  %v449_v4 = vld [vmem:[%s2056_s3 + $0x20] sm:$0xff]  ;;  %v448_v7 = vld [vmem:[%s2056_s3 + $0x18] sm:$0xff]  ;;  %v447_v11 = vld [vmem:[%s2056_s3 + $0x10] sm:$0xff]  ;;  %vm542_vm2 = vcmask 261120  }
   0xd   : > { %1541 = vmatpush3.msra.mxu0 %v452_v0  ;;  %1570 = vmatprep.subr.mxu1 %v1718_v1  ;;  %s435_s21 = scalar_lea.vmem %s2053_s0, %s1462_s16  ;;  %v446_v13 = vld [vmem:[%s2056_s3 + $0x8] sm:$0xff]  ;;  %v445_v15 = vld [vmem:[%s2056_s3] sm:$0xff]  ;;  %v456_v20 = vld [vmem:[%s2057_s4 + $0x18] sm:$0xff]  ;;  %v1884_v28 = vshrl.u32 %v616_v27, 7  ;;  %vm1168_vm3 = vcmask 130048   ;;  %s440_s18 = scalar_lea.vmem %s2066_s13, %s1462_s16 }
   0xe   : > { %1542 = vmatprep.subr.mxu0 %v1718_v1  ;;  %1571 = vmatpush3.msra.mxu1 %v452_v0  ;;  %v1825_v5 = vld [vmem:[%s435_s21] sm:$0xff]  ;;  %v1827_v6 = vld [vmem:[%s435_s21 + $0x8] sm:$0xff]  ;;  %v455_v21 = vld [vmem:[%s2057_s4 + $0x10] sm:$0xff] }
   0xf   : > { %1543 = vmatpush3.msra.mxu0 %v451_v2  ;;  %1572 = vmatprep.subr.mxu1 %v1718_v1  ;;  %v458_v8 = vsel %vm457_vm1, %v1825_v5, 0.0  ;;  %v459_v9 = vsel %vm457_vm1, %v1827_v6, 0.0  ;;  %v454_v22 = vld [vmem:[%s2057_s4 + $0x8] sm:$0xff]  ;;  %v453_v23 = vld [vmem:[%s2057_s4] sm:$0xff]  ;;  %v618_v29 = vsub.s32 0, %v1884_v28  ;;  %v810_v49 = vld [vmem:[%s2058_s5 + $0x38] sm:$0xff] }
  0x10   : > { %1544 = vmatprep.subr.mxu0 %v1718_v1  ;;  %1573 = vmatpush3.msra.mxu1 %v451_v2  ;;  %v460_v10 = vadd.f32 %v459_v9, %v458_v8  ;;  %v906_v50 = vld [vmem:[%s2059_s6 + $0x38] sm:$0xff]  ;;  %v809_v51 = vld [vmem:[%s2058_s5 + $0x30] sm:$0xff]  ;;  %v808_v53 = vld [vmem:[%s2058_s5 + $0x28] sm:$0xff] }
  0x11   : > { %1545 = vmatpush3.msra.mxu0 %v450_v3  ;;  %1574 = vmatprep.subr.mxu1 %v1718_v1  ;;  %v905_v52 = vld [vmem:[%s2059_s6 + $0x30] sm:$0xff]  ;;  %v904_v54 = vld [vmem:[%s2059_s6 + $0x28] sm:$0xff]  ;;  %v807_v55 = vld [vmem:[%s2058_s5 + $0x20] sm:$0xff] }
  0x12   : > { %1546 = vmatprep.subr.mxu0 %v1718_v1  ;;  %1575 = vmatpush3.msra.mxu1 %v450_v3  ;;  %v461_v12 = vrot.slane %v460_v10, 4  ;;  %v903_v56 = vld [vmem:[%s2059_s6 + $0x20] sm:$0xff]  ;;  %v806_v57 = vld [vmem:[%s2058_s5 + $0x18] sm:$0xff]  ;;  %v805_v59 = vld [vmem:[%s2058_s5 + $0x10] sm:$0xff] }
  0x13   : > { %1547 = vmatpush3.msra.mxu0 %v449_v4  ;;  %1576 = vmatprep.subr.mxu1 %v1718_v1  ;;  %v902_v58 = vld [vmem:[%s2059_s6 + $0x18] sm:$0xff]  ;;  %v901_v60 = vld [vmem:[%s2059_s6 + $0x10] sm:$0xff]  ;;  %v804_v61 = vld [vmem:[%s2058_s5 + $0x8] sm:$0xff] }
  0x14   : > { %1548 = vmatprep.subr.mxu0 %v1718_v1  ;;  %1577 = vmatpush3.msra.mxu1 %v449_v4  ;;  %v462_v14 = vadd.f32 %v461_v12, %v460_v10  ;;  %v900_v62 = vld [vmem:[%s2059_s6 + $0x8] sm:$0xff]  ;;  %v803_v63 = vld [vmem:[%s2058_s5] sm:$0xff] }
  0x15   : > { %1549 = vmatpush3.msra.mxu0 %v448_v7  ;;  %1578 = vmatprep.subr.mxu1 %v1718_v1  ;;  %v899_v0 = vld [vmem:[%s2059_s6] sm:$0xff] }
  0x16   : > { %1550 = vmatprep.subr.mxu0 %v1718_v1  ;;  %1579 = vmatpush3.msra.mxu1 %v448_v7  ;;  %v463_v16 = vrot.slane %v462_v14, 2  ;;  %v1440_v9 = vld [vmem:[%s2054_s1] ss:$0 sm:$0xff] }
  0x17   : > { %1551 = vmatpush3.msra.mxu0 %v447_v11  ;;  %1580 = vmatprep.subr.mxu1 %v1718_v1  ;;  %v1441_v12 = vld [vmem:[%s2055_s2] ss:$0 sm:$0xff] }
  0x18   : > { %1552 = vmatprep.subr.mxu0 %v1718_v1  ;;  %1581 = vmatpush3.msra.mxu1 %v447_v11  ;;  %v464_v17 = vadd.f32 %v463_v16, %v462_v14  ;;  %v1442_v28 = vld [vmem:[%s2062_s9] ss:$0 sm:$0xff] }
  0x19   : > { %1553 = vmatpush3.msra.mxu0 %v446_v13  ;;  %1582 = vmatprep.subr.mxu1 %v1718_v1 }
  0x1a   : > { %1554 = vmatprep.subr.mxu0 %v1718_v1  ;;  %1583 = vmatpush3.msra.mxu1 %v446_v13  ;;  %v465_v18 = vrot.slane %v464_v17, 1 }
  0x1b   : > { %1555 = vmatpush3.msra.mxu0 %v445_v15  ;;  %1584 = vmatprep.subr.mxu1 %v1718_v1 }
  0x1c   : > { %1559 = vmatprep.subr.mxu0 %v1718_v1  ;;  %1585 = vmatpush3.msra.mxu1 %v445_v15  ;;  %v466_v19 = vadd.f32 %v465_v18, %v464_v17  ;;  %v995_v17 = vld [vmem:[%s2060_s7 + $0x30] sm:$0xff]  ;;  %v994_v18 = vld [vmem:[%s2060_s7 + $0x28] sm:$0xff] }
  0x1d   : > { %1586 = vmatprep.mubr.msk.f32.mxu1 %vm1719_vm0, %v1718_v1  ;;  %1619 = vmatprep.subr.mxu1 %v906_v50 }
  0x1e   : > { %1557 = vmatmul.mubr.msk.f32.vlgmr.msra.gmra.mxu0 %vm457_vm1, %v466_v19  ;;  %v993_v19 = vld [vmem:[%s2060_s7 + $0x20] sm:$0xff] }
  0x1f   : > { %1560 = vmatpush3.msra.mxu0 %v456_v20  ;;  %1567 = vmatprep.mubr.msk.f32.mxu0 %vm1719_vm0, %v1718_v1 }
  0x20   : > { %1561 = vmatprep.subr.mxu0 %v1718_v1 }
  0x21   : > { %1562 = vmatpush3.msra.mxu0 %v455_v21 }
  0x22   : > { %1563 = vmatprep.subr.mxu0 %v1718_v1 }
  0x23   : > { %1564 = vmatpush3.msra.mxu0 %v454_v22 }
  0x24   : > { %1565 = vmatprep.subr.mxu0 %v1718_v1 }
  0x25   : > { %1566 = vmatpush3.msra.mxu0 %v453_v23 }
  0x26   : > { %1589 = vmatprep.subr.mxu0 %v1718_v1 }
  0xde   : > { %v536_v24 = vpop.f32.mrf.mxu0 }
  0xdf   : > { %v541_v25 = vmul.f32 0.03125, %v536_v24  ;;  %v1445_v24 = vld [vmem:[%s2063_s10] ss:$0 sm:$0xff] }
  0xe0   : > { %v1558_v26 = vpop.f32.mrf.mxu0 }
  0xe1   : > { %1568 = vmatmul.mubr.msk.f32.vlgmr.msra.gmra.mxu0 %vm542_vm2, %v541_v25 }
  0xe2   : > { %1590 = vmatpush3.msra.mxu0 %v456_v20  ;;  %1597 = vmatprep.mubr.msk.f32.mxu0 %vm1719_vm0, %v1718_v1  ;;  %v992_v20 = vld [vmem:[%s2060_s7 + $0x18] sm:$0xff] }
  0xe3   : > { %1591 = vmatprep.subr.mxu0 %v1718_v1 }
  0xe4   : > { %1592 = vmatpush3.msra.mxu0 %v455_v21  ;;  %v991_v21 = vld [vmem:[%s2060_s7 + $0x10] sm:$0xff] }
  0xe5   : > { %1593 = vmatprep.subr.mxu0 %v1718_v1 }
  0xe6   : > { %1594 = vmatpush3.msra.mxu0 %v454_v22  ;;  %v990_v22 = vld [vmem:[%s2060_s7 + $0x8] sm:$0xff] }
  0xe7   : > { %1595 = vmatprep.subr.mxu0 %v1718_v1  ;;  %v996_v1 = vld [vmem:[%s2060_s7 + $0x38] sm:$0xff] }
  0xe8   : > { %1596 = vmatpush3.msra.mxu0 %v453_v23  ;;  %v989_v23 = vld [vmem:[%s2060_s7] sm:$0xff] }
  0xe9   : > { %1600 = vmatprep.subr.mxu0 %v810_v49 }
 0x1a1   : > { %v612_v30 = vpop.f32.mrf.mxu0 }
 0x1a2   : > { %v619_v31 = vrot.slane %v612_v30, %v618_v29 }
 0x1a3   : > { %v1569_v32 = vpop.f32.mrf.mxu0 }
 0x1a4   : > { %v1890_v33 = vsub.f32 %v1825_v5, %v619_v31  ;;  %v1893_v34 = vsub.f32 %v1827_v6, %v619_v31 }
 0x1a6   : > { %v622_v35 = vmul.f32 %v1890_v33, %v1890_v33  ;;  %v623_v36 = vmul.f32 %v1893_v34, %v1893_v34 }
 0x1a8   : > { %v624_v37 = vsel %vm457_vm1, %v622_v35, 0.0  ;;  %v625_v38 = vsel %vm457_vm1, %v623_v36, 0.0 }
 0x1a9   : > { %v626_v39 = vadd.f32 %v625_v38, %v624_v37 }
 0x1ab   : > { %v627_v40 = vrot.slane %v626_v39, 4 }
 0x1ad   : > { %v628_v41 = vadd.f32 %v627_v40, %v626_v39 }
 0x1af   : > { %v629_v42 = vrot.slane %v628_v41, 2 }
 0x1b1   : > { %v630_v43 = vadd.f32 %v629_v42, %v628_v41 }
 0x1b3   : > { %v631_v44 = vrot.slane %v630_v43, 1 }
 0x1b5   : > { %v632_v45 = vadd.f32 %v631_v44, %v630_v43 }
 0x1b7   : > { %1587 = vmatmul.mubr.msk.f32.vlgmr.msra.gmra.mxu1 %vm457_vm1, %v632_v45 }
 0x1b8   : > { %1620 = vmatpush3.msra.mxu1 %v906_v50 }
 0x1b9   : > { %1621 = vmatprep.subr.mxu1 %v905_v52 }
 0x1ba   : > { %1622 = vmatpush3.msra.mxu1 %v905_v52 }
 0x1bb   : > { %1623 = vmatprep.subr.mxu1 %v904_v54 }
 0x1bc   : > { %1624 = vmatpush3.msra.mxu1 %v904_v54 }
 0x1bd   : > { %1625 = vmatprep.subr.mxu1 %v903_v56 }
 0x1be   : > { %1626 = vmatpush3.msra.mxu1 %v903_v56 }
 0x1bf   : > { %1627 = vmatprep.subr.mxu1 %v902_v58 }
 0x1c0   : > { %1628 = vmatpush3.msra.mxu1 %v902_v58 }
 0x1c1   : > { %1629 = vmatprep.subr.mxu1 %v901_v60 }
 0x1c2   : > { %1630 = vmatpush3.msra.mxu1 %v901_v60 }
 0x1c3   : > { %1631 = vmatprep.subr.mxu1 %v900_v62 }
 0x1c4   : > { %1632 = vmatpush3.msra.mxu1 %v900_v62  ;;  %v1278_v62 = vld [vmem:[%s2061_s8 + $0x30] sm:$0xff] }
 0x1c5   : > { %1633 = vmatprep.subr.mxu1 %v899_v0 }
 0x1c6   : > { %1634 = vmatpush3.msra.mxu1 %v899_v0  ;;  %v1276_v0 = vld [vmem:[%s2061_s8 + $0x20] sm:$0xff] }
 0x277   : > { %v702_v46 = vpop.f32.mrf.mxu1 }
 0x278   : > { %v706_v47 = vmul.f32 0.03125, %v702_v46 }
 0x279   : > { %v1588_v48 = vpop.f32.mrf.mxu1 }
 0x27a   : > { %1598 = vmatmul.mubr.msk.f32.vlgmr.msra.gmra.mxu0 %vm542_vm2, %v706_v47 }
 0x27b   : > { %1601 = vmatpush3.msra.mxu0 %v810_v49 }
 0x27c   : > { %1602 = vmatprep.subr.mxu0 %v809_v51 }
 0x27d   : > { %1603 = vmatpush3.msra.mxu0 %v809_v51 }
 0x27e   : > { %1604 = vmatprep.subr.mxu0 %v808_v53 }
 0x27f   : > { %1605 = vmatpush3.msra.mxu0 %v808_v53 }
 0x280   : > { %1606 = vmatprep.subr.mxu0 %v807_v55 }
 0x281   : > { %1607 = vmatpush3.msra.mxu0 %v807_v55  ;;  %v1279_v55 = vld [vmem:[%s2061_s8 + $0x38] sm:$0xff] }
 0x282   : > { %1608 = vmatprep.subr.mxu0 %v806_v57 }
 0x283   : > { %1609 = vmatpush3.msra.mxu0 %v806_v57 }
 0x284   : > { %1610 = vmatprep.subr.mxu0 %v805_v59 }
 0x285   : > { %1611 = vmatpush3.msra.mxu0 %v805_v59 }
 0x286   : > { %1612 = vmatprep.subr.mxu0 %v804_v61 }
 0x287   : > { %1613 = vmatpush3.msra.mxu0 %v804_v61 }
 0x288   : > { %1614 = vmatprep.subr.mxu0 %v803_v63 }
 0x289   : > { %1615 = vmatpush3.msra.mxu0 %v803_v63  ;;  %v1277_v63 = vld [vmem:[%s2061_s8 + $0x28] sm:$0xff] }
 0x28a   : > { %1638 = vmatprep.subr.mxu0 %v996_v1 }
 0x33a   : > { %v776_v2 = vpop.f32.mrf.mxu0 }
 0x33b   : > { %v777_v3 = vadd.f32 1e-06, %v776_v2  ;;  %v1274_v2 = vld [vmem:[%s2061_s8 + $0x10] sm:$0xff] }
 0x33c   : > { %v1599_v4 = vpop.f32.mrf.mxu0 }
 0x33d   : > { %1700 = vrsqrt.f32 %v777_v3  ;;  %v1273_v3 = vld [vmem:[%s2061_s8 + $0x8] sm:$0xff]  ;;  %v1272_v4 = vld [vmem:[%s2061_s8] sm:$0xff] }
 0x34a   : > { %v1701_v7 = vpop.eup %1700 }
 0x34b   : > { %v784_v8 = vrot.slane %v1701_v7, %v618_v29 }
 0x34d   : > { %v785_v10 = vmul.f32 %v784_v8, %v1890_v33  ;;  %v786_v11 = vmul.f32 %v784_v8, %v1893_v34  ;;  %v1448_v34 = vld [vmem:[%s2064_s11] ss:$0 sm:$0xff] }
 0x34f   : > { %v793_v13 = vmul.f32 %v1440_v9, %v785_v10  ;;  %v794_v14 = vmul.f32 %v1440_v9, %v786_v11  ;;  %v1457_v9 = vld [vmem:[%s2065_s12] ss:$0 sm:$0xff] }
 0x351   : > { %v801_v15 = vadd.f32 %v1441_v12, %v793_v13  ;;  %v802_v16 = vadd.f32 %v1441_v12, %v794_v14 }
 0x353   : > { %1616 = vmatprep.mubr.msk.f32.mxu0 %vm457_vm1, %v801_v15  ;;  %1635 = vmatprep.mubr.msk.f32.mxu1 %vm457_vm1, %v801_v15 }
 0x354   : > { %1617 = vmatmul.mubr.msk.f32.vlgmr.msra.gmra.mxu0 %vm457_vm1, %v802_v16  ;;  %1636 = vmatmul.mubr.msk.f32.vlgmr.msra.gmra.mxu1 %vm457_vm1, %v802_v16 }
 0x355   : > { %1639 = vmatpush3.msra.mxu0 %v996_v1  ;;  %1654 = vmatprep.mubr.msk.f32.mxu0 %vm457_vm1, %v801_v15  ;;  %v1275_v1 = vld [vmem:[%s2061_s8 + $0x18] sm:$0xff] }
 0x356   : > { %1640 = vmatprep.subr.mxu0 %v995_v17 }
 0x357   : > { %1641 = vmatpush3.msra.mxu0 %v995_v17 }
 0x358   : > { %1642 = vmatprep.subr.mxu0 %v994_v18 }
 0x359   : > { %1643 = vmatpush3.msra.mxu0 %v994_v18 }
 0x35a   : > { %1644 = vmatprep.subr.mxu0 %v993_v19 }
 0x35b   : > { %1645 = vmatpush3.msra.mxu0 %v993_v19 }
 0x35c   : > { %1646 = vmatprep.subr.mxu0 %v992_v20 }
 0x35d   : > { %1647 = vmatpush3.msra.mxu0 %v992_v20 }
 0x35e   : > { %1648 = vmatprep.subr.mxu0 %v991_v21 }
 0x35f   : > { %1649 = vmatpush3.msra.mxu0 %v991_v21 }
 0x360   : > { %1650 = vmatprep.subr.mxu0 %v990_v22 }
 0x361   : > { %1651 = vmatpush3.msra.mxu0 %v990_v22 }
 0x362   : > { %1652 = vmatprep.subr.mxu0 %v989_v23 }
 0x363   : > { %1653 = vmatpush3.msra.mxu0 %v989_v23 }
 0x364   : > { %1655 = vmatmul.mubr.msk.f32.vlgmr.msra.gmra.mxu0 %vm457_vm1, %v802_v16 }
 0x414   : > { %v1618_v25 = vpop.f32.mrf.mxu0  ;;  %v1637_v26 = vpop.f32.mrf.mxu1 }
 0x415   : > { %v986_v27 = vadd.f32 %v1637_v26, %v1445_v24  ;;  %v896_v33 = vadd.f32 %v1618_v25, %v1442_v28 }
 0x416   : > { %v890_v29 = vpop.f32.mrf.mxu0  ;;  %v980_v30 = vpop.f32.mrf.mxu1 }
 0x417   : > { %v891_v31 = vadd.f32 %v1442_v28, %v890_v29  ;;  %v981_v32 = vadd.f32 %v1445_v24, %v980_v30  ;;  %1657 = vmatprep.subr.msk.mxu1 %vm457_vm1, %v986_v27 }
 0x418   : > { %1658 = vmatpush3.xpose.msk.msra.mxu1 %vm457_vm1, %v986_v27 }
 0x419   : > { %1659 = vmatprep.subr.msk.mxu1 %vm457_vm1, %v981_v32  ;;  %1661 = vmatprep.mubr.msk.f32.mxu1 %vm457_vm1, %v891_v31 }
 0x41c   : > { %1660 = vmatpush3.xpose.msk.msra.mxu1 %vm457_vm1, %v981_v32 }
 0x41f   : > { %1662 = vmatmul.mubr.msk.f32.vlgmr.msra.gmra.mxu1 %vm457_vm1, %v896_v33 }
 0x424   : > { %v1656_v35 = vpop.f32.mrf.mxu0 }
 0x425   : > { %v1076_v36 = vadd.f32 %v1656_v35, %v1448_v34 }
 0x426   : > { %v1070_v37 = vpop.f32.mrf.mxu0 }
 0x427   : > { %v1071_v38 = vadd.f32 %v1448_v34, %v1070_v37  ;;  %1664 = vmatprep.subr.mxu1 %v1076_v36 }
 0x428   : > { %1665 = vmatpush3.msra.mxu1 %v1076_v36 }
 0x429   : > { %1666 = vmatprep.subr.mxu1 %v1071_v38 }
 0x42a   : > { %1667 = vmatpush3.msra.mxu1 %v1071_v38 }
 0x42b   : > { %1671 = vmatprep.subr.mxu1 %v1279_v55 }
 0x4df   : > { %v1663_v39 = vpop.f32.mrf.mxu1 }
 0x4e0   : > { %v1167_v42 = vmul.f32 0.125, %v1663_v39 }
 0x4e1   : > { %v1157_v40 = vpop.f32.mrf.mxu1 }
 0x4e2   : > { %v1166_v41 = vmul.f32 0.125, %v1157_v40  ;;  %v1172_v44 = vsel %vm1168_vm3, %v1167_v42, -inf }
 0x4e4   : > { %v1169_v43 = vsel %vm1168_vm3, %v1166_v41, -inf }
 0x4e5   : > { %1170 = vmax.xlane.f32.xlu0 %v1169_v43 }
 0x4e9   : > { %1173 = vmax.xlane.f32.xlu0 %v1172_v44 }
 0x56e   : > { %v1171_v45 = vpop.xlane.xlu0 %1170 }
 0x56f   : > { %v1175_v46 = vsub.f32 %v1166_v41, %v1171_v45 }
 0x571   : > { %v1177_v47 = vmul.f32 1.442695, %v1175_v46 }
 0x572   : > { %v1174_v48 = vpop.xlane.xlu0 %1173 }
 0x573   : > { %1702 = vpow2.f32 %v1177_v47  ;;  %v1176_v49 = vsub.f32 %v1167_v42, %v1174_v48 }
 0x575   : > { %v1179_v50 = vmul.f32 1.442695, %v1176_v49 }
 0x577   : > { %1704 = vpow2.f32 %v1179_v50 }
 0x580   : > { %v1703_v51 = vpop.eup %1702 }
 0x581   : > { %v1181_v52 = vsel %vm1168_vm3, %v1703_v51, 0.0 }
 0x582   : > { %1182 = vadd.xlane.f32.xlu1 %v1181_v52 }
 0x584   : > { %v1705_v53 = vpop.eup %1704 }
 0x585   : > { %v1184_v54 = vsel %vm1168_vm3, %v1705_v53, 0.0 }
 0x586   : > { %1185 = vadd.xlane.f32.xlu1 %v1184_v54 }
 0x60b   : > { %v1183_v56 = vpop.xlane.xlu1 %1182 }
 0x60c   : > { %1706 = vrcp.f32 %v1183_v56 }
 0x60f   : > { %v1186_v57 = vpop.xlane.xlu1 %1185 }
 0x610   : > { %1708 = vrcp.f32 %v1186_v57 }
 0x619   : > { %v1707_v58 = vpop.eup %1706 }
 0x61a   : > { %v1189_v59 = vmul.f32 %v1707_v58, %v1703_v51 }
 0x61c   : > { %1668 = vmatprep.mubr.msk.f32.mxu1 %vm1168_vm3, %v1189_v59 }
 0x61d   : > { %v1709_v60 = vpop.eup %1708 }
 0x61e   : > { %v1190_v61 = vmul.f32 %v1709_v60, %v1705_v53 }
 0x620   : > { %1669 = vmatmul.mubr.msk.f32.vlgmr.msra.gmra.mxu1 %vm1168_vm3, %v1190_v61 }
 0x621   : > { %1672 = vmatpush3.msra.mxu1 %v1279_v55 }
 0x622   : > { %1673 = vmatprep.subr.mxu1 %v1278_v62 }
 0x623   : > { %1674 = vmatpush3.msra.mxu1 %v1278_v62 }
 0x624   : > { %1675 = vmatprep.subr.mxu1 %v1277_v63 }
 0x625   : > { %1676 = vmatpush3.msra.mxu1 %v1277_v63 }
 0x626   : > { %1677 = vmatprep.subr.mxu1 %v1276_v0 }
 0x627   : > { %1678 = vmatpush3.msra.mxu1 %v1276_v0 }
 0x628   : > { %1679 = vmatprep.subr.mxu1 %v1275_v1 }
 0x629   : > { %1680 = vmatpush3.msra.mxu1 %v1275_v1 }
 0x62a   : > { %1681 = vmatprep.subr.mxu1 %v1274_v2 }
 0x62b   : > { %1682 = vmatpush3.msra.mxu1 %v1274_v2 }
 0x62c   : > { %1683 = vmatprep.subr.mxu1 %v1273_v3 }
 0x62d   : > { %1684 = vmatpush3.msra.mxu1 %v1273_v3 }
 0x62e   : > { %1685 = vmatprep.subr.mxu1 %v1272_v4 }
 0x62f   : > { %1686 = vmatpush3.msra.mxu1 %v1272_v4 }
 0x6e0   : > { %v1670_v7 = vpop.f32.mrf.mxu1 }
 0x6e2   : > { %v1263_v8 = vpop.f32.mrf.mxu1 }
 0x6e3   : > { %1687 = vmatprep.mubr.msk.f32.mxu1 %vm457_vm1, %v1263_v8 }
 0x6e4   : > { %1688 = vmatmul.mubr.msk.f32.vlgmr.msra.gmra.mxu1 %vm457_vm1, %v1670_v7 }
 0x7a4   : > { %v1689_v10 = vpop.f32.mrf.mxu1 }
 0x7a5   : > { %v1365_v11 = vadd.f32 %v1689_v10, %v1457_v9 }
 0x7a6   : > { %v1359_v12 = vpop.f32.mrf.mxu1 }
 0x7a7   : > { %v1369_v13 = vadd.f32 %v1365_v11, %v1827_v6  ;;  %v1360_v14 = vadd.f32 %v1457_v9, %v1359_v12 }
 0x7a9   : > { %1371 = vst.msk [vmem:[%s440_s18 + $0x8] sm:$0xff] %vm457_vm1, %v1369_v13  ;;  %v1368_v15 = vadd.f32 %v1360_v14, %v1825_v5 }
 0x7ab   : > { %1370 = vst.msk [vmem:[%s440_s18] sm:$0xff] %vm457_vm1, %v1368_v15 }
 0x7ac PF: > { %s23_s25 = sadd.s32 1, %s1716_s25  }
 0x7ad   : > { %p20_p4 = scmp.ge.s32.totalorder %s23_s25, 4  }
 0x7af   :  { %22 = sbr.rel (!%p20_p4) target bundleno = 1 (0x1), region = 102 }

// kernel: _lambda_.12
= control target key start
LH: loop header
LB: loop body
LE: loop exit
PB: predicated region body
PF: predicated region fallthrough
CT: control target
= control target key end

     0   :  { %8 = vsyncpa [#allocation3], 0  ;;  %s654_s12 = smov 0   ;;  %s701_s0 = inlined_call_operand.vmem [shape: f32[2,16,8], index: 0, kind: input, shape index: {}]   ;;  %s702_s1 = inlined_call_operand.hbm [shape: f32[3,8,64], index: 1, kind: input, shape index: {}]   ;;  %s703_s2 = inlined_call_operand.vmem [shape: f32[1,64], index: 2, kind: input, shape index: {}]   ;;  %s704_s3 = inlined_call_operand.vmem [shape: f32[2,16,64], index: 3, kind: output, shape index: {}]  }
   0x1 LB: > { %s526_s13 = sadd.s32 4294967295, %s629_s12   ;;  %p528_p0 = scmp.ge.s32.totalorder %s629_s12, 1  ;;  %s629_s12 = sphi %s654_s12, %s14_s12  }
   0x2   : > { %p113_p1 = scmp.lt.s32.totalorder %s629_s12, 3  ;;  %s631_s14 = smov [#allocation2]  }
   0x3   : > { %s125_s15 = sshll.u32 %s631_s14, 4  ;;  %p580_p3 = scmp.eq.s32.totalorder %s526_s13, 0  ;;  %s126_s15 = int_to_ptr.vmem [resolvable:$true] %s125_s15 }
   0x4   : > { %p662_p2 = pnand %p528_p0, %p113_p1  ;;  %s604_s17 = scalar_lea.vmem %s126_s15, 384 }
   0x5   : > { %p605_p7 = scmp.ne.s32.totalorder %s126_s15, %s604_s17  ;;  %p612_p10 = scmp.lt.s32.totalorder %s126_s15, %s126_s15 }
   0x6   : > { %p576_p4 = pneg %p662_p2  ;;  %p613_p11 = scmp.lt.s32.totalorder %s604_s17, %s604_s17 }
   0x8   : > { %p577_p5 = pnand %p580_p3, %p576_p4  ;;  %p614_p12 = por %p613_p11, %p612_p10 }
   0xa   : > { %p595_p6 = pneg %p577_p5 }
   0xc   : > { %p607_p8 = pnand %p605_p7, %p595_p6 }
   0xe   : > { %p608_p9 = pneg %p607_p8 }
  0x10   : > { %p615_p13 = pnand %p614_p12, %p608_p9 }
  0x12   : > { %618 = shalt.err (!%p615_p13)
}
  0x13   : > { %s632_s18 = smov 128   ;;  %s633_s19 = smov 8  }
  0x14   : > { %579 = dma.hbm_to_vmem [thread:$0]  (!%p577_p5), %s702_s1, 384, %s126_s15, [#allocation3], %s632_s18, %s632_s18, %s633_s19  }
  0x15   : > { %152 = sbr.rel (%p662_p2) target bundleno = 241 (0xf1), region = 32 }
  0x1a   : > { %624 = dma.done.wait (%p580_p3), [#allocation3], 384  }
  0x1b   : > { %626 = vsyncadd (%p580_p3), [#allocation3], 4294966912  ;;  %p176_p0 = scmp.lt.s32.totalorder %s526_s13, 1  ;;  %vm190_vm0 = vcmask 64512   ;;  %v189_v0 = vld [vmem:[#allocation2] sm:$0xff]  ;;  %v350_v3 = vld [vmem:[#allocation2 + $0x10] sm:$0xff] }
  0x1c   : > { %557 = vmatprep.subr.mxu0 %v189_v0  ;;  %v273_v4 = vld [vmem:[#allocation2 + $0x8] sm:$0xff]  ;;  %vm428_vm1 = vcmask 1040384   ;;  %vm439_vm2 = vcmask 1046528   ;;  %v543_v17 = vld [vmem:[%s703_s2] ss:$0 sm:$0xff]  ;;  %vm456_vm3 = vcmask 523264  }
  0x1d   : > { %s707_s13 = smov (!%p176_p0, %s526_s13), 1  ;;  %558 = vmatpush3.msra.mxu0 %v189_v0  ;;  %562 = vmatprep.subr.mxu1 %v273_v4 }
  0x1e   : > { %s546_s22 = sshll.u32 %s707_s13, 4  ;;  %567 = vmatprep.subr.mxu0 %v350_v3  ;;  %563 = vmatpush3.msra.mxu1 %v273_v4 }
  0x1f   : > { %s180_s25 = scalar_lea.vmem %s701_s0, %s546_s22  ;;  %s185_s30 = scalar_lea.vmem %s704_s3, %s546_s22 }
  0x20   : > { %v186_v1 = vld [vmem:[%s180_s25] sm:$0xff]  ;;  %v187_v2 = vld [vmem:[%s180_s25 + $0x8] sm:$0xff] }
  0x21   : > { %559 = vmatprep.mubr.msk.f32.mxu0 %vm190_vm0, %v186_v1  ;;  %564 = vmatprep.mubr.msk.f32.mxu1 %vm190_vm0, %v186_v1 }
  0x22   : > { %560 = vmatmul.mubr.msk.f32.vlgmr.msra.gmra.mxu0 %vm190_vm0, %v187_v2  ;;  %565 = vmatmul.mubr.msk.f32.vlgmr.msra.gmra.mxu1 %vm190_vm0, %v187_v2 }
  0x23   : > { %568 = vmatpush3.msra.mxu0 %v350_v3  ;;  %569 = vmatprep.mubr.msk.f32.mxu0 %vm190_vm0, %v186_v1 }
  0x26   : > { %570 = vmatmul.mubr.msk.f32.vlgmr.msra.gmra.mxu0 %vm190_vm0, %v187_v2 }
  0xe2   : > { %v561_v5 = vpop.f32.mrf.mxu0  ;;  %v566_v9 = vpop.f32.mrf.mxu1 }
  0xe3   : > { %v430_v7 = vrot.slane %v561_v5, 7 }
  0xe4   : > { %v263_v6 = vpop.f32.mrf.mxu0  ;;  %v340_v13 = vpop.f32.mrf.mxu1 }
  0xe5   : > { %v429_v8 = vrot.slane %v263_v6, 7 }
  0xe6   : > { %v571_v10 = vpop.f32.mrf.mxu0 }
  0xe7   : > { %v431_v11 = vsel %vm428_vm1, %v429_v8, %v430_v7  ;;  %v441_v12 = vrot.slane %v571_v10, 1  ;;  %v434_v14 = vsel %vm428_vm1, 0.0, %v429_v8 }
  0xe8   : > { %v436_v15 = vadd.f32 %v566_v9, %v431_v11  ;;  %v417_v16 = vpop.f32.mrf.mxu0  ;;  %v435_v21 = vadd.f32 %v434_v14, %v340_v13 }
  0xe9   : > { %v445_v18 = vsel %vm439_vm2, %v441_v12, 0.0  ;;  %v440_v19 = vrot.slane %v417_v16, 1 }
  0xea   : > { %v447_v20 = vadd.f32 %v445_v18, %v436_v15 }
  0xeb   : > { %v442_v22 = vsel %vm439_vm2, %v440_v19, %v441_v12 }
  0xec   : > { %v455_v23 = vadd.f32 %v543_v17, %v447_v20  ;;  %v446_v24 = vadd.f32 %v442_v22, %v435_v21 }
  0xee   : > { %458 = vst.msk [vmem:[%s185_s30 + $0x8] sm:$0xff] %vm456_vm3, %v455_v23  ;;  %v454_v25 = vadd.f32 %v543_v17, %v446_v24 }
  0xf0   : > { %457 = vst.msk [vmem:[%s185_s30] sm:$0xff] %vm456_vm3, %v454_v25 }
  0xf1 PF: > { %s14_s12 = sadd.s32 1, %s629_s12  }
  0xf2   : > { %p11_p1 = scmp.ge.s32.totalorder %s14_s12, 4  }
  0xf4   :  { %13 = sbr.rel (!%p11_p1) target bundleno = 1 (0x1), region = 69 }
  0xf9   :  { %480 = vsyncpa [#allocation3], 1 }
  0xfa   :  { %482 = vsyncpa [#allocation3 + $0x1], 1 }

// kernel: _lambda_.15
= control target key start
LH: loop header
LB: loop body
LE: loop exit
PB: predicated region body
PF: predicated region fallthrough
CT: control target
= control target key end

     0   :  { %s2356_s25 = smov 0   ;;  %s2776_s0 = inlined_call_operand.vmem [shape: f32[2,16,64], index: 0, kind: input, shape index: {}]   ;;  %s2777_s1 = inlined_call_operand.vmem [shape: f32[1,64], index: 1, kind: input, shape index: {}]   ;;  %s2778_s2 = inlined_call_operand.vmem [shape: f32[1,64], index: 2, kind: input, shape index: {}]   ;;  %s2779_s3 = inlined_call_operand.vmem [shape: f32[64,32], index: 3, kind: input, shape index: {}, may-alias: {3,9}]   ;;  %s2780_s4 = inlined_call_operand.vmem [shape: f32[32,64], index: 4, kind: input, shape index: {}, may-alias: {4,10}]   ;;  %s2781_s5 = inlined_call_operand.vmem [shape: f32[3,64,64], index: 5, kind: input, shape index: {}]   ;;  %s2782_s6 = inlined_call_operand.vmem [shape: f32[1,64], index: 6, kind: input, shape index: {}]   ;;  %s2783_s7 = inlined_call_operand.vmem [shape: f32[1,64], index: 7, kind: input, shape index: {}]   ;;  %s2784_s8 = inlined_call_operand.vmem [shape: f32[1,64], index: 8, kind: input, shape index: {}]   ;;  %s2785_s9 = inlined_call_operand.vmem [shape: f32[64,32], index: 9, kind: input, shape index: {}, may-alias: {3,9}]   ;;  %s2786_s10 = inlined_call_operand.vmem [shape: f32[32,64], index: 10, kind: input, shape index: {}, may-alias: {4,10}]   ;;  %s2787_s11 = inlined_call_operand.vmem [shape: f32[3,64,64], index: 11, kind: input, shape index: {}]   ;;  %s2788_s12 = inlined_call_operand.vmem [shape: f32[1,64], index: 12, kind: input, shape index: {}]   ;;  %s2789_s13 = inlined_call_operand.vmem [shape: f32[2,16,64], index: 13, kind: output, shape index: {}]  }
   0x1 LB: > { %s1821_s26 = sadd.s32 4294967295, %s2282_s25   ;;  %p1825_p0 = scmp.ge.s32.totalorder %s2282_s25, 1  ;;  %s2282_s25 = sphi %s2356_s25, %s23_s25  }
   0x2   : > { %p387_p1 = scmp.lt.s32.totalorder %s2282_s25, 3 }
   0x4   : > { %p388_p2 = pnand %p1825_p0, %p387_p1 }
   0x5   : > { %p431_p3 = scmp.lt.s32.totalorder (!%p388_p2), %s1821_s26, 1 }
   0x6   : > { %391 = sbr.rel (%p388_p2) target bundleno = 2196 (0x894), region = 72 }
   0xb   : > { %v2367_v0 = vld [vmem:[%s2779_s3 + $0x38] sm:$0xff]  ;;  %v2284_v1 = vmov 0.0   ;;  %v451_v2 = vld [vmem:[%s2779_s3 + $0x30] sm:$0xff]  ;;  %vm2285_vm0 = vmmov 0   ;;  %s2791_s26 = smov (!%p431_p3, %s1821_s26), 1  ;;  %v450_v4 = vld [vmem:[%s2779_s3 + $0x28] sm:$0xff]  ;;  %v616_v27 = vlaneseq }
   0xc   : > { %2012 = vmatprep.subr.mxu0 %v2284_v1  ;;  %2028 = vmatprep.mubr.msk.f32.mxu0 %vm2285_vm0, %v2284_v1  ;;  %v2382_v3 = vld [vmem:[%s2780_s4 + $0x18] sm:$0xff]  ;;  %v2392_v5 = vld [vmem:[%s2780_s4 + $0x10] sm:$0xff]  ;;  %s1894_s20 = sshll.u32 %s2791_s26, 4  ;;  %vm457_vm1 = vcmask 523264   ;;  %v449_v6 = vld [vmem:[%s2779_s3 + $0x20] sm:$0xff]  ;;  %vm542_vm2 = vcmask 261120  }
   0xd   : > { %2013 = vmatpush3.msra.mxu0 %v2367_v0  ;;  %2031 = vmatprep.subr.mxu1 %v2284_v1  ;;  %s435_s27 = scalar_lea.vmem %s2776_s0, %s1894_s20  ;;  %v448_v9 = vld [vmem:[%s2779_s3 + $0x18] sm:$0xff]  ;;  %v447_v13 = vld [vmem:[%s2779_s3 + $0x10] sm:$0xff]  ;;  %v446_v15 = vld [vmem:[%s2779_s3 + $0x8] sm:$0xff]  ;;  %v617_v28 = vshrl.u32 %v616_v27, 7  ;;  %vm1077_vm3 = vcmask 1040384   ;;  %vm1088_vm4 = vcmask 1046528   ;;  %s440_s17 = scalar_lea.vmem %s2789_s13, %s1894_s20 }
   0xe   : > { %2014 = vmatprep.subr.mxu0 %v2284_v1  ;;  %2032 = vmatpush3.msra.mxu1 %v2382_v3  ;;  %v2406_v7 = vld [vmem:[%s435_s27] sm:$0xff]  ;;  %v2408_v8 = vld [vmem:[%s435_s27 + $0x8] sm:$0xff]  ;;  %v825_v49 = vld [vmem:[%s2781_s5 + $0x38] sm:$0xff] }
   0xf   : > { %2015 = vmatpush3.msra.mxu0 %v451_v2  ;;  %2033 = vmatprep.subr.mxu1 %v2284_v1  ;;  %v458_v10 = vsel %vm457_vm1, %v2406_v7, 0.0  ;;  %v459_v11 = vsel %vm457_vm1, %v2408_v8, 0.0  ;;  %v445_v17 = vld [vmem:[%s2779_s3] sm:$0xff]  ;;  %v454_v22 = vld [vmem:[%s2780_s4 + $0x8] sm:$0xff]  ;;  %v2455_v29 = vsub.s32 0, %v617_v28  ;;  %v1847_v50 = vld [vmem:[%s2781_s5 + $0x78] sm:$0xff] }
  0x10   : > { %2016 = vmatprep.subr.mxu0 %v2284_v1  ;;  %2034 = vmatpush3.msra.mxu1 %v2392_v5  ;;  %v460_v12 = vadd.f32 %v459_v11, %v458_v10  ;;  %v453_v23 = vld [vmem:[%s2780_s4] sm:$0xff]  ;;  %v824_v51 = vld [vmem:[%s2781_s5 + $0x30] sm:$0xff]  ;;  %v823_v53 = vld [vmem:[%s2781_s5 + $0x28] sm:$0xff] }
  0x11   : > { %2017 = vmatpush3.msra.mxu0 %v450_v4  ;;  %2035 = vmatprep.subr.mxu1 %v2284_v1  ;;  %v1846_v52 = vld [vmem:[%s2781_s5 + $0x70] sm:$0xff]  ;;  %v1845_v54 = vld [vmem:[%s2781_s5 + $0x68] sm:$0xff]  ;;  %v822_v55 = vld [vmem:[%s2781_s5 + $0x20] sm:$0xff] }
  0x12   : > { %2018 = vmatprep.subr.mxu0 %v2284_v1  ;;  %2039 = vmatprep.mubr.msk.f32.mxu1 %vm2285_vm0, %v2284_v1  ;;  %v461_v14 = vrot.slane %v460_v12, 4  ;;  %v1844_v56 = vld [vmem:[%s2781_s5 + $0x60] sm:$0xff]  ;;  %v821_v57 = vld [vmem:[%s2781_s5 + $0x18] sm:$0xff]  ;;  %v820_v59 = vld [vmem:[%s2781_s5 + $0x10] sm:$0xff] }
  0x13   : > { %2019 = vmatpush3.msra.mxu0 %v449_v6  ;;  %2036 = vmatpush3.msra.mxu1 %v454_v22  ;;  %v1843_v58 = vld [vmem:[%s2781_s5 + $0x58] sm:$0xff]  ;;  %v1842_v60 = vld [vmem:[%s2781_s5 + $0x50] sm:$0xff]  ;;  %v819_v61 = vld [vmem:[%s2781_s5 + $0x8] sm:$0xff] }
  0x14   : > { %2020 = vmatprep.subr.mxu0 %v2284_v1  ;;  %v462_v16 = vadd.f32 %v461_v14, %v460_v12  ;;  %2037 = vmatprep.subr.mxu1 %v2284_v1  ;;  %v1841_v62 = vld [vmem:[%s2781_s5 + $0x48] sm:$0xff]  ;;  %v818_v63 = vld [vmem:[%s2781_s5] sm:$0xff]  ;;  %v1856_v28 = vld [vmem:[%s2781_s5 + $0xb0] sm:$0xff] }
  0x15   : > { %2021 = vmatpush3.msra.mxu0 %v448_v9  ;;  %2038 = vmatpush3.msra.mxu1 %v453_v23  ;;  %v1834_v10 = vld [vmem:[%s2777_s1] ss:$0 sm:$0xff] }
  0x16   : > { %2022 = vmatprep.subr.mxu0 %v2284_v1  ;;  %v463_v18 = vrot.slane %v462_v16, 2  ;;  %2042 = vmatprep.subr.mxu1 %v2284_v1 }
  0x17   : > { %2023 = vmatpush3.msra.mxu0 %v447_v13 }
  0x18   : > { %2024 = vmatprep.subr.mxu0 %v2284_v1  ;;  %v464_v19 = vadd.f32 %v463_v18, %v462_v16 }
  0x19   : > { %2025 = vmatpush3.msra.mxu0 %v446_v15 }
  0x1a   : > { %2026 = vmatprep.subr.mxu0 %v2284_v1  ;;  %v465_v20 = vrot.slane %v464_v19, 1 }
  0x1b   : > { %2027 = vmatpush3.msra.mxu0 %v445_v17 }
  0x1c   : > { %v466_v21 = vadd.f32 %v465_v20, %v464_v19  ;;  %2072 = vmatprep.subr.mxu0 %v825_v49 }
  0x1e   : > { %2029 = vmatmul.mubr.msk.f32.vlgmr.msra.gmra.mxu0 %vm457_vm1, %v466_v21 }
  0x1f   : > { %2073 = vmatpush3.msra.mxu0 %v825_v49 }
  0x20   : > { %2074 = vmatprep.subr.mxu0 %v824_v51 }
  0x21   : > { %2075 = vmatpush3.msra.mxu0 %v824_v51 }
  0x22   : > { %2076 = vmatprep.subr.mxu0 %v823_v53 }
  0x23   : > { %2077 = vmatpush3.msra.mxu0 %v823_v53 }
  0x24   : > { %2078 = vmatprep.subr.mxu0 %v822_v55 }
  0x25   : > { %2079 = vmatpush3.msra.mxu0 %v822_v55 }
  0x26   : > { %2080 = vmatprep.subr.mxu0 %v821_v57 }
  0x27   : > { %2081 = vmatpush3.msra.mxu0 %v821_v57 }
  0x28   : > { %2082 = vmatprep.subr.mxu0 %v820_v59 }
  0x29   : > { %2083 = vmatpush3.msra.mxu0 %v820_v59 }
  0x2a   : > { %2084 = vmatprep.subr.mxu0 %v819_v61 }
  0x2b   : > { %2085 = vmatpush3.msra.mxu0 %v819_v61 }
  0x2c   : > { %2086 = vmatprep.subr.mxu0 %v818_v63 }
  0x2d   : > { %2087 = vmatpush3.msra.mxu0 %v818_v63 }
  0xde   : > { %v536_v24 = vpop.f32.mrf.mxu0 }
  0xdf   : > { %v541_v25 = vmul.f32 0.03125, %v536_v24 }
  0xe0   : > { %v2030_v26 = vpop.f32.mrf.mxu0 }
  0xe1   : > { %2040 = vmatmul.mubr.msk.f32.vlgmr.msra.gmra.mxu1 %vm542_vm2, %v541_v25 }
  0xe2   : > { %2043 = vmatpush3.msra.mxu1 %v2367_v0  ;;  %2058 = vmatprep.mubr.msk.f32.mxu1 %vm2285_vm0, %v2284_v1  ;;  %v1840_v0 = vld [vmem:[%s2781_s5 + $0x40] sm:$0xff] }
  0xe3   : > { %2044 = vmatprep.subr.mxu1 %v2284_v1 }
  0xe4   : > { %2045 = vmatpush3.msra.mxu1 %v451_v2  ;;  %v1857_v2 = vld [vmem:[%s2781_s5 + $0xb8] sm:$0xff] }
  0xe5   : > { %2046 = vmatprep.subr.mxu1 %v2284_v1  ;;  %2110 = vmatprep.subr.mxu0 %v1857_v2 }
  0xe6   : > { %2047 = vmatpush3.msra.mxu1 %v450_v4 }
  0xe7   : > { %2048 = vmatprep.subr.mxu1 %v2284_v1 }
  0xe8   : > { %2049 = vmatpush3.msra.mxu1 %v449_v6 }
  0xe9   : > { %2050 = vmatprep.subr.mxu1 %v2284_v1 }
  0xea   : > { %2051 = vmatpush3.msra.mxu1 %v448_v9 }
  0xeb   : > { %2052 = vmatprep.subr.mxu1 %v2284_v1 }
  0xec   : > { %2053 = vmatpush3.msra.mxu1 %v447_v13  ;;  %v1835_v13 = vld [vmem:[%s2778_s2] ss:$0 sm:$0xff] }
  0xed   : > { %2054 = vmatprep.subr.mxu1 %v2284_v1 }
  0xee   : > { %2055 = vmatpush3.msra.mxu1 %v446_v15 }
  0xef   : > { %2056 = vmatprep.subr.mxu1 %v2284_v1 }
  0xf0   : > { %2057 = vmatpush3.msra.mxu1 %v445_v17 }
  0xf1   : > { %2061 = vmatprep.subr.mxu1 %v2284_v1 }
 0x1a1   : > { %v612_v30 = vpop.f32.mrf.mxu1 }
 0x1a2   : > { %v619_v31 = vrot.slane %v612_v30, %v2455_v29  ;;  %v1855_v30 = vld [vmem:[%s2781_s5 + $0xa8] sm:$0xff] }
 0x1a3   : > { %v2041_v32 = vpop.f32.mrf.mxu1 }
 0x1a4   : > { %v2459_v33 = vsub.f32 %v2406_v7, %v619_v31  ;;  %v2462_v34 = vsub.f32 %v2408_v8, %v619_v31  ;;  %v1854_v31 = vld [vmem:[%s2781_s5 + $0xa0] sm:$0xff]  ;;  %v1853_v32 = vld [vmem:[%s2781_s5 + $0x98] sm:$0xff] }
 0x1a6   : > { %v622_v35 = vmul.f32 %v2459_v33, %v2459_v33  ;;  %v623_v36 = vmul.f32 %v2462_v34, %v2462_v34 }
 0x1a8   : > { %v624_v37 = vsel %vm457_vm1, %v622_v35, 0.0  ;;  %v625_v38 = vsel %vm457_vm1, %v623_v36, 0.0  ;;  %v1850_v35 = vld [vmem:[%s2781_s5 + $0x80] sm:$0xff]  ;;  %v2575_v36 = vld [vmem:[%s2785_s9 + $0x38] sm:$0xff] }
 0x1a9   : > { %v626_v39 = vadd.f32 %v625_v38, %v624_v37  ;;  %v1113_v37 = vld [vmem:[%s2785_s9 + $0x30] sm:$0xff]  ;;  %v1112_v38 = vld [vmem:[%s2785_s9 + $0x28] sm:$0xff] }
 0x1ab   : > { %v627_v40 = vrot.slane %v626_v39, 4 }
 0x1ad   : > { %v628_v41 = vadd.f32 %v627_v40, %v626_v39  ;;  %v1111_v39 = vld [vmem:[%s2785_s9 + $0x20] sm:$0xff]  ;;  %v1110_v40 = vld [vmem:[%s2785_s9 + $0x18] sm:$0xff] }
 0x1af   : > { %v629_v42 = vrot.slane %v628_v41, 2 }
 0x1b1   : > { %v630_v43 = vadd.f32 %v629_v42, %v628_v41  ;;  %v1109_v41 = vld [vmem:[%s2785_s9 + $0x10] sm:$0xff]  ;;  %v1108_v42 = vld [vmem:[%s2785_s9 + $0x8] sm:$0xff] }
 0x1b3   : > { %v631_v44 = vrot.slane %v630_v43, 1 }
 0x1b5   : > { %v632_v45 = vadd.f32 %v631_v44, %v630_v43  ;;  %v1107_v43 = vld [vmem:[%s2785_s9] sm:$0xff]  ;;  %v2609_v44 = vld [vmem:[%s2786_s10 + $0x18] sm:$0xff] }
 0x1b7   : > { %2059 = vmatmul.mubr.msk.f32.vlgmr.msra.gmra.mxu1 %vm457_vm1, %v632_v45  ;;  %v2614_v45 = vld [vmem:[%s2786_s10 + $0x10] sm:$0xff] }
 0x1b8   : > { %2062 = vmatpush3.msra.mxu1 %v2382_v3  ;;  %2069 = vmatprep.mubr.msk.f32.mxu1 %vm2285_vm0, %v2284_v1 }
 0x1b9   : > { %2063 = vmatprep.subr.mxu1 %v2284_v1 }
 0x1ba   : > { %2064 = vmatpush3.msra.mxu1 %v2392_v5 }
 0x1bb   : > { %2065 = vmatprep.subr.mxu1 %v2284_v1 }
 0x1bc   : > { %2066 = vmatpush3.msra.mxu1 %v454_v22 }
 0x1bd   : > { %2067 = vmatprep.subr.mxu1 %v2284_v1 }
 0x1be   : > { %2068 = vmatpush3.msra.mxu1 %v453_v23 }
 0x1bf   : > { %2091 = vmatprep.subr.mxu1 %v1847_v50 }
 0x277   : > { %v702_v46 = vpop.f32.mrf.mxu1 }
 0x278   : > { %v706_v47 = vmul.f32 0.03125, %v702_v46 }
 0x279   : > { %v2060_v48 = vpop.f32.mrf.mxu1 }
 0x27a   : > { %2070 = vmatmul.mubr.msk.f32.vlgmr.msra.gmra.mxu1 %vm542_vm2, %v706_v47 }
 0x27b   : > { %2092 = vmatpush3.msra.mxu1 %v1847_v50 }
 0x27c   : > { %2093 = vmatprep.subr.mxu1 %v1846_v52 }
 0x27d   : > { %2094 = vmatpush3.msra.mxu1 %v1846_v52 }
 0x27e   : > { %2095 = vmatprep.subr.mxu1 %v1845_v54 }
 0x27f   : > { %2096 = vmatpush3.msra.mxu1 %v1845_v54 }
 0x280   : > { %2097 = vmatprep.subr.mxu1 %v1844_v56 }
 0x281   : > { %2098 = vmatpush3.msra.mxu1 %v1844_v56 }
 0x282   : > { %2099 = vmatprep.subr.mxu1 %v1843_v58 }
 0x283   : > { %2100 = vmatpush3.msra.mxu1 %v1843_v58  ;;  %v1860_v58 = vld [vmem:[%s2782_s6] ss:$0 sm:$0xff] }
 0x284   : > { %2101 = vmatprep.subr.mxu1 %v1842_v60 }
 0x285   : > { %2102 = vmatpush3.msra.mxu1 %v1842_v60 }
 0x286   : > { %2103 = vmatprep.subr.mxu1 %v1841_v62 }
 0x287   : > { %2104 = vmatpush3.msra.mxu1 %v1841_v62 }
 0x288   : > { %2105 = vmatprep.subr.mxu1 %v1840_v0 }
 0x289   : > { %2106 = vmatpush3.msra.mxu1 %v1840_v0 }
 0x28a   : > { %2129 = vmatprep.subr.mxu1 %v2284_v1 }
 0x33a   : > { %v776_v3 = vpop.f32.mrf.mxu1 }
 0x33b   : > { %v777_v4 = vadd.f32 1e-06, %v776_v3 }
 0x33c   : > { %v2071_v5 = vpop.f32.mrf.mxu1 }
 0x33d   : > { %2256 = vrsqrt.f32 %v777_v4 }
 0x34a   : > { %v2257_v6 = vpop.eup %2256 }
 0x34b   : > { %v784_v9 = vrot.slane %v2257_v6, %v2455_v29 }
 0x34d   : > { %v785_v11 = vmul.f32 %v784_v9, %v2459_v33  ;;  %v786_v12 = vmul.f32 %v784_v9, %v2462_v34  ;;  %v1852_v33 = vld [vmem:[%s2781_s5 + $0x90] sm:$0xff]  ;;  %v1851_v34 = vld [vmem:[%s2781_s5 + $0x88] sm:$0xff] }
 0x34f   : > { %v793_v14 = vmul.f32 %v1834_v10, %v785_v11  ;;  %v794_v15 = vmul.f32 %v1834_v10, %v786_v12 }
 0x351   : > { %v801_v16 = vadd.f32 %v1835_v13, %v793_v14  ;;  %v802_v17 = vadd.f32 %v1835_v13, %v794_v15  ;;  %v1116_v15 = vld [vmem:[%s2786_s10 + $0x8] sm:$0xff] }
 0x353   : > { %v1836_v18 = vmul.f32 -1.442695, %v801_v16  ;;  %v1837_v19 = vmul.f32 -1.442695, %v802_v17 }
 0x355   : > { %2258 = vpow2.f32 %v1836_v18 }
 0x356   : > { %2260 = vpow2.f32 %v1837_v19 }
 0x362   : > { %v2259_v20 = vpop.eup %2258 }
 0x363   : > { %v2261_v21 = vpop.eup %2260  ;;  %v809_v22 = vadd.f32 1.0, %v2259_v20 }
 0x364   : > { %v810_v23 = vadd.f32 1.0, %v2261_v21 }
 0x365   : > { %2262 = vrcp.f32 %v809_v22 }
 0x366   : > { %2264 = vrcp.f32 %v810_v23 }
 0x372   : > { %v2263_v24 = vpop.eup %2262 }
 0x373   : > { %v2265_v25 = vpop.eup %2264  ;;  %v815_v26 = vmul.f32 %v2263_v24, %v801_v16  ;;  %v1115_v16 = vld [vmem:[%s2786_s10] sm:$0xff] }
 0x374   : > { %v816_v27 = vmul.f32 %v2265_v25, %v802_v17 }
 0x375   : > { %2088 = vmatprep.mubr.msk.f32.mxu0 %vm457_vm1, %v815_v26  ;;  %2107 = vmatprep.mubr.msk.f32.mxu1 %vm457_vm1, %v815_v26 }
 0x376   : > { %2089 = vmatmul.mubr.msk.f32.vlgmr.msra.gmra.mxu0 %vm457_vm1, %v816_v27  ;;  %2108 = vmatmul.mubr.msk.f32.vlgmr.msra.gmra.mxu1 %vm457_vm1, %v816_v27 }
 0x377   : > { %2111 = vmatpush3.msra.mxu0 %v1857_v2  ;;  %2126 = vmatprep.mubr.msk.f32.mxu0 %vm457_vm1, %v815_v26 }
 0x378   : > { %2112 = vmatprep.subr.mxu0 %v1856_v28  ;;  %2145 = vmatprep.mubr.msk.f32.mxu1 %vm2285_vm0, %v2284_v1 }
 0x379   : > { %2113 = vmatpush3.msra.mxu0 %v1856_v28  ;;  %2130 = vmatpush3.msra.mxu1 %v2575_v36 }
 0x37a   : > { %2114 = vmatprep.subr.mxu0 %v1855_v30  ;;  %2131 = vmatprep.subr.mxu1 %v2284_v1 }
 0x37b   : > { %2115 = vmatpush3.msra.mxu0 %v1855_v30  ;;  %2132 = vmatpush3.msra.mxu1 %v1113_v37 }
 0x37c   : > { %2116 = vmatprep.subr.mxu0 %v1854_v31  ;;  %2133 = vmatprep.subr.mxu1 %v2284_v1 }
 0x37d   : > { %2117 = vmatpush3.msra.mxu0 %v1854_v31  ;;  %2134 = vmatpush3.msra.mxu1 %v1112_v38 }
 0x37e   : > { %2118 = vmatprep.subr.mxu0 %v1853_v32  ;;  %2135 = vmatprep.subr.mxu1 %v2284_v1 }
 0x37f   : > { %2119 = vmatpush3.msra.mxu0 %v1853_v32  ;;  %2136 = vmatpush3.msra.mxu1 %v1111_v39 }
 0x380   : > { %2120 = vmatprep.subr.mxu0 %v1852_v33  ;;  %2137 = vmatprep.subr.mxu1 %v2284_v1 }
 0x381   : > { %2121 = vmatpush3.msra.mxu0 %v1852_v33  ;;  %2138 = vmatpush3.msra.mxu1 %v1110_v40 }
 0x382   : > { %2122 = vmatprep.subr.mxu0 %v1851_v34  ;;  %2139 = vmatprep.subr.mxu1 %v2284_v1 }
 0x383   : > { %2123 = vmatpush3.msra.mxu0 %v1851_v34  ;;  %2140 = vmatpush3.msra.mxu1 %v1109_v41 }
 0x384   : > { %2124 = vmatprep.subr.mxu0 %v1850_v35  ;;  %2141 = vmatprep.subr.mxu1 %v2284_v1 }
 0x385   : > { %2125 = vmatpush3.msra.mxu0 %v1850_v35  ;;  %2142 = vmatpush3.msra.mxu1 %v1108_v42 }
 0x386   : > { %2127 = vmatmul.mubr.msk.f32.vlgmr.msra.gmra.mxu0 %vm457_vm1, %v816_v27  ;;  %2148 = vmatprep.subr.mxu0 %v2284_v1 }
 0x387   : > { %2156 = vmatprep.mubr.msk.f32.mxu0 %vm2285_vm0, %v2284_v1  ;;  %2143 = vmatprep.subr.mxu1 %v2284_v1 }
 0x388   : > { %2144 = vmatpush3.msra.mxu1 %v1107_v43  ;;  %2149 = vmatpush3.msra.mxu0 %v2609_v44 }
 0x389   : > { %2159 = vmatprep.subr.mxu1 %v2284_v1  ;;  %2150 = vmatprep.subr.mxu0 %v2284_v1 }
 0x38a   : > { %2151 = vmatpush3.msra.mxu0 %v2614_v45 }
 0x38b   : > { %2152 = vmatprep.subr.mxu0 %v2284_v1 }
 0x38c   : > { %2153 = vmatpush3.msra.mxu0 %v1116_v15 }
 0x38d   : > { %2154 = vmatprep.subr.mxu0 %v2284_v1 }
 0x38e   : > { %2155 = vmatpush3.msra.mxu0 %v1115_v16 }
 0x38f   : > { %2178 = vmatprep.subr.mxu0 %v2284_v1 }
 0x436   : > { %v2090_v46 = vpop.f32.mrf.mxu0  ;;  %v2109_v50 = vpop.f32.mrf.mxu1 }
 0x437   : > { %v1079_v49 = vrot.slane %v2090_v46, 7  ;;  %v1875_v46 = vld [vmem:[%s2787_s11 + $0x60] sm:$0xff] }
 0x438   : > { %v898_v47 = vpop.f32.mrf.mxu0  ;;  %v982_v57 = vpop.f32.mrf.mxu1 }
 0x439   : > { %v1078_v48 = vrot.slane %v898_v47, 7  ;;  %v1480_v47 = vld [vmem:[%s2787_s11 + $0x18] sm:$0xff] }
 0x43b   : > { %v1080_v51 = vsel %vm1077_vm3, %v1078_v48, %v1079_v49  ;;  %v1083_v53 = vsel %vm1077_vm3, 0.0, %v1078_v48  ;;  %v1874_v48 = vld [vmem:[%s2787_s11 + $0x58] sm:$0xff]  ;;  %v1479_v49 = vld [vmem:[%s2787_s11 + $0x10] sm:$0xff] }
 0x43c   : > { %v1085_v55 = vadd.f32 %v2109_v50, %v1080_v51  ;;  %v1084_v61 = vadd.f32 %v1083_v53, %v982_v57  ;;  %v1873_v50 = vld [vmem:[%s2787_s11 + $0x50] sm:$0xff]  ;;  %v1478_v51 = vld [vmem:[%s2787_s11 + $0x8] sm:$0xff]  ;;  %v1477_v53 = vld [vmem:[%s2787_s11] sm:$0xff] }
 0x446   : > { %v2128_v52 = vpop.f32.mrf.mxu0 }
 0x447   : > { %v1090_v54 = vrot.slane %v2128_v52, 1  ;;  %v1872_v52 = vld [vmem:[%s2787_s11 + $0x48] sm:$0xff] }
 0x448   : > { %v1066_v56 = vpop.f32.mrf.mxu0 }
 0x449   : > { %v1094_v59 = vsel %vm1088_vm4, %v1090_v54, 0.0  ;;  %v1089_v60 = vrot.slane %v1066_v56, 1 }
 0x44a   : > { %v1096_v62 = vadd.f32 %v1094_v59, %v1085_v55  ;;  %v1888_v55 = vld [vmem:[%s2787_s11 + $0xb8] sm:$0xff] }
 0x44b   : > { %v1091_v63 = vsel %vm1088_vm4, %v1089_v60, %v1090_v54  ;;  %v1871_v54 = vld [vmem:[%s2787_s11 + $0x40] sm:$0xff] }
 0x44c   : > { %v1104_v0 = vadd.f32 %v1860_v58, %v1096_v62  ;;  %v1095_v2 = vadd.f32 %v1091_v63, %v1084_v61  ;;  %v1865_v61 = vld [vmem:[%s2783_s7] ss:$0 sm:$0xff] }
 0x44e   : > { %v1103_v3 = vadd.f32 %v1860_v58, %v1095_v2  ;;  %v1120_v4 = vsel %vm457_vm1, %v1104_v0, 0.0 }
 0x450   : > { %v1119_v5 = vsel %vm457_vm1, %v1103_v3, 0.0 }
 0x451   : > { %v1121_v6 = vadd.f32 %v1120_v4, %v1119_v5 }
 0x453   : > { %v1122_v9 = vrot.slane %v1121_v6, 4 }
 0x455   : > { %v1123_v10 = vadd.f32 %v1122_v9, %v1121_v6 }
 0x457   : > { %v1124_v11 = vrot.slane %v1123_v10, 2 }
 0x459   : > { %v1125_v12 = vadd.f32 %v1124_v11, %v1123_v10 }
 0x45b   : > { %v1126_v13 = vrot.slane %v1125_v12, 1 }
 0x45d   : > { %v1127_v14 = vadd.f32 %v1126_v13, %v1125_v12 }
 0x45f   : > { %2146 = vmatmul.mubr.msk.f32.vlgmr.msra.gmra.mxu1 %vm457_vm1, %v1127_v14 }
 0x460   : > { %2160 = vmatpush3.msra.mxu1 %v2575_v36  ;;  %2175 = vmatprep.mubr.msk.f32.mxu1 %vm2285_vm0, %v2284_v1 }
 0x461   : > { %2161 = vmatprep.subr.mxu1 %v2284_v1 }
 0x462   : > { %2162 = vmatpush3.msra.mxu1 %v1113_v37 }
 0x463   : > { %2163 = vmatprep.subr.mxu1 %v2284_v1 }
 0x464   : > { %2164 = vmatpush3.msra.mxu1 %v1112_v38 }
 0x465   : > { %2165 = vmatprep.subr.mxu1 %v2284_v1 }
 0x466   : > { %2166 = vmatpush3.msra.mxu1 %v1111_v39  ;;  %v1484_v39 = vld [vmem:[%s2787_s11 + $0x38] sm:$0xff] }
 0x467   : > { %2167 = vmatprep.subr.mxu1 %v2284_v1 }
 0x468   : > { %2168 = vmatpush3.msra.mxu1 %v1110_v40  ;;  %v1878_v40 = vld [vmem:[%s2787_s11 + $0x78] sm:$0xff] }
 0x469   : > { %2169 = vmatprep.subr.mxu1 %v2284_v1 }
 0x46a   : > { %2170 = vmatpush3.msra.mxu1 %v1109_v41  ;;  %v1483_v41 = vld [vmem:[%s2787_s11 + $0x30] sm:$0xff] }
 0x46b   : > { %2171 = vmatprep.subr.mxu1 %v2284_v1 }
 0x46c   : > { %2172 = vmatpush3.msra.mxu1 %v1108_v42  ;;  %v1877_v42 = vld [vmem:[%s2787_s11 + $0x70] sm:$0xff] }
 0x46d   : > { %2173 = vmatprep.subr.mxu1 %v2284_v1 }
 0x46e   : > { %2174 = vmatpush3.msra.mxu1 %v1107_v43  ;;  %v1482_v43 = vld [vmem:[%s2787_s11 + $0x28] sm:$0xff] }
 0x46f   : > { %2208 = vmatprep.subr.mxu1 %v1878_v40 }
 0x51f   : > { %v1197_v17 = vpop.f32.mrf.mxu1 }
 0x520   : > { %v1201_v18 = vmul.f32 0.03125, %v1197_v17  ;;  %v1887_v17 = vld [vmem:[%s2787_s11 + $0xb0] sm:$0xff] }
 0x521   : > { %v2147_v19 = vpop.f32.mrf.mxu1 }
 0x522   : > { %2157 = vmatmul.mubr.msk.f32.vlgmr.msra.gmra.mxu0 %vm542_vm2, %v1201_v18  ;;  %v1886_v18 = vld [vmem:[%s2787_s11 + $0xa8] sm:$0xff]  ;;  %v1885_v19 = vld [vmem:[%s2787_s11 + $0xa0] sm:$0xff] }
 0x523   : > { %2179 = vmatpush3.msra.mxu0 %v2609_v44  ;;  %2186 = vmatprep.mubr.msk.f32.mxu0 %vm2285_vm0, %v2284_v1  ;;  %v1876_v44 = vld [vmem:[%s2787_s11 + $0x68] sm:$0xff] }
 0x524   : > { %2180 = vmatprep.subr.mxu0 %v2284_v1 }
 0x525   : > { %2181 = vmatpush3.msra.mxu0 %v2614_v45  ;;  %v1481_v45 = vld [vmem:[%s2787_s11 + $0x20] sm:$0xff] }
 0x526   : > { %2182 = vmatprep.subr.mxu0 %v2284_v1 }
 0x527   : > { %2183 = vmatpush3.msra.mxu0 %v1116_v15 }
 0x528   : > { %2184 = vmatprep.subr.mxu0 %v2284_v1 }
 0x529   : > { %2185 = vmatpush3.msra.mxu0 %v1115_v16 }
 0x52a   : > { %2189 = vmatprep.subr.mxu0 %v1484_v39 }
 0x5e2   : > { %v1271_v20 = vpop.f32.mrf.mxu0 }
 0x5e3   : > { %v1278_v21 = vrot.slane %v1271_v20, %v2455_v29  ;;  %v1884_v20 = vld [vmem:[%s2787_s11 + $0x98] sm:$0xff] }
 0x5e4   : > { %v2158_v22 = vpop.f32.mrf.mxu0 }
 0x5e5   : > { %v2658_v23 = vsub.f32 %v1103_v3, %v1278_v21  ;;  %v2660_v24 = vsub.f32 %v1104_v0, %v1278_v21  ;;  %v1866_v0 = vld [vmem:[%s2784_s8] ss:$0 sm:$0xff]  ;;  %v1883_v21 = vld [vmem:[%s2787_s11 + $0x90] sm:$0xff]  ;;  %v1882_v22 = vld [vmem:[%s2787_s11 + $0x88] sm:$0xff] }
 0x5e7   : > { %v1281_v25 = vmul.f32 %v2658_v23, %v2658_v23  ;;  %v1282_v26 = vmul.f32 %v2660_v24, %v2660_v24 }
 0x5e9   : > { %v1283_v27 = vsel %vm457_vm1, %v1281_v25, 0.0  ;;  %v1284_v28 = vsel %vm457_vm1, %v1282_v26, 0.0 }
 0x5ea   : > { %v1285_v1 = vadd.f32 %v1284_v28, %v1283_v27 }
 0x5ec   : > { %v1286_v30 = vrot.slane %v1285_v1, 4 }
 0x5ee   : > { %v1287_v31 = vadd.f32 %v1286_v30, %v1285_v1 }
 0x5f0   : > { %v1288_v32 = vrot.slane %v1287_v31, 2 }
 0x5f2   : > { %v1289_v33 = vadd.f32 %v1288_v32, %v1287_v31 }
 0x5f4   : > { %v1290_v34 = vrot.slane %v1289_v33, 1 }
 0x5f6   : > { %v1291_v35 = vadd.f32 %v1290_v34, %v1289_v33 }
 0x5f8   : > { %2176 = vmatmul.mubr.msk.f32.vlgmr.msra.gmra.mxu1 %vm457_vm1, %v1291_v35 }
 0x5f9   : > { %2209 = vmatpush3.msra.mxu1 %v1878_v40 }
 0x5fa   : > { %2210 = vmatprep.subr.mxu1 %v1877_v42 }
 0x5fb   : > { %2211 = vmatpush3.msra.mxu1 %v1877_v42 }
 0x5fc   : > { %2212 = vmatprep.subr.mxu1 %v1876_v44 }
 0x5fd   : > { %2213 = vmatpush3.msra.mxu1 %v1876_v44 }
 0x5fe   : > { %2214 = vmatprep.subr.mxu1 %v1875_v46 }
 0x5ff   : > { %2215 = vmatpush3.msra.mxu1 %v1875_v46 }
 0x600   : > { %2216 = vmatprep.subr.mxu1 %v1874_v48 }
 0x601   : > { %2217 = vmatpush3.msra.mxu1 %v1874_v48 }
 0x602   : > { %2218 = vmatprep.subr.mxu1 %v1873_v50 }
 0x603   : > { %2219 = vmatpush3.msra.mxu1 %v1873_v50 }
 0x604   : > { %2220 = vmatprep.subr.mxu1 %v1872_v52 }
 0x605   : > { %2221 = vmatpush3.msra.mxu1 %v1872_v52 }
 0x606   : > { %2222 = vmatprep.subr.mxu1 %v1871_v54 }
 0x607   : > { %2223 = vmatpush3.msra.mxu1 %v1871_v54 }
 0x6b8   : > { %v1361_v36 = vpop.f32.mrf.mxu1 }
 0x6b9   : > { %v1365_v37 = vmul.f32 0.03125, %v1361_v36  ;;  %v1891_v36 = vld [vmem:[%s2788_s12] ss:$0 sm:$0xff] }
 0x6ba   : > { %v2177_v38 = vpop.f32.mrf.mxu1 }
 0x6bb   : > { %2187 = vmatmul.mubr.msk.f32.vlgmr.msra.gmra.mxu0 %vm542_vm2, %v1365_v37 }
 0x6bc   : > { %2190 = vmatpush3.msra.mxu0 %v1484_v39 }
 0x6bd   : > { %2191 = vmatprep.subr.mxu0 %v1483_v41 }
 0x6be   : > { %2192 = vmatpush3.msra.mxu0 %v1483_v41 }
 0x6bf   : > { %2193 = vmatprep.subr.mxu0 %v1482_v43 }
 0x6c0   : > { %2194 = vmatpush3.msra.mxu0 %v1482_v43 }
 0x6c1   : > { %2195 = vmatprep.subr.mxu0 %v1481_v45 }
 0x6c2   : > { %2196 = vmatpush3.msra.mxu0 %v1481_v45 }
 0x6c3   : > { %2197 = vmatprep.subr.mxu0 %v1480_v47 }
 0x6c4   : > { %2198 = vmatpush3.msra.mxu0 %v1480_v47 }
 0x6c5   : > { %2199 = vmatprep.subr.mxu0 %v1479_v49 }
 0x6c6   : > { %2200 = vmatpush3.msra.mxu0 %v1479_v49 }
 0x6c7   : > { %2201 = vmatprep.subr.mxu0 %v1478_v51 }
 0x6c8   : > { %2202 = vmatpush3.msra.mxu0 %v1478_v51 }
 0x6c9   : > { %2203 = vmatprep.subr.mxu0 %v1477_v53 }
 0x6ca   : > { %2204 = vmatpush3.msra.mxu0 %v1477_v53 }
 0x6cb   : > { %2227 = vmatprep.subr.mxu0 %v1888_v55 }
 0x77b   : > { %v1435_v56 = vpop.f32.mrf.mxu0 }
 0x77c   : > { %v1436_v57 = vadd.f32 1e-06, %v1435_v56 }
 0x77d   : > { %v2188_v58 = vpop.f32.mrf.mxu0 }
 0x77e   : > { %2266 = vrsqrt.f32 %v1436_v57 }
 0x78b   : > { %v2267_v59 = vpop.eup %2266 }
 0x78c   : > { %v1443_v60 = vrot.slane %v2267_v59, %v2455_v29 }
 0x78e   : > { %v1444_v62 = vmul.f32 %v1443_v60, %v2658_v23  ;;  %v1445_v63 = vmul.f32 %v1443_v60, %v2660_v24  ;;  %v1881_v23 = vld [vmem:[%s2787_s11 + $0x80] sm:$0xff] }
 0x790   : > { %v1452_v2 = vmul.f32 %v1865_v61, %v1444_v62  ;;  %v1453_v3 = vmul.f32 %v1865_v61, %v1445_v63 }
 0x792   : > { %v1460_v4 = vadd.f32 %v1866_v0, %v1452_v2  ;;  %v1461_v5 = vadd.f32 %v1866_v0, %v1453_v3 }
 0x794   : > { %v1867_v6 = vmul.f32 -1.442695, %v1460_v4  ;;  %v1868_v9 = vmul.f32 -1.442695, %v1461_v5 }
 0x796   : > { %2268 = vpow2.f32 %v1867_v6 }
 0x797   : > { %2270 = vpow2.f32 %v1868_v9 }
 0x7a3   : > { %v2269_v29 = vpop.eup %2268 }
 0x7a4   : > { %v2271_v10 = vpop.eup %2270  ;;  %v1468_v11 = vadd.f32 1.0, %v2269_v29 }
 0x7a5   : > { %v1469_v12 = vadd.f32 1.0, %v2271_v10 }
 0x7a6   : > { %2272 = vrcp.f32 %v1468_v11 }
 0x7a7   : > { %2274 = vrcp.f32 %v1469_v12 }
 0x7b3   : > { %v2273_v13 = vpop.eup %2272 }
 0x7b4   : > { %v2275_v14 = vpop.eup %2274  ;;  %v1474_v15 = vmul.f32 %v2273_v13, %v1460_v4 }
 0x7b5   : > { %v1475_v16 = vmul.f32 %v2275_v14, %v1461_v5 }
 0x7b6   : > { %2205 = vmatprep.mubr.msk.f32.mxu0 %vm457_vm1, %v1474_v15  ;;  %2224 = vmatprep.mubr.msk.f32.mxu1 %vm457_vm1, %v1474_v15 }
 0x7b7   : > { %2206 = vmatmul.mubr.msk.f32.vlgmr.msra.gmra.mxu0 %vm457_vm1, %v1475_v16  ;;  %2225 = vmatmul.mubr.msk.f32.vlgmr.msra.gmra.mxu1 %vm457_vm1, %v1475_v16 }
 0x7b8   : > { %2228 = vmatpush3.msra.mxu0 %v1888_v55  ;;  %2243 = vmatprep.mubr.msk.f32.mxu0 %vm457_vm1, %v1474_v15 }
 0x7b9   : > { %2229 = vmatprep.subr.mxu0 %v1887_v17 }
 0x7ba   : > { %2230 = vmatpush3.msra.mxu0 %v1887_v17 }
 0x7bb   : > { %2231 = vmatprep.subr.mxu0 %v1886_v18 }
 0x7bc   : > { %2232 = vmatpush3.msra.mxu0 %v1886_v18 }
 0x7bd   : > { %2233 = vmatprep.subr.mxu0 %v1885_v19 }
 0x7be   : > { %2234 = vmatpush3.msra.mxu0 %v1885_v19 }
 0x7bf   : > { %2235 = vmatprep.subr.mxu0 %v1884_v20 }
 0x7c0   : > { %2236 = vmatpush3.msra.mxu0 %v1884_v20 }
 0x7c1   : > { %2237 = vmatprep.subr.mxu0 %v1883_v21 }
 0x7c2   : > { %2238 = vmatpush3.msra.mxu0 %v1883_v21 }
 0x7c3   : > { %2239 = vmatprep.subr.mxu0 %v1882_v22 }
 0x7c4   : > { %2240 = vmatpush3.msra.mxu0 %v1882_v22 }
 0x7c5   : > { %2241 = vmatprep.subr.mxu0 %v1881_v23 }
 0x7c6   : > { %2242 = vmatpush3.msra.mxu0 %v1881_v23 }
 0x7c7   : > { %2244 = vmatmul.mubr.msk.f32.vlgmr.msra.gmra.mxu0 %vm457_vm1, %v1475_v16 }
 0x877   : > { %v2207_v24 = vpop.f32.mrf.mxu0  ;;  %v2226_v28 = vpop.f32.mrf.mxu1 }
 0x878   : > { %v1737_v27 = vrot.slane %v2207_v24, 7 }
 0x879   : > { %v1557_v25 = vpop.f32.mrf.mxu0  ;;  %v1641_v35 = vpop.f32.mrf.mxu1 }
 0x87a   : > { %v1736_v26 = vrot.slane %v1557_v25, 7 }
 0x87c   : > { %v1738_v1 = vsel %vm1077_vm3, %v1736_v26, %v1737_v27  ;;  %v1741_v31 = vsel %vm1077_vm3, 0.0, %v1736_v26 }
 0x87d   : > { %v1743_v33 = vadd.f32 %v2226_v28, %v1738_v1  ;;  %v1742_v39 = vadd.f32 %v1741_v31, %v1641_v35 }
 0x887   : > { %v2245_v30 = vpop.f32.mrf.mxu0 }
 0x888   : > { %v1747_v32 = vrot.slane %v2245_v30, 1 }
 0x889   : > { %v1725_v34 = vpop.f32.mrf.mxu0 }
 0x88a   : > { %v1751_v37 = vsel %vm1088_vm4, %v1747_v32, 0.0  ;;  %v1746_v38 = vrot.slane %v1725_v34, 1 }
 0x88b   : > { %v1753_v40 = vadd.f32 %v1751_v37, %v1743_v33 }
 0x88c   : > { %v1748_v41 = vsel %vm1088_vm4, %v1746_v38, %v1747_v32 }
 0x88d   : > { %v1761_v42 = vadd.f32 %v1891_v36, %v1753_v40  ;;  %v1752_v43 = vadd.f32 %v1748_v41, %v1742_v39 }
 0x88f   : > { %v1763_v44 = vadd.f32 %v1761_v42, %v2408_v8  ;;  %v1760_v45 = vadd.f32 %v1891_v36, %v1752_v43 }
 0x891   : > { %1765 = vst.msk [vmem:[%s440_s17 + $0x8] sm:$0xff] %vm457_vm1, %v1763_v44  ;;  %v1762_v46 = vadd.f32 %v1760_v45, %v2406_v7 }
 0x893   : > { %1764 = vst.msk [vmem:[%s440_s17] sm:$0xff] %vm457_vm1, %v1762_v46 }
 0x894 PF: > { %s23_s25 = sadd.s32 1, %s2282_s25  }
 0x895   : > { %p20_p4 = scmp.ge.s32.totalorder %s23_s25, 4  }
 0x897   :  { %22 = sbr.rel (!%p20_p4) target bundleno = 1 (0x1), region = 106 }

// kernel: _lambda_.13
= control target key start
LH: loop header
LB: loop body
LE: loop exit
PB: predicated region body
PF: predicated region fallthrough
CT: control target
= control target key end

     0   :  { %18 = vsyncpa [#allocation3], 0  ;;  %s3248_s0 = inlined_call_operand.vmem [shape: f32[2,16,64], index: 0, kind: input, shape index: {}]   ;;  %s3249_s1 = inlined_call_operand.hbm [shape: f32[1,64], index: 1, kind: input, shape index: {}]   ;;  %s3250_s2 = inlined_call_operand.hbm [shape: f32[1,64], index: 2, kind: input, shape index: {}]   ;;  %s3251_s3 = inlined_call_operand.vmem [shape: f32[64,32], index: 3, kind: input, shape index: {}, may-alias: {3,9}]   ;;  %s3252_s4 = inlined_call_operand.vmem [shape: f32[32,64], index: 4, kind: input, shape index: {}, may-alias: {4,10}]   ;;  %s3253_s5 = inlined_call_operand.vmem [shape: f32[3,64,64], index: 5, kind: input, shape index: {}]   ;;  %s3254_s6 = inlined_call_operand.hbm [shape: f32[1,64], index: 6, kind: input, shape index: {}]   ;;  %s3255_s7 = inlined_call_operand.hbm [shape: f32[1,64], index: 7, kind: input, shape index: {}]   ;;  %s3256_s8 = inlined_call_operand.hbm [shape: f32[1,64], index: 8, kind: input, shape index: {}]   ;;  %s3257_s9 = inlined_call_operand.vmem [shape: f32[64,32], index: 9, kind: input, shape index: {}, may-alias: {3,9}]   ;;  %s3258_s10 = inlined_call_operand.vmem [shape: f32[32,64], index: 10, kind: input, shape index: {}, may-alias: {4,10}]   ;;  %s3259_s11 = inlined_call_operand.vmem [shape: f32[3,64,64], index: 11, kind: input, shape index: {}]   ;;  %s3260_s12 = inlined_call_operand.hbm [shape: f32[1,64], index: 12, kind: input, shape index: {}]   ;;  %s3261_s13 = inlined_call_operand.vmem [shape: f32[2,16,64], index: 13, kind: output, shape index: {}]  }
   0x1   :  { %19 = vsyncpa [#allocation5], 0 }
   0x2   :  { %20 = vsyncpa [#allocation8], 0 }
   0x3   :  { %21 = vsyncpa [#allocation11], 0  ;;  %s2743_s25 = smov 0  }
   0x4 LB: > { %s2665_s26 = smov [#allocation4]   ;;  %s2749_s28 = sadd.s32 4294967295, %s2663_s25   ;;  %s2663_s25 = sphi %s2743_s25, %s27_s25  }
   0x5   : > { %s360_s27 = sshll.u32 %s2665_s26, 4  ;;  %p1959_p0 = scmp.ge.s32.totalorder %s2663_s25, 1  ;;  %s361_s27 = int_to_ptr.vmem [resolvable:$true] %s360_s27 }
   0x6   : > { %p336_p1 = scmp.lt.s32.totalorder %s2663_s25, 3  ;;  %p3262_p2 = scmp.eq.s32.totalorder %s2749_s28, 0 }
   0x7   : > { %s2666_s30 = smov [#allocation7]   ;;  %s2667_s15 = smov [#allocation2]  }
   0x8   : > { %p2754_p3 = pnand %p1959_p0, %p336_p1  ;;  %s391_s14 = sshll.u32 %s2666_s30, 4  ;;  %s2760_s14 = int_to_ptr.vmem [resolvable:$true] %s391_s14 }
   0x9   : > { %s349_s16 = sshll.u32 %s2667_s15, 4  ;;  %s2668_s18 = smov [#allocation6]   ;;  %s2768_s16 = int_to_ptr.vmem [resolvable:$true] %s349_s16 }
   0xa   : > { %p2418_p4 = pneg %p2754_p3  ;;  %s380_s19 = sshll.u32 %s2668_s18, 4  ;;  %s2770_s19 = int_to_ptr.vmem [resolvable:$true] %s380_s19 }
   0xb   : > { %s2496_s21 = scalar_lea.vmem %s361_s27, 16  ;;  %s2503_s22 = scalar_lea.vmem %s361_s27, 32 }
   0xc   : > { %p2764_p5 = pnand %p3262_p2, %p2418_p4  ;;  %p2497_p7 = scmp.ne.s32.totalorder %s361_s27, %s2496_s21 }
   0xd   : > { %p2504_p10 = scmp.lt.s32.totalorder %s361_s27, %s361_s27  ;;  %p2505_p11 = scmp.lt.s32.totalorder %s2503_s22, %s2496_s21 }
   0xe   : > { %p2774_p6 = pneg %p2764_p5 }
   0xf   : > { %p2506_p12 = por %p2505_p11, %p2504_p10 }
  0x10   : > { %p2499_p8 = pnand %p2497_p7, %p2774_p6 }
  0x12   : > { %p2500_p9 = pneg %p2499_p8 }
  0x14   : > { %p2507_p13 = pnand %p2506_p12, %p2500_p9 }
  0x16   : > { %2510 = shalt.err (!%p2507_p13)
}
  0x17   : > { %2424 = dma.hbm_to_vmem [thread:$0]  (!%p2764_p5), %s3250_s2, 16, %s361_s27, [#allocation5]  }
  0x18   : > { %s2522_s26 = scalar_lea.vmem %s2760_s14, 16  ;;  %s2529_s30 = scalar_lea.vmem %s2760_s14, 32 }
  0x19   : > { %p2523_p0 = scmp.ne.s32.totalorder %s2760_s14, %s2522_s26  ;;  %p2530_p7 = scmp.lt.s32.totalorder %s2760_s14, %s2760_s14 }
  0x1a   : > { %p2531_p8 = scmp.lt.s32.totalorder %s2529_s30, %s2522_s26 }
  0x1b   : > { %p2525_p1 = pnand %p2523_p0, %p2774_p6 }
  0x1c   : > { %p2532_p9 = por %p2531_p8, %p2530_p7 }
  0x1d   : > { %p2526_p4 = pneg %p2525_p1 }
  0x1f   : > { %p2533_p10 = pnand %p2532_p9, %p2526_p4 }
  0x21   : > { %2536 = shalt.err (!%p2533_p10)
}
  0x22   : > { %2430 = dma.hbm_to_vmem [thread:$0]  (!%p2764_p5), %s3255_s7, 16, %s2760_s14, [#allocation8]  }
  0x23   : > { %s2548_s27 = scalar_lea.vmem %s2768_s16, 16  ;;  %s2555_s21 = scalar_lea.vmem %s2768_s16, 32 }
  0x24   : > { %p2549_p11 = scmp.ne.s32.totalorder %s2768_s16, %s2548_s27  ;;  %p2556_p0 = scmp.lt.s32.totalorder %s2768_s16, %s2768_s16 }
  0x25   : > { %p2557_p1 = scmp.lt.s32.totalorder %s2555_s21, %s2548_s27 }
  0x26   : > { %p2551_p12 = pnand %p2549_p11, %p2774_p6 }
  0x27   : > { %p2558_p4 = por %p2557_p1, %p2556_p0 }
  0x28   : > { %p2552_p13 = pneg %p2551_p12 }
  0x2a   : > { %p2559_p7 = pnand %p2558_p4, %p2552_p13 }
  0x2c   : > { %2562 = shalt.err (!%p2559_p7)
}
  0x2d   : > { %2421 = dma.hbm_to_vmem [thread:$0]  (!%p2764_p5), %s3249_s1, 16, %s2768_s16, [#allocation3]  }
  0x2e   : > { %s2574_s14 = scalar_lea.vmem %s2770_s19, 16  ;;  %s2581_s24 = scalar_lea.vmem %s2770_s19, 32 }
  0x2f   : > { %p2575_p8 = scmp.ne.s32.totalorder %s2770_s19, %s2574_s14  ;;  %p2582_p11 = scmp.lt.s32.totalorder %s2770_s19, %s2770_s19 }
  0x30   : > { %p2583_p12 = scmp.lt.s32.totalorder %s2581_s24, %s2574_s14 }
  0x31   : > { %p2577_p9 = pnand %p2575_p8, %p2774_p6 }
  0x32   : > { %p2584_p13 = por %p2583_p12, %p2582_p11 }
  0x33   : > { %p2578_p10 = pneg %p2577_p9 }
  0x35   : > { %p2585_p0 = pnand %p2584_p13, %p2578_p10 }
  0x37   : > { %2588 = shalt.err (!%p2585_p0)
}
  0x38   : > { %2427 = dma.hbm_to_vmem [thread:$0]  (!%p2764_p5), %s3254_s6, 16, %s2770_s19, [#allocation5]  }
  0x39   : > { %s2669_s16 = smov [#allocation9]   ;;  %s2670_s18 = smov [#allocation10]  }
  0x3a   : > { %s402_s15 = sshll.u32 %s2669_s16, 4  ;;  %s422_s27 = sshll.u32 %s2670_s18, 4  ;;  %s403_s15 = int_to_ptr.vmem [resolvable:$true] %s402_s15  ;;  %s423_s27 = int_to_ptr.vmem [resolvable:$true] %s422_s27 }
  0x3b   : > { %s2600_s21 = scalar_lea.vmem %s403_s15, 16  ;;  %s2607_s22 = scalar_lea.vmem %s403_s15, 32 }
  0x3c   : > { %p2601_p1 = scmp.ne.s32.totalorder %s403_s15, %s2600_s21  ;;  %p2608_p8 = scmp.lt.s32.totalorder %s403_s15, %s403_s15 }
  0x3d   : > { %p2609_p9 = scmp.lt.s32.totalorder %s2607_s22, %s2600_s21 }
  0x3e   : > { %p2603_p4 = pnand %p2601_p1, %p2774_p6 }
  0x3f   : > { %p2610_p10 = por %p2609_p9, %p2608_p8 }
  0x40   : > { %p2604_p7 = pneg %p2603_p4 }
  0x42   : > { %p2611_p11 = pnand %p2610_p10, %p2604_p7 }
  0x44   : > { %2614 = shalt.err (!%p2611_p11)
}
  0x45   : > { %2433 = dma.hbm_to_vmem [thread:$0]  (!%p2764_p5), %s3256_s8, 16, %s403_s15, [#allocation8]  }
  0x46   : > { %s2626_s14 = scalar_lea.vmem %s423_s27, 16  ;;  %s2633_s24 = scalar_lea.vmem %s423_s27, 32 }
  0x47   : > { %p2627_p12 = scmp.ne.s32.totalorder %s423_s27, %s2626_s14  ;;  %p2634_p1 = scmp.lt.s32.totalorder %s423_s27, %s423_s27 }
  0x48   : > { %p2635_p4 = scmp.lt.s32.totalorder %s2633_s24, %s2626_s14 }
  0x49   : > { %p2629_p13 = pnand %p2627_p12, %p2774_p6 }
  0x4a   : > { %p2636_p2 = por %p2635_p4, %p2634_p1 }
  0x4b   : > { %p2630_p0 = pneg %p2629_p13 }
  0x4d   : > { %p2637_p8 = pnand %p2636_p2, %p2630_p0 }
  0x4f   : > { %2640 = shalt.err (!%p2637_p8)
}
  0x50   : > { %2436 = dma.hbm_to_vmem [thread:$0]  (!%p2764_p5), %s3260_s12, 16, %s423_s27, [#allocation11]  }
  0x51   : > { %443 = sbr.rel (%p2754_p3) target bundleno = 2284 (0x8ec), region = 72  ;;  %p3266_p7 = scmp.eq.s32.totalorder (!%p2754_p3), %s2749_s28, 0 }
  0x56   : > { %2646 = dma.done.wait (%p3266_p7), [#allocation3], 16   ;;  %p3267_p6 = pmov %p3266_p7 }
  0x58   : > { %2648 = vsyncadd (%p3267_p6), [#allocation3], 4294967280  ;;  %p3268_p9 = pmov %p3267_p6 }
  0x59   : > { %p3269_p2 = pmov %p3267_p6 }
  0x5a   : > { %2650 = dma.done.wait (%p3268_p9), [#allocation5], 32  }
  0x5b   : > { %2652 = vsyncadd (%p3269_p2), [#allocation5], 4294967264  ;;  %p3270_p10 = pmov %p3269_p2 }
  0x5c   : > { %p3271_p5 = pmov %p3269_p2 }
  0x5d   : > { %2654 = dma.done.wait (%p3270_p10), [#allocation8], 32  }
  0x5e   : > { %2656 = vsyncadd (%p3271_p5), [#allocation8], 4294967264  ;;  %p3272_p3 = pmov %p3269_p2 }
  0x5f   : > { %p3273_p11 = pmov %p3269_p2 }
  0x60   : > { %2658 = dma.done.wait (%p3272_p3), [#allocation11], 16  }
  0x61   : > { %2660 = vsyncadd (%p3273_p11), [#allocation11], 4294967280  ;;  %p507_p12 = scmp.lt.s32.totalorder %s2749_s28, 1  ;;  %v2671_v0 = vmov 0.0   ;;  %vm2672_vm0 = vmmov 0   ;;  %v528_v1 = vld [vmem:[%s3251_s3 + $0x38] sm:$0xff]  ;;  %v692_v27 = vlaneseq }
  0x62   : > { %2160 = vmatprep.subr.mxu0 %v2671_v0  ;;  %2176 = vmatprep.mubr.msk.f32.mxu0 %vm2672_vm0, %v2671_v0  ;;  %v527_v2 = vld [vmem:[%s3251_s3 + $0x30] sm:$0xff]  ;;  %vm533_vm1 = vcmask 523264   ;;  %v526_v3 = vld [vmem:[%s3251_s3 + $0x28] sm:$0xff]  ;;  %v2891_v7 = vld [vmem:[%s3252_s4 + $0x18] sm:$0xff]  ;;  %vm618_vm2 = vcmask 261120   ;;  %vm1153_vm3 = vcmask 1040384  }
  0x63   : > { %s3275_s28 = smov (!%p507_p12, %s2749_s28), 1  ;;  %2179 = vmatprep.subr.mxu1 %v2671_v0  ;;  %2187 = vmatprep.mubr.msk.f32.mxu1 %vm2672_vm0, %v2671_v0  ;;  %v2896_v8 = vld [vmem:[%s3252_s4 + $0x10] sm:$0xff]  ;;  %v525_v9 = vld [vmem:[%s3251_s3 + $0x20] sm:$0xff]  ;;  %v524_v12 = vld [vmem:[%s3251_s3 + $0x18] sm:$0xff]  ;;  %v693_v28 = vshrl.u32 %v692_v27, 7  ;;  %vm1164_vm4 = vcmask 1046528  }
  0x64   : > { %s2042_s29 = sshll.u32 %s3275_s28, 4  ;;  %2161 = vmatpush3.msra.mxu0 %v528_v1  ;;  %2180 = vmatpush3.msra.mxu1 %v2891_v7  ;;  %v523_v14 = vld [vmem:[%s3251_s3 + $0x10] sm:$0xff]  ;;  %v522_v16 = vld [vmem:[%s3251_s3 + $0x8] sm:$0xff]  ;;  %v521_v18 = vld [vmem:[%s3251_s3] sm:$0xff] }
  0x65   : > { %s511_s16 = scalar_lea.vmem %s3248_s0, %s2042_s29  ;;  %2162 = vmatprep.subr.mxu0 %v2671_v0  ;;  %2181 = vmatprep.subr.mxu1 %v2671_v0  ;;  %v530_v22 = vld [vmem:[%s3252_s4 + $0x8] sm:$0xff]  ;;  %v529_v23 = vld [vmem:[%s3252_s4] sm:$0xff]  ;;  %v2945_v29 = vsub.s32 0, %v693_v28  ;;  %v901_v49 = vld [vmem:[%s3253_s5 + $0x38] sm:$0xff]  ;;  %s516_s19 = scalar_lea.vmem %s3261_s13, %s2042_s29 }
  0x66   : > { %v2882_v4 = vld [vmem:[%s511_s16] sm:$0xff]  ;;  %2163 = vmatpush3.msra.mxu0 %v527_v2  ;;  %v2884_v5 = vld [vmem:[%s511_s16 + $0x8] sm:$0xff]  ;;  %2182 = vmatpush3.msra.mxu1 %v2896_v8  ;;  %v1995_v50 = vld [vmem:[%s3253_s5 + $0x78] sm:$0xff] }
  0x67   : > { %v534_v6 = vsel %vm533_vm1, %v2882_v4, 0.0  ;;  %2164 = vmatprep.subr.mxu0 %v2671_v0  ;;  %v535_v10 = vsel %vm533_vm1, %v2884_v5, 0.0  ;;  %2183 = vmatprep.subr.mxu1 %v2671_v0  ;;  %v900_v51 = vld [vmem:[%s3253_s5 + $0x30] sm:$0xff]  ;;  %v899_v53 = vld [vmem:[%s3253_s5 + $0x28] sm:$0xff]  ;;  %v898_v55 = vld [vmem:[%s3253_s5 + $0x20] sm:$0xff] }
  0x68   : > { %2165 = vmatpush3.msra.mxu0 %v526_v3  ;;  %v536_v11 = vadd.f32 %v535_v10, %v534_v6  ;;  %2184 = vmatpush3.msra.mxu1 %v530_v22  ;;  %v1994_v52 = vld [vmem:[%s3253_s5 + $0x70] sm:$0xff]  ;;  %v1993_v54 = vld [vmem:[%s3253_s5 + $0x68] sm:$0xff]  ;;  %v1992_v56 = vld [vmem:[%s3253_s5 + $0x60] sm:$0xff] }
  0x69   : > { %2166 = vmatprep.subr.mxu0 %v2671_v0  ;;  %2185 = vmatprep.subr.mxu1 %v2671_v0  ;;  %v897_v57 = vld [vmem:[%s3253_s5 + $0x18] sm:$0xff]  ;;  %v896_v59 = vld [vmem:[%s3253_s5 + $0x10] sm:$0xff]  ;;  %v895_v61 = vld [vmem:[%s3253_s5 + $0x8] sm:$0xff] }
  0x6a   : > { %2167 = vmatpush3.msra.mxu0 %v525_v9  ;;  %v537_v13 = vrot.slane %v536_v11, 4  ;;  %2186 = vmatpush3.msra.mxu1 %v529_v23  ;;  %v1991_v58 = vld [vmem:[%s3253_s5 + $0x58] sm:$0xff]  ;;  %v1990_v60 = vld [vmem:[%s3253_s5 + $0x50] sm:$0xff]  ;;  %v1989_v62 = vld [vmem:[%s3253_s5 + $0x48] sm:$0xff] }
  0x6b   : > { %2168 = vmatprep.subr.mxu0 %v2671_v0  ;;  %2190 = vmatprep.subr.mxu1 %v2671_v0  ;;  %v894_v63 = vld [vmem:[%s3253_s5] sm:$0xff]  ;;  %v2004_v28 = vld [vmem:[%s3253_s5 + $0xb0] sm:$0xff] }
  0x6c   : > { %2169 = vmatpush3.msra.mxu0 %v524_v12  ;;  %v538_v15 = vadd.f32 %v537_v13, %v536_v11  ;;  %v1982_v10 = vld [vmem:[#allocation2] ss:$0 sm:$0xff]  ;;  %v1983_v13 = vld [vmem:[#allocation4] ss:$0 sm:$0xff] }
  0x6d   : > { %2170 = vmatprep.subr.mxu0 %v2671_v0 }
  0x6e   : > { %2171 = vmatpush3.msra.mxu0 %v523_v14  ;;  %v539_v17 = vrot.slane %v538_v15, 2 }
  0x6f   : > { %2172 = vmatprep.subr.mxu0 %v2671_v0 }
  0x70   : > { %2173 = vmatpush3.msra.mxu0 %v522_v16  ;;  %v540_v19 = vadd.f32 %v539_v17, %v538_v15 }
  0x71   : > { %2174 = vmatprep.subr.mxu0 %v2671_v0 }
  0x72   : > { %2175 = vmatpush3.msra.mxu0 %v521_v18  ;;  %v541_v20 = vrot.slane %v540_v19, 1 }
  0x73   : > { %2220 = vmatprep.subr.mxu0 %v901_v49 }
  0x74   : > { %v542_v21 = vadd.f32 %v541_v20, %v540_v19 }
  0x76   : > { %2177 = vmatmul.mubr.msk.f32.vlgmr.msra.gmra.mxu0 %vm533_vm1, %v542_v21 }
  0x77   : > { %2221 = vmatpush3.msra.mxu0 %v901_v49 }
  0x78   : > { %2222 = vmatprep.subr.mxu0 %v900_v51 }
  0x79   : > { %2223 = vmatpush3.msra.mxu0 %v900_v51 }
  0x7a   : > { %2224 = vmatprep.subr.mxu0 %v899_v53 }
  0x7b   : > { %2225 = vmatpush3.msra.mxu0 %v899_v53 }
  0x7c   : > { %2226 = vmatprep.subr.mxu0 %v898_v55 }
  0x7d   : > { %2227 = vmatpush3.msra.mxu0 %v898_v55 }
  0x7e   : > { %2228 = vmatprep.subr.mxu0 %v897_v57 }
  0x7f   : > { %2229 = vmatpush3.msra.mxu0 %v897_v57 }
  0x80   : > { %2230 = vmatprep.subr.mxu0 %v896_v59 }
  0x81   : > { %2231 = vmatpush3.msra.mxu0 %v896_v59 }
  0x82   : > { %2232 = vmatprep.subr.mxu0 %v895_v61 }
  0x83   : > { %2233 = vmatpush3.msra.mxu0 %v895_v61 }
  0x84   : > { %2234 = vmatprep.subr.mxu0 %v894_v63 }
  0x85   : > { %2235 = vmatpush3.msra.mxu0 %v894_v63 }
 0x136   : > { %v612_v24 = vpop.f32.mrf.mxu0 }
 0x137   : > { %v617_v25 = vmul.f32 0.03125, %v612_v24 }
 0x138   : > { %v2178_v26 = vpop.f32.mrf.mxu0 }
 0x139   : > { %2188 = vmatmul.mubr.msk.f32.vlgmr.msra.gmra.mxu1 %vm618_vm2, %v617_v25 }
 0x13a   : > { %2191 = vmatpush3.msra.mxu1 %v528_v1  ;;  %2206 = vmatprep.mubr.msk.f32.mxu1 %vm2672_vm0, %v2671_v0  ;;  %v1988_v1 = vld [vmem:[%s3253_s5 + $0x40] sm:$0xff] }
 0x13b   : > { %2192 = vmatprep.subr.mxu1 %v2671_v0 }
 0x13c   : > { %2193 = vmatpush3.msra.mxu1 %v527_v2  ;;  %v2005_v2 = vld [vmem:[%s3253_s5 + $0xb8] sm:$0xff] }
 0x13d   : > { %2194 = vmatprep.subr.mxu1 %v2671_v0  ;;  %2258 = vmatprep.subr.mxu0 %v2005_v2 }
 0x13e   : > { %2195 = vmatpush3.msra.mxu1 %v526_v3 }
 0x13f   : > { %2196 = vmatprep.subr.mxu1 %v2671_v0 }
 0x140   : > { %2197 = vmatpush3.msra.mxu1 %v525_v9 }
 0x141   : > { %2198 = vmatprep.subr.mxu1 %v2671_v0 }
 0x142   : > { %2199 = vmatpush3.msra.mxu1 %v524_v12 }
 0x143   : > { %2200 = vmatprep.subr.mxu1 %v2671_v0 }
 0x144   : > { %2201 = vmatpush3.msra.mxu1 %v523_v14 }
 0x145   : > { %2202 = vmatprep.subr.mxu1 %v2671_v0 }
 0x146   : > { %2203 = vmatpush3.msra.mxu1 %v522_v16 }
 0x147   : > { %2204 = vmatprep.subr.mxu1 %v2671_v0 }
 0x148   : > { %2205 = vmatpush3.msra.mxu1 %v521_v18 }
 0x149   : > { %2209 = vmatprep.subr.mxu1 %v2671_v0 }
 0x1f9   : > { %v688_v30 = vpop.f32.mrf.mxu1 }
 0x1fa   : > { %v695_v31 = vrot.slane %v688_v30, %v2945_v29  ;;  %v2003_v30 = vld [vmem:[%s3253_s5 + $0xa8] sm:$0xff] }
 0x1fb   : > { %v2189_v32 = vpop.f32.mrf.mxu1 }
 0x1fc   : > { %v2949_v33 = vsub.f32 %v2882_v4, %v695_v31  ;;  %v2952_v34 = vsub.f32 %v2884_v5, %v695_v31  ;;  %v2002_v31 = vld [vmem:[%s3253_s5 + $0xa0] sm:$0xff]  ;;  %v2001_v32 = vld [vmem:[%s3253_s5 + $0x98] sm:$0xff] }
 0x1fe   : > { %v698_v35 = vmul.f32 %v2949_v33, %v2949_v33  ;;  %v699_v36 = vmul.f32 %v2952_v34, %v2952_v34 }
 0x200   : > { %v700_v37 = vsel %vm533_vm1, %v698_v35, 0.0  ;;  %v701_v38 = vsel %vm533_vm1, %v699_v36, 0.0  ;;  %v1998_v35 = vld [vmem:[%s3253_s5 + $0x80] sm:$0xff]  ;;  %v3059_v36 = vld [vmem:[%s3257_s9 + $0x38] sm:$0xff] }
 0x201   : > { %v702_v39 = vadd.f32 %v701_v38, %v700_v37  ;;  %v1189_v37 = vld [vmem:[%s3257_s9 + $0x30] sm:$0xff]  ;;  %v1188_v38 = vld [vmem:[%s3257_s9 + $0x28] sm:$0xff] }
 0x203   : > { %v703_v40 = vrot.slane %v702_v39, 4 }
 0x205   : > { %v704_v41 = vadd.f32 %v703_v40, %v702_v39  ;;  %v1187_v39 = vld [vmem:[%s3257_s9 + $0x20] sm:$0xff]  ;;  %v1186_v40 = vld [vmem:[%s3257_s9 + $0x18] sm:$0xff] }
 0x207   : > { %v705_v42 = vrot.slane %v704_v41, 2 }
 0x209   : > { %v706_v43 = vadd.f32 %v705_v42, %v704_v41  ;;  %v1185_v41 = vld [vmem:[%s3257_s9 + $0x10] sm:$0xff]  ;;  %v1184_v42 = vld [vmem:[%s3257_s9 + $0x8] sm:$0xff] }
 0x20b   : > { %v707_v44 = vrot.slane %v706_v43, 1 }
 0x20d   : > { %v708_v45 = vadd.f32 %v707_v44, %v706_v43  ;;  %v1183_v43 = vld [vmem:[%s3257_s9] sm:$0xff]  ;;  %v3093_v44 = vld [vmem:[%s3258_s10 + $0x18] sm:$0xff] }
 0x20f   : > { %2207 = vmatmul.mubr.msk.f32.vlgmr.msra.gmra.mxu1 %vm533_vm1, %v708_v45  ;;  %v3098_v45 = vld [vmem:[%s3258_s10 + $0x10] sm:$0xff] }
 0x210   : > { %2210 = vmatpush3.msra.mxu1 %v2891_v7  ;;  %2217 = vmatprep.mubr.msk.f32.mxu1 %vm2672_vm0, %v2671_v0 }
 0x211   : > { %2211 = vmatprep.subr.mxu1 %v2671_v0 }
 0x212   : > { %2212 = vmatpush3.msra.mxu1 %v2896_v8 }
 0x213   : > { %2213 = vmatprep.subr.mxu1 %v2671_v0 }
 0x214   : > { %2214 = vmatpush3.msra.mxu1 %v530_v22 }
 0x215   : > { %2215 = vmatprep.subr.mxu1 %v2671_v0 }
 0x216   : > { %2216 = vmatpush3.msra.mxu1 %v529_v23 }
 0x217   : > { %2239 = vmatprep.subr.mxu1 %v1995_v50 }
 0x2cf   : > { %v778_v46 = vpop.f32.mrf.mxu1 }
 0x2d0   : > { %v782_v47 = vmul.f32 0.03125, %v778_v46 }
 0x2d1   : > { %v2208_v48 = vpop.f32.mrf.mxu1 }
 0x2d2   : > { %2218 = vmatmul.mubr.msk.f32.vlgmr.msra.gmra.mxu1 %vm618_vm2, %v782_v47 }
 0x2d3   : > { %2240 = vmatpush3.msra.mxu1 %v1995_v50 }
 0x2d4   : > { %2241 = vmatprep.subr.mxu1 %v1994_v52 }
 0x2d5   : > { %2242 = vmatpush3.msra.mxu1 %v1994_v52 }
 0x2d6   : > { %2243 = vmatprep.subr.mxu1 %v1993_v54 }
 0x2d7   : > { %2244 = vmatpush3.msra.mxu1 %v1993_v54 }
 0x2d8   : > { %2245 = vmatprep.subr.mxu1 %v1992_v56 }
 0x2d9   : > { %2246 = vmatpush3.msra.mxu1 %v1992_v56 }
 0x2da   : > { %2247 = vmatprep.subr.mxu1 %v1991_v58 }
 0x2db   : > { %2248 = vmatpush3.msra.mxu1 %v1991_v58  ;;  %v2008_v58 = vld [vmem:[#allocation6] ss:$0 sm:$0xff] }
 0x2dc   : > { %2249 = vmatprep.subr.mxu1 %v1990_v60 }
 0x2dd   : > { %2250 = vmatpush3.msra.mxu1 %v1990_v60 }
 0x2de   : > { %2251 = vmatprep.subr.mxu1 %v1989_v62 }
 0x2df   : > { %2252 = vmatpush3.msra.mxu1 %v1989_v62 }
 0x2e0   : > { %2253 = vmatprep.subr.mxu1 %v1988_v1 }
 0x2e1   : > { %2254 = vmatpush3.msra.mxu1 %v1988_v1 }
 0x2e2   : > { %2277 = vmatprep.subr.mxu1 %v2671_v0 }
 0x392   : > { %v852_v3 = vpop.f32.mrf.mxu1 }
 0x393   : > { %v853_v6 = vadd.f32 1e-06, %v852_v3 }
 0x394   : > { %v2219_v7 = vpop.f32.mrf.mxu1 }
 0x395   : > { %2465 = vrsqrt.f32 %v853_v6 }
 0x3a2   : > { %v2466_v8 = vpop.eup %2465 }
 0x3a3   : > { %v860_v9 = vrot.slane %v2466_v8, %v2945_v29 }
 0x3a5   : > { %v861_v11 = vmul.f32 %v860_v9, %v2949_v33  ;;  %v862_v12 = vmul.f32 %v860_v9, %v2952_v34  ;;  %v2000_v33 = vld [vmem:[%s3253_s5 + $0x90] sm:$0xff]  ;;  %v1999_v34 = vld [vmem:[%s3253_s5 + $0x88] sm:$0xff] }
 0x3a7   : > { %v869_v14 = vmul.f32 %v1982_v10, %v861_v11  ;;  %v870_v15 = vmul.f32 %v1982_v10, %v862_v12 }
 0x3a9   : > { %v877_v16 = vadd.f32 %v1983_v13, %v869_v14  ;;  %v878_v17 = vadd.f32 %v1983_v13, %v870_v15  ;;  %v1192_v15 = vld [vmem:[%s3258_s10 + $0x8] sm:$0xff] }
 0x3ab   : > { %v1984_v18 = vmul.f32 -1.442695, %v877_v16  ;;  %v1985_v19 = vmul.f32 -1.442695, %v878_v17 }
 0x3ad   : > { %2467 = vpow2.f32 %v1984_v18 }
 0x3ae   : > { %2469 = vpow2.f32 %v1985_v19 }
 0x3ba   : > { %v2468_v20 = vpop.eup %2467 }
 0x3bb   : > { %v2470_v21 = vpop.eup %2469  ;;  %v885_v22 = vadd.f32 1.0, %v2468_v20 }
 0x3bc   : > { %v886_v23 = vadd.f32 1.0, %v2470_v21 }
 0x3bd   : > { %2471 = vrcp.f32 %v885_v22 }
 0x3be   : > { %2473 = vrcp.f32 %v886_v23 }
 0x3ca   : > { %v2472_v24 = vpop.eup %2471 }
 0x3cb   : > { %v2474_v25 = vpop.eup %2473  ;;  %v891_v26 = vmul.f32 %v2472_v24, %v877_v16  ;;  %v1191_v16 = vld [vmem:[%s3258_s10] sm:$0xff] }
 0x3cc   : > { %v892_v27 = vmul.f32 %v2474_v25, %v878_v17 }
 0x3cd   : > { %2236 = vmatprep.mubr.msk.f32.mxu0 %vm533_vm1, %v891_v26  ;;  %2255 = vmatprep.mubr.msk.f32.mxu1 %vm533_vm1, %v891_v26 }
 0x3ce   : > { %2237 = vmatmul.mubr.msk.f32.vlgmr.msra.gmra.mxu0 %vm533_vm1, %v892_v27  ;;  %2256 = vmatmul.mubr.msk.f32.vlgmr.msra.gmra.mxu1 %vm533_vm1, %v892_v27 }
 0x3cf   : > { %2259 = vmatpush3.msra.mxu0 %v2005_v2  ;;  %2274 = vmatprep.mubr.msk.f32.mxu0 %vm533_vm1, %v891_v26 }
 0x3d0   : > { %2260 = vmatprep.subr.mxu0 %v2004_v28  ;;  %2293 = vmatprep.mubr.msk.f32.mxu1 %vm2672_vm0, %v2671_v0 }
 0x3d1   : > { %2261 = vmatpush3.msra.mxu0 %v2004_v28  ;;  %2278 = vmatpush3.msra.mxu1 %v3059_v36 }
 0x3d2   : > { %2262 = vmatprep.subr.mxu0 %v2003_v30  ;;  %2279 = vmatprep.subr.mxu1 %v2671_v0 }
 0x3d3   : > { %2263 = vmatpush3.msra.mxu0 %v2003_v30  ;;  %2280 = vmatpush3.msra.mxu1 %v1189_v37 }
 0x3d4   : > { %2264 = vmatprep.subr.mxu0 %v2002_v31  ;;  %2281 = vmatprep.subr.mxu1 %v2671_v0 }
 0x3d5   : > { %2265 = vmatpush3.msra.mxu0 %v2002_v31  ;;  %2282 = vmatpush3.msra.mxu1 %v1188_v38 }
 0x3d6   : > { %2266 = vmatprep.subr.mxu0 %v2001_v32  ;;  %2283 = vmatprep.subr.mxu1 %v2671_v0 }
 0x3d7   : > { %2267 = vmatpush3.msra.mxu0 %v2001_v32  ;;  %2284 = vmatpush3.msra.mxu1 %v1187_v39 }
 0x3d8   : > { %2268 = vmatprep.subr.mxu0 %v2000_v33  ;;  %2285 = vmatprep.subr.mxu1 %v2671_v0 }
 0x3d9   : > { %2269 = vmatpush3.msra.mxu0 %v2000_v33  ;;  %2286 = vmatpush3.msra.mxu1 %v1186_v40 }
 0x3da   : > { %2270 = vmatprep.subr.mxu0 %v1999_v34  ;;  %2287 = vmatprep.subr.mxu1 %v2671_v0 }
 0x3db   : > { %2271 = vmatpush3.msra.mxu0 %v1999_v34  ;;  %2288 = vmatpush3.msra.mxu1 %v1185_v41 }
 0x3dc   : > { %2272 = vmatprep.subr.mxu0 %v1998_v35  ;;  %2289 = vmatprep.subr.mxu1 %v2671_v0 }
 0x3dd   : > { %2273 = vmatpush3.msra.mxu0 %v1998_v35  ;;  %2290 = vmatpush3.msra.mxu1 %v1184_v42 }
 0x3de   : > { %2275 = vmatmul.mubr.msk.f32.vlgmr.msra.gmra.mxu0 %vm533_vm1, %v892_v27  ;;  %2296 = vmatprep.subr.mxu0 %v2671_v0 }
 0x3df   : > { %2304 = vmatprep.mubr.msk.f32.mxu0 %vm2672_vm0, %v2671_v0  ;;  %2291 = vmatprep.subr.mxu1 %v2671_v0 }
 0x3e0   : > { %2292 = vmatpush3.msra.mxu1 %v1183_v43  ;;  %2297 = vmatpush3.msra.mxu0 %v3093_v44 }
 0x3e1   : > { %2307 = vmatprep.subr.mxu1 %v2671_v0  ;;  %2298 = vmatprep.subr.mxu0 %v2671_v0 }
 0x3e2   : > { %2299 = vmatpush3.msra.mxu0 %v3098_v45 }
 0x3e3   : > { %2300 = vmatprep.subr.mxu0 %v2671_v0 }
 0x3e4   : > { %2301 = vmatpush3.msra.mxu0 %v1192_v15 }
 0x3e5   : > { %2302 = vmatprep.subr.mxu0 %v2671_v0 }
 0x3e6   : > { %2303 = vmatpush3.msra.mxu0 %v1191_v16 }
 0x3e7   : > { %2326 = vmatprep.subr.mxu0 %v2671_v0 }
 0x48e   : > { %v2238_v46 = vpop.f32.mrf.mxu0  ;;  %v2257_v50 = vpop.f32.mrf.mxu1 }
 0x48f   : > { %v1155_v49 = vrot.slane %v2238_v46, 7  ;;  %v2023_v46 = vld [vmem:[%s3259_s11 + $0x60] sm:$0xff] }
 0x490   : > { %v974_v47 = vpop.f32.mrf.mxu0  ;;  %v1058_v57 = vpop.f32.mrf.mxu1 }
 0x491   : > { %v1154_v48 = vrot.slane %v974_v47, 7  ;;  %v1556_v47 = vld [vmem:[%s3259_s11 + $0x18] sm:$0xff] }
 0x493   : > { %v1156_v51 = vsel %vm1153_vm3, %v1154_v48, %v1155_v49  ;;  %v1159_v53 = vsel %vm1153_vm3, 0.0, %v1154_v48  ;;  %v2022_v48 = vld [vmem:[%s3259_s11 + $0x58] sm:$0xff]  ;;  %v1555_v49 = vld [vmem:[%s3259_s11 + $0x10] sm:$0xff] }
 0x494   : > { %v1161_v55 = vadd.f32 %v2257_v50, %v1156_v51  ;;  %v1160_v61 = vadd.f32 %v1159_v53, %v1058_v57  ;;  %v2021_v50 = vld [vmem:[%s3259_s11 + $0x50] sm:$0xff]  ;;  %v1554_v51 = vld [vmem:[%s3259_s11 + $0x8] sm:$0xff]  ;;  %v1553_v53 = vld [vmem:[%s3259_s11] sm:$0xff] }
 0x49e   : > { %v2276_v52 = vpop.f32.mrf.mxu0 }
 0x49f   : > { %v1166_v54 = vrot.slane %v2276_v52, 1  ;;  %v2020_v52 = vld [vmem:[%s3259_s11 + $0x48] sm:$0xff] }
 0x4a0   : > { %v1142_v56 = vpop.f32.mrf.mxu0 }
 0x4a1   : > { %v1170_v59 = vsel %vm1164_vm4, %v1166_v54, 0.0  ;;  %v1165_v60 = vrot.slane %v1142_v56, 1 }
 0x4a2   : > { %v1172_v62 = vadd.f32 %v1170_v59, %v1161_v55  ;;  %v2036_v55 = vld [vmem:[%s3259_s11 + $0xb8] sm:$0xff] }
 0x4a3   : > { %v1167_v63 = vsel %vm1164_vm4, %v1165_v60, %v1166_v54  ;;  %v2019_v54 = vld [vmem:[%s3259_s11 + $0x40] sm:$0xff] }
 0x4a4   : > { %v1180_v1 = vadd.f32 %v2008_v58, %v1172_v62  ;;  %v1171_v2 = vadd.f32 %v1167_v63, %v1160_v61  ;;  %v2013_v61 = vld [vmem:[#allocation7] ss:$0 sm:$0xff] }
 0x4a6   : > { %v1179_v3 = vadd.f32 %v2008_v58, %v1171_v2  ;;  %v1196_v6 = vsel %vm533_vm1, %v1180_v1, 0.0 }
 0x4a8   : > { %v1195_v7 = vsel %vm533_vm1, %v1179_v3, 0.0 }
 0x4a9   : > { %v1197_v8 = vadd.f32 %v1196_v6, %v1195_v7 }
 0x4ab   : > { %v1198_v9 = vrot.slane %v1197_v8, 4 }
 0x4ad   : > { %v1199_v10 = vadd.f32 %v1198_v9, %v1197_v8 }
 0x4af   : > { %v1200_v11 = vrot.slane %v1199_v10, 2 }
 0x4b1   : > { %v1201_v12 = vadd.f32 %v1200_v11, %v1199_v10 }
 0x4b3   : > { %v1202_v13 = vrot.slane %v1201_v12, 1 }
 0x4b5   : > { %v1203_v14 = vadd.f32 %v1202_v13, %v1201_v12 }
 0x4b7   : > { %2294 = vmatmul.mubr.msk.f32.vlgmr.msra.gmra.mxu1 %vm533_vm1, %v1203_v14 }
 0x4b8   : > { %2308 = vmatpush3.msra.mxu1 %v3059_v36  ;;  %2323 = vmatprep.mubr.msk.f32.mxu1 %vm2672_vm0, %v2671_v0 }
 0x4b9   : > { %2309 = vmatprep.subr.mxu1 %v2671_v0 }
 0x4ba   : > { %2310 = vmatpush3.msra.mxu1 %v1189_v37 }
 0x4bb   : > { %2311 = vmatprep.subr.mxu1 %v2671_v0 }
 0x4bc   : > { %2312 = vmatpush3.msra.mxu1 %v1188_v38 }
 0x4bd   : > { %2313 = vmatprep.subr.mxu1 %v2671_v0 }
 0x4be   : > { %2314 = vmatpush3.msra.mxu1 %v1187_v39  ;;  %v1560_v39 = vld [vmem:[%s3259_s11 + $0x38] sm:$0xff] }
 0x4bf   : > { %2315 = vmatprep.subr.mxu1 %v2671_v0 }
 0x4c0   : > { %2316 = vmatpush3.msra.mxu1 %v1186_v40  ;;  %v2026_v40 = vld [vmem:[%s3259_s11 + $0x78] sm:$0xff] }
 0x4c1   : > { %2317 = vmatprep.subr.mxu1 %v2671_v0 }
 0x4c2   : > { %2318 = vmatpush3.msra.mxu1 %v1185_v41  ;;  %v1559_v41 = vld [vmem:[%s3259_s11 + $0x30] sm:$0xff] }
 0x4c3   : > { %2319 = vmatprep.subr.mxu1 %v2671_v0 }
 0x4c4   : > { %2320 = vmatpush3.msra.mxu1 %v1184_v42  ;;  %v2025_v42 = vld [vmem:[%s3259_s11 + $0x70] sm:$0xff] }
 0x4c5   : > { %2321 = vmatprep.subr.mxu1 %v2671_v0 }
 0x4c6   : > { %2322 = vmatpush3.msra.mxu1 %v1183_v43  ;;  %v1558_v43 = vld [vmem:[%s3259_s11 + $0x28] sm:$0xff] }
 0x4c7   : > { %2356 = vmatprep.subr.mxu1 %v2026_v40 }
 0x577   : > { %v1273_v17 = vpop.f32.mrf.mxu1 }
 0x578   : > { %v1277_v18 = vmul.f32 0.03125, %v1273_v17  ;;  %v2035_v17 = vld [vmem:[%s3259_s11 + $0xb0] sm:$0xff] }
 0x579   : > { %v2295_v19 = vpop.f32.mrf.mxu1 }
 0x57a   : > { %2305 = vmatmul.mubr.msk.f32.vlgmr.msra.gmra.mxu0 %vm618_vm2, %v1277_v18  ;;  %v2034_v18 = vld [vmem:[%s3259_s11 + $0xa8] sm:$0xff]  ;;  %v2033_v19 = vld [vmem:[%s3259_s11 + $0xa0] sm:$0xff] }
 0x57b   : > { %2327 = vmatpush3.msra.mxu0 %v3093_v44  ;;  %2334 = vmatprep.mubr.msk.f32.mxu0 %vm2672_vm0, %v2671_v0  ;;  %v2024_v44 = vld [vmem:[%s3259_s11 + $0x68] sm:$0xff] }
 0x57c   : > { %2328 = vmatprep.subr.mxu0 %v2671_v0 }
 0x57d   : > { %2329 = vmatpush3.msra.mxu0 %v3098_v45  ;;  %v1557_v45 = vld [vmem:[%s3259_s11 + $0x20] sm:$0xff] }
 0x57e   : > { %2330 = vmatprep.subr.mxu0 %v2671_v0 }
 0x57f   : > { %2331 = vmatpush3.msra.mxu0 %v1192_v15 }
 0x580   : > { %2332 = vmatprep.subr.mxu0 %v2671_v0 }
 0x581   : > { %2333 = vmatpush3.msra.mxu0 %v1191_v16 }
 0x582   : > { %2337 = vmatprep.subr.mxu0 %v1560_v39 }
 0x63a   : > { %v1347_v20 = vpop.f32.mrf.mxu0 }
 0x63b   : > { %v1354_v21 = vrot.slane %v1347_v20, %v2945_v29  ;;  %v2032_v20 = vld [vmem:[%s3259_s11 + $0x98] sm:$0xff] }
 0x63c   : > { %v2306_v22 = vpop.f32.mrf.mxu0 }
 0x63d   : > { %v3139_v23 = vsub.f32 %v1179_v3, %v1354_v21  ;;  %v3141_v24 = vsub.f32 %v1180_v1, %v1354_v21  ;;  %v2014_v1 = vld [vmem:[#allocation9] ss:$0 sm:$0xff]  ;;  %v2031_v21 = vld [vmem:[%s3259_s11 + $0x90] sm:$0xff] }
 0x63e   : > { %v2030_v22 = vld [vmem:[%s3259_s11 + $0x88] sm:$0xff] }
 0x63f   : > { %v1357_v25 = vmul.f32 %v3139_v23, %v3139_v23  ;;  %v1358_v26 = vmul.f32 %v3141_v24, %v3141_v24 }
 0x641   : > { %v1359_v27 = vsel %vm533_vm1, %v1357_v25, 0.0  ;;  %v1360_v28 = vsel %vm533_vm1, %v1358_v26, 0.0 }
 0x642   : > { %v1361_v0 = vadd.f32 %v1360_v28, %v1359_v27 }
 0x644   : > { %v1362_v30 = vrot.slane %v1361_v0, 4 }
 0x646   : > { %v1363_v31 = vadd.f32 %v1362_v30, %v1361_v0 }
 0x648   : > { %v1364_v32 = vrot.slane %v1363_v31, 2 }
 0x64a   : > { %v1365_v33 = vadd.f32 %v1364_v32, %v1363_v31 }
 0x64c   : > { %v1366_v34 = vrot.slane %v1365_v33, 1 }
 0x64e   : > { %v1367_v35 = vadd.f32 %v1366_v34, %v1365_v33 }
 0x650   : > { %2324 = vmatmul.mubr.msk.f32.vlgmr.msra.gmra.mxu1 %vm533_vm1, %v1367_v35 }
 0x651   : > { %2357 = vmatpush3.msra.mxu1 %v2026_v40 }
 0x652   : > { %2358 = vmatprep.subr.mxu1 %v2025_v42 }
 0x653   : > { %2359 = vmatpush3.msra.mxu1 %v2025_v42 }
 0x654   : > { %2360 = vmatprep.subr.mxu1 %v2024_v44 }
 0x655   : > { %2361 = vmatpush3.msra.mxu1 %v2024_v44 }
 0x656   : > { %2362 = vmatprep.subr.mxu1 %v2023_v46 }
 0x657   : > { %2363 = vmatpush3.msra.mxu1 %v2023_v46 }
 0x658   : > { %2364 = vmatprep.subr.mxu1 %v2022_v48 }
 0x659   : > { %2365 = vmatpush3.msra.mxu1 %v2022_v48 }
 0x65a   : > { %2366 = vmatprep.subr.mxu1 %v2021_v50 }
 0x65b   : > { %2367 = vmatpush3.msra.mxu1 %v2021_v50 }
 0x65c   : > { %2368 = vmatprep.subr.mxu1 %v2020_v52 }
 0x65d   : > { %2369 = vmatpush3.msra.mxu1 %v2020_v52 }
 0x65e   : > { %2370 = vmatprep.subr.mxu1 %v2019_v54 }
 0x65f   : > { %2371 = vmatpush3.msra.mxu1 %v2019_v54 }
 0x710   : > { %v1437_v36 = vpop.f32.mrf.mxu1 }
 0x711   : > { %v1441_v37 = vmul.f32 0.03125, %v1437_v36  ;;  %v2039_v36 = vld [vmem:[#allocation10] ss:$0 sm:$0xff] }
 0x712   : > { %v2325_v38 = vpop.f32.mrf.mxu1 }
 0x713   : > { %2335 = vmatmul.mubr.msk.f32.vlgmr.msra.gmra.mxu0 %vm618_vm2, %v1441_v37 }
 0x714   : > { %2338 = vmatpush3.msra.mxu0 %v1560_v39 }
 0x715   : > { %2339 = vmatprep.subr.mxu0 %v1559_v41 }
 0x716   : > { %2340 = vmatpush3.msra.mxu0 %v1559_v41 }
 0x717   : > { %2341 = vmatprep.subr.mxu0 %v1558_v43 }
 0x718   : > { %2342 = vmatpush3.msra.mxu0 %v1558_v43 }
 0x719   : > { %2343 = vmatprep.subr.mxu0 %v1557_v45 }
 0x71a   : > { %2344 = vmatpush3.msra.mxu0 %v1557_v45 }
 0x71b   : > { %2345 = vmatprep.subr.mxu0 %v1556_v47 }
 0x71c   : > { %2346 = vmatpush3.msra.mxu0 %v1556_v47 }
 0x71d   : > { %2347 = vmatprep.subr.mxu0 %v1555_v49 }
 0x71e   : > { %2348 = vmatpush3.msra.mxu0 %v1555_v49 }
 0x71f   : > { %2349 = vmatprep.subr.mxu0 %v1554_v51 }
 0x720   : > { %2350 = vmatpush3.msra.mxu0 %v1554_v51 }
 0x721   : > { %2351 = vmatprep.subr.mxu0 %v1553_v53 }
 0x722   : > { %2352 = vmatpush3.msra.mxu0 %v1553_v53 }
 0x723   : > { %2375 = vmatprep.subr.mxu0 %v2036_v55 }
 0x7d3   : > { %v1511_v56 = vpop.f32.mrf.mxu0 }
 0x7d4   : > { %v1512_v57 = vadd.f32 1e-06, %v1511_v56 }
 0x7d5   : > { %v2336_v58 = vpop.f32.mrf.mxu0 }
 0x7d6   : > { %2475 = vrsqrt.f32 %v1512_v57 }
 0x7e3   : > { %v2476_v59 = vpop.eup %2475 }
 0x7e4   : > { %v1519_v60 = vrot.slane %v2476_v59, %v2945_v29 }
 0x7e6   : > { %v1520_v62 = vmul.f32 %v1519_v60, %v3139_v23  ;;  %v1521_v63 = vmul.f32 %v1519_v60, %v3141_v24  ;;  %v2029_v23 = vld [vmem:[%s3259_s11 + $0x80] sm:$0xff] }
 0x7e8   : > { %v1528_v2 = vmul.f32 %v2013_v61, %v1520_v62  ;;  %v1529_v3 = vmul.f32 %v2013_v61, %v1521_v63 }
 0x7ea   : > { %v1536_v6 = vadd.f32 %v2014_v1, %v1528_v2  ;;  %v1537_v7 = vadd.f32 %v2014_v1, %v1529_v3 }
 0x7ec   : > { %v2015_v8 = vmul.f32 -1.442695, %v1536_v6  ;;  %v2016_v9 = vmul.f32 -1.442695, %v1537_v7 }
 0x7ee   : > { %2477 = vpow2.f32 %v2015_v8 }
 0x7ef   : > { %2479 = vpow2.f32 %v2016_v9 }
 0x7fb   : > { %v2478_v10 = vpop.eup %2477 }
 0x7fc   : > { %v2480_v11 = vpop.eup %2479  ;;  %v1544_v12 = vadd.f32 1.0, %v2478_v10 }
 0x7fd   : > { %v1545_v13 = vadd.f32 1.0, %v2480_v11 }
 0x7fe   : > { %2481 = vrcp.f32 %v1544_v12 }
 0x7ff   : > { %2483 = vrcp.f32 %v1545_v13 }
 0x80b   : > { %v2482_v29 = vpop.eup %2481 }
 0x80c   : > { %v2484_v14 = vpop.eup %2483  ;;  %v1550_v15 = vmul.f32 %v2482_v29, %v1536_v6 }
 0x80d   : > { %v1551_v16 = vmul.f32 %v2484_v14, %v1537_v7 }
 0x80e   : > { %2353 = vmatprep.mubr.msk.f32.mxu0 %vm533_vm1, %v1550_v15  ;;  %2372 = vmatprep.mubr.msk.f32.mxu1 %vm533_vm1, %v1550_v15 }
 0x80f   : > { %2354 = vmatmul.mubr.msk.f32.vlgmr.msra.gmra.mxu0 %vm533_vm1, %v1551_v16  ;;  %2373 = vmatmul.mubr.msk.f32.vlgmr.msra.gmra.mxu1 %vm533_vm1, %v1551_v16 }
 0x810   : > { %2376 = vmatpush3.msra.mxu0 %v2036_v55  ;;  %2391 = vmatprep.mubr.msk.f32.mxu0 %vm533_vm1, %v1550_v15 }
 0x811   : > { %2377 = vmatprep.subr.mxu0 %v2035_v17 }
 0x812   : > { %2378 = vmatpush3.msra.mxu0 %v2035_v17 }
 0x813   : > { %2379 = vmatprep.subr.mxu0 %v2034_v18 }
 0x814   : > { %2380 = vmatpush3.msra.mxu0 %v2034_v18 }
 0x815   : > { %2381 = vmatprep.subr.mxu0 %v2033_v19 }
 0x816   : > { %2382 = vmatpush3.msra.mxu0 %v2033_v19 }
 0x817   : > { %2383 = vmatprep.subr.mxu0 %v2032_v20 }
 0x818   : > { %2384 = vmatpush3.msra.mxu0 %v2032_v20 }
 0x819   : > { %2385 = vmatprep.subr.mxu0 %v2031_v21 }
 0x81a   : > { %2386 = vmatpush3.msra.mxu0 %v2031_v21 }
 0x81b   : > { %2387 = vmatprep.subr.mxu0 %v2030_v22 }
 0x81c   : > { %2388 = vmatpush3.msra.mxu0 %v2030_v22 }
 0x81d   : > { %2389 = vmatprep.subr.mxu0 %v2029_v23 }
 0x81e   : > { %2390 = vmatpush3.msra.mxu0 %v2029_v23 }
 0x81f   : > { %2392 = vmatmul.mubr.msk.f32.vlgmr.msra.gmra.mxu0 %vm533_vm1, %v1551_v16 }
 0x8cf   : > { %v2355_v24 = vpop.f32.mrf.mxu0  ;;  %v2374_v28 = vpop.f32.mrf.mxu1 }
 0x8d0   : > { %v1813_v27 = vrot.slane %v2355_v24, 7 }
 0x8d1   : > { %v1633_v25 = vpop.f32.mrf.mxu0  ;;  %v1717_v35 = vpop.f32.mrf.mxu1 }
 0x8d2   : > { %v1812_v26 = vrot.slane %v1633_v25, 7 }
 0x8d4   : > { %v1814_v0 = vsel %vm1153_vm3, %v1812_v26, %v1813_v27  ;;  %v1817_v31 = vsel %vm1153_vm3, 0.0, %v1812_v26 }
 0x8d5   : > { %v1819_v33 = vadd.f32 %v2374_v28, %v1814_v0  ;;  %v1818_v39 = vadd.f32 %v1817_v31, %v1717_v35 }
 0x8df   : > { %v2393_v30 = vpop.f32.mrf.mxu0 }
 0x8e0   : > { %v1823_v32 = vrot.slane %v2393_v30, 1 }
 0x8e1   : > { %v1801_v34 = vpop.f32.mrf.mxu0 }
 0x8e2   : > { %v1827_v37 = vsel %vm1164_vm4, %v1823_v32, 0.0  ;;  %v1822_v38 = vrot.slane %v1801_v34, 1 }
 0x8e3   : > { %v1829_v40 = vadd.f32 %v1827_v37, %v1819_v33 }
 0x8e4   : > { %v1824_v41 = vsel %vm1164_vm4, %v1822_v38, %v1823_v32 }
 0x8e5   : > { %v1837_v42 = vadd.f32 %v2039_v36, %v1829_v40  ;;  %v1828_v43 = vadd.f32 %v1824_v41, %v1818_v39 }
 0x8e7   : > { %v1839_v44 = vadd.f32 %v1837_v42, %v2884_v5  ;;  %v1836_v45 = vadd.f32 %v2039_v36, %v1828_v43 }
 0x8e9   : > { %1841 = vst.msk [vmem:[%s516_s19 + $0x8] sm:$0xff] %vm533_vm1, %v1839_v44  ;;  %v1838_v46 = vadd.f32 %v1836_v45, %v2882_v4 }
 0x8eb   : > { %1840 = vst.msk [vmem:[%s516_s19] sm:$0xff] %vm533_vm1, %v1838_v46 }
 0x8ec PF: > { %s27_s25 = sadd.s32 1, %s2663_s25  }
 0x8ed   : > { %p24_p13 = scmp.ge.s32.totalorder %s27_s25, 4  }
 0x8ef   :  { %26 = sbr.rel (!%p24_p13) target bundleno = 4 (0x4), region = 131 }
 0x8f4   :  { %1863 = vsyncpa [#allocation3], 1 }
 0x8f5   :  { %1865 = vsyncpa [#allocation3 + $0x1], 1 }
 0x8f6   :  { %1866 = vsyncpa [#allocation5], 1 }
 0x8f7   :  { %1867 = vsyncpa [#allocation8], 1 }
 0x8f8   :  { %1868 = vsyncpa [#allocation11], 1 }

// kernel: _lambda_.20
= control target key start
LH: loop header
LB: loop body
LE: loop exit
PB: predicated region body
PF: predicated region fallthrough
CT: control target
= control target key end

     0   :  { %s767_s15 = smov 0   ;;  %s879_s0 = inlined_call_operand.vmem [shape: f32[2,16,64], index: 0, kind: input, shape index: {}]   ;;  %s880_s1 = inlined_call_operand.vmem [shape: f32[3,64,64], index: 1, kind: input, shape index: {}]   ;;  %s881_s2 = inlined_call_operand.vmem [shape: f32[1,64], index: 2, kind: input, shape index: {}]   ;;  %s882_s3 = inlined_call_operand.vmem [shape: f32[2,16,64], index: 3, kind: output, shape index: {0}]   ;;  %s883_s4 = inlined_call_operand.vmem [shape: f32[2,16,64], index: 4, kind: output, shape index: {1}]  }
   0x1 LB: > { %s600_s16 = sadd.s32 4294967295, %s740_s15   ;;  %p604_p0 = scmp.ge.s32.totalorder %s740_s15, 1  ;;  %s740_s15 = sphi %s767_s15, %s15_s15  }
   0x2   : > { %p165_p1 = scmp.lt.s32.totalorder %s740_s15, 3 }
   0x4   : > { %p166_p2 = pnand %p604_p0, %p165_p1 }
   0x5   : > { %p196_p3 = scmp.lt.s32.totalorder (!%p166_p2), %s600_s16, 1 }
   0x6   : > { %169 = sbr.rel (%p166_p2) target bundleno = 249 (0xf9), region = 32 }
   0xb   : > { %v220_v0 = vld [vmem:[%s880_s1 + $0x38] sm:$0xff]  ;;  %v219_v2 = vld [vmem:[%s880_s1 + $0x30] sm:$0xff]  ;;  %v218_v4 = vld [vmem:[%s880_s1 + $0x28] sm:$0xff]  ;;  %s885_s16 = smov (!%p196_p3, %s600_s16), 1  ;;  %vm221_vm0 = vcmask 523264   ;;  %vm474_vm1 = vcmask 1040384  }
   0xc   : > { %v620_v1 = vld [vmem:[%s880_s1 + $0x78] sm:$0xff]  ;;  %669 = vmatprep.subr.mxu0 %v220_v0  ;;  %v619_v3 = vld [vmem:[%s880_s1 + $0x70] sm:$0xff]  ;;  %v618_v5 = vld [vmem:[%s880_s1 + $0x68] sm:$0xff]  ;;  %s805_s11 = sshll.u32 %s885_s16, 4  ;;  %vm499_vm2 = vcmask 1046528  }
   0xd   : > { %688 = vmatprep.subr.mxu1 %v620_v1  ;;  %670 = vmatpush3.msra.mxu0 %v220_v0  ;;  %v217_v6 = vld [vmem:[%s880_s1 + $0x20] sm:$0xff]  ;;  %v216_v8 = vld [vmem:[%s880_s1 + $0x18] sm:$0xff]  ;;  %v215_v10 = vld [vmem:[%s880_s1 + $0x10] sm:$0xff]  ;;  %s200_s23 = scalar_lea.vmem %s879_s0, %s805_s11  ;;  %s205_s24 = scalar_lea.vmem %s882_s3, %s805_s11 }
   0xe   : > { %689 = vmatpush3.msra.mxu1 %v620_v1  ;;  %671 = vmatprep.subr.mxu0 %v219_v2  ;;  %v617_v7 = vld [vmem:[%s880_s1 + $0x60] sm:$0xff]  ;;  %v616_v9 = vld [vmem:[%s880_s1 + $0x58] sm:$0xff]  ;;  %v615_v11 = vld [vmem:[%s880_s1 + $0x50] sm:$0xff]  ;;  %s210_s27 = scalar_lea.vmem %s883_s4, %s805_s11 }
   0xf   : > { %690 = vmatprep.subr.mxu1 %v619_v3  ;;  %672 = vmatpush3.msra.mxu0 %v219_v2  ;;  %v214_v12 = vld [vmem:[%s880_s1 + $0x8] sm:$0xff]  ;;  %v213_v14 = vld [vmem:[%s880_s1] sm:$0xff]  ;;  %v630_v18 = vld [vmem:[%s880_s1 + $0xb8] sm:$0xff] }
  0x10   : > { %691 = vmatpush3.msra.mxu1 %v619_v3  ;;  %673 = vmatprep.subr.mxu0 %v218_v4  ;;  %v614_v13 = vld [vmem:[%s880_s1 + $0x48] sm:$0xff]  ;;  %v613_v15 = vld [vmem:[%s880_s1 + $0x40] sm:$0xff]  ;;  %v629_v19 = vld [vmem:[%s880_s1 + $0xb0] sm:$0xff] }
  0x11   : > { %692 = vmatprep.subr.mxu1 %v618_v5  ;;  %674 = vmatpush3.msra.mxu0 %v218_v4  ;;  %v211_v16 = vld [vmem:[%s200_s23] sm:$0xff]  ;;  %v212_v17 = vld [vmem:[%s200_s23 + $0x8] sm:$0xff]  ;;  %v626_v22 = vld [vmem:[%s880_s1 + $0x98] sm:$0xff] }
  0x12   : > { %693 = vmatpush3.msra.mxu1 %v618_v5  ;;  %675 = vmatprep.subr.mxu0 %v217_v6  ;;  %v628_v20 = vld [vmem:[%s880_s1 + $0xa8] sm:$0xff]  ;;  %v627_v21 = vld [vmem:[%s880_s1 + $0xa0] sm:$0xff]  ;;  %v625_v23 = vld [vmem:[%s880_s1 + $0x90] sm:$0xff] }
  0x13   : > { %694 = vmatprep.subr.mxu1 %v617_v7  ;;  %676 = vmatpush3.msra.mxu0 %v217_v6  ;;  %v624_v24 = vld [vmem:[%s880_s1 + $0x88] sm:$0xff]  ;;  %v623_v25 = vld [vmem:[%s880_s1 + $0x80] sm:$0xff] }
  0x14   : > { %695 = vmatpush3.msra.mxu1 %v617_v7  ;;  %677 = vmatprep.subr.mxu0 %v216_v8  ;;  %v633_v36 = vld [vmem:[%s881_s2] ss:$0 sm:$0xff] }
  0x15   : > { %696 = vmatprep.subr.mxu1 %v616_v9  ;;  %678 = vmatpush3.msra.mxu0 %v216_v8 }
  0x16   : > { %697 = vmatpush3.msra.mxu1 %v616_v9  ;;  %679 = vmatprep.subr.mxu0 %v215_v10 }
  0x17   : > { %698 = vmatprep.subr.mxu1 %v615_v11  ;;  %680 = vmatpush3.msra.mxu0 %v215_v10 }
  0x18   : > { %699 = vmatpush3.msra.mxu1 %v615_v11  ;;  %681 = vmatprep.subr.mxu0 %v214_v12 }
  0x19   : > { %700 = vmatprep.subr.mxu1 %v614_v13  ;;  %682 = vmatpush3.msra.mxu0 %v214_v12 }
  0x1a   : > { %701 = vmatpush3.msra.mxu1 %v614_v13  ;;  %683 = vmatprep.subr.mxu0 %v213_v14 }
  0x1b   : > { %702 = vmatprep.subr.mxu1 %v613_v15  ;;  %684 = vmatpush3.msra.mxu0 %v213_v14 }
  0x1c   : > { %685 = vmatprep.mubr.msk.f32.mxu0 %vm221_vm0, %v211_v16  ;;  %703 = vmatpush3.msra.mxu1 %v613_v15 }
  0x1d   : > { %704 = vmatprep.mubr.msk.f32.mxu1 %vm221_vm0, %v211_v16  ;;  %686 = vmatmul.mubr.msk.f32.vlgmr.msra.gmra.mxu0 %vm221_vm0, %v212_v17 }
  0x1e   : > { %705 = vmatmul.mubr.msk.f32.vlgmr.msra.gmra.mxu1 %vm221_vm0, %v212_v17  ;;  %707 = vmatprep.subr.mxu0 %v630_v18 }
  0x1f   : > { %723 = vmatprep.mubr.msk.f32.mxu0 %vm221_vm0, %v211_v16  ;;  %708 = vmatpush3.msra.mxu0 %v630_v18 }
  0x20   : > { %709 = vmatprep.subr.mxu0 %v629_v19 }
  0x21   : > { %710 = vmatpush3.msra.mxu0 %v629_v19 }
  0x22   : > { %711 = vmatprep.subr.mxu0 %v628_v20 }
  0x23   : > { %712 = vmatpush3.msra.mxu0 %v628_v20 }
  0x24   : > { %713 = vmatprep.subr.mxu0 %v627_v21 }
  0x25   : > { %714 = vmatpush3.msra.mxu0 %v627_v21 }
  0x26   : > { %715 = vmatprep.subr.mxu0 %v626_v22 }
  0x27   : > { %716 = vmatpush3.msra.mxu0 %v626_v22 }
  0x28   : > { %717 = vmatprep.subr.mxu0 %v625_v23 }
  0x29   : > { %718 = vmatpush3.msra.mxu0 %v625_v23 }
  0x2a   : > { %719 = vmatprep.subr.mxu0 %v624_v24 }
  0x2b   : > { %720 = vmatpush3.msra.mxu0 %v624_v24 }
  0x2c   : > { %721 = vmatprep.subr.mxu0 %v623_v25 }
  0x2d   : > { %722 = vmatpush3.msra.mxu0 %v623_v25 }
  0x2e   : > { %724 = vmatmul.mubr.msk.f32.vlgmr.msra.gmra.mxu0 %vm221_vm0, %v212_v17 }
  0xdd   : > { %v687_v26 = vpop.f32.mrf.mxu0 }
  0xde   : > { %v476_v28 = vrot.slane %v687_v26, 7  ;;  %v706_v30 = vpop.f32.mrf.mxu1 }
  0xdf   : > { %v294_v27 = vpop.f32.mrf.mxu0  ;;  %v496_v40 = vadd.f32 %v706_v30, %v687_v26 }
  0xe0   : > { %v475_v29 = vrot.slane %v294_v27, 7  ;;  %v378_v34 = vpop.f32.mrf.mxu1 }
  0xe1   : > { %v495_v46 = vadd.f32 %v378_v34, %v294_v27 }
  0xe2   : > { %v477_v31 = vsel %vm474_vm1, %v475_v29, %v476_v28  ;;  %v480_v32 = vsel %vm474_vm1, 0.0, %v475_v29 }
  0xe3   : > { %v482_v33 = vadd.f32 %v706_v30, %v477_v31  ;;  %v481_v37 = vadd.f32 %v480_v32, %v378_v34 }
  0xee   : > { %v725_v35 = vpop.f32.mrf.mxu0 }
  0xef   : > { %v484_v38 = vadd.f32 %v725_v35, %v482_v33  ;;  %v501_v39 = vrot.slane %v725_v35, 1 }
  0xf0   : > { %v462_v41 = vpop.f32.mrf.mxu0 }
  0xf1   : > { %v492_v42 = vadd.f32 %v633_v36, %v484_v38  ;;  %v505_v43 = vsel %vm499_vm2, %v501_v39, 0.0  ;;  %v483_v44 = vadd.f32 %v481_v37, %v462_v41  ;;  %v500_v45 = vrot.slane %v462_v41, 1 }
  0xf2   : > { %v507_v47 = vadd.f32 %v505_v43, %v496_v40 }
  0xf3   : > { %494 = vst.msk [vmem:[%s205_s24 + $0x8] sm:$0xff] %vm221_vm0, %v492_v42  ;;  %v491_v48 = vadd.f32 %v633_v36, %v483_v44  ;;  %v502_v49 = vsel %vm499_vm2, %v500_v45, %v501_v39 }
  0xf4   : > { %v509_v50 = vadd.f32 %v633_v36, %v507_v47  ;;  %v506_v51 = vadd.f32 %v502_v49, %v495_v46 }
  0xf5   : > { %493 = vst.msk [vmem:[%s205_s24] sm:$0xff] %vm221_vm0, %v491_v48 }
  0xf6   : > { %511 = vst.msk [vmem:[%s210_s27 + $0x8] sm:$0xff] %vm221_vm0, %v509_v50  ;;  %v508_v52 = vadd.f32 %v633_v36, %v506_v51 }
  0xf8   : > { %510 = vst.msk [vmem:[%s210_s27] sm:$0xff] %vm221_vm0, %v508_v52 }
  0xf9 PF: > { %s15_s15 = sadd.s32 1, %s740_s15  }
  0xfa   : > { %p12_p4 = scmp.ge.s32.totalorder %s15_s15, 4  }
  0xfc   :  { %14 = sbr.rel (!%p12_p4) target bundleno = 1 (0x1), region = 76 }

// kernel: _lambda_.21
= control target key start
LH: loop header
LB: loop body
LE: loop exit
PB: predicated region body
PF: predicated region fallthrough
CT: control target
= control target key end

     0   :  { %s2736_s18 = smov 0   ;;  %s3163_s0 = inlined_call_operand.vmem [shape: f32[2,32,64], index: 0, kind: input, shape index: {}]   ;;  %s3164_s1 = inlined_call_operand.vmem [shape: f32[1,64], index: 1, kind: input, shape index: {}]   ;;  %s3165_s2 = inlined_call_operand.vmem [shape: f32[1,64], index: 2, kind: input, shape index: {}]   ;;  %s3166_s3 = inlined_call_operand.vmem [shape: f32[64,32], index: 3, kind: input, shape index: {}]   ;;  %s3167_s4 = inlined_call_operand.vmem [shape: f32[32,64], index: 4, kind: input, shape index: {}]   ;;  %s3168_s5 = inlined_call_operand.vmem [shape: f32[3,64,32], index: 5, kind: input, shape index: {}]   ;;  %s3169_s6 = inlined_call_operand.vmem [shape: f32[1,32], index: 6, kind: input, shape index: {}]   ;;  %s3170_s7 = inlined_call_operand.vmem [shape: f32[1,32], index: 7, kind: input, shape index: {}]   ;;  %s3171_s8 = inlined_call_operand.vmem [shape: f32[1,32], index: 8, kind: input, shape index: {}]   ;;  %s3172_s9 = inlined_call_operand.vmem [shape: f32[32,32], index: 9, kind: input, shape index: {}]   ;;  %s3173_s10 = inlined_call_operand.vmem [shape: f32[32,32], index: 10, kind: input, shape index: {}]   ;;  %s3174_s11 = inlined_call_operand.vmem [shape: f32[3,32,32], index: 11, kind: input, shape index: {}]   ;;  %s3175_s12 = inlined_call_operand.vmem [shape: f32[1,32], index: 12, kind: input, shape index: {}]   ;;  %s3176_s13 = inlined_call_operand.vmem [shape: f32[64,32], index: 13, kind: input, shape index: {}]   ;;  %s3177_s14 = inlined_call_operand.vmem [shape: f32[1,32], index: 14, kind: input, shape index: {}]   ;;  %s3178_s15 = inlined_call_operand.vmem [shape: f32[2,32,32], index: 15, kind: output, shape index: {}]  }
   0x1 LB: > { %s2158_s19 = sadd.s32 4294967295, %s2652_s18   ;;  %p2162_p0 = scmp.ge.s32.totalorder %s2652_s18, 1  ;;  %s2652_s18 = sphi %s2736_s18, %s25_s18  }
   0x2   : > { %p437_p1 = scmp.lt.s32.totalorder %s2652_s18, 3 }
   0x4   : > { %p438_p2 = pnand %p2162_p0, %p437_p1 }
   0x5   : > { %p485_p3 = scmp.lt.s32.totalorder (!%p438_p2), %s2158_s19, 1 }
   0x6   : > { %441 = sbr.rel (%p438_p2) target bundleno = 2217 (0x8a9), region = 80 }
   0xb   : > { %v2747_v0 = vld [vmem:[%s3166_s3 + $0x38] sm:$0xff]  ;;  %v2654_v1 = vmov 0.0   ;;  %v2753_v2 = vld [vmem:[%s3166_s3 + $0x30] sm:$0xff]  ;;  %vm2655_vm0 = vmmov 0   ;;  %s3180_s19 = smov (!%p485_p3, %s2158_s19), 1  ;;  %v2768_v4 = vld [vmem:[%s3166_s3 + $0x28] sm:$0xff]  ;;  %v676_v33 = vlaneseq }
   0xc   : > { %2366 = vmatprep.subr.mxu0 %v2654_v1  ;;  %2382 = vmatprep.mubr.msk.f32.mxu0 %vm2655_vm0, %v2654_v1  ;;  %v512_v3 = vld [vmem:[%s3167_s4 + $0x18] sm:$0xff]  ;;  %v511_v5 = vld [vmem:[%s3167_s4 + $0x10] sm:$0xff]  ;;  %s2244_s30 = sshll.u32 %s3180_s19, 5  ;;  %vm513_vm1 = vcmask 523264   ;;  %v2780_v6 = vld [vmem:[%s3166_s3 + $0x20] sm:$0xff]  ;;  %vm602_vm2 = vcmask 261120  }
   0xd   : > { %2367 = vmatpush3.msra.mxu0 %v2747_v0  ;;  %2385 = vmatprep.subr.mxu1 %v2654_v1  ;;  %s489_s22 = scalar_lea.vmem %s3163_s0, %s2244_s30  ;;  %v504_v10 = vld [vmem:[%s3166_s3 + $0x18] sm:$0xff]  ;;  %v503_v16 = vld [vmem:[%s3166_s3 + $0x10] sm:$0xff]  ;;  %v502_v19 = vld [vmem:[%s3166_s3 + $0x8] sm:$0xff]  ;;  %v677_v34 = vshrl.u32 %v676_v33, 7  ;;  %vm1203_vm3 = vcmask 1040384   ;;  %vm1224_vm4 = vcmask 1046528   ;;  %s494_s23 = scalar_lea.vmem %s3178_s15, %s2244_s30 }
   0xe   : > { %2368 = vmatprep.subr.mxu0 %v2654_v1  ;;  %2386 = vmatpush3.msra.mxu1 %v512_v3  ;;  %v2788_v7 = vld [vmem:[%s489_s22] sm:$0xff]  ;;  %v2790_v8 = vld [vmem:[%s489_s22 + $0x8] sm:$0xff]  ;;  %v2792_v9 = vld [vmem:[%s489_s22 + $0x10] sm:$0xff] }
   0xf   : > { %2369 = vmatpush3.msra.mxu0 %v2753_v2  ;;  %2387 = vmatprep.subr.mxu1 %v2654_v1  ;;  %v2799_v11 = vld [vmem:[%s489_s22 + $0x18] sm:$0xff]  ;;  %v514_v12 = vsel %vm513_vm1, %v2788_v7, 0.0  ;;  %v515_v13 = vsel %vm513_vm1, %v2790_v8, 0.0  ;;  %v517_v14 = vsel %vm513_vm1, %v2792_v9, 0.0  ;;  %v501_v21 = vld [vmem:[%s3166_s3] sm:$0xff]  ;;  %v510_v28 = vld [vmem:[%s3167_s4 + $0x8] sm:$0xff] }
  0x10   : > { %2370 = vmatprep.subr.mxu0 %v2654_v1  ;;  %2388 = vmatpush3.msra.mxu1 %v511_v5  ;;  %v516_v15 = vadd.f32 %v515_v13, %v514_v12  ;;  %v519_v17 = vsel %vm513_vm1, %v2799_v11, 0.0  ;;  %v509_v29 = vld [vmem:[%s3167_s4] sm:$0xff]  ;;  %v2854_v35 = vsub.s32 0, %v677_v34  ;;  %v913_v63 = vld [vmem:[%s3168_s5 + $0x38] sm:$0xff] }
  0x11   : > { %2371 = vmatpush3.msra.mxu0 %v2768_v4  ;;  %2389 = vmatprep.subr.mxu1 %v2654_v1  ;;  %v909_v12 = vld [vmem:[%s3168_s5 + $0x18] sm:$0xff] }
  0x12   : > { %2372 = vmatprep.subr.mxu0 %v2654_v1  ;;  %2393 = vmatprep.mubr.msk.f32.mxu1 %vm2655_vm0, %v2654_v1  ;;  %v518_v18 = vadd.f32 %v517_v14, %v516_v15  ;;  %v2184_v13 = vld [vmem:[%s3168_s5 + $0x58] sm:$0xff]  ;;  %v908_v14 = vld [vmem:[%s3168_s5 + $0x10] sm:$0xff] }
  0x13   : > { %2373 = vmatpush3.msra.mxu0 %v2780_v6  ;;  %2390 = vmatpush3.msra.mxu1 %v510_v28  ;;  %v2183_v15 = vld [vmem:[%s3168_s5 + $0x50] sm:$0xff] }
  0x14   : > { %2374 = vmatprep.subr.mxu0 %v2654_v1  ;;  %v520_v20 = vadd.f32 %v519_v17, %v518_v18  ;;  %2391 = vmatprep.subr.mxu1 %v2654_v1  ;;  %v2182_v17 = vld [vmem:[%s3168_s5 + $0x48] sm:$0xff]  ;;  %v906_v18 = vld [vmem:[%s3168_s5] sm:$0xff] }
  0x15   : > { %2375 = vmatpush3.msra.mxu0 %v504_v10  ;;  %2392 = vmatpush3.msra.mxu1 %v509_v29 }
  0x16   : > { %2376 = vmatprep.subr.mxu0 %v2654_v1  ;;  %v521_v22 = vrot.slane %v520_v20, 4  ;;  %2396 = vmatprep.subr.mxu1 %v2654_v1 }
  0x17   : > { %2377 = vmatpush3.msra.mxu0 %v503_v16 }
  0x18   : > { %2378 = vmatprep.subr.mxu0 %v2654_v1  ;;  %v522_v23 = vadd.f32 %v521_v22, %v520_v20  ;;  %v2200_v20 = vld [vmem:[%s3168_s5 + $0xb8] sm:$0xff] }
  0x19   : > { %2379 = vmatpush3.msra.mxu0 %v502_v19 }
  0x1a   : > { %2380 = vmatprep.subr.mxu0 %v2654_v1  ;;  %v523_v24 = vrot.slane %v522_v23, 2 }
  0x1b   : > { %2381 = vmatpush3.msra.mxu0 %v501_v21 }
  0x1c   : > { %2415 = vmatprep.subr.mxu0 %v2654_v1  ;;  %v524_v25 = vadd.f32 %v523_v24, %v522_v23 }
  0x1e   : > { %v525_v26 = vrot.slane %v524_v25, 1 }
  0x20   : > { %v526_v27 = vadd.f32 %v525_v26, %v524_v25  ;;  %v2171_v26 = vld [vmem:[%s3164_s1] ss:$0 sm:$0xff] }
  0x22   : > { %2383 = vmatmul.mubr.msk.f32.vlgmr.msra.gmra.mxu0 %vm513_vm1, %v526_v27 }
  0x23   : > { %2416 = vmatpush3.msra.mxu0 %v512_v3  ;;  %2423 = vmatprep.mubr.msk.f32.mxu0 %vm2655_vm0, %v2654_v1  ;;  %v2187_v3 = vld [vmem:[%s3168_s5 + $0x70] sm:$0xff] }
  0x24   : > { %2417 = vmatprep.subr.mxu0 %v2654_v1 }
  0x25   : > { %2418 = vmatpush3.msra.mxu0 %v511_v5  ;;  %v2186_v5 = vld [vmem:[%s3168_s5 + $0x68] sm:$0xff] }
  0x26   : > { %2419 = vmatprep.subr.mxu0 %v2654_v1 }
  0x27   : > { %2420 = vmatpush3.msra.mxu0 %v510_v28 }
  0x28   : > { %2421 = vmatprep.subr.mxu0 %v2654_v1 }
  0x29   : > { %2422 = vmatpush3.msra.mxu0 %v509_v29 }
  0x2a   : > { %2426 = vmatprep.subr.mxu0 %v913_v63 }
  0xe2   : > { %v596_v30 = vpop.f32.mrf.mxu0 }
  0xe3   : > { %v601_v31 = vmul.f32 0.015625, %v596_v30 }
  0xe4   : > { %v2384_v32 = vpop.f32.mrf.mxu0 }
  0xe5   : > { %2394 = vmatmul.mubr.msk.f32.vlgmr.msra.gmra.mxu1 %vm602_vm2, %v601_v31  ;;  %v2172_v31 = vld [vmem:[%s3165_s2] ss:$0 sm:$0xff] }
  0xe6   : > { %2397 = vmatpush3.msra.mxu1 %v2747_v0  ;;  %2412 = vmatprep.mubr.msk.f32.mxu1 %vm2655_vm0, %v2654_v1  ;;  %v2188_v0 = vld [vmem:[%s3168_s5 + $0x78] sm:$0xff] }
  0xe7   : > { %2398 = vmatprep.subr.mxu1 %v2654_v1 }
  0xe8   : > { %2399 = vmatpush3.msra.mxu1 %v2753_v2  ;;  %v912_v2 = vld [vmem:[%s3168_s5 + $0x30] sm:$0xff] }
  0xe9   : > { %2400 = vmatprep.subr.mxu1 %v2654_v1 }
  0xea   : > { %2401 = vmatpush3.msra.mxu1 %v2768_v4  ;;  %v911_v4 = vld [vmem:[%s3168_s5 + $0x28] sm:$0xff] }
  0xeb   : > { %2402 = vmatprep.subr.mxu1 %v2654_v1 }
  0xec   : > { %2403 = vmatpush3.msra.mxu1 %v2780_v6  ;;  %v910_v6 = vld [vmem:[%s3168_s5 + $0x20] sm:$0xff] }
  0xed   : > { %2404 = vmatprep.subr.mxu1 %v2654_v1 }
  0xee   : > { %2405 = vmatpush3.msra.mxu1 %v504_v10  ;;  %v2185_v10 = vld [vmem:[%s3168_s5 + $0x60] sm:$0xff] }
  0xef   : > { %2406 = vmatprep.subr.mxu1 %v2654_v1 }
  0xf0   : > { %2407 = vmatpush3.msra.mxu1 %v503_v16  ;;  %v907_v16 = vld [vmem:[%s3168_s5 + $0x8] sm:$0xff] }
  0xf1   : > { %2408 = vmatprep.subr.mxu1 %v2654_v1 }
  0xf2   : > { %2409 = vmatpush3.msra.mxu1 %v502_v19  ;;  %v2181_v19 = vld [vmem:[%s3168_s5 + $0x40] sm:$0xff] }
  0xf3   : > { %2410 = vmatprep.subr.mxu1 %v2654_v1 }
  0xf4   : > { %2411 = vmatpush3.msra.mxu1 %v501_v21 }
  0xf5   : > { %2448 = vmatprep.subr.mxu1 %v2188_v0 }
 0x1a5   : > { %v672_v36 = vpop.f32.mrf.mxu1 }
 0x1a6   : > { %v679_v37 = vrot.slane %v672_v36, %v2854_v35 }
 0x1a7   : > { %v2395_v38 = vpop.f32.mrf.mxu1 }
 0x1a8   : > { %v2858_v39 = vsub.f32 %v2788_v7, %v679_v37  ;;  %v2861_v40 = vsub.f32 %v2790_v8, %v679_v37  ;;  %v2864_v41 = vsub.f32 %v2792_v9, %v679_v37  ;;  %v2867_v42 = vsub.f32 %v2799_v11, %v679_v37 }
 0x1aa   : > { %v684_v43 = vmul.f32 %v2858_v39, %v2858_v39  ;;  %v685_v44 = vmul.f32 %v2861_v40, %v2861_v40  ;;  %v686_v45 = vmul.f32 %v2864_v41, %v2864_v41  ;;  %v687_v46 = vmul.f32 %v2867_v42, %v2867_v42 }
 0x1ac   : > { %v688_v47 = vsel %vm513_vm1, %v684_v43, 0.0  ;;  %v689_v48 = vsel %vm513_vm1, %v685_v44, 0.0  ;;  %v691_v50 = vsel %vm513_vm1, %v686_v45, 0.0  ;;  %v693_v52 = vsel %vm513_vm1, %v687_v46, 0.0 }
 0x1ad   : > { %v690_v49 = vadd.f32 %v689_v48, %v688_v47 }
 0x1af   : > { %v692_v51 = vadd.f32 %v691_v50, %v690_v49 }
 0x1b1   : > { %v694_v53 = vadd.f32 %v693_v52, %v692_v51 }
 0x1b3   : > { %v695_v54 = vrot.slane %v694_v53, 4 }
 0x1b5   : > { %v696_v55 = vadd.f32 %v695_v54, %v694_v53 }
 0x1b7   : > { %v697_v56 = vrot.slane %v696_v55, 2 }
 0x1b9   : > { %v698_v57 = vadd.f32 %v697_v56, %v696_v55 }
 0x1bb   : > { %v699_v58 = vrot.slane %v698_v57, 1 }
 0x1bd   : > { %v700_v59 = vadd.f32 %v699_v58, %v698_v57 }
 0x1bf   : > { %2413 = vmatmul.mubr.msk.f32.vlgmr.msra.gmra.mxu1 %vm513_vm1, %v700_v59 }
 0x1c0   : > { %2449 = vmatpush3.msra.mxu1 %v2188_v0  ;;  %v2196_v0 = vld [vmem:[%s3168_s5 + $0x98] sm:$0xff] }
 0x1c1   : > { %2450 = vmatprep.subr.mxu1 %v2187_v3 }
 0x1c2   : > { %2451 = vmatpush3.msra.mxu1 %v2187_v3  ;;  %v2194_v3 = vld [vmem:[%s3168_s5 + $0x88] sm:$0xff] }
 0x1c3   : > { %2452 = vmatprep.subr.mxu1 %v2186_v5 }
 0x1c4   : > { %2453 = vmatpush3.msra.mxu1 %v2186_v5  ;;  %v1256_v5 = vld [vmem:[%s3172_s9 + $0x18] sm:$0xff] }
 0x1c5   : > { %2454 = vmatprep.subr.mxu1 %v2185_v10 }
 0x1c6   : > { %2455 = vmatpush3.msra.mxu1 %v2185_v10  ;;  %v1254_v10 = vld [vmem:[%s3172_s9 + $0x8] sm:$0xff] }
 0x1c7   : > { %2456 = vmatprep.subr.mxu1 %v2184_v13 }
 0x1c8   : > { %2457 = vmatpush3.msra.mxu1 %v2184_v13 }
 0x1c9   : > { %2458 = vmatprep.subr.mxu1 %v2183_v15 }
 0x1ca   : > { %2459 = vmatpush3.msra.mxu1 %v2183_v15 }
 0x1cb   : > { %2460 = vmatprep.subr.mxu1 %v2182_v17 }
 0x1cc   : > { %2461 = vmatpush3.msra.mxu1 %v2182_v17 }
 0x1cd   : > { %2462 = vmatprep.subr.mxu1 %v2181_v19 }
 0x1ce   : > { %2463 = vmatpush3.msra.mxu1 %v2181_v19 }
 0x1cf   : > { %2492 = vmatprep.subr.mxu1 %v2654_v1 }
 0x27f   : > { %v770_v60 = vpop.f32.mrf.mxu1 }
 0x280   : > { %v774_v61 = vmul.f32 0.015625, %v770_v60  ;;  %v2199_v60 = vld [vmem:[%s3168_s5 + $0xb0] sm:$0xff] }
 0x281   : > { %v2414_v62 = vpop.f32.mrf.mxu1 }
 0x282   : > { %2424 = vmatmul.mubr.msk.f32.vlgmr.msra.gmra.mxu0 %vm602_vm2, %v774_v61  ;;  %v2198_v61 = vld [vmem:[%s3168_s5 + $0xa8] sm:$0xff] }
 0x283   : > { %2427 = vmatpush3.msra.mxu0 %v913_v63  ;;  %v2197_v63 = vld [vmem:[%s3168_s5 + $0xa0] sm:$0xff] }
 0x284   : > { %2428 = vmatprep.subr.mxu0 %v912_v2 }
 0x285   : > { %2429 = vmatpush3.msra.mxu0 %v912_v2  ;;  %v2195_v2 = vld [vmem:[%s3168_s5 + $0x90] sm:$0xff] }
 0x286   : > { %2430 = vmatprep.subr.mxu0 %v911_v4 }
 0x287   : > { %2431 = vmatpush3.msra.mxu0 %v911_v4  ;;  %v2193_v4 = vld [vmem:[%s3168_s5 + $0x80] sm:$0xff] }
 0x288   : > { %2432 = vmatprep.subr.mxu0 %v910_v6 }
 0x289   : > { %2433 = vmatpush3.msra.mxu0 %v910_v6  ;;  %v1255_v6 = vld [vmem:[%s3172_s9 + $0x10] sm:$0xff] }
 0x28a   : > { %2434 = vmatprep.subr.mxu0 %v909_v12 }
 0x28b   : > { %2435 = vmatpush3.msra.mxu0 %v909_v12  ;;  %v1253_v12 = vld [vmem:[%s3172_s9] sm:$0xff] }
 0x28c   : > { %2436 = vmatprep.subr.mxu0 %v908_v14 }
 0x28d   : > { %2437 = vmatpush3.msra.mxu0 %v908_v14 }
 0x28e   : > { %2438 = vmatprep.subr.mxu0 %v907_v16 }
 0x28f   : > { %2439 = vmatpush3.msra.mxu0 %v907_v16 }
 0x290   : > { %2440 = vmatprep.subr.mxu0 %v906_v18 }
 0x291   : > { %2441 = vmatpush3.msra.mxu0 %v906_v18 }
 0x292   : > { %2470 = vmatprep.subr.mxu0 %v2200_v20 }
 0x342   : > { %v844_v21 = vpop.f32.mrf.mxu0 }
 0x343   : > { %v845_v22 = vadd.f32 1e-06, %v844_v21 }
 0x344   : > { %v2425_v23 = vpop.f32.mrf.mxu0 }
 0x345   : > { %2610 = vrsqrt.f32 %v845_v22 }
 0x352   : > { %v2611_v24 = vpop.eup %2610 }
 0x353   : > { %v852_v25 = vrot.slane %v2611_v24, %v2854_v35 }
 0x355   : > { %v853_v27 = vmul.f32 %v852_v25, %v2858_v39  ;;  %v854_v28 = vmul.f32 %v852_v25, %v2861_v40  ;;  %v855_v29 = vmul.f32 %v852_v25, %v2864_v41  ;;  %v856_v30 = vmul.f32 %v852_v25, %v2867_v42 }
 0x357   : > { %v863_v32 = vmul.f32 %v2171_v26, %v853_v27  ;;  %v864_v33 = vmul.f32 %v2171_v26, %v854_v28  ;;  %v865_v34 = vmul.f32 %v2171_v26, %v855_v29  ;;  %v866_v36 = vmul.f32 %v2171_v26, %v856_v30 }
 0x359   : > { %v873_v37 = vadd.f32 %v2172_v31, %v863_v32  ;;  %v874_v38 = vadd.f32 %v2172_v31, %v864_v33  ;;  %v875_v43 = vadd.f32 %v2172_v31, %v865_v34  ;;  %v876_v44 = vadd.f32 %v2172_v31, %v866_v36 }
 0x35b   : > { %v2173_v45 = vmul.f32 -1.442695, %v873_v37  ;;  %v2174_v39 = vmul.f32 -1.442695, %v874_v38  ;;  %v2175_v46 = vmul.f32 -1.442695, %v875_v43 }
 0x35c   : > { %v2176_v40 = vmul.f32 -1.442695, %v876_v44 }
 0x35d   : > { %2612 = vpow2.f32 %v2173_v45 }
 0x35e   : > { %2614 = vpow2.f32 %v2174_v39 }
 0x35f   : > { %2616 = vpow2.f32 %v2175_v46 }
 0x360   : > { %2618 = vpow2.f32 %v2176_v40 }
 0x36a   : > { %v2613_v41 = vpop.eup %2612 }
 0x36b   : > { %v2615_v42 = vpop.eup %2614  ;;  %v889_v47 = vadd.f32 1.0, %v2613_v41 }
 0x36c   : > { %v2617_v48 = vpop.eup %2616  ;;  %v890_v49 = vadd.f32 1.0, %v2615_v42 }
 0x36d   : > { %v2619_v50 = vpop.eup %2618  ;;  %2620 = vrcp.f32 %v889_v47  ;;  %v891_v51 = vadd.f32 1.0, %v2617_v48 }
 0x36e   : > { %2622 = vrcp.f32 %v890_v49  ;;  %v892_v52 = vadd.f32 1.0, %v2619_v50 }
 0x36f   : > { %2624 = vrcp.f32 %v891_v51 }
 0x370   : > { %2626 = vrcp.f32 %v892_v52 }
 0x37a   : > { %v2621_v53 = vpop.eup %2620 }
 0x37b   : > { %v2623_v54 = vpop.eup %2622  ;;  %v901_v55 = vmul.f32 %v2621_v53, %v873_v37 }
 0x37c   : > { %v2625_v56 = vpop.eup %2624  ;;  %v902_v57 = vmul.f32 %v2623_v54, %v874_v38 }
 0x37d   : > { %v2627_v58 = vpop.eup %2626  ;;  %2442 = vmatprep.mubr.msk.f32.mxu0 %vm513_vm1, %v901_v55  ;;  %2464 = vmatprep.mubr.msk.f32.mxu1 %vm513_vm1, %v901_v55  ;;  %v903_v59 = vmul.f32 %v2625_v56, %v875_v43 }
 0x37e   : > { %2443 = vmatmul.mubr.msk.f32.vlgmr.msra.gmra.mxu0 %vm513_vm1, %v902_v57  ;;  %2465 = vmatmul.mubr.msk.f32.vlgmr.msra.gmra.mxu1 %vm513_vm1, %v902_v57  ;;  %v904_v62 = vmul.f32 %v2627_v58, %v876_v44  ;;  %v2205_v44 = vld [vmem:[%s3169_s6] ss:$0 sm:$0xff] }
 0x37f   : > { %2471 = vmatpush3.msra.mxu0 %v2200_v20  ;;  %2445 = vmatprep.mubr.msk.f32.mxu0 %vm513_vm1, %v903_v59 }
 0x380   : > { %2467 = vmatprep.mubr.msk.f32.mxu1 %vm513_vm1, %v903_v59  ;;  %2472 = vmatprep.subr.mxu0 %v2199_v60 }
 0x381   : > { %2473 = vmatpush3.msra.mxu0 %v2199_v60  ;;  %2493 = vmatpush3.msra.mxu1 %v1256_v5 }
 0x382   : > { %2474 = vmatprep.subr.mxu0 %v2198_v61  ;;  %2446 = vmatmul.mubr.msk.f32.gmra.mxu0 %vm513_vm1, %v904_v62 }
 0x383   : > { %2468 = vmatmul.mubr.msk.f32.gmra.mxu1 %vm513_vm1, %v904_v62  ;;  %2475 = vmatpush3.msra.mxu0 %v2198_v61 }
 0x384   : > { %2476 = vmatprep.subr.mxu0 %v2197_v63  ;;  %2486 = vmatprep.mubr.msk.f32.mxu0 %vm513_vm1, %v901_v55 }
 0x385   : > { %2477 = vmatpush3.msra.mxu0 %v2197_v63  ;;  %2500 = vmatprep.mubr.msk.f32.mxu1 %vm2655_vm0, %v2654_v1 }
 0x386   : > { %2478 = vmatprep.subr.mxu0 %v2196_v0  ;;  %2494 = vmatprep.subr.mxu1 %v2654_v1 }
 0x387   : > { %2479 = vmatpush3.msra.mxu0 %v2196_v0  ;;  %2495 = vmatpush3.msra.mxu1 %v1255_v6 }
 0x388   : > { %2480 = vmatprep.subr.mxu0 %v2195_v2  ;;  %2496 = vmatprep.subr.mxu1 %v2654_v1 }
 0x389   : > { %2481 = vmatpush3.msra.mxu0 %v2195_v2  ;;  %2497 = vmatpush3.msra.mxu1 %v1254_v10 }
 0x38a   : > { %2482 = vmatprep.subr.mxu0 %v2194_v3  ;;  %2498 = vmatprep.subr.mxu1 %v2654_v1 }
 0x38b   : > { %2483 = vmatpush3.msra.mxu0 %v2194_v3  ;;  %2499 = vmatpush3.msra.mxu1 %v1253_v12 }
 0x38c   : > { %2484 = vmatprep.subr.mxu0 %v2193_v4  ;;  %2503 = vmatprep.subr.mxu1 %v2654_v1 }
 0x38d   : > { %2485 = vmatpush3.msra.mxu0 %v2193_v4 }
 0x38e   : > { %2487 = vmatmul.mubr.msk.f32.vlgmr.msra.gmra.mxu0 %vm513_vm1, %v902_v57  ;;  %2514 = vmatprep.subr.mxu0 %v2654_v1 }
 0x38f   : > { %2489 = vmatprep.mubr.msk.f32.mxu0 %vm513_vm1, %v903_v59  ;;  %2515 = vmatpush3.msra.mxu0 %v1256_v5  ;;  %v1260_v5 = vld [vmem:[%s3173_s10 + $0x18] sm:$0xff] }
 0x390   : > { %2516 = vmatprep.subr.mxu0 %v2654_v1 }
 0x391   : > { %2517 = vmatpush3.msra.mxu0 %v1255_v6  ;;  %v1259_v6 = vld [vmem:[%s3173_s10 + $0x10] sm:$0xff] }
 0x392   : > { %2490 = vmatmul.mubr.msk.f32.gmra.mxu0 %vm513_vm1, %v904_v62  ;;  %2518 = vmatprep.subr.mxu0 %v2654_v1 }
 0x393   : > { %2522 = vmatprep.mubr.msk.f32.mxu0 %vm2655_vm0, %v2654_v1  ;;  %2519 = vmatpush3.msra.mxu0 %v1254_v10  ;;  %v1258_v10 = vld [vmem:[%s3173_s10 + $0x8] sm:$0xff] }
 0x394   : > { %2520 = vmatprep.subr.mxu0 %v2654_v1 }
 0x395   : > { %2521 = vmatpush3.msra.mxu0 %v1253_v12  ;;  %v1257_v12 = vld [vmem:[%s3173_s10] sm:$0xff] }
 0x43e   : > { %v2444_v13 = vpop.f32.mrf.mxu0  ;;  %v2466_v16 = vpop.f32.mrf.mxu1 }
 0x43f   : > { %v1205_v23 = vrot.slane %v2444_v13, 7 }
 0x440   : > { %v992_v14 = vpop.f32.mrf.mxu0  ;;  %v1086_v19 = vpop.f32.mrf.mxu1 }
 0x441   : > { %v1204_v17 = vrot.slane %v992_v14, 7 }
 0x442   : > { %v2447_v15 = vpop.f32.mrf.mxu0 }
 0x443   : > { %v1215_v21 = vsel %vm1203_vm3, 0.0, %v1204_v17  ;;  %v1209_v25 = vrot.slane %v2447_v15, 7  ;;  %v2469_v26 = vpop.f32.mrf.mxu1  ;;  %v1206_v29 = vsel %vm1203_vm3, %v1204_v17, %v1205_v23 }
 0x444   : > { %v1002_v18 = vpop.f32.mrf.mxu0  ;;  %v1216_v30 = vadd.f32 %v1215_v21, %v1086_v19  ;;  %v1217_v46 = vadd.f32 %v2466_v16, %v1206_v29 }
 0x445   : > { %v1207_v22 = vrot.slane %v1002_v18, 7  ;;  %v1096_v43 = vpop.f32.mrf.mxu1 }
 0x447   : > { %v1210_v32 = vsel %vm1203_vm3, %v1207_v22, %v1209_v25  ;;  %v1208_v33 = vsel %vm1203_vm3, %v1205_v23, %v1207_v22 }
 0x448   : > { %v1218_v40 = vadd.f32 %v1208_v33, %v1096_v43  ;;  %v1219_v41 = vadd.f32 %v2469_v26, %v1210_v32 }
 0x44e   : > { %v2488_v20 = vpop.f32.mrf.mxu0 }
 0x44f   : > { %v1226_v27 = vrot.slane %v2488_v20, 1 }
 0x450   : > { %v1180_v24 = vpop.f32.mrf.mxu0 }
 0x451   : > { %v1225_v28 = vrot.slane %v1180_v24, 1 }
 0x452   : > { %v2491_v31 = vpop.f32.mrf.mxu0 }
 0x453   : > { %v1227_v34 = vsel %vm1224_vm4, %v1225_v28, %v1226_v27  ;;  %v1230_v36 = vrot.slane %v2491_v31, 1 }
 0x454   : > { %v1237_v37 = vadd.f32 %v1227_v34, %v1216_v30  ;;  %v1190_v38 = vpop.f32.mrf.mxu0 }
 0x455   : > { %v1236_v45 = vsel %vm1224_vm4, %v1230_v36, 0.0  ;;  %v1228_v39 = vrot.slane %v1190_v38, 1 }
 0x456   : > { %v1247_v48 = vadd.f32 %v2205_v44, %v1237_v37  ;;  %v1240_v49 = vadd.f32 %v1236_v45, %v1219_v41  ;;  %v2222_v41 = vld [vmem:[%s3174_s11 + $0x30] sm:$0xff] }
 0x457   : > { %v1229_v42 = vsel %vm1224_vm4, %v1226_v27, %v1228_v39  ;;  %v1231_v47 = vsel %vm1224_vm4, %v1228_v39, %v1230_v36 }
 0x458   : > { %v1238_v50 = vadd.f32 %v1229_v42, %v1217_v46  ;;  %v1239_v51 = vadd.f32 %v1231_v47, %v1218_v40  ;;  %v1261_v54 = vsel %vm602_vm2, %v1247_v48, 0.0  ;;  %v1250_v55 = vadd.f32 %v2205_v44, %v1240_v49  ;;  %v2223_v46 = vld [vmem:[%s3174_s11 + $0x38] sm:$0xff]  ;;  %v1654_v42 = vld [vmem:[%s3174_s11 + $0x10] sm:$0xff]  ;;  %v2221_v47 = vld [vmem:[%s3174_s11 + $0x28] sm:$0xff] }
 0x459   : > { %v1655_v40 = vld [vmem:[%s3174_s11 + $0x18] sm:$0xff]  ;;  %v2220_v49 = vld [vmem:[%s3174_s11 + $0x20] sm:$0xff] }
 0x45a   : > { %v1248_v52 = vadd.f32 %v2205_v44, %v1238_v50  ;;  %v1249_v53 = vadd.f32 %v2205_v44, %v1239_v51  ;;  %v1266_v60 = vsel %vm602_vm2, %v1250_v55, 0.0  ;;  %2536 = vmatprep.subr.mxu0 %v1655_v40  ;;  %v1652_v50 = vld [vmem:[%s3174_s11] sm:$0xff]  ;;  %v1990_v51 = vld [vmem:[%s3176_s13 + $0x38] sm:$0xff] }
 0x45c   : > { %v1262_v56 = vsel %vm602_vm2, %v1248_v52, 0.0  ;;  %v1264_v58 = vsel %vm602_vm2, %v1249_v53, 0.0 }
 0x45d   : > { %v1263_v57 = vadd.f32 %v1262_v56, %v1261_v54 }
 0x45f   : > { %v1265_v59 = vadd.f32 %v1264_v58, %v1263_v57  ;;  %v2210_v58 = vld [vmem:[%s3170_s7] ss:$0 sm:$0xff] }
 0x461   : > { %v1267_v61 = vadd.f32 %v1266_v60, %v1265_v59 }
 0x463   : > { %v1268_v62 = vrot.slane %v1267_v61, 4 }
 0x465   : > { %v1269_v63 = vadd.f32 %v1268_v62, %v1267_v61 }
 0x467   : > { %v1270_v0 = vrot.slane %v1269_v63, 2 }
 0x469   : > { %v1271_v2 = vadd.f32 %v1270_v0, %v1269_v63  ;;  %v2211_v63 = vld [vmem:[%s3171_s8] ss:$0 sm:$0xff] }
 0x46b   : > { %v1272_v3 = vrot.slane %v1271_v2, 1 }
 0x46d   : > { %v1273_v4 = vadd.f32 %v1272_v3, %v1271_v2 }
 0x46f   : > { %2501 = vmatmul.mubr.msk.f32.vlgmr.msra.gmra.mxu1 %vm602_vm2, %v1273_v4 }
 0x470   : > { %2504 = vmatpush3.msra.mxu1 %v1260_v5  ;;  %2511 = vmatprep.mubr.msk.f32.mxu1 %vm2655_vm0, %v2654_v1 }
 0x471   : > { %2505 = vmatprep.subr.mxu1 %v2654_v1 }
 0x472   : > { %2506 = vmatpush3.msra.mxu1 %v1259_v6 }
 0x473   : > { %2507 = vmatprep.subr.mxu1 %v2654_v1 }
 0x474   : > { %2508 = vmatpush3.msra.mxu1 %v1258_v10 }
 0x475   : > { %2509 = vmatprep.subr.mxu1 %v2654_v1 }
 0x476   : > { %2510 = vmatpush3.msra.mxu1 %v1257_v12 }
 0x477   : > { %2525 = vmatprep.subr.mxu1 %v2654_v1 }
 0x52f   : > { %v1343_v13 = vpop.f32.mrf.mxu1 }
 0x530   : > { %v1348_v14 = vmul.f32 0.03125, %v1343_v13 }
 0x531   : > { %v2502_v15 = vpop.f32.mrf.mxu1 }
 0x532   : > { %2512 = vmatmul.mubr.msk.f32.vlgmr.msra.gmra.mxu1 %vm602_vm2, %v1348_v14 }
 0x533   : > { %2526 = vmatpush3.msra.mxu1 %v1260_v5  ;;  %2533 = vmatprep.mubr.msk.f32.mxu1 %vm2655_vm0, %v2654_v1 }
 0x534   : > { %2527 = vmatprep.subr.mxu1 %v2654_v1 }
 0x535   : > { %2528 = vmatpush3.msra.mxu1 %v1259_v6 }
 0x536   : > { %2529 = vmatprep.subr.mxu1 %v2654_v1 }
 0x537   : > { %2530 = vmatpush3.msra.mxu1 %v1258_v10 }
 0x538   : > { %2531 = vmatprep.subr.mxu1 %v2654_v1 }
 0x539   : > { %2532 = vmatpush3.msra.mxu1 %v1257_v12 }
 0x53a   : > { %2550 = vmatprep.subr.mxu1 %v2223_v46 }
 0x5f2   : > { %v1418_v16 = vpop.f32.mrf.mxu1 }
 0x5f3   : > { %v1425_v17 = vrot.slane %v1418_v16, %v2854_v35 }
 0x5f4   : > { %v2513_v18 = vpop.f32.mrf.mxu1 }
 0x5f5   : > { %v1426_v19 = vsub.f32 %v1247_v48, %v1425_v17  ;;  %v1427_v20 = vsub.f32 %v1248_v52, %v1425_v17  ;;  %v1428_v21 = vsub.f32 %v1249_v53, %v1425_v17  ;;  %v1429_v22 = vsub.f32 %v1250_v55, %v1425_v17  ;;  %v1653_v48 = vld [vmem:[%s3174_s11 + $0x8] sm:$0xff]  ;;  %v2231_v52 = vld [vmem:[%s3174_s11 + $0x58] sm:$0xff] }
 0x5f7   : > { %v1430_v23 = vmul.f32 %v1426_v19, %v1426_v19  ;;  %v1431_v24 = vmul.f32 %v1427_v20, %v1427_v20  ;;  %v1432_v25 = vmul.f32 %v1428_v21, %v1428_v21  ;;  %v1433_v26 = vmul.f32 %v1429_v22, %v1429_v22 }
 0x5f9   : > { %v1434_v27 = vsel %vm602_vm2, %v1430_v23, 0.0  ;;  %v1435_v28 = vsel %vm602_vm2, %v1431_v24, 0.0  ;;  %v1437_v1 = vsel %vm602_vm2, %v1432_v25, 0.0  ;;  %v1439_v31 = vsel %vm602_vm2, %v1433_v26, 0.0 }
 0x5fa   : > { %v1436_v29 = vadd.f32 %v1435_v28, %v1434_v27 }
 0x5fc   : > { %v1438_v30 = vadd.f32 %v1437_v1, %v1436_v29 }
 0x5fe   : > { %v1440_v32 = vadd.f32 %v1439_v31, %v1438_v30  ;;  %v1989_v30 = vld [vmem:[%s3176_s13 + $0x30] sm:$0xff] }
 0x5ff   : > { %v2230_v31 = vld [vmem:[%s3174_s11 + $0x50] sm:$0xff] }
 0x600   : > { %v1441_v33 = vrot.slane %v1440_v32, 4 }
 0x602   : > { %v1442_v34 = vadd.f32 %v1441_v33, %v1440_v32  ;;  %v1988_v32 = vld [vmem:[%s3176_s13 + $0x28] sm:$0xff] }
 0x604   : > { %v1443_v36 = vrot.slane %v1442_v34, 2 }
 0x606   : > { %v1444_v37 = vadd.f32 %v1443_v36, %v1442_v34  ;;  %v2229_v34 = vld [vmem:[%s3174_s11 + $0x48] sm:$0xff]  ;;  %v1987_v36 = vld [vmem:[%s3176_s13 + $0x20] sm:$0xff] }
 0x608   : > { %v1445_v38 = vrot.slane %v1444_v37, 1 }
 0x60a   : > { %v1446_v43 = vadd.f32 %v1445_v38, %v1444_v37  ;;  %v2228_v37 = vld [vmem:[%s3174_s11 + $0x40] sm:$0xff]  ;;  %v1986_v38 = vld [vmem:[%s3176_s13 + $0x18] sm:$0xff] }
 0x60c   : > { %2523 = vmatmul.mubr.msk.f32.vlgmr.msra.gmra.mxu0 %vm602_vm2, %v1446_v43  ;;  %v1985_v43 = vld [vmem:[%s3176_s13 + $0x10] sm:$0xff] }
 0x60d   : > { %2537 = vmatpush3.msra.mxu0 %v1655_v40 }
 0x60e   : > { %2538 = vmatprep.subr.mxu0 %v1654_v42 }
 0x60f   : > { %2539 = vmatpush3.msra.mxu0 %v1654_v42 }
 0x610   : > { %2540 = vmatprep.subr.mxu0 %v1653_v48 }
 0x611   : > { %2541 = vmatpush3.msra.mxu0 %v1653_v48 }
 0x612   : > { %2542 = vmatprep.subr.mxu0 %v1652_v50 }
 0x613   : > { %2543 = vmatpush3.msra.mxu0 %v1652_v50 }
 0x614   : > { %2564 = vmatprep.subr.mxu0 %v2231_v52 }
 0x6cc   : > { %v1516_v44 = vpop.f32.mrf.mxu0 }
 0x6cd   : > { %v1520_v45 = vmul.f32 0.03125, %v1516_v44  ;;  %v1984_v44 = vld [vmem:[%s3176_s13 + $0x8] sm:$0xff] }
 0x6ce   : > { %v2524_v39 = vpop.f32.mrf.mxu0 }
 0x6cf   : > { %2534 = vmatmul.mubr.msk.f32.vlgmr.msra.gmra.mxu1 %vm602_vm2, %v1520_v45  ;;  %v1983_v45 = vld [vmem:[%s3176_s13] sm:$0xff] }
 0x6d0   : > { %2551 = vmatpush3.msra.mxu1 %v2223_v46 }
 0x6d1   : > { %2552 = vmatprep.subr.mxu1 %v2222_v41 }
 0x6d2   : > { %2553 = vmatpush3.msra.mxu1 %v2222_v41 }
 0x6d3   : > { %2554 = vmatprep.subr.mxu1 %v2221_v47 }
 0x6d4   : > { %2555 = vmatpush3.msra.mxu1 %v2221_v47 }
 0x6d5   : > { %2556 = vmatprep.subr.mxu1 %v2220_v49 }
 0x6d6   : > { %2557 = vmatpush3.msra.mxu1 %v2220_v49 }
 0x6d7   : > { %2578 = vmatprep.subr.mxu1 %v1990_v51 }
 0x78f   : > { %v1590_v53 = vpop.f32.mrf.mxu1 }
 0x790   : > { %v1591_v54 = vadd.f32 1e-06, %v1590_v53 }
 0x791   : > { %v2535_v55 = vpop.f32.mrf.mxu1 }
 0x792   : > { %2628 = vrsqrt.f32 %v1591_v54 }
 0x79f   : > { %v2629_v56 = vpop.eup %2628 }
 0x7a0   : > { %v1598_v57 = vrot.slane %v2629_v56, %v2854_v35 }
 0x7a2   : > { %v1599_v59 = vmul.f32 %v1598_v57, %v1426_v19  ;;  %v1600_v60 = vmul.f32 %v1598_v57, %v1427_v20  ;;  %v1601_v61 = vmul.f32 %v1598_v57, %v1428_v21  ;;  %v1602_v62 = vmul.f32 %v1598_v57, %v1429_v22 }
 0x7a4   : > { %v1609_v0 = vmul.f32 %v2210_v58, %v1599_v59  ;;  %v1610_v2 = vmul.f32 %v2210_v58, %v1600_v60  ;;  %v1611_v3 = vmul.f32 %v2210_v58, %v1601_v61  ;;  %v1612_v4 = vmul.f32 %v2210_v58, %v1602_v62 }
 0x7a6   : > { %v1619_v5 = vadd.f32 %v2211_v63, %v1609_v0  ;;  %v1620_v6 = vadd.f32 %v2211_v63, %v1610_v2  ;;  %v1621_v10 = vadd.f32 %v2211_v63, %v1611_v3  ;;  %v1622_v35 = vadd.f32 %v2211_v63, %v1612_v4  ;;  %v2236_v4 = vld [vmem:[%s3175_s12] ss:$0 sm:$0xff] }
 0x7a8   : > { %v2212_v12 = vmul.f32 -1.442695, %v1619_v5  ;;  %v2213_v13 = vmul.f32 -1.442695, %v1620_v6  ;;  %v2214_v14 = vmul.f32 -1.442695, %v1621_v10 }
 0x7a9   : > { %v2215_v15 = vmul.f32 -1.442695, %v1622_v35 }
 0x7aa   : > { %2630 = vpow2.f32 %v2212_v12  ;;  %v2237_v12 = vld [vmem:[%s3177_s14] ss:$0 sm:$0xff] }
 0x7ab   : > { %2632 = vpow2.f32 %v2213_v13 }
 0x7ac   : > { %2634 = vpow2.f32 %v2214_v14 }
 0x7ad   : > { %2636 = vpow2.f32 %v2215_v15 }
 0x7b7   : > { %v2631_v16 = vpop.eup %2630 }
 0x7b8   : > { %v2633_v17 = vpop.eup %2632  ;;  %v1635_v18 = vadd.f32 1.0, %v2631_v16 }
 0x7b9   : > { %v2635_v19 = vpop.eup %2634  ;;  %v1636_v20 = vadd.f32 1.0, %v2633_v17 }
 0x7ba   : > { %v2637_v21 = vpop.eup %2636  ;;  %2638 = vrcp.f32 %v1635_v18  ;;  %v1637_v22 = vadd.f32 1.0, %v2635_v19 }
 0x7bb   : > { %2640 = vrcp.f32 %v1636_v20  ;;  %v1638_v23 = vadd.f32 1.0, %v2637_v21 }
 0x7bc   : > { %2642 = vrcp.f32 %v1637_v22 }
 0x7bd   : > { %2644 = vrcp.f32 %v1638_v23 }
 0x7c7   : > { %v2639_v24 = vpop.eup %2638 }
 0x7c8   : > { %v2641_v25 = vpop.eup %2640  ;;  %v1647_v26 = vmul.f32 %v2639_v24, %v1619_v5 }
 0x7c9   : > { %v2643_v27 = vpop.eup %2642  ;;  %v1648_v28 = vmul.f32 %v2641_v25, %v1620_v6 }
 0x7ca   : > { %2544 = vmatprep.mubr.msk.f32.mxu0 %vm602_vm2, %v1647_v26  ;;  %2558 = vmatprep.mubr.msk.f32.mxu1 %vm602_vm2, %v1647_v26  ;;  %v1649_v29 = vmul.f32 %v2643_v27, %v1621_v10  ;;  %v2645_v1 = vpop.eup %2644 }
 0x7cb   : > { %2545 = vmatmul.mubr.msk.f32.vlgmr.msra.gmra.mxu0 %vm602_vm2, %v1648_v28  ;;  %2559 = vmatmul.mubr.msk.f32.vlgmr.msra.gmra.mxu1 %vm602_vm2, %v1648_v28  ;;  %v1650_v33 = vmul.f32 %v2645_v1, %v1622_v35 }
 0x7cc   : > { %2579 = vmatpush3.msra.mxu1 %v1990_v51  ;;  %2547 = vmatprep.mubr.msk.f32.mxu0 %vm602_vm2, %v1649_v29 }
 0x7cd   : > { %2561 = vmatprep.mubr.msk.f32.mxu1 %vm602_vm2, %v1649_v29  ;;  %2565 = vmatpush3.msra.mxu0 %v2231_v52 }
 0x7ce   : > { %2580 = vmatprep.subr.mxu1 %v1989_v30  ;;  %2566 = vmatprep.subr.mxu0 %v2230_v31 }
 0x7cf   : > { %2581 = vmatpush3.msra.mxu1 %v1989_v30  ;;  %2567 = vmatpush3.msra.mxu0 %v2230_v31 }
 0x7d0   : > { %2582 = vmatprep.subr.mxu1 %v1988_v32  ;;  %2548 = vmatmul.mubr.msk.f32.gmra.mxu0 %vm602_vm2, %v1650_v33 }
 0x7d1   : > { %2562 = vmatmul.mubr.msk.f32.gmra.mxu1 %vm602_vm2, %v1650_v33  ;;  %2568 = vmatprep.subr.mxu0 %v2229_v34 }
 0x7d2   : > { %2583 = vmatpush3.msra.mxu1 %v1988_v32  ;;  %2569 = vmatpush3.msra.mxu0 %v2229_v34 }
 0x7d3   : > { %2572 = vmatprep.mubr.msk.f32.mxu0 %vm602_vm2, %v1647_v26  ;;  %2584 = vmatprep.subr.mxu1 %v1987_v36 }
 0x7d4   : > { %2570 = vmatprep.subr.mxu0 %v2228_v37  ;;  %2585 = vmatpush3.msra.mxu1 %v1987_v36 }
 0x7d5   : > { %2571 = vmatpush3.msra.mxu0 %v2228_v37  ;;  %2586 = vmatprep.subr.mxu1 %v1986_v38 }
 0x7d6   : > { %2573 = vmatmul.mubr.msk.f32.vlgmr.msra.gmra.mxu0 %vm602_vm2, %v1648_v28  ;;  %2587 = vmatpush3.msra.mxu1 %v1986_v38 }
 0x7d7   : > { %2575 = vmatprep.mubr.msk.f32.mxu0 %vm602_vm2, %v1649_v29  ;;  %2588 = vmatprep.subr.mxu1 %v1985_v43 }
 0x7d8   : > { %2589 = vmatpush3.msra.mxu1 %v1985_v43  ;;  %2594 = vmatprep.mubr.msk.f32.mxu1 %vm513_vm1, %v2788_v7 }
 0x7d9   : > { %2590 = vmatprep.subr.mxu1 %v1984_v44 }
 0x7da   : > { %2576 = vmatmul.mubr.msk.f32.gmra.mxu0 %vm602_vm2, %v1650_v33  ;;  %2591 = vmatpush3.msra.mxu1 %v1984_v44 }
 0x7db   : > { %2592 = vmatprep.subr.mxu1 %v1983_v45 }
 0x7dc   : > { %2593 = vmatpush3.msra.mxu1 %v1983_v45 }
 0x7dd   : > { %2595 = vmatmul.mubr.msk.f32.vlgmr.msra.gmra.mxu1 %vm513_vm1, %v2790_v8 }
 0x7de   : > { %2597 = vmatprep.mubr.msk.f32.mxu1 %vm513_vm1, %v2792_v9 }
 0x7e1   : > { %2598 = vmatmul.mubr.msk.f32.gmra.mxu1 %vm513_vm1, %v2799_v11 }
 0x88b   : > { %v2546_v39 = vpop.f32.mrf.mxu0  ;;  %v2560_v40 = vpop.f32.mrf.mxu1 }
 0x88c   : > { %v1938_v53 = vrot.slane %v2546_v39, 7 }
 0x88d   : > { %v1734_v46 = vpop.f32.mrf.mxu0  ;;  %v1824_v47 = vpop.f32.mrf.mxu1 }
 0x88e   : > { %v1937_v42 = vrot.slane %v1734_v46, 7 }
 0x890   : > { %v2549_v41 = vpop.f32.mrf.mxu0  ;;  %v1948_v50 = vsel %vm1203_vm3, 0.0, %v1937_v42  ;;  %v1939_v57 = vsel %vm1203_vm3, %v1937_v42, %v1938_v53 }
 0x891   : > { %v1942_v51 = vrot.slane %v2549_v41, 7  ;;  %v2563_v52 = vpop.f32.mrf.mxu1  ;;  %v1949_v11 = vadd.f32 %v1948_v50, %v1824_v47  ;;  %v1950_v6 = vadd.f32 %v2560_v40, %v1939_v57 }
 0x892   : > { %v1744_v7 = vpop.f32.mrf.mxu0 }
 0x893   : > { %v1940_v48 = vrot.slane %v1744_v7, 7  ;;  %v1834_v58 = vpop.f32.mrf.mxu1 }
 0x895   : > { %v1943_v9 = vsel %vm1203_vm3, %v1940_v48, %v1942_v51  ;;  %v1941_v59 = vsel %vm1203_vm3, %v1938_v53, %v1940_v48 }
 0x896   : > { %v2574_v49 = vpop.f32.mrf.mxu0  ;;  %v1952_v63 = vadd.f32 %v2563_v52, %v1943_v9  ;;  %v1951_v10 = vadd.f32 %v1941_v59, %v1834_v58 }
 0x897   : > { %v1958_v54 = vrot.slane %v2574_v49, 1 }
 0x898   : > { %v1914_v8 = vpop.f32.mrf.mxu0 }
 0x899   : > { %v1957_v55 = vrot.slane %v1914_v8, 1 }
 0x89a   : > { %v2577_v56 = vpop.f32.mrf.mxu0 }
 0x89b   : > { %v1959_v60 = vsel %vm1224_vm4, %v1957_v55, %v1958_v54  ;;  %v1962_v61 = vrot.slane %v2577_v56, 1 }
 0x89c   : > { %v1969_v62 = vadd.f32 %v1959_v60, %v1949_v11  ;;  %v1924_v0 = vpop.f32.mrf.mxu0 }
 0x89d   : > { %v1968_v2 = vsel %vm1224_vm4, %v1962_v61, 0.0  ;;  %v1960_v3 = vrot.slane %v1924_v0, 1  ;;  %v2596_v5 = vpop.f32.mrf.mxu1 }
 0x89e   : > { %v1972_v35 = vadd.f32 %v1968_v2, %v1952_v63  ;;  %v1979_v18 = vadd.f32 %v2236_v4, %v1969_v62  ;;  %v2082_v20 = vadd.f32 %v2596_v5, %v2237_v12 }
 0x89f   : > { %v1961_v13 = vsel %vm1224_vm4, %v1958_v54, %v1960_v3  ;;  %v1963_v14 = vsel %vm1224_vm4, %v1960_v3, %v1962_v61  ;;  %v2076_v15 = vpop.f32.mrf.mxu1 }
 0x8a0   : > { %v1970_v16 = vadd.f32 %v1961_v13, %v1950_v6  ;;  %v1971_v17 = vadd.f32 %v1963_v14, %v1951_v10  ;;  %v2077_v19 = vadd.f32 %v2237_v12, %v2076_v15  ;;  %v1982_v24 = vadd.f32 %v2236_v4, %v1972_v35 }
 0x8a1   : > { %v2599_v21 = vpop.f32.mrf.mxu1 }
 0x8a2   : > { %v1980_v22 = vadd.f32 %v2236_v4, %v1970_v16  ;;  %v2095_v23 = vadd.f32 %v2077_v19, %v1979_v18  ;;  %v2092_v25 = vadd.f32 %v2599_v21, %v2237_v12  ;;  %v1981_v29 = vadd.f32 %v2236_v4, %v1971_v17 }
 0x8a3   : > { %v2086_v26 = vpop.f32.mrf.mxu1 }
 0x8a4   : > { %v2096_v27 = vadd.f32 %v2082_v20, %v1980_v22  ;;  %2099 = vst.msk [vmem:[%s494_s23] sm:$0xff] %vm602_vm2, %v2095_v23  ;;  %v2098_v28 = vadd.f32 %v2092_v25, %v1982_v24  ;;  %v2087_v1 = vadd.f32 %v2237_v12, %v2086_v26 }
 0x8a6   : > { %2100 = vst.msk [vmem:[%s494_s23 + $0x8] sm:$0xff] %vm602_vm2, %v2096_v27  ;;  %2102 = vst.msk [vmem:[%s494_s23 + $0x18] sm:$0xff] %vm602_vm2, %v2098_v28  ;;  %v2097_v30 = vadd.f32 %v2087_v1, %v1981_v29 }
 0x8a8   : > { %2101 = vst.msk [vmem:[%s494_s23 + $0x10] sm:$0xff] %vm602_vm2, %v2097_v30 }
 0x8a9 PF: > { %s25_s18 = sadd.s32 1, %s2652_s18  }
 0x8aa   : > { %p22_p4 = scmp.ge.s32.totalorder %s25_s18, 4  }
 0x8ac   :  { %24 = sbr.rel (!%p22_p4) target bundleno = 1 (0x1), region = 114 }

// kernel: _lambda_.22
= control target key start
LH: loop header
LB: loop body
LE: loop exit
PB: predicated region body
PF: predicated region fallthrough
CT: control target
= control target key end

     0   :  { %s2435_s25 = smov 0   ;;  %s2767_s0 = inlined_call_operand.vmem [shape: f32[2,32,32], index: 0, kind: input, shape index: {}]   ;;  %s2768_s1 = inlined_call_operand.vmem [shape: f32[1,32], index: 1, kind: input, shape index: {}]   ;;  %s2769_s2 = inlined_call_operand.vmem [shape: f32[1,32], index: 2, kind: input, shape index: {}]   ;;  %s2770_s3 = inlined_call_operand.vmem [shape: f32[32,32], index: 3, kind: input, shape index: {}, may-alias: {3,9}]   ;;  %s2771_s4 = inlined_call_operand.vmem [shape: f32[32,32], index: 4, kind: input, shape index: {}, may-alias: {4,10}]   ;;  %s2772_s5 = inlined_call_operand.vmem [shape: f32[3,32,32], index: 5, kind: input, shape index: {}]   ;;  %s2773_s6 = inlined_call_operand.vmem [shape: f32[1,32], index: 6, kind: input, shape index: {}]   ;;  %s2774_s7 = inlined_call_operand.vmem [shape: f32[1,32], index: 7, kind: input, shape index: {}]   ;;  %s2775_s8 = inlined_call_operand.vmem [shape: f32[1,32], index: 8, kind: input, shape index: {}]   ;;  %s2776_s9 = inlined_call_operand.vmem [shape: f32[32,32], index: 9, kind: input, shape index: {}, may-alias: {3,9}]   ;;  %s2777_s10 = inlined_call_operand.vmem [shape: f32[32,32], index: 10, kind: input, shape index: {}, may-alias: {4,10}]   ;;  %s2778_s11 = inlined_call_operand.vmem [shape: f32[3,32,32], index: 11, kind: input, shape index: {}]   ;;  %s2779_s12 = inlined_call_operand.vmem [shape: f32[1,32], index: 12, kind: input, shape index: {}]   ;;  %s2780_s13 = inlined_call_operand.vmem [shape: f32[2,32,32], index: 13, kind: output, shape index: {}]  }
   0x1 LB: > { %s1974_s26 = sadd.s32 4294967295, %s2361_s25   ;;  %p1978_p0 = scmp.ge.s32.totalorder %s2361_s25, 1  ;;  %s2361_s25 = sphi %s2435_s25, %s23_s25  }
   0x2   : > { %p387_p1 = scmp.lt.s32.totalorder %s2361_s25, 3 }
   0x4   : > { %p388_p2 = pnand %p1978_p0, %p387_p1 }
   0x5   : > { %p431_p3 = scmp.lt.s32.totalorder (!%p388_p2), %s1974_s26, 1 }
   0x6   : > { %391 = sbr.rel (%p388_p2) target bundleno = 2204 (0x89c), region = 72 }
   0xb   : > { %v450_v0 = vld [vmem:[%s2770_s3 + $0x18] sm:$0xff]  ;;  %v2363_v1 = vmov 0.0   ;;  %v449_v2 = vld [vmem:[%s2770_s3 + $0x10] sm:$0xff]  ;;  %vm2364_vm0 = vmmov 0   ;;  %s2782_s26 = smov (!%p431_p3, %s1974_s26), 1  ;;  %v448_v5 = vld [vmem:[%s2770_s3 + $0x8] sm:$0xff]  ;;  %v617_v29 = vlaneseq }
   0xc   : > { %2137 = vmatprep.subr.mxu0 %v2363_v1  ;;  %2145 = vmatprep.mubr.msk.f32.mxu0 %vm2364_vm0, %v2363_v1  ;;  %v454_v3 = vld [vmem:[%s2771_s4 + $0x18] sm:$0xff]  ;;  %v453_v4 = vld [vmem:[%s2771_s4 + $0x10] sm:$0xff]  ;;  %s2047_s20 = sshll.u32 %s2782_s26, 5  ;;  %vm455_vm1 = vcmask 261120   ;;  %v447_v6 = vld [vmem:[%s2770_s3] sm:$0xff]  ;;  %vm1132_vm2 = vcmask 1040384  }
   0xd   : > { %2138 = vmatpush3.msra.mxu0 %v450_v0  ;;  %2148 = vmatprep.subr.mxu1 %v2363_v1  ;;  %s435_s27 = scalar_lea.vmem %s2767_s0, %s2047_s20  ;;  %v452_v24 = vld [vmem:[%s2771_s4 + $0x8] sm:$0xff]  ;;  %v451_v25 = vld [vmem:[%s2771_s4] sm:$0xff]  ;;  %v618_v30 = vshrl.u32 %v617_v29, 7  ;;  %v850_v59 = vld [vmem:[%s2772_s5 + $0x18] sm:$0xff]  ;;  %vm1153_vm3 = vcmask 1046528   ;;  %s440_s24 = scalar_lea.vmem %s2780_s13, %s2047_s20 }
   0xe   : > { %2139 = vmatprep.subr.mxu0 %v2363_v1  ;;  %2149 = vmatpush3.msra.mxu1 %v454_v3  ;;  %v2476_v7 = vld [vmem:[%s435_s27] sm:$0xff]  ;;  %v2478_v8 = vld [vmem:[%s435_s27 + $0x8] sm:$0xff]  ;;  %v2480_v9 = vld [vmem:[%s435_s27 + $0x10] sm:$0xff] }
   0xf   : > { %2140 = vmatpush3.msra.mxu0 %v449_v2  ;;  %2150 = vmatprep.subr.mxu1 %v2363_v1  ;;  %v2484_v10 = vld [vmem:[%s435_s27 + $0x18] sm:$0xff]  ;;  %v456_v11 = vsel %vm455_vm1, %v2476_v7, 0.0  ;;  %v457_v12 = vsel %vm455_vm1, %v2478_v8, 0.0  ;;  %v459_v13 = vsel %vm455_vm1, %v2480_v9, 0.0  ;;  %v2517_v31 = vsub.s32 0, %v618_v30  ;;  %v849_v61 = vld [vmem:[%s2772_s5 + $0x10] sm:$0xff] }
  0x10   : > { %2141 = vmatprep.subr.mxu0 %v2363_v1  ;;  %2151 = vmatpush3.msra.mxu1 %v453_v4  ;;  %v458_v14 = vadd.f32 %v457_v12, %v456_v11  ;;  %v461_v15 = vsel %vm455_vm1, %v2484_v10, 0.0  ;;  %v2000_v60 = vld [vmem:[%s2772_s5 + $0x38] sm:$0xff]  ;;  %v1999_v62 = vld [vmem:[%s2772_s5 + $0x30] sm:$0xff]  ;;  %v848_v63 = vld [vmem:[%s2772_s5 + $0x8] sm:$0xff] }
  0x11   : > { %2142 = vmatpush3.msra.mxu0 %v448_v5  ;;  %2152 = vmatprep.subr.mxu1 %v2363_v1 }
  0x12   : > { %2143 = vmatprep.subr.mxu0 %v2363_v1  ;;  %2156 = vmatprep.mubr.msk.f32.mxu1 %vm2364_vm0, %v2363_v1  ;;  %v460_v16 = vadd.f32 %v459_v13, %v458_v14  ;;  %v1987_v14 = vld [vmem:[%s2768_s1] ss:$0 sm:$0xff] }
  0x13   : > { %2144 = vmatpush3.msra.mxu0 %v447_v6  ;;  %2153 = vmatpush3.msra.mxu1 %v452_v24 }
  0x14   : > { %2159 = vmatprep.subr.mxu0 %v2363_v1  ;;  %v462_v17 = vadd.f32 %v461_v15, %v460_v16  ;;  %2154 = vmatprep.subr.mxu1 %v2363_v1 }
  0x15   : > { %2155 = vmatpush3.msra.mxu1 %v451_v25 }
  0x16   : > { %v463_v18 = vrot.slane %v462_v17, 4  ;;  %2170 = vmatprep.subr.mxu1 %v2363_v1 }
  0x18   : > { %v464_v19 = vadd.f32 %v463_v18, %v462_v17 }
  0x1a   : > { %v465_v20 = vrot.slane %v464_v19, 2 }
  0x1c   : > { %v466_v21 = vadd.f32 %v465_v20, %v464_v19  ;;  %v1988_v19 = vld [vmem:[%s2769_s2] ss:$0 sm:$0xff] }
  0x1e   : > { %v467_v22 = vrot.slane %v466_v21, 1 }
  0x20   : > { %v468_v23 = vadd.f32 %v467_v22, %v466_v21 }
  0x22   : > { %2146 = vmatmul.mubr.msk.f32.vlgmr.msra.gmra.mxu0 %vm455_vm1, %v468_v23 }
  0x23   : > { %2160 = vmatpush3.msra.mxu0 %v450_v0  ;;  %2167 = vmatprep.mubr.msk.f32.mxu0 %vm2364_vm0, %v2363_v1  ;;  %v1998_v0 = vld [vmem:[%s2772_s5 + $0x28] sm:$0xff] }
  0x24   : > { %2161 = vmatprep.subr.mxu0 %v2363_v1 }
  0x25   : > { %2162 = vmatpush3.msra.mxu0 %v449_v2  ;;  %v847_v2 = vld [vmem:[%s2772_s5] sm:$0xff] }
  0x26   : > { %2163 = vmatprep.subr.mxu0 %v2363_v1 }
  0x27   : > { %2164 = vmatpush3.msra.mxu0 %v448_v5 }
  0x28   : > { %2165 = vmatprep.subr.mxu0 %v2363_v1 }
  0x29   : > { %2166 = vmatpush3.msra.mxu0 %v447_v6 }
  0x2a   : > { %2181 = vmatprep.subr.mxu0 %v850_v59 }
  0xe2   : > { %v538_v26 = vpop.f32.mrf.mxu0 }
  0xe3   : > { %v543_v27 = vmul.f32 0.03125, %v538_v26 }
  0xe4   : > { %v2147_v28 = vpop.f32.mrf.mxu0 }
  0xe5   : > { %2157 = vmatmul.mubr.msk.f32.vlgmr.msra.gmra.mxu1 %vm455_vm1, %v543_v27 }
  0xe6   : > { %2171 = vmatpush3.msra.mxu1 %v454_v3  ;;  %2178 = vmatprep.mubr.msk.f32.mxu1 %vm2364_vm0, %v2363_v1  ;;  %v1997_v3 = vld [vmem:[%s2772_s5 + $0x20] sm:$0xff] }
  0xe7   : > { %2172 = vmatprep.subr.mxu1 %v2363_v1 }
  0xe8   : > { %2173 = vmatpush3.msra.mxu1 %v453_v4  ;;  %v2008_v4 = vld [vmem:[%s2772_s5 + $0x58] sm:$0xff] }
  0xe9   : > { %2174 = vmatprep.subr.mxu1 %v2363_v1 }
  0xea   : > { %2175 = vmatpush3.msra.mxu1 %v452_v24 }
  0xeb   : > { %2176 = vmatprep.subr.mxu1 %v2363_v1 }
  0xec   : > { %2177 = vmatpush3.msra.mxu1 %v451_v25 }
  0xed   : > { %2195 = vmatprep.subr.mxu1 %v2000_v60 }
 0x1a5   : > { %v613_v32 = vpop.f32.mrf.mxu1 }
 0x1a6   : > { %v620_v33 = vrot.slane %v613_v32, %v2517_v31 }
 0x1a7   : > { %v2158_v34 = vpop.f32.mrf.mxu1 }
 0x1a8   : > { %v621_v35 = vsub.f32 %v2476_v7, %v620_v33  ;;  %v622_v36 = vsub.f32 %v2478_v8, %v620_v33  ;;  %v623_v37 = vsub.f32 %v2480_v9, %v620_v33  ;;  %v624_v38 = vsub.f32 %v2484_v10, %v620_v33 }
 0x1aa   : > { %v625_v39 = vmul.f32 %v621_v35, %v621_v35  ;;  %v626_v40 = vmul.f32 %v622_v36, %v622_v36  ;;  %v627_v41 = vmul.f32 %v623_v37, %v623_v37  ;;  %v628_v42 = vmul.f32 %v624_v38, %v624_v38 }
 0x1ac   : > { %v629_v43 = vsel %vm455_vm1, %v625_v39, 0.0  ;;  %v630_v44 = vsel %vm455_vm1, %v626_v40, 0.0  ;;  %v632_v46 = vsel %vm455_vm1, %v627_v41, 0.0  ;;  %v634_v48 = vsel %vm455_vm1, %v628_v42, 0.0 }
 0x1ad   : > { %v631_v45 = vadd.f32 %v630_v44, %v629_v43 }
 0x1af   : > { %v633_v47 = vadd.f32 %v632_v46, %v631_v45 }
 0x1b1   : > { %v635_v49 = vadd.f32 %v634_v48, %v633_v47  ;;  %v2007_v48 = vld [vmem:[%s2772_s5 + $0x50] sm:$0xff] }
 0x1b3   : > { %v636_v50 = vrot.slane %v635_v49, 4 }
 0x1b5   : > { %v637_v51 = vadd.f32 %v636_v50, %v635_v49  ;;  %v2006_v49 = vld [vmem:[%s2772_s5 + $0x48] sm:$0xff] }
 0x1b7   : > { %v638_v52 = vrot.slane %v637_v51, 2 }
 0x1b9   : > { %v639_v53 = vadd.f32 %v638_v52, %v637_v51  ;;  %v2005_v51 = vld [vmem:[%s2772_s5 + $0x40] sm:$0xff]  ;;  %v2594_v52 = vld [vmem:[%s2776_s9 + $0x18] sm:$0xff] }
 0x1bb   : > { %v640_v54 = vrot.slane %v639_v53, 1 }
 0x1bd   : > { %v641_v55 = vadd.f32 %v640_v54, %v639_v53  ;;  %v2600_v53 = vld [vmem:[%s2776_s9 + $0x10] sm:$0xff]  ;;  %v2606_v54 = vld [vmem:[%s2776_s9 + $0x8] sm:$0xff] }
 0x1bf   : > { %2168 = vmatmul.mubr.msk.f32.vlgmr.msra.gmra.mxu0 %vm455_vm1, %v641_v55  ;;  %v2613_v55 = vld [vmem:[%s2776_s9] sm:$0xff] }
 0x1c0   : > { %2182 = vmatpush3.msra.mxu0 %v850_v59 }
 0x1c1   : > { %2183 = vmatprep.subr.mxu0 %v849_v61 }
 0x1c2   : > { %2184 = vmatpush3.msra.mxu0 %v849_v61 }
 0x1c3   : > { %2185 = vmatprep.subr.mxu0 %v848_v63 }
 0x1c4   : > { %2186 = vmatpush3.msra.mxu0 %v848_v63 }
 0x1c5   : > { %2187 = vmatprep.subr.mxu0 %v847_v2 }
 0x1c6   : > { %2188 = vmatpush3.msra.mxu0 %v847_v2 }
 0x1c7   : > { %2209 = vmatprep.subr.mxu0 %v2008_v4 }
 0x27f   : > { %v711_v56 = vpop.f32.mrf.mxu0 }
 0x280   : > { %v715_v57 = vmul.f32 0.03125, %v711_v56  ;;  %v2619_v56 = vld [vmem:[%s2777_s10 + $0x18] sm:$0xff] }
 0x281   : > { %v2169_v58 = vpop.f32.mrf.mxu0 }
 0x282   : > { %2179 = vmatmul.mubr.msk.f32.vlgmr.msra.gmra.mxu1 %vm455_vm1, %v715_v57  ;;  %v2624_v57 = vld [vmem:[%s2777_s10 + $0x10] sm:$0xff]  ;;  %v2633_v58 = vld [vmem:[%s2777_s10 + $0x8] sm:$0xff] }
 0x283   : > { %2196 = vmatpush3.msra.mxu1 %v2000_v60 }
 0x284   : > { %2197 = vmatprep.subr.mxu1 %v1999_v62 }
 0x285   : > { %2198 = vmatpush3.msra.mxu1 %v1999_v62 }
 0x286   : > { %2199 = vmatprep.subr.mxu1 %v1998_v0 }
 0x287   : > { %2200 = vmatpush3.msra.mxu1 %v1998_v0 }
 0x288   : > { %2201 = vmatprep.subr.mxu1 %v1997_v3 }
 0x289   : > { %2202 = vmatpush3.msra.mxu1 %v1997_v3 }
 0x28a   : > { %2223 = vmatprep.subr.mxu1 %v2363_v1 }
 0x342   : > { %v785_v5 = vpop.f32.mrf.mxu1 }
 0x343   : > { %v786_v6 = vadd.f32 1e-06, %v785_v5 }
 0x344   : > { %v2180_v11 = vpop.f32.mrf.mxu1 }
 0x345   : > { %2319 = vrsqrt.f32 %v786_v6 }
 0x352   : > { %v2320_v12 = vpop.eup %2319 }
 0x353   : > { %v793_v13 = vrot.slane %v2320_v12, %v2517_v31 }
 0x355   : > { %v794_v15 = vmul.f32 %v793_v13, %v621_v35  ;;  %v795_v16 = vmul.f32 %v793_v13, %v622_v36  ;;  %v796_v17 = vmul.f32 %v793_v13, %v623_v37  ;;  %v797_v18 = vmul.f32 %v793_v13, %v624_v38 }
 0x357   : > { %v804_v20 = vmul.f32 %v1987_v14, %v794_v15  ;;  %v805_v21 = vmul.f32 %v1987_v14, %v795_v16  ;;  %v806_v22 = vmul.f32 %v1987_v14, %v796_v17  ;;  %v807_v23 = vmul.f32 %v1987_v14, %v797_v18 }
 0x359   : > { %v814_v24 = vadd.f32 %v1988_v19, %v804_v20  ;;  %v815_v25 = vadd.f32 %v1988_v19, %v805_v21  ;;  %v816_v26 = vadd.f32 %v1988_v19, %v806_v22  ;;  %v817_v27 = vadd.f32 %v1988_v19, %v807_v23 }
 0x35b   : > { %v1989_v28 = vmul.f32 -1.442695, %v814_v24  ;;  %v1990_v29 = vmul.f32 -1.442695, %v815_v25  ;;  %v1991_v30 = vmul.f32 -1.442695, %v816_v26 }
 0x35c   : > { %v1992_v32 = vmul.f32 -1.442695, %v817_v27 }
 0x35d   : > { %2321 = vpow2.f32 %v1989_v28 }
 0x35e   : > { %2323 = vpow2.f32 %v1990_v29 }
 0x35f   : > { %2325 = vpow2.f32 %v1991_v30 }
 0x360   : > { %2327 = vpow2.f32 %v1992_v32 }
 0x36a   : > { %v2322_v33 = vpop.eup %2321 }
 0x36b   : > { %v2324_v34 = vpop.eup %2323  ;;  %v830_v35 = vadd.f32 1.0, %v2322_v33 }
 0x36c   : > { %v2326_v36 = vpop.eup %2325  ;;  %v831_v37 = vadd.f32 1.0, %v2324_v34 }
 0x36d   : > { %v2328_v38 = vpop.eup %2327  ;;  %2329 = vrcp.f32 %v830_v35  ;;  %v832_v39 = vadd.f32 1.0, %v2326_v36 }
 0x36e   : > { %2331 = vrcp.f32 %v831_v37  ;;  %v833_v40 = vadd.f32 1.0, %v2328_v38 }
 0x36f   : > { %2333 = vrcp.f32 %v832_v39 }
 0x370   : > { %2335 = vrcp.f32 %v833_v40 }
 0x37a   : > { %v2330_v41 = vpop.eup %2329 }
 0x37b   : > { %v2332_v42 = vpop.eup %2331  ;;  %v842_v43 = vmul.f32 %v2330_v41, %v814_v24 }
 0x37c   : > { %v2334_v44 = vpop.eup %2333  ;;  %v843_v45 = vmul.f32 %v2332_v42, %v815_v25 }
 0x37d   : > { %v2336_v46 = vpop.eup %2335  ;;  %2189 = vmatprep.mubr.msk.f32.mxu0 %vm455_vm1, %v842_v43  ;;  %2203 = vmatprep.mubr.msk.f32.mxu1 %vm455_vm1, %v842_v43  ;;  %v844_v47 = vmul.f32 %v2334_v44, %v816_v26  ;;  %v2013_v26 = vld [vmem:[%s2773_s6] ss:$0 sm:$0xff] }
 0x37e   : > { %2190 = vmatmul.mubr.msk.f32.vlgmr.msra.gmra.mxu0 %vm455_vm1, %v843_v45  ;;  %2204 = vmatmul.mubr.msk.f32.vlgmr.msra.gmra.mxu1 %vm455_vm1, %v843_v45  ;;  %v845_v50 = vmul.f32 %v2336_v46, %v817_v27 }
 0x37f   : > { %2210 = vmatpush3.msra.mxu0 %v2008_v4  ;;  %2192 = vmatprep.mubr.msk.f32.mxu0 %vm455_vm1, %v844_v47 }
 0x380   : > { %2206 = vmatprep.mubr.msk.f32.mxu1 %vm455_vm1, %v844_v47  ;;  %2211 = vmatprep.subr.mxu0 %v2007_v48 }
 0x381   : > { %2212 = vmatpush3.msra.mxu0 %v2007_v48  ;;  %2224 = vmatpush3.msra.mxu1 %v2594_v52 }
 0x382   : > { %2213 = vmatprep.subr.mxu0 %v2006_v49  ;;  %2193 = vmatmul.mubr.msk.f32.gmra.mxu0 %vm455_vm1, %v845_v50 }
 0x383   : > { %2207 = vmatmul.mubr.msk.f32.gmra.mxu1 %vm455_vm1, %v845_v50  ;;  %2214 = vmatpush3.msra.mxu0 %v2006_v49 }
 0x384   : > { %2215 = vmatprep.subr.mxu0 %v2005_v51  ;;  %2217 = vmatprep.mubr.msk.f32.mxu0 %vm455_vm1, %v842_v43 }
 0x385   : > { %2216 = vmatpush3.msra.mxu0 %v2005_v51  ;;  %2231 = vmatprep.mubr.msk.f32.mxu1 %vm2364_vm0, %v2363_v1 }
 0x386   : > { %2218 = vmatmul.mubr.msk.f32.vlgmr.msra.gmra.mxu0 %vm455_vm1, %v843_v45  ;;  %2234 = vmatprep.subr.mxu0 %v2363_v1 }
 0x387   : > { %2220 = vmatprep.mubr.msk.f32.mxu0 %vm455_vm1, %v844_v47  ;;  %2225 = vmatprep.subr.mxu1 %v2363_v1 }
 0x388   : > { %2226 = vmatpush3.msra.mxu1 %v2600_v53  ;;  %2235 = vmatpush3.msra.mxu0 %v2619_v56 }
 0x389   : > { %2227 = vmatprep.subr.mxu1 %v2363_v1  ;;  %2236 = vmatprep.subr.mxu0 %v2363_v1 }
 0x38a   : > { %2221 = vmatmul.mubr.msk.f32.gmra.mxu0 %vm455_vm1, %v845_v50  ;;  %2228 = vmatpush3.msra.mxu1 %v2606_v54 }
 0x38b   : > { %2242 = vmatprep.mubr.msk.f32.mxu0 %vm2364_vm0, %v2363_v1  ;;  %2229 = vmatprep.subr.mxu1 %v2363_v1 }
 0x38c   : > { %2230 = vmatpush3.msra.mxu1 %v2613_v55  ;;  %2237 = vmatpush3.msra.mxu0 %v2624_v57 }
 0x38d   : > { %2245 = vmatprep.subr.mxu1 %v2363_v1  ;;  %2238 = vmatprep.subr.mxu0 %v2363_v1 }
 0x38e   : > { %2239 = vmatpush3.msra.mxu0 %v2633_v58 }
 0x38f   : > { %2240 = vmatprep.subr.mxu0 %v2363_v1 }
 0x43e   : > { %v2191_v59 = vpop.f32.mrf.mxu0  ;;  %v2205_v61 = vpop.f32.mrf.mxu1 }
 0x43f   : > { %v1134_v6 = vrot.slane %v2191_v59, 7 }
 0x440   : > { %v929_v60 = vpop.f32.mrf.mxu0  ;;  %v1019_v2 = vpop.f32.mrf.mxu1 }
 0x441   : > { %v1133_v63 = vrot.slane %v929_v60, 7 }
 0x442   : > { %v2194_v62 = vpop.f32.mrf.mxu0 }
 0x443   : > { %v1144_v4 = vsel %vm1132_vm2, 0.0, %v1133_v63  ;;  %v1138_v12 = vrot.slane %v2194_v62, 7  ;;  %v2208_v13 = vpop.f32.mrf.mxu1  ;;  %v1135_v16 = vsel %vm1132_vm2, %v1133_v63, %v1134_v6  ;;  %v1186_v62 = vld [vmem:[%s2777_s10] sm:$0xff] }
 0x444   : > { %v939_v0 = vpop.f32.mrf.mxu0  ;;  %v1145_v17 = vadd.f32 %v1144_v4, %v1019_v2  ;;  %v1146_v29 = vadd.f32 %v2205_v61, %v1135_v16  ;;  %2241 = vmatpush3.msra.mxu0 %v1186_v62 }
 0x445   : > { %v1136_v5 = vrot.slane %v939_v0, 7  ;;  %v1029_v25 = vpop.f32.mrf.mxu1  ;;  %2256 = vmatprep.subr.mxu0 %v2363_v1 }
 0x446   : > { %v2219_v3 = vpop.f32.mrf.mxu0 }
 0x447   : > { %v1155_v14 = vrot.slane %v2219_v3, 1  ;;  %v1139_v19 = vsel %vm1132_vm2, %v1136_v5, %v1138_v12  ;;  %v1137_v20 = vsel %vm1132_vm2, %v1134_v6, %v1136_v5 }
 0x448   : > { %v1109_v11 = vpop.f32.mrf.mxu0  ;;  %v1147_v30 = vadd.f32 %v1137_v20, %v1029_v25  ;;  %v1148_v32 = vadd.f32 %v2208_v13, %v1139_v19 }
 0x449   : > { %v1154_v15 = vrot.slane %v1109_v11, 1 }
 0x44a   : > { %v2222_v18 = vpop.f32.mrf.mxu0 }
 0x44b   : > { %v1156_v21 = vsel %vm1153_vm3, %v1154_v15, %v1155_v14  ;;  %v1159_v22 = vrot.slane %v2222_v18, 1 }
 0x44c   : > { %v1166_v23 = vadd.f32 %v1156_v21, %v1145_v17  ;;  %v1119_v24 = vpop.f32.mrf.mxu0 }
 0x44d   : > { %v1165_v27 = vsel %vm1153_vm3, %v1159_v22, 0.0  ;;  %v1157_v28 = vrot.slane %v1119_v24, 1 }
 0x44e   : > { %v1176_v35 = vadd.f32 %v2013_v26, %v1166_v23  ;;  %v1169_v36 = vadd.f32 %v1165_v27, %v1148_v32  ;;  %v2031_v27 = vld [vmem:[%s2778_s11 + $0x38] sm:$0xff]  ;;  %v2029_v32 = vld [vmem:[%s2778_s11 + $0x28] sm:$0xff] }
 0x44f   : > { %v1158_v33 = vsel %vm1153_vm3, %v1155_v14, %v1157_v28  ;;  %v1160_v34 = vsel %vm1153_vm3, %v1157_v28, %v1159_v22  ;;  %v1582_v28 = vld [vmem:[%s2778_s11 + $0x10] sm:$0xff] }
 0x450   : > { %v1167_v37 = vadd.f32 %v1158_v33, %v1146_v29  ;;  %v1168_v38 = vadd.f32 %v1160_v34, %v1147_v30  ;;  %v1190_v41 = vsel %vm455_vm1, %v1176_v35, 0.0  ;;  %v1179_v42 = vadd.f32 %v2013_v26, %v1169_v36  ;;  %v2030_v29 = vld [vmem:[%s2778_s11 + $0x30] sm:$0xff]  ;;  %v1581_v30 = vld [vmem:[%s2778_s11 + $0x8] sm:$0xff]  ;;  %v1580_v33 = vld [vmem:[%s2778_s11] sm:$0xff] }
 0x451   : > { %v2028_v34 = vld [vmem:[%s2778_s11 + $0x20] sm:$0xff] }
 0x452   : > { %v1177_v39 = vadd.f32 %v2013_v26, %v1167_v37  ;;  %v1178_v40 = vadd.f32 %v2013_v26, %v1168_v38  ;;  %v1195_v47 = vsel %vm455_vm1, %v1179_v42, 0.0  ;;  %v1583_v26 = vld [vmem:[%s2778_s11 + $0x18] sm:$0xff] }
 0x454   : > { %v1191_v43 = vsel %vm455_vm1, %v1177_v39, 0.0  ;;  %v1193_v45 = vsel %vm455_vm1, %v1178_v40, 0.0 }
 0x455   : > { %v1192_v44 = vadd.f32 %v1191_v43, %v1190_v41  ;;  %v2018_v41 = vld [vmem:[%s2774_s7] ss:$0 sm:$0xff] }
 0x457   : > { %v1194_v46 = vadd.f32 %v1193_v45, %v1192_v44 }
 0x459   : > { %v1196_v48 = vadd.f32 %v1195_v47, %v1194_v46  ;;  %v2019_v46 = vld [vmem:[%s2775_s8] ss:$0 sm:$0xff] }
 0x45b   : > { %v1197_v49 = vrot.slane %v1196_v48, 4 }
 0x45d   : > { %v1198_v50 = vadd.f32 %v1197_v49, %v1196_v48 }
 0x45f   : > { %v1199_v51 = vrot.slane %v1198_v50, 2 }
 0x461   : > { %v1200_v59 = vadd.f32 %v1199_v51, %v1198_v50 }
 0x463   : > { %v1201_v60 = vrot.slane %v1200_v59, 1 }
 0x465   : > { %v1202_v61 = vadd.f32 %v1201_v60, %v1200_v59 }
 0x467   : > { %2232 = vmatmul.mubr.msk.f32.vlgmr.msra.gmra.mxu1 %vm455_vm1, %v1202_v61 }
 0x468   : > { %2246 = vmatpush3.msra.mxu1 %v2594_v52  ;;  %2253 = vmatprep.mubr.msk.f32.mxu1 %vm2364_vm0, %v2363_v1 }
 0x469   : > { %2247 = vmatprep.subr.mxu1 %v2363_v1 }
 0x46a   : > { %2248 = vmatpush3.msra.mxu1 %v2600_v53 }
 0x46b   : > { %2249 = vmatprep.subr.mxu1 %v2363_v1 }
 0x46c   : > { %2250 = vmatpush3.msra.mxu1 %v2606_v54 }
 0x46d   : > { %2251 = vmatprep.subr.mxu1 %v2363_v1 }
 0x46e   : > { %2252 = vmatpush3.msra.mxu1 %v2613_v55 }
 0x46f   : > { %2267 = vmatprep.subr.mxu1 %v1583_v26 }
 0x527   : > { %v1272_v52 = vpop.f32.mrf.mxu1 }
 0x528   : > { %v1276_v63 = vmul.f32 0.03125, %v1272_v52 }
 0x529   : > { %v2233_v0 = vpop.f32.mrf.mxu1 }
 0x52a   : > { %2243 = vmatmul.mubr.msk.f32.vlgmr.msra.gmra.mxu0 %vm455_vm1, %v1276_v63 }
 0x52b   : > { %2257 = vmatpush3.msra.mxu0 %v2619_v56  ;;  %2264 = vmatprep.mubr.msk.f32.mxu0 %vm2364_vm0, %v2363_v1 }
 0x52c   : > { %2258 = vmatprep.subr.mxu0 %v2363_v1 }
 0x52d   : > { %2259 = vmatpush3.msra.mxu0 %v2624_v57 }
 0x52e   : > { %2260 = vmatprep.subr.mxu0 %v2363_v1 }
 0x52f   : > { %2261 = vmatpush3.msra.mxu0 %v2633_v58 }
 0x530   : > { %2262 = vmatprep.subr.mxu0 %v2363_v1 }
 0x531   : > { %2263 = vmatpush3.msra.mxu0 %v1186_v62 }
 0x532   : > { %2281 = vmatprep.subr.mxu0 %v2031_v27 }
 0x5ea   : > { %v1346_v53 = vpop.f32.mrf.mxu0 }
 0x5eb   : > { %v1353_v54 = vrot.slane %v1346_v53, %v2517_v31 }
 0x5ec   : > { %v2244_v55 = vpop.f32.mrf.mxu0 }
 0x5ed   : > { %v1354_v2 = vsub.f32 %v1176_v35, %v1353_v54  ;;  %v1355_v56 = vsub.f32 %v1177_v39, %v1353_v54  ;;  %v1356_v3 = vsub.f32 %v1178_v40, %v1353_v54  ;;  %v1357_v4 = vsub.f32 %v1179_v42, %v1353_v54  ;;  %v2039_v35 = vld [vmem:[%s2778_s11 + $0x58] sm:$0xff] }
 0x5ef   : > { %v1358_v5 = vmul.f32 %v1354_v2, %v1354_v2  ;;  %v1359_v6 = vmul.f32 %v1355_v56, %v1355_v56  ;;  %v1360_v11 = vmul.f32 %v1356_v3, %v1356_v3  ;;  %v1361_v12 = vmul.f32 %v1357_v4, %v1357_v4 }
 0x5f1   : > { %v1362_v57 = vsel %vm455_vm1, %v1358_v5, 0.0  ;;  %v1363_v13 = vsel %vm455_vm1, %v1359_v6, 0.0  ;;  %v1365_v1 = vsel %vm455_vm1, %v1360_v11, 0.0  ;;  %v1367_v15 = vsel %vm455_vm1, %v1361_v12, 0.0 }
 0x5f2   : > { %v1364_v58 = vadd.f32 %v1363_v13, %v1362_v57 }
 0x5f4   : > { %v1366_v14 = vadd.f32 %v1365_v1, %v1364_v58  ;;  %v2038_v1 = vld [vmem:[%s2778_s11 + $0x50] sm:$0xff] }
 0x5f6   : > { %v1368_v16 = vadd.f32 %v1367_v15, %v1366_v14  ;;  %v2037_v14 = vld [vmem:[%s2778_s11 + $0x48] sm:$0xff] }
 0x5f8   : > { %v1369_v17 = vrot.slane %v1368_v16, 4 }
 0x5fa   : > { %v1370_v18 = vadd.f32 %v1369_v17, %v1368_v16  ;;  %v2036_v16 = vld [vmem:[%s2778_s11 + $0x40] sm:$0xff] }
 0x5fc   : > { %v1371_v19 = vrot.slane %v1370_v18, 2 }
 0x5fe   : > { %v1372_v20 = vadd.f32 %v1371_v19, %v1370_v18 }
 0x600   : > { %v1373_v21 = vrot.slane %v1372_v20, 1 }
 0x602   : > { %v1374_v22 = vadd.f32 %v1373_v21, %v1372_v20 }
 0x604   : > { %2254 = vmatmul.mubr.msk.f32.vlgmr.msra.gmra.mxu1 %vm455_vm1, %v1374_v22 }
 0x605   : > { %2268 = vmatpush3.msra.mxu1 %v1583_v26 }
 0x606   : > { %2269 = vmatprep.subr.mxu1 %v1582_v28 }
 0x607   : > { %2270 = vmatpush3.msra.mxu1 %v1582_v28 }
 0x608   : > { %2271 = vmatprep.subr.mxu1 %v1581_v30 }
 0x609   : > { %2272 = vmatpush3.msra.mxu1 %v1581_v30 }
 0x60a   : > { %2273 = vmatprep.subr.mxu1 %v1580_v33 }
 0x60b   : > { %2274 = vmatpush3.msra.mxu1 %v1580_v33 }
 0x60c   : > { %2295 = vmatprep.subr.mxu1 %v2039_v35 }
 0x6c4   : > { %v1444_v23 = vpop.f32.mrf.mxu1 }
 0x6c5   : > { %v1448_v24 = vmul.f32 0.03125, %v1444_v23 }
 0x6c6   : > { %v2255_v25 = vpop.f32.mrf.mxu1 }
 0x6c7   : > { %2265 = vmatmul.mubr.msk.f32.vlgmr.msra.gmra.mxu0 %vm455_vm1, %v1448_v24 }
 0x6c8   : > { %2282 = vmatpush3.msra.mxu0 %v2031_v27 }
 0x6c9   : > { %2283 = vmatprep.subr.mxu0 %v2030_v29 }
 0x6ca   : > { %2284 = vmatpush3.msra.mxu0 %v2030_v29 }
 0x6cb   : > { %2285 = vmatprep.subr.mxu0 %v2029_v32 }
 0x6cc   : > { %2286 = vmatpush3.msra.mxu0 %v2029_v32 }
 0x6cd   : > { %2287 = vmatprep.subr.mxu0 %v2028_v34 }
 0x6ce   : > { %2288 = vmatpush3.msra.mxu0 %v2028_v34 }
 0x787   : > { %v1518_v36 = vpop.f32.mrf.mxu0 }
 0x788   : > { %v1519_v37 = vadd.f32 1e-06, %v1518_v36 }
 0x789   : > { %v2266_v38 = vpop.f32.mrf.mxu0 }
 0x78a   : > { %2337 = vrsqrt.f32 %v1519_v37 }
 0x797   : > { %v2338_v39 = vpop.eup %2337 }
 0x798   : > { %v1526_v40 = vrot.slane %v2338_v39, %v2517_v31  ;;  %v2044_v39 = vld [vmem:[%s2779_s12] ss:$0 sm:$0xff] }
 0x79a   : > { %v1527_v42 = vmul.f32 %v1526_v40, %v1354_v2  ;;  %v1528_v43 = vmul.f32 %v1526_v40, %v1355_v56  ;;  %v1529_v44 = vmul.f32 %v1526_v40, %v1356_v3  ;;  %v1530_v45 = vmul.f32 %v1526_v40, %v1357_v4 }
 0x79c   : > { %v1537_v47 = vmul.f32 %v2018_v41, %v1527_v42  ;;  %v1538_v48 = vmul.f32 %v2018_v41, %v1528_v43  ;;  %v1539_v49 = vmul.f32 %v2018_v41, %v1529_v44  ;;  %v1540_v50 = vmul.f32 %v2018_v41, %v1530_v45 }
 0x79e   : > { %v1547_v51 = vadd.f32 %v2019_v46, %v1537_v47  ;;  %v1548_v59 = vadd.f32 %v2019_v46, %v1538_v48  ;;  %v1549_v60 = vadd.f32 %v2019_v46, %v1539_v49  ;;  %v1550_v31 = vadd.f32 %v2019_v46, %v1540_v50 }
 0x7a0   : > { %v2020_v61 = vmul.f32 -1.442695, %v1547_v51  ;;  %v2021_v62 = vmul.f32 -1.442695, %v1548_v59  ;;  %v2022_v52 = vmul.f32 -1.442695, %v1549_v60 }
 0x7a1   : > { %v2023_v63 = vmul.f32 -1.442695, %v1550_v31 }
 0x7a2   : > { %2339 = vpow2.f32 %v2020_v61 }
 0x7a3   : > { %2341 = vpow2.f32 %v2021_v62 }
 0x7a4   : > { %2343 = vpow2.f32 %v2022_v52 }
 0x7a5   : > { %2345 = vpow2.f32 %v2023_v63 }
 0x7af   : > { %v2340_v0 = vpop.eup %2339 }
 0x7b0   : > { %v2342_v53 = vpop.eup %2341  ;;  %v1563_v54 = vadd.f32 1.0, %v2340_v0 }
 0x7b1   : > { %v2344_v55 = vpop.eup %2343  ;;  %v1564_v2 = vadd.f32 1.0, %v2342_v53 }
 0x7b2   : > { %v2346_v56 = vpop.eup %2345  ;;  %2347 = vrcp.f32 %v1563_v54  ;;  %v1565_v3 = vadd.f32 1.0, %v2344_v55 }
 0x7b3   : > { %2349 = vrcp.f32 %v1564_v2  ;;  %v1566_v4 = vadd.f32 1.0, %v2346_v56 }
 0x7b4   : > { %2351 = vrcp.f32 %v1565_v3 }
 0x7b5   : > { %2353 = vrcp.f32 %v1566_v4 }
 0x7bf   : > { %v2348_v5 = vpop.eup %2347 }
 0x7c0   : > { %v2350_v6 = vpop.eup %2349  ;;  %v1575_v11 = vmul.f32 %v2348_v5, %v1547_v51 }
 0x7c1   : > { %v2352_v12 = vpop.eup %2351  ;;  %v1576_v57 = vmul.f32 %v2350_v6, %v1548_v59 }
 0x7c2   : > { %v2354_v13 = vpop.eup %2353  ;;  %2275 = vmatprep.mubr.msk.f32.mxu1 %vm455_vm1, %v1575_v11  ;;  %2289 = vmatprep.mubr.msk.f32.mxu0 %vm455_vm1, %v1575_v11  ;;  %v1577_v58 = vmul.f32 %v2352_v12, %v1549_v60 }
 0x7c3   : > { %2276 = vmatmul.mubr.msk.f32.vlgmr.msra.gmra.mxu1 %vm455_vm1, %v1576_v57  ;;  %2290 = vmatmul.mubr.msk.f32.vlgmr.msra.gmra.mxu0 %vm455_vm1, %v1576_v57  ;;  %v1578_v15 = vmul.f32 %v2354_v13, %v1550_v31 }
 0x7c4   : > { %2296 = vmatpush3.msra.mxu1 %v2039_v35  ;;  %2278 = vmatprep.mubr.msk.f32.mxu1 %vm455_vm1, %v1577_v58 }
 0x7c5   : > { %2292 = vmatprep.mubr.msk.f32.mxu0 %vm455_vm1, %v1577_v58  ;;  %2297 = vmatprep.subr.mxu1 %v2038_v1 }
 0x7c6   : > { %2298 = vmatpush3.msra.mxu1 %v2038_v1 }
 0x7c7   : > { %2299 = vmatprep.subr.mxu1 %v2037_v14  ;;  %2279 = vmatmul.mubr.msk.f32.gmra.mxu1 %vm455_vm1, %v1578_v15 }
 0x7c8   : > { %2293 = vmatmul.mubr.msk.f32.gmra.mxu0 %vm455_vm1, %v1578_v15  ;;  %2300 = vmatpush3.msra.mxu1 %v2037_v14 }
 0x7c9   : > { %2301 = vmatprep.subr.mxu1 %v2036_v16  ;;  %2303 = vmatprep.mubr.msk.f32.mxu1 %vm455_vm1, %v1575_v11 }
 0x7ca   : > { %2302 = vmatpush3.msra.mxu1 %v2036_v16 }
 0x7cb   : > { %2304 = vmatmul.mubr.msk.f32.vlgmr.msra.gmra.mxu1 %vm455_vm1, %v1576_v57 }
 0x7cc   : > { %2306 = vmatprep.mubr.msk.f32.mxu1 %vm455_vm1, %v1577_v58 }
 0x7cf   : > { %2307 = vmatmul.mubr.msk.f32.gmra.mxu1 %vm455_vm1, %v1578_v15 }
 0x883   : > { %v2277_v17 = vpop.f32.mrf.mxu1  ;;  %v2291_v19 = vpop.f32.mrf.mxu0 }
 0x884   : > { %v1866_v29 = vrot.slane %v2277_v17, 7 }
 0x885   : > { %v1662_v18 = vpop.f32.mrf.mxu1  ;;  %v1752_v23 = vpop.f32.mrf.mxu0 }
 0x886   : > { %v1865_v21 = vrot.slane %v1662_v18, 7 }
 0x887   : > { %v2280_v20 = vpop.f32.mrf.mxu1 }
 0x888   : > { %v1876_v26 = vsel %vm1132_vm2, 0.0, %v1865_v21  ;;  %v1870_v27 = vrot.slane %v2280_v20, 7  ;;  %v2294_v30 = vpop.f32.mrf.mxu0  ;;  %v1867_v37 = vsel %vm1132_vm2, %v1865_v21, %v1866_v29 }
 0x889   : > { %v1672_v22 = vpop.f32.mrf.mxu1  ;;  %v1877_v35 = vadd.f32 %v1876_v26, %v1752_v23  ;;  %v1878_v48 = vadd.f32 %v2291_v19, %v1867_v37 }
 0x88a   : > { %v1868_v24 = vrot.slane %v1672_v22, 7  ;;  %v1762_v45 = vpop.f32.mrf.mxu0 }
 0x88b   : > { %v2305_v25 = vpop.f32.mrf.mxu1 }
 0x88c   : > { %v1871_v32 = vsel %vm1132_vm2, %v1868_v24, %v1870_v27  ;;  %v1886_v33 = vrot.slane %v2305_v25, 1  ;;  %v1869_v38 = vsel %vm1132_vm2, %v1866_v29, %v1868_v24 }
 0x88d   : > { %v1842_v28 = vpop.f32.mrf.mxu1  ;;  %v1880_v43 = vadd.f32 %v2294_v30, %v1871_v32  ;;  %v1879_v49 = vadd.f32 %v1869_v38, %v1762_v45 }
 0x88e   : > { %v1885_v34 = vrot.slane %v1842_v28, 1 }
 0x88f   : > { %v2308_v36 = vpop.f32.mrf.mxu1 }
 0x890   : > { %v1887_v40 = vsel %vm1153_vm3, %v1885_v34, %v1886_v33  ;;  %v1890_v41 = vrot.slane %v2308_v36, 1 }
 0x891   : > { %v1897_v42 = vadd.f32 %v1887_v40, %v1877_v35  ;;  %v1852_v44 = vpop.f32.mrf.mxu1 }
 0x892   : > { %v1896_v46 = vsel %vm1153_vm3, %v1890_v41, 0.0  ;;  %v1888_v47 = vrot.slane %v1852_v44, 1 }
 0x893   : > { %v1907_v50 = vadd.f32 %v2044_v39, %v1897_v42  ;;  %v1900_v51 = vadd.f32 %v1896_v46, %v1880_v43 }
 0x894   : > { %v1889_v59 = vsel %vm1153_vm3, %v1886_v33, %v1888_v47  ;;  %v1891_v60 = vsel %vm1153_vm3, %v1888_v47, %v1890_v41 }
 0x895   : > { %v1911_v31 = vadd.f32 %v1907_v50, %v2476_v7  ;;  %v1910_v61 = vadd.f32 %v2044_v39, %v1900_v51  ;;  %v1898_v62 = vadd.f32 %v1889_v59, %v1878_v48  ;;  %v1899_v52 = vadd.f32 %v1891_v60, %v1879_v49 }
 0x897   : > { %1915 = vst.msk [vmem:[%s440_s24] sm:$0xff] %vm455_vm1, %v1911_v31  ;;  %v1914_v63 = vadd.f32 %v1910_v61, %v2484_v10  ;;  %v1908_v0 = vadd.f32 %v2044_v39, %v1898_v62  ;;  %v1909_v53 = vadd.f32 %v2044_v39, %v1899_v52 }
 0x899   : > { %1918 = vst.msk [vmem:[%s440_s24 + $0x18] sm:$0xff] %vm455_vm1, %v1914_v63  ;;  %v1912_v54 = vadd.f32 %v1908_v0, %v2478_v8  ;;  %v1913_v55 = vadd.f32 %v1909_v53, %v2480_v9 }
 0x89b   : > { %1916 = vst.msk [vmem:[%s440_s24 + $0x8] sm:$0xff] %vm455_vm1, %v1912_v54  ;;  %1917 = vst.msk [vmem:[%s440_s24 + $0x10] sm:$0xff] %vm455_vm1, %v1913_v55 }
 0x89c PF: > { %s23_s25 = sadd.s32 1, %s2361_s25  }
 0x89d   : > { %p20_p4 = scmp.ge.s32.totalorder %s23_s25, 4  }
 0x89f   :  { %22 = sbr.rel (!%p20_p4) target bundleno = 1 (0x1), region = 106 }

// kernel: _lambda_.23
= control target key start
LH: loop header
LB: loop body
LE: loop exit
PB: predicated region body
PF: predicated region fallthrough
CT: control target
= control target key end

     0   :  { %s1338_s24 = smov 0   ;;  %s1486_s0 = inlined_call_operand.vmem [shape: f32[2,32,32], index: 0, kind: input, shape index: {}]   ;;  %s1487_s1 = inlined_call_operand.vmem [shape: f32[1,32], index: 1, kind: input, shape index: {}]   ;;  %s1488_s2 = inlined_call_operand.vmem [shape: f32[1,32], index: 2, kind: input, shape index: {}]   ;;  %s1489_s3 = inlined_call_operand.vmem [shape: f32[32,32], index: 3, kind: input, shape index: {}]   ;;  %s1490_s4 = inlined_call_operand.vmem [shape: f32[32,32], index: 4, kind: input, shape index: {}]   ;;  %s1491_s5 = inlined_call_operand.vmem [shape: f32[3,32,4], index: 5, kind: input, shape index: {}]   ;;  %s1492_s6 = inlined_call_operand.vmem [shape: f32[1,4], index: 6, kind: input, shape index: {}]   ;;  %s1493_s7 = inlined_call_operand.vmem [shape: f32[2,32,4], index: 7, kind: output, shape index: {}]  }
   0x1 LB: > { %s1078_s25 = sadd.s32 4294967295, %s1294_s24   ;;  %p1082_p0 = scmp.ge.s32.totalorder %s1294_s24, 1  ;;  %s1294_s24 = sphi %s1338_s24, %s17_s24  }
   0x2   : > { %p237_p1 = scmp.lt.s32.totalorder %s1294_s24, 3 }
   0x4   : > { %p238_p2 = pnand %p1082_p0, %p237_p1 }
   0x5   : > { %p269_p3 = scmp.lt.s32.totalorder (!%p238_p2), %s1078_s25, 1 }
   0x6   : > { %241 = sbr.rel (%p238_p2) target bundleno = 1109 (0x455), region = 48 }
   0xb   : > { %v288_v0 = vld [vmem:[%s1489_s3 + $0x18] sm:$0xff]  ;;  %v1296_v1 = vmov 0.0   ;;  %v287_v2 = vld [vmem:[%s1489_s3 + $0x10] sm:$0xff]  ;;  %vm1297_vm0 = vmmov 0   ;;  %s1495_s25 = smov (!%p269_p3, %s1078_s25), 1  ;;  %v286_v5 = vld [vmem:[%s1489_s3 + $0x8] sm:$0xff]  ;;  %v455_v29 = vlaneseq }
   0xc   : > { %1166 = vmatprep.subr.mxu0 %v1296_v1  ;;  %1174 = vmatprep.mubr.msk.f32.mxu0 %vm1297_vm0, %v1296_v1  ;;  %v292_v3 = vld [vmem:[%s1490_s4 + $0x18] sm:$0xff]  ;;  %v291_v4 = vld [vmem:[%s1490_s4 + $0x10] sm:$0xff]  ;;  %s1120_s13 = sshll.u32 %s1495_s25, 5  ;;  %vm293_vm1 = vcmask 261120   ;;  %v285_v6 = vld [vmem:[%s1489_s3] sm:$0xff]  ;;  %vm970_vm2 = vcmask 1040384  }
   0xd   : > { %1167 = vmatpush3.msra.mxu0 %v288_v0  ;;  %1177 = vmatprep.subr.mxu1 %v1296_v1  ;;  %s273_s18 = scalar_lea.vmem %s1486_s0, %s1120_s13  ;;  %v290_v24 = vld [vmem:[%s1490_s4 + $0x8] sm:$0xff]  ;;  %v289_v25 = vld [vmem:[%s1490_s4] sm:$0xff]  ;;  %v1408_v30 = vshrl.u32 %v455_v29, 7  ;;  %v688_v59 = vld [vmem:[%s1491_s5 + $0x18] sm:$0xff]  ;;  %vm991_vm3 = vcmask 1046528   ;;  %s278_s15 = scalar_lea.vmem %s1493_s7, %s1120_s13  ;;  %vm1018_vm4 = vcmask 31744  }
   0xe   : > { %1168 = vmatprep.subr.mxu0 %v1296_v1  ;;  %1178 = vmatpush3.msra.mxu1 %v292_v3  ;;  %v279_v7 = vld [vmem:[%s273_s18] sm:$0xff]  ;;  %v280_v8 = vld [vmem:[%s273_s18 + $0x8] sm:$0xff]  ;;  %v281_v9 = vld [vmem:[%s273_s18 + $0x10] sm:$0xff] }
   0xf   : > { %1169 = vmatpush3.msra.mxu0 %v287_v2  ;;  %1179 = vmatprep.subr.mxu1 %v1296_v1  ;;  %v282_v10 = vld [vmem:[%s273_s18 + $0x18] sm:$0xff]  ;;  %v294_v11 = vsel %vm293_vm1, %v279_v7, 0.0  ;;  %v295_v12 = vsel %vm293_vm1, %v280_v8, 0.0  ;;  %v297_v13 = vsel %vm293_vm1, %v281_v9, 0.0  ;;  %v457_v31 = vsub.s32 0, %v1408_v30  ;;  %v687_v61 = vld [vmem:[%s1491_s5 + $0x10] sm:$0xff] }
  0x10   : > { %1170 = vmatprep.subr.mxu0 %v1296_v1  ;;  %1180 = vmatpush3.msra.mxu1 %v291_v4  ;;  %v296_v14 = vadd.f32 %v295_v12, %v294_v11  ;;  %v299_v15 = vsel %vm293_vm1, %v282_v10, 0.0  ;;  %v1104_v60 = vld [vmem:[%s1491_s5 + $0x38] sm:$0xff]  ;;  %v1103_v62 = vld [vmem:[%s1491_s5 + $0x30] sm:$0xff]  ;;  %v686_v63 = vld [vmem:[%s1491_s5 + $0x8] sm:$0xff] }
  0x11   : > { %1171 = vmatpush3.msra.mxu0 %v286_v5  ;;  %1181 = vmatprep.subr.mxu1 %v1296_v1 }
  0x12   : > { %1172 = vmatprep.subr.mxu0 %v1296_v1  ;;  %1185 = vmatprep.mubr.msk.f32.mxu1 %vm1297_vm0, %v1296_v1  ;;  %v298_v16 = vadd.f32 %v297_v13, %v296_v14  ;;  %v1092_v14 = vld [vmem:[%s1488_s2] ss:$0 sm:$0xff] }
  0x13   : > { %1173 = vmatpush3.msra.mxu0 %v285_v6  ;;  %1182 = vmatpush3.msra.mxu1 %v290_v24 }
  0x14   : > { %1188 = vmatprep.subr.mxu0 %v1296_v1  ;;  %v300_v17 = vadd.f32 %v299_v15, %v298_v16  ;;  %1183 = vmatprep.subr.mxu1 %v1296_v1 }
  0x15   : > { %1184 = vmatpush3.msra.mxu1 %v289_v25 }
  0x16   : > { %v301_v18 = vrot.slane %v300_v17, 4  ;;  %1199 = vmatprep.subr.mxu1 %v1296_v1 }
  0x18   : > { %v302_v19 = vadd.f32 %v301_v18, %v300_v17 }
  0x1a   : > { %v303_v20 = vrot.slane %v302_v19, 2 }
  0x1c   : > { %v304_v21 = vadd.f32 %v303_v20, %v302_v19 }
  0x1e   : > { %v305_v22 = vrot.slane %v304_v21, 1 }
  0x20   : > { %v306_v23 = vadd.f32 %v305_v22, %v304_v21 }
  0x22   : > { %1175 = vmatmul.mubr.msk.f32.vlgmr.msra.gmra.mxu0 %vm293_vm1, %v306_v23 }
  0x23   : > { %1189 = vmatpush3.msra.mxu0 %v288_v0  ;;  %1196 = vmatprep.mubr.msk.f32.mxu0 %vm1297_vm0, %v1296_v1  ;;  %v1102_v0 = vld [vmem:[%s1491_s5 + $0x28] sm:$0xff] }
  0x24   : > { %1190 = vmatprep.subr.mxu0 %v1296_v1 }
  0x25   : > { %1191 = vmatpush3.msra.mxu0 %v287_v2  ;;  %v1101_v2 = vld [vmem:[%s1491_s5 + $0x20] sm:$0xff] }
  0x26   : > { %1192 = vmatprep.subr.mxu0 %v1296_v1 }
  0x27   : > { %1193 = vmatpush3.msra.mxu0 %v286_v5 }
  0x28   : > { %1194 = vmatprep.subr.mxu0 %v1296_v1 }
  0x29   : > { %1195 = vmatpush3.msra.mxu0 %v285_v6 }
  0x2a   : > { %1210 = vmatprep.subr.mxu0 %v688_v59 }
  0xe2   : > { %v376_v26 = vpop.f32.mrf.mxu0 }
  0xe3   : > { %v381_v27 = vmul.f32 0.03125, %v376_v26 }
  0xe4   : > { %v1176_v28 = vpop.f32.mrf.mxu0 }
  0xe5   : > { %1186 = vmatmul.mubr.msk.f32.vlgmr.msra.gmra.mxu1 %vm293_vm1, %v381_v27 }
  0xe6   : > { %1200 = vmatpush3.msra.mxu1 %v292_v3  ;;  %1207 = vmatprep.mubr.msk.f32.mxu1 %vm1297_vm0, %v1296_v1  ;;  %v1112_v3 = vld [vmem:[%s1491_s5 + $0x58] sm:$0xff] }
  0xe7   : > { %1201 = vmatprep.subr.mxu1 %v1296_v1 }
  0xe8   : > { %1202 = vmatpush3.msra.mxu1 %v291_v4 }
  0xe9   : > { %1203 = vmatprep.subr.mxu1 %v1296_v1 }
  0xea   : > { %1204 = vmatpush3.msra.mxu1 %v290_v24 }
  0xeb   : > { %1205 = vmatprep.subr.mxu1 %v1296_v1  ;;  %v685_v1 = vld [vmem:[%s1491_s5] sm:$0xff] }
  0xec   : > { %1206 = vmatpush3.msra.mxu1 %v289_v25 }
  0xed   : > { %1224 = vmatprep.subr.mxu1 %v1104_v60 }
 0x1a5   : > { %v451_v32 = vpop.f32.mrf.mxu1 }
 0x1a6   : > { %v458_v33 = vrot.slane %v451_v32, %v457_v31 }
 0x1a7   : > { %v1187_v34 = vpop.f32.mrf.mxu1 }
 0x1a8   : > { %v459_v35 = vsub.f32 %v279_v7, %v458_v33  ;;  %v460_v36 = vsub.f32 %v280_v8, %v458_v33  ;;  %v461_v37 = vsub.f32 %v281_v9, %v458_v33  ;;  %v462_v38 = vsub.f32 %v282_v10, %v458_v33  ;;  %v1091_v9 = vld [vmem:[%s1487_s1] ss:$0 sm:$0xff] }
 0x1aa   : > { %v463_v39 = vmul.f32 %v459_v35, %v459_v35  ;;  %v464_v40 = vmul.f32 %v460_v36, %v460_v36  ;;  %v465_v41 = vmul.f32 %v461_v37, %v461_v37  ;;  %v466_v42 = vmul.f32 %v462_v38, %v462_v38 }
 0x1ac   : > { %v467_v43 = vsel %vm293_vm1, %v463_v39, 0.0  ;;  %v468_v44 = vsel %vm293_vm1, %v464_v40, 0.0  ;;  %v470_v46 = vsel %vm293_vm1, %v465_v41, 0.0  ;;  %v472_v48 = vsel %vm293_vm1, %v466_v42, 0.0  ;;  %v1111_v41 = vld [vmem:[%s1491_s5 + $0x50] sm:$0xff] }
 0x1ad   : > { %v469_v45 = vadd.f32 %v468_v44, %v467_v43  ;;  %v1110_v43 = vld [vmem:[%s1491_s5 + $0x48] sm:$0xff] }
 0x1af   : > { %v471_v47 = vadd.f32 %v470_v46, %v469_v45  ;;  %v1109_v45 = vld [vmem:[%s1491_s5 + $0x40] sm:$0xff] }
 0x1b1   : > { %v473_v49 = vadd.f32 %v472_v48, %v471_v47 }
 0x1b3   : > { %v474_v50 = vrot.slane %v473_v49, 4 }
 0x1b5   : > { %v475_v51 = vadd.f32 %v474_v50, %v473_v49 }
 0x1b7   : > { %v476_v52 = vrot.slane %v475_v51, 2 }
 0x1b9   : > { %v477_v53 = vadd.f32 %v476_v52, %v475_v51 }
 0x1bb   : > { %v478_v54 = vrot.slane %v477_v53, 1 }
 0x1bd   : > { %v479_v55 = vadd.f32 %v478_v54, %v477_v53 }
 0x1bf   : > { %1197 = vmatmul.mubr.msk.f32.vlgmr.msra.gmra.mxu0 %vm293_vm1, %v479_v55 }
 0x1c0   : > { %1211 = vmatpush3.msra.mxu0 %v688_v59 }
 0x1c1   : > { %1212 = vmatprep.subr.mxu0 %v687_v61 }
 0x1c2   : > { %1213 = vmatpush3.msra.mxu0 %v687_v61 }
 0x1c3   : > { %1214 = vmatprep.subr.mxu0 %v686_v63 }
 0x1c4   : > { %1215 = vmatpush3.msra.mxu0 %v686_v63 }
 0x1c5   : > { %1216 = vmatprep.subr.mxu0 %v685_v1 }
 0x1c6   : > { %1217 = vmatpush3.msra.mxu0 %v685_v1 }
 0x1c7   : > { %1238 = vmatprep.subr.mxu0 %v1112_v3 }
 0x27f   : > { %v549_v56 = vpop.f32.mrf.mxu0 }
 0x280   : > { %v553_v57 = vmul.f32 0.03125, %v549_v56 }
 0x281   : > { %v1198_v58 = vpop.f32.mrf.mxu0 }
 0x282   : > { %1208 = vmatmul.mubr.msk.f32.vlgmr.msra.gmra.mxu1 %vm293_vm1, %v553_v57 }
 0x283   : > { %1225 = vmatpush3.msra.mxu1 %v1104_v60 }
 0x284   : > { %1226 = vmatprep.subr.mxu1 %v1103_v62 }
 0x285   : > { %1227 = vmatpush3.msra.mxu1 %v1103_v62 }
 0x286   : > { %1228 = vmatprep.subr.mxu1 %v1102_v0 }
 0x287   : > { %1229 = vmatpush3.msra.mxu1 %v1102_v0 }
 0x288   : > { %1230 = vmatprep.subr.mxu1 %v1101_v2 }
 0x289   : > { %1231 = vmatpush3.msra.mxu1 %v1101_v2 }
 0x28a   : > { %1252 = vmatprep.subr.mxu1 %v1112_v3 }
 0x342   : > { %v623_v4 = vpop.f32.mrf.mxu1 }
 0x343   : > { %v624_v5 = vadd.f32 1e-06, %v623_v4 }
 0x344   : > { %v1209_v6 = vpop.f32.mrf.mxu1 }
 0x345   : > { %1270 = vrsqrt.f32 %v624_v5  ;;  %v1117_v5 = vld [vmem:[%s1492_s6] ss:$0 sm:$0xff] }
 0x352   : > { %v1271_v7 = vpop.eup %1270 }
 0x353   : > { %v631_v8 = vrot.slane %v1271_v7, %v457_v31 }
 0x355   : > { %v632_v10 = vmul.f32 %v631_v8, %v459_v35  ;;  %v633_v11 = vmul.f32 %v631_v8, %v460_v36  ;;  %v634_v12 = vmul.f32 %v631_v8, %v461_v37  ;;  %v635_v13 = vmul.f32 %v631_v8, %v462_v38 }
 0x357   : > { %v642_v15 = vmul.f32 %v1091_v9, %v632_v10  ;;  %v643_v16 = vmul.f32 %v1091_v9, %v633_v11  ;;  %v644_v17 = vmul.f32 %v1091_v9, %v634_v12  ;;  %v645_v18 = vmul.f32 %v1091_v9, %v635_v13 }
 0x359   : > { %v652_v19 = vadd.f32 %v1092_v14, %v642_v15  ;;  %v653_v20 = vadd.f32 %v1092_v14, %v643_v16  ;;  %v654_v21 = vadd.f32 %v1092_v14, %v644_v17  ;;  %v655_v22 = vadd.f32 %v1092_v14, %v645_v18 }
 0x35b   : > { %v1093_v23 = vmul.f32 -1.442695, %v652_v19  ;;  %v1094_v24 = vmul.f32 -1.442695, %v653_v20  ;;  %v1095_v25 = vmul.f32 -1.442695, %v654_v21 }
 0x35c   : > { %v1096_v26 = vmul.f32 -1.442695, %v655_v22 }
 0x35d   : > { %1272 = vpow2.f32 %v1093_v23 }
 0x35e   : > { %1274 = vpow2.f32 %v1094_v24 }
 0x35f   : > { %1276 = vpow2.f32 %v1095_v25 }
 0x360   : > { %1278 = vpow2.f32 %v1096_v26 }
 0x36a   : > { %v1273_v27 = vpop.eup %1272 }
 0x36b   : > { %v1275_v28 = vpop.eup %1274  ;;  %v668_v29 = vadd.f32 1.0, %v1273_v27 }
 0x36c   : > { %v1277_v30 = vpop.eup %1276  ;;  %v669_v31 = vadd.f32 1.0, %v1275_v28 }
 0x36d   : > { %v1279_v32 = vpop.eup %1278  ;;  %1280 = vrcp.f32 %v668_v29  ;;  %v670_v33 = vadd.f32 1.0, %v1277_v30 }
 0x36e   : > { %1282 = vrcp.f32 %v669_v31  ;;  %v671_v34 = vadd.f32 1.0, %v1279_v32 }
 0x36f   : > { %1284 = vrcp.f32 %v670_v33 }
 0x370   : > { %1286 = vrcp.f32 %v671_v34 }
 0x37a   : > { %v1281_v35 = vpop.eup %1280 }
 0x37b   : > { %v1283_v36 = vpop.eup %1282  ;;  %v680_v37 = vmul.f32 %v1281_v35, %v652_v19 }
 0x37c   : > { %v1285_v38 = vpop.eup %1284  ;;  %v681_v39 = vmul.f32 %v1283_v36, %v653_v20 }
 0x37d   : > { %1218 = vmatprep.mubr.msk.f32.mxu0 %vm293_vm1, %v680_v37  ;;  %1232 = vmatprep.mubr.msk.f32.mxu1 %vm293_vm1, %v680_v37  ;;  %v682_v40 = vmul.f32 %v1285_v38, %v654_v21  ;;  %v1287_v42 = vpop.eup %1286 }
 0x37e   : > { %1219 = vmatmul.mubr.msk.f32.vlgmr.msra.gmra.mxu0 %vm293_vm1, %v681_v39  ;;  %1233 = vmatmul.mubr.msk.f32.vlgmr.msra.gmra.mxu1 %vm293_vm1, %v681_v39  ;;  %v683_v44 = vmul.f32 %v1287_v42, %v655_v22 }
 0x37f   : > { %1239 = vmatpush3.msra.mxu0 %v1112_v3  ;;  %1256 = vmatpush3.msra.mxu1 %v1112_v3 }
 0x380   : > { %1221 = vmatprep.mubr.msk.f32.mxu0 %vm293_vm1, %v682_v40  ;;  %1235 = vmatprep.mubr.msk.f32.mxu1 %vm293_vm1, %v682_v40 }
 0x381   : > { %1240 = vmatprep.subr.mxu0 %v1111_v41  ;;  %1253 = vmatprep.subr.mxu1 %v1111_v41 }
 0x382   : > { %1241 = vmatpush3.msra.mxu0 %v1111_v41  ;;  %1257 = vmatpush3.msra.mxu1 %v1111_v41 }
 0x383   : > { %1242 = vmatprep.subr.mxu0 %v1110_v43  ;;  %1254 = vmatprep.subr.mxu1 %v1110_v43 }
 0x384   : > { %1222 = vmatmul.mubr.msk.f32.gmra.mxu0 %vm293_vm1, %v683_v44  ;;  %1236 = vmatmul.mubr.msk.f32.gmra.mxu1 %vm293_vm1, %v683_v44 }
 0x385   : > { %1243 = vmatpush3.msra.mxu0 %v1110_v43  ;;  %1258 = vmatpush3.msra.mxu1 %v1110_v43 }
 0x386   : > { %1244 = vmatprep.subr.mxu0 %v1109_v45  ;;  %1255 = vmatprep.subr.mxu1 %v1109_v45 }
 0x387   : > { %1246 = vmatprep.mubr.msk.f32.mxu0 %vm293_vm1, %v680_v37  ;;  %1249 = vmatprep.mubr.msk.f32.mxu1 %vm293_vm1, %v682_v40 }
 0x388   : > { %1245 = vmatpush3.msra.mxu0 %v1109_v45  ;;  %1259 = vmatpush3.msra.mxu1 %v1109_v45 }
 0x389   : > { %1247 = vmatmul.mubr.msk.f32.vlgmr.msra.gmra.mxu0 %vm293_vm1, %v681_v39  ;;  %1250 = vmatmul.mubr.msk.f32.vlgmr.msra.gmra.mxu1 %vm293_vm1, %v683_v44 }
 0x43e   : > { %v1220_v46 = vpop.f32.mrf.mxu0  ;;  %v1234_v47 = vpop.f32.mrf.mxu1 }
 0x43f   : > { %v972_v55 = vrot.slane %v1220_v46, 7 }
 0x440   : > { %v767_v48 = vpop.f32.mrf.mxu0  ;;  %v857_v49 = vpop.f32.mrf.mxu1 }
 0x441   : > { %v971_v52 = vrot.slane %v767_v48, 7 }
 0x443   : > { %v973_v58 = vsel %vm970_vm2, %v971_v52, %v972_v55  ;;  %v982_v62 = vsel %vm970_vm2, 0.0, %v971_v52 }
 0x444   : > { %v1223_v50 = vpop.f32.mrf.mxu0  ;;  %v1237_v51 = vpop.f32.mrf.mxu1  ;;  %v984_v9 = vadd.f32 %v1234_v47, %v973_v58  ;;  %v983_v10 = vadd.f32 %v982_v62, %v857_v49 }
 0x445   : > { %v976_v56 = vrot.slane %v1223_v50, 7 }
 0x446   : > { %v777_v53 = vpop.f32.mrf.mxu0  ;;  %v867_v54 = vpop.f32.mrf.mxu1 }
 0x447   : > { %v974_v57 = vrot.slane %v777_v53, 7 }
 0x449   : > { %v977_v59 = vsel %vm970_vm2, %v974_v57, %v976_v56  ;;  %v1248_v60 = vpop.f32.mrf.mxu0  ;;  %v1251_v61 = vpop.f32.mrf.mxu1  ;;  %v975_v63 = vsel %vm970_vm2, %v972_v55, %v974_v57 }
 0x44a   : > { %v986_v0 = vadd.f32 %v1237_v51, %v977_v59  ;;  %v997_v1 = vrot.slane %v1251_v61, 1  ;;  %v993_v4 = vrot.slane %v1248_v60, 1  ;;  %v985_v11 = vadd.f32 %v975_v63, %v867_v54 }
 0x44b   : > { %v947_v2 = vpop.f32.mrf.mxu0  ;;  %v957_v3 = vpop.f32.mrf.mxu1 }
 0x44c   : > { %v1003_v6 = vsel %vm991_vm3, %v997_v1, 0.0  ;;  %v992_v7 = vrot.slane %v947_v2, 1  ;;  %v995_v8 = vrot.slane %v957_v3, 1 }
 0x44d   : > { %v1007_v12 = vadd.f32 %v1003_v6, %v986_v0 }
 0x44e   : > { %v994_v13 = vsel %vm991_vm3, %v992_v7, %v993_v4  ;;  %v996_v14 = vsel %vm991_vm3, %v993_v4, %v995_v8  ;;  %v998_v15 = vsel %vm991_vm3, %v995_v8, %v997_v1 }
 0x44f   : > { %v1017_v16 = vadd.f32 %v1117_v5, %v1007_v12  ;;  %v1004_v17 = vadd.f32 %v994_v13, %v983_v10  ;;  %v1005_v18 = vadd.f32 %v996_v14, %v984_v9  ;;  %v1006_v19 = vadd.f32 %v998_v15, %v985_v11 }
 0x451   : > { %1022 = vst.msk [vmem:[%s278_s15 + $0x18] sm:$0xff] %vm1018_vm4, %v1017_v16  ;;  %v1014_v20 = vadd.f32 %v1117_v5, %v1004_v17  ;;  %v1015_v21 = vadd.f32 %v1117_v5, %v1005_v18  ;;  %v1016_v22 = vadd.f32 %v1117_v5, %v1006_v19 }
 0x453   : > { %1019 = vst.msk [vmem:[%s278_s15] sm:$0xff] %vm1018_vm4, %v1014_v20  ;;  %1020 = vst.msk [vmem:[%s278_s15 + $0x8] sm:$0xff] %vm1018_vm4, %v1015_v21 }
 0x454   : > { %1021 = vst.msk [vmem:[%s278_s15 + $0x10] sm:$0xff] %vm1018_vm4, %v1016_v22 }
 0x455 PF: > { %s17_s24 = sadd.s32 1, %s1294_s24  }
 0x456   : > { %p14_p4 = scmp.ge.s32.totalorder %s17_s24, 4  }
 0x458   :  { %16 = sbr.rel (!%p14_p4) target bundleno = 1 (0x1), region = 80 }

</bundles_post_ra>
